<compile_context>
chip_gen: v7x
topology: tpu7x:2x2x1
jax: 0.10.0
libtpu: 0.0.40
codegen_flags: <defaults>
</compile_context>

<pallas_src>
import jax
import jax.numpy as jnp
from jax import lax
from jax.experimental import pallas as pl
from jax.experimental.pallas import tpu as pltpu

L = 30135            # hard-coded by the torch module (view + Linear in_features)
NCHUNK = 8           # sublane chunks per batch row
LC = 3840            # lanes per chunk (multiple of 128)
LPAD = NCHUNK * LC   # 30720, lane-aligned padded sequence length
C_MID = 16           # conv1 output channels
D_OUT = 128          # fc1 output features

WSUB = 768           # lane sub-tile inside the conv kernel (multiple of 128): keeps accs in vregs
NSUB = LC // WSUB    # 5

TK = 15360           # FC K-tile (bf16 weight: 3.9 MB/tile, ~7.9 MB double-buffered -> fits v7x)
KSPLIT = 2           # parallel partial K sums (engages 2nd TensorCore on v7x)
NK = LPAD // (TK * KSPLIT)   # 1 "arbitrary" K step per partial

assert LC % 128 == 0 and LPAD % 128 == 0 and TK % 128 == 0
assert WSUB % 128 == 0 and LC % WSUB == 0
assert LPAD >= L + 1, "conv halo wraparound must land in the zero tail"
assert LPAD == KSPLIT * NK * TK


# -------------------- kernel 1: conv1 -> relu -> conv2 -> relu (sublane-packed) --------------------
def conv_kernel(x_ref, w1_ref, b1_ref, w2_ref, b2_ref, z_ref,
                xl_ref, xr_ref, al_ref, am_ref, ar_ref):
    # x_ref / z_ref: (NCHUNK, LC) VMEM -- one batch row, sequence packed row-major onto sublanes.
    # w1 (16,3), b1 (16,), w2 (16,3), b2 (1,) are scalar tables in SMEM.
    rows = x_ref.shape[0]

    def shift_left_halo(v):
        # u[l] = v[l-1] in flat sequence order.  v must have a zero tail (seq >= L) so the wrap
        # at l == 0 lands on zeros == Conv1d's zero padding.
        lane = lax.broadcasted_iota(jnp.int32, v.shape, 1)
        r = pltpu.roll(v, shift=1, axis=1)                 # within-chunk l-1
        fix = pltpu.roll(r, shift=1, axis=0)               # previous chunk's last element
        return jnp.where(lane == 0, fix, r)

    def shift_right_halo(v):
        # u[l] = v[l+1].  Only positions l < L are consumed downstream, so the wrap at the very
        # last packed element is harmless.
        lane = lax.broadcasted_iota(jnp.int32, v.shape, 1)
        r = pltpu.roll(v, shift=LC - 1, axis=1)            # within-chunk l+1 (non-negative shift)
        fix = pltpu.roll(r, shift=v.shape[0] - 1, axis=0)  # next chunk's first element
        return jnp.where(lane == LC - 1, fix, r)

    # Stage the two shifted copies of x once (full width) so the sub-tile loop below never has to
    # handle sub-tile-boundary halos.
    xl_ref[...] = shift_left_halo(x_ref[...])
    xr_ref[...] = shift_right_halo(x_ref[...])

    # conv2 is linear in y: accumulate the three tap-weighted channel sums per lane sub-tile so
    # x/xl/xr slices and acc_l/m/r stay resident in vregs (no spills), shift once at the end.
    def subtile(s, carry):
        off = pl.multiple_of(s * WSUB, 128)
        xs = x_ref[:, pl.ds(off, WSUB)]
        xls = xl_ref[:, pl.ds(off, WSUB)]
        xrs = xr_ref[:, pl.ds(off, WSUB)]
        al = jnp.zeros_like(xs)      # sum_c w2[c,0] * y_c
        am = jnp.zeros_like(xs)      # sum_c w2[c,1] * y_c
        ar = jnp.zeros_like(xs)      # sum_c w2[c,2] * y_c
        for ci in range(C_MID):
            y = (w1_ref[ci, 0] * xls + w1_ref[ci, 1] * xs + w1_ref[ci, 2] * xrs) + b1_ref[ci]
            y = jnp.maximum(y, 0.0)  # ReLU only; the seq<L tail mask is hoisted out of this loop
            al = al + w2_ref[ci, 0] * y
            am = am + w2_ref[ci, 1] * y
            ar = ar + w2_ref[ci, 2] * y
        al_ref[:, pl.ds(off, WSUB)] = al
        am_ref[:, pl.ds(off, WSUB)] = am
        ar_ref[:, pl.ds(off, WSUB)] = ar
        return carry

    lax.fori_loop(0, NSUB, subtile, 0)

    # Hoisted tail mask: zeroing the linear accumulators at seq >= L is equivalent to zeroing each
    # y_c there.  Required so that (a) the wrap of shift_left at l==0 picks a zero (left padding)
    # and (b) z[L-1]'s right neighbour (position L, where b1 made y nonzero) is zero padding.
    lane = lax.broadcasted_iota(jnp.int32, (rows, LC), 1)
    chunk = lax.broadcasted_iota(jnp.int32, (rows, LC), 0)
    mask = (chunk * LC + lane) < L
    al = jnp.where(mask, al_ref[...], 0.0)
    am = jnp.where(mask, am_ref[...], 0.0)
    ar = jnp.where(mask, ar_ref[...], 0.0)

    z = shift_left_halo(al) + am + shift_right_halo(ar) + b2_ref[0]
    # No final tail mask: rows >= L of the padded FC weight are exactly zero (verified at weight
    # load time), so the (nonzero) tail of z never reaches the output.
    z_ref[...] = jnp.maximum(z, 0.0)


def run_conv(x_packed, w1, b1, w2, b2):
    rows = x_packed.shape[0]
    B = rows // NCHUNK
    return pl.pallas_call(
        conv_kernel,
        out_shape=jax.ShapeDtypeStruct((rows, LC), jnp.float32),
        grid_spec=pltpu.PrefetchScalarGridSpec(
            num_scalar_prefetch=0,
            grid=(B,),
            in_specs=[
                pl.BlockSpec((NCHUNK, LC), lambda b: (b, 0)),
                pl.BlockSpec(memory_space=pltpu.MemorySpace.SMEM),
                pl.BlockSpec(memory_space=pltpu.MemorySpace.SMEM),
                pl.BlockSpec(memory_space=pltpu.MemorySpace.SMEM),
                pl.BlockSpec(memory_space=pltpu.MemorySpace.SMEM),
            ],
            out_specs=pl.BlockSpec((NCHUNK, LC), lambda b: (b, 0)),
            scratch_shapes=[
                pltpu.VMEM((NCHUNK, LC), jnp.float32),   # xl (x shifted left halo)
                pltpu.VMEM((NCHUNK, LC), jnp.float32),   # xr (x shifted right halo)
                pltpu.VMEM((NCHUNK, LC), jnp.float32),   # acc_l
                pltpu.VMEM((NCHUNK, LC), jnp.float32),   # acc_m
                pltpu.VMEM((NCHUNK, LC), jnp.float32),   # acc_r
            ],
        ),
        compiler_params=pltpu.CompilerParams(
            dimension_semantics=("parallel",),
        ),
    )(x_packed, w1, b1, w2, b2)


# ------------------------------ kernel 2: fc1 matmul (partial K sums) ------------------------------
def fc_kernel(z_ref, w_ref, o_ref):
    k = pl.program_id(1)

    @pl.when(k == 0)
    def _():
        o_ref[...] = jnp.zeros_like(o_ref)

    # bf16 x bf16 on the MXU, f32 accumulation.  The weight stream (dominant HBM traffic) is bf16;
    # casting the small z tile here keeps the conv kernel's output / HBM layout plain f32.
    z_bf16 = z_ref[...].astype(jnp.bfloat16)
    o_ref[0] += jnp.dot(z_bf16, w_ref[...], preferred_element_type=jnp.float32)


def run_fc(z, wfc_pad):
    assert wfc_pad.shape == (LPAD, D_OUT) and wfc_pad.dtype == jnp.bfloat16, (
        "run_fc expects the bf16 weight built by pad_fc_weight (rows >= L must be zero)")
    B = z.shape[0]
    return pl.pallas_call(
        fc_kernel,
        out_shape=jax.ShapeDtypeStruct((KSPLIT, B, D_OUT), jnp.float32),
        grid_spec=pltpu.PrefetchScalarGridSpec(
            num_scalar_prefetch=0,
            grid=(KSPLIT, NK),
            in_specs=[
                pl.BlockSpec((B, TK), lambda p, k: (0, p * NK + k)),
                pl.BlockSpec((TK, D_OUT), lambda p, k: (p * NK + k, 0)),
            ],
            out_specs=pl.BlockSpec((1, B, D_OUT), lambda p, k: (p, 0, 0)),
        ),
        compiler_params=pltpu.CompilerParams(
            dimension_semantics=("parallel", "arbitrary"),
            vmem_limit_bytes=32 * 1024 * 1024,   # ~8 MB used; stay inside v7x's scoped VMEM
        ),
    )(z, wfc_pad)


# ------------------------------------------ full forward -------------------------------------------
def pad_fc_weight(wfc):
    # Build ONCE at weight-load time (not inside the per-call forward).  wfc is fc1.weight.T with
    # shape (L, 128).  Stored/streamed in bf16 (the FC is HBM-bound on this read); rows >= L are
    # zero so the garbage tail of the conv output is inert.
    assert wfc.shape == (L, D_OUT)
    return jnp.zeros((LPAD, D_OUT), jnp.bfloat16).at[:L, :].set(wfc.astype(jnp.bfloat16))


def check_fc_weight_padding(wfc_pad):
    # The conv kernel skips its final tail mask because it relies on these rows being exactly zero;
    # verify once at weight-load time so a caller passing an unpadded weight fails loudly.
    assert wfc_pad.shape == (LPAD, D_OUT) and wfc_pad.dtype == jnp.bfloat16
    assert bool(jnp.all(wfc_pad[L:, :] == 0)), "padded FC weight rows >= L must be exactly zero"


@jax.jit
def matrix_to_feature(x, w1, b1, w2, b2, wfc_pad, bfc):
    # x: (B, 30135)  ->  out: (B, 128)
    B = x.shape[0]
    x_pad = jnp.zeros((B, LPAD), jnp.float32).at[:, :L].set(x.astype(jnp.float32))
    x_packed = x_pad.reshape(B * NCHUNK, LC)              # free row-major reshape
    z_packed = run_conv(x_packed, w1, b1, w2, b2)         # (B*8, LC) f32
    z = z_packed.reshape(B, LPAD)                         # free row-major reshape
    partial = run_fc(z, wfc_pad)                          # (KSPLIT, B, 128) f32
    return jnp.maximum(jnp.sum(partial, axis=0) + bfc, 0.0)   # tiny fused epilogue


# -------------------------------------- pure-JAX reference -----------------------------------------
def ref_forward(x, w1, b1, w2, b2, wfc, bfc):
    xp = jnp.pad(x, ((0, 0), (1, 1)))
    y = (w1[None, :, 0, None] * xp[:, None, 0:L]
         + w1[None, :, 1, None] * xp[:, None, 1:L + 1]
         + w1[None, :, 2, None] * xp[:, None, 2:L + 2]
         + b1[None, :, None])
    y = jnp.maximum(y, 0.0)
    yp = jnp.pad(y, ((0, 0), (0, 0), (1, 1)))
    z = jnp.sum(w2[None, :, 0, None] * yp[:, :, 0:L]
                + w2[None, :, 1, None] * yp[:, :, 1:L + 1]
                + w2[None, :, 2, None] * yp[:, :, 2:L + 2], axis=1) + b2[0]
    z = jnp.maximum(z, 0.0)
    return jnp.maximum(z @ wfc + bfc, 0.0)


if __name__ == "__main__":
    key = jax.random.PRNGKey(0)
    kx, k1, k2, k3, k4, k5, k6 = jax.random.split(key, 7)

    B = 2
    x = jax.random.normal(kx, (B, L), jnp.float32)

    # deterministic "PyTorch-like" init (uniform +/- 1/sqrt(fan_in))
    w1 = jax.random.uniform(k1, (C_MID, 3), jnp.float32, -1.0, 1.0) / jnp.sqrt(3.0)       # conv1.weight[:,0,:]
    b1 = jax.random.uniform(k2, (C_MID,), jnp.float32, -1.0, 1.0) / jnp.sqrt(3.0)
    w2 = jax.random.uniform(k3, (C_MID, 3), jnp.float32, -1.0, 1.0) / jnp.sqrt(48.0)      # conv2.weight[0,:,:]
    b2 = jax.random.uniform(k4, (1,), jnp.float32, -1.0, 1.0) / jnp.sqrt(48.0)
    wfc = jax.random.uniform(k5, (L, D_OUT), jnp.float32, -1.0, 1.0) / jnp.sqrt(float(L))  # fc1.weight.T
    bfc = jax.random.uniform(k6, (D_OUT,), jnp.float32, -1.0, 1.0) / jnp.sqrt(float(L))

    wfc_pad = pad_fc_weight(wfc)          # built once, outside the jitted forward
    check_fc_weight_padding(wfc_pad)

    out = matrix_to_feature(x, w1, b1, w2, b2, wfc_pad, bfc)
    out = jax.block_until_ready(out)

    ref = ref_forward(x, w1, b1, w2, b2, wfc, bfc)
    assert out.shape == (B, D_OUT)
    # bf16 weight/activation stream in the FC (f32 MXU accumulation): expected quantization error
    # of the 30,135-term dot is ~1e-3, so validate against the f32 reference at 3e-3.
    assert jnp.allclose(out, ref, rtol=3e-3, atol=3e-3), (
        f"max abs err {jnp.max(jnp.abs(out - ref))}")

    print("KERNEL_OK")
</pallas_src>

<mosaic_0001>
module attributes {stable_mosaic.version = 11 : i64} {
  func.func @fc_kernel(%arg0: i32, %arg1: i32, %arg2: memref<2x15360xf32, #tpu.memory_space<vmem>>, %arg3: memref<15360x128xbf16, #tpu.memory_space<vmem>>, %arg4: memref<1x2x128xf32, #tpu.memory_space<vmem>>) attributes {dimension_semantics = [#tpu.dimension_semantics<parallel>, #tpu.dimension_semantics<arbitrary>], iteration_bounds = array<i64: 2, 1>, scalar_prefetch = 0 : i64, scratch_operands = 0 : i64, tpu.core_type = #tpu.core_type<tc>, window_params = [{transform_indices = @transform_0, window_bounds = array<i64: 2, 15360>}, {transform_indices = @transform_1, window_bounds = array<i64: 15360, 128>}, {transform_indices = @transform_2, window_bounds = array<i64: 1, 2, 128>}]} {
    %c0_i32 = arith.constant 0 : i32
    %0 = arith.cmpi eq, %arg1, %c0_i32 : i32
    %1 = arith.extui %0 : i1 to i32
    %c0_i32_0 = arith.constant 0 : i32
    %2 = arith.cmpi ne, %1, %c0_i32_0 : i32
    scf.if %2 {
      %cst_10 = arith.constant 0.000000e+00 : f32
      %13 = vector.broadcast %cst_10 : f32 to vector<1x2x128xf32>
      %c0_11 = arith.constant 0 : index
      %c0_12 = arith.constant 0 : index
      %c0_13 = arith.constant 0 : index
      %14 = vector.load %arg4[%c0_11, %c0_12, %c0_13] : memref<1x2x128xf32, #tpu.memory_space<vmem>>, vector<1x2x128xf32>
      tpu.vector_store %arg4[%c0_11, %c0_12, %c0_13], %13 {strides = array<i32>} : memref<1x2x128xf32, #tpu.memory_space<vmem>>, vector<1x2x128xf32>,
    } else {
    }
    %c0 = arith.constant 0 : index
    %c0_1 = arith.constant 0 : index
    %3 = vector.load %arg2[%c0, %c0_1] : memref<2x15360xf32, #tpu.memory_space<vmem>>, vector<2x15360xf32>
    %4 = arith.truncf %3 : vector<2x15360xf32> to vector<2x15360xbf16>
    %c0_2 = arith.constant 0 : index
    %c0_3 = arith.constant 0 : index
    %c0_4 = arith.constant 0 : index
    %5 = vector.load %arg4[%c0_2, %c0_3, %c0_4] : memref<1x2x128xf32, #tpu.memory_space<vmem>>, vector<1x2x128xf32>
    %6 = vector.shape_cast %5 : vector<1x2x128xf32> to vector<2x128xf32>
    %c0_5 = arith.constant 0 : index
    %c0_6 = arith.constant 0 : index
    %7 = vector.load %arg3[%c0_5, %c0_6] : memref<15360x128xbf16, #tpu.memory_space<vmem>>, vector<15360x128xbf16>
    %cst = arith.constant dense<0.000000e+00> : vector<2x128xf32>
    %8 = tpu.matmul %4, %7, %cst {dimension_numbers = #tpu.dot_dimension_numbers<[1], [0], [0], [1], [0, 0, 1, 1], [], []>} : vector<2x15360xbf16>, vector<15360x128xbf16>, vector<2x128xf32> -> vector<2x128xf32>
    %9 = arith.addf %6, %8 : vector<2x128xf32>
    %c0_7 = arith.constant 0 : index
    %c0_8 = arith.constant 0 : index
    %c0_9 = arith.constant 0 : index
    %10 = vector.load %arg4[%c0_7, %c0_8, %c0_9] : memref<1x2x128xf32, #tpu.memory_space<vmem>>, vector<1x2x128xf32>
    %11 = vector.shape_cast %10 : vector<1x2x128xf32> to vector<2x128xf32>
    %12 = vector.shape_cast %9 : vector<2x128xf32> to vector<1x2x128xf32>
    tpu.vector_store %arg4[%c0_7, %c0_8, %c0_9], %12 {strides = array<i32>} : memref<1x2x128xf32, #tpu.memory_space<vmem>>, vector<1x2x128xf32>,
    return
  }
  func.func @transform_0(%arg0: i32, %arg1: i32) -> (i32, i32) {
    %c1_i32 = arith.constant 1 : i32
    %0 = arith.muli %arg0, %c1_i32 : i32
    %1 = arith.addi %0, %arg1 : i32
    %c0_i32 = arith.constant 0 : i32
    %c0_i32_0 = arith.constant 0 : i32
    return %c0_i32, %1 : i32, i32
  }
  func.func @transform_1(%arg0: i32, %arg1: i32) -> (i32, i32) {
    %c1_i32 = arith.constant 1 : i32
    %0 = arith.muli %arg0, %c1_i32 : i32
    %1 = arith.addi %0, %arg1 : i32
    %c0_i32 = arith.constant 0 : i32
    %c0_i32_0 = arith.constant 0 : i32
    return %1, %c0_i32 : i32, i32
  }
  func.func @transform_2(%arg0: i32, %arg1: i32) -> (i32, i32, i32) {
    %c0_i32 = arith.constant 0 : i32
    %c0_i32_0 = arith.constant 0 : i32
    %c0_i32_1 = arith.constant 0 : i32
    return %arg0, %c0_i32, %c0_i32_0 : i32, i32, i32
  }
}

module attributes {stable_mosaic.version = 11 : i64} {
  func.func @conv_kernel(%arg0: i32, %arg1: memref<8x3840xf32, #tpu.memory_space<vmem>>, %arg2: memref<16x3xf32, #tpu.memory_space<smem>>, %arg3: memref<16xf32, #tpu.memory_space<smem>>, %arg4: memref<16x3xf32, #tpu.memory_space<smem>>, %arg5: memref<1xf32, #tpu.memory_space<smem>>, %arg6: memref<8x3840xf32, #tpu.memory_space<vmem>>, %arg7: memref<8x3840xf32, #tpu.memory_space<vmem>>, %arg8: memref<8x3840xf32, #tpu.memory_space<vmem>>, %arg9: memref<8x3840xf32, #tpu.memory_space<vmem>>, %arg10: memref<8x3840xf32, #tpu.memory_space<vmem>>, %arg11: memref<8x3840xf32, #tpu.memory_space<vmem>>) attributes {dimension_semantics = [#tpu.dimension_semantics<parallel>], iteration_bounds = array<i64: 2>, scalar_prefetch = 0 : i64, scratch_operands = 5 : i64, tpu.core_type = #tpu.core_type<tc>, window_params = [{transform_indices = @transform_0, window_bounds = array<i64: 8, 3840>}, {transform_indices = @transform_1, window_bounds = array<i64: 16, 3>}, {transform_indices = @transform_2, window_bounds = array<i64: 16>}, {transform_indices = @transform_3, window_bounds = array<i64: 16, 3>}, {transform_indices = @transform_4, window_bounds = array<i64: 1>}, {transform_indices = @transform_5, window_bounds = array<i64: 8, 3840>}]} {
    %c0 = arith.constant 0 : index
    %c0_0 = arith.constant 0 : index
    %0 = vector.load %arg1[%c0, %c0_0] : memref<8x3840xf32, #tpu.memory_space<vmem>>, vector<8x3840xf32>
    %1 = tpu.iota {dimensions = array<i32: 1>} : vector<8x3840xi32>
    %c1_i32 = arith.constant 1 : i32
    %2 = tpu.dynamic_rotate %0 by %c1_i32 dim 1 : vector<8x3840xf32>, i32 -> vector<8x3840xf32>
    %c1_i32_1 = arith.constant 1 : i32
    %3 = tpu.dynamic_rotate %2 by %c1_i32_1 dim 0 : vector<8x3840xf32>, i32 -> vector<8x3840xf32>
    %c0_i32 = arith.constant 0 : i32
    %4 = vector.broadcast %c0_i32 : i32 to vector<8x3840xi32>
    %5 = arith.cmpi eq, %1, %4 : vector<8x3840xi32>
    %6 = arith.select %5, %3, %2 : vector<8x3840xi1>, vector<8x3840xf32>
    %c0_2 = arith.constant 0 : index
    %c0_3 = arith.constant 0 : index
    %7 = vector.load %arg7[%c0_2, %c0_3] : memref<8x3840xf32, #tpu.memory_space<vmem>>, vector<8x3840xf32>
    tpu.vector_store %arg7[%c0_2, %c0_3], %6 {strides = array<i32>} : memref<8x3840xf32, #tpu.memory_space<vmem>>, vector<8x3840xf32>,
    %c0_4 = arith.constant 0 : index
    %c0_5 = arith.constant 0 : index
    %8 = vector.load %arg1[%c0_4, %c0_5] : memref<8x3840xf32, #tpu.memory_space<vmem>>, vector<8x3840xf32>
    %9 = tpu.iota {dimensions = array<i32: 1>} : vector<8x3840xi32>
    %c3839_i32 = arith.constant 3839 : i32
    %10 = tpu.dynamic_rotate %8 by %c3839_i32 dim 1 : vector<8x3840xf32>, i32 -> vector<8x3840xf32>
    %c7_i32 = arith.constant 7 : i32
    %11 = tpu.dynamic_rotate %10 by %c7_i32 dim 0 : vector<8x3840xf32>, i32 -> vector<8x3840xf32>
    %c3839_i32_6 = arith.constant 3839 : i32
    %12 = vector.broadcast %c3839_i32_6 : i32 to vector<8x3840xi32>
    %13 = arith.cmpi eq, %9, %12 : vector<8x3840xi32>
    %14 = arith.select %13, %11, %10 : vector<8x3840xi1>, vector<8x3840xf32>
    %c0_7 = arith.constant 0 : index
    %c0_8 = arith.constant 0 : index
    %15 = vector.load %arg8[%c0_7, %c0_8] : memref<8x3840xf32, #tpu.memory_space<vmem>>, vector<8x3840xf32>
    tpu.vector_store %arg8[%c0_7, %c0_8], %14 {strides = array<i32>} : memref<8x3840xf32, #tpu.memory_space<vmem>>, vector<8x3840xf32>,
    %c0_i32_9 = arith.constant 0 : i32
    %c5_i32 = arith.constant 5 : i32
    %16 = arith.addi %c0_i32_9, %c5_i32 : i32
    %c1_i32_10 = arith.constant 1 : i32
    scf.for %arg12 = %c0_i32_9 to %16 step %c1_i32_10  : i32 {
      %c768_i32 = arith.constant 768 : i32
      %53 = arith.muli %arg12, %c768_i32 : i32
      %54 = tpu.assume_multiple %53, 128 : i32
      %c0_30 = arith.constant 0 : index
      %55 = arith.index_cast %54 : i32 to index
      %56 = vector.load %arg1[%c0_30, %55] : memref<8x3840xf32, #tpu.memory_space<vmem>>, vector<8x768xf32>
      %c0_31 = arith.constant 0 : index
      %57 = arith.index_cast %54 : i32 to index
      %58 = vector.load %arg7[%c0_31, %57] : memref<8x3840xf32, #tpu.memory_space<vmem>>, vector<8x768xf32>
      %c0_32 = arith.constant 0 : index
      %59 = arith.index_cast %54 : i32 to index
      %60 = vector.load %arg8[%c0_32, %59] : memref<8x3840xf32, #tpu.memory_space<vmem>>, vector<8x768xf32>
      %cst_33 = arith.constant 0.000000e+00 : f32
      %61 = vector.broadcast %cst_33 : f32 to vector<8x768xf32>
      %cst_34 = arith.constant 0.000000e+00 : f32
      %62 = vector.broadcast %cst_34 : f32 to vector<8x768xf32>
      %cst_35 = arith.constant 0.000000e+00 : f32
      %63 = vector.broadcast %cst_35 : f32 to vector<8x768xf32>
      %c0_36 = arith.constant 0 : index
      %c0_37 = arith.constant 0 : index
      %64 = memref.load %arg2[%c0_36, %c0_37] : memref<16x3xf32, #tpu.memory_space<smem>>
      %65 = vector.broadcast %64 : f32 to vector<8x768xf32>
      %66 = arith.mulf %65, %58 : vector<8x768xf32>
      %c0_38 = arith.constant 0 : index
      %c1 = arith.constant 1 : index
      %67 = memref.load %arg2[%c0_38, %c1] : memref<16x3xf32, #tpu.memory_space<smem>>
      %68 = vector.broadcast %67 : f32 to vector<8x768xf32>
      %69 = arith.mulf %68, %56 : vector<8x768xf32>
      %70 = arith.addf %66, %69 : vector<8x768xf32>
      %c0_39 = arith.constant 0 : index
      %c2 = arith.constant 2 : index
      %71 = memref.load %arg2[%c0_39, %c2] : memref<16x3xf32, #tpu.memory_space<smem>>
      %72 = vector.broadcast %71 : f32 to vector<8x768xf32>
      %73 = arith.mulf %72, %60 : vector<8x768xf32>
      %74 = arith.addf %70, %73 : vector<8x768xf32>
      %c0_40 = arith.constant 0 : index
      %75 = memref.load %arg3[%c0_40] : memref<16xf32, #tpu.memory_space<smem>>
      %76 = vector.broadcast %75 : f32 to vector<8x768xf32>
      %77 = arith.addf %74, %76 : vector<8x768xf32>
      %cst_41 = arith.constant 0.000000e+00 : f32
      %78 = vector.broadcast %cst_41 : f32 to vector<8x768xf32>
      %79 = arith.maximumf %77, %78 : vector<8x768xf32>
      %c0_42 = arith.constant 0 : index
      %c0_43 = arith.constant 0 : index
      %80 = memref.load %arg4[%c0_42, %c0_43] : memref<16x3xf32, #tpu.memory_space<smem>>
      %81 = vector.broadcast %80 : f32 to vector<8x768xf32>
      %82 = arith.mulf %81, %79 : vector<8x768xf32>
      %83 = arith.addf %61, %82 : vector<8x768xf32>
      %c0_44 = arith.constant 0 : index
      %c1_45 = arith.constant 1 : index
      %84 = memref.load %arg4[%c0_44, %c1_45] : memref<16x3xf32, #tpu.memory_space<smem>>
      %85 = vector.broadcast %84 : f32 to vector<8x768xf32>
      %86 = arith.mulf %85, %79 : vector<8x768xf32>
      %87 = arith.addf %62, %86 : vector<8x768xf32>
      %c0_46 = arith.constant 0 : index
      %c2_47 = arith.constant 2 : index
      %88 = memref.load %arg4[%c0_46, %c2_47] : memref<16x3xf32, #tpu.memory_space<smem>>
      %89 = vector.broadcast %88 : f32 to vector<8x768xf32>
      %90 = arith.mulf %89, %79 : vector<8x768xf32>
      %91 = arith.addf %63, %90 : vector<8x768xf32>
      %c1_48 = arith.constant 1 : index
      %c0_49 = arith.constant 0 : index
      %92 = memref.load %arg2[%c1_48, %c0_49] : memref<16x3xf32, #tpu.memory_space<smem>>
      %93 = vector.broadcast %92 : f32 to vector<8x768xf32>
      %94 = arith.mulf %93, %58 : vector<8x768xf32>
      %c1_50 = arith.constant 1 : index
      %c1_51 = arith.constant 1 : index
      %95 = memref.load %arg2[%c1_50, %c1_51] : memref<16x3xf32, #tpu.memory_space<smem>>
      %96 = vector.broadcast %95 : f32 to vector<8x768xf32>
      %97 = arith.mulf %96, %56 : vector<8x768xf32>
      %98 = arith.addf %94, %97 : vector<8x768xf32>
      %c1_52 = arith.constant 1 : index
      %c2_53 = arith.constant 2 : index
      %99 = memref.load %arg2[%c1_52, %c2_53] : memref<16x3xf32, #tpu.memory_space<smem>>
      %100 = vector.broadcast %99 : f32 to vector<8x768xf32>
      %101 = arith.mulf %100, %60 : vector<8x768xf32>
      %102 = arith.addf %98, %101 : vector<8x768xf32>
      %c1_54 = arith.constant 1 : index
      %103 = memref.load %arg3[%c1_54] : memref<16xf32, #tpu.memory_space<smem>>
      %104 = vector.broadcast %103 : f32 to vector<8x768xf32>
      %105 = arith.addf %102, %104 : vector<8x768xf32>
      %cst_55 = arith.constant 0.000000e+00 : f32
      %106 = vector.broadcast %cst_55 : f32 to vector<8x768xf32>
      %107 = arith.maximumf %105, %106 : vector<8x768xf32>
      %c1_56 = arith.constant 1 : index
      %c0_57 = arith.constant 0 : index
      %108 = memref.load %arg4[%c1_56, %c0_57] : memref<16x3xf32, #tpu.memory_space<smem>>
      %109 = vector.broadcast %108 : f32 to vector<8x768xf32>
      %110 = arith.mulf %109, %107 : vector<8x768xf32>
      %111 = arith.addf %83, %110 : vector<8x768xf32>
      %c1_58 = arith.constant 1 : index
      %c1_59 = arith.constant 1 : index
      %112 = memref.load %arg4[%c1_58, %c1_59] : memref<16x3xf32, #tpu.memory_space<smem>>
      %113 = vector.broadcast %112 : f32 to vector<8x768xf32>
      %114 = arith.mulf %113, %107 : vector<8x768xf32>
      %115 = arith.addf %87, %114 : vector<8x768xf32>
      %c1_60 = arith.constant 1 : index
      %c2_61 = arith.constant 2 : index
      %116 = memref.load %arg4[%c1_60, %c2_61] : memref<16x3xf32, #tpu.memory_space<smem>>
      %117 = vector.broadcast %116 : f32 to vector<8x768xf32>
      %118 = arith.mulf %117, %107 : vector<8x768xf32>
      %119 = arith.addf %91, %118 : vector<8x768xf32>
      %c2_62 = arith.constant 2 : index
      %c0_63 = arith.constant 0 : index
      %120 = memref.load %arg2[%c2_62, %c0_63] : memref<16x3xf32, #tpu.memory_space<smem>>
      %121 = vector.broadcast %120 : f32 to vector<8x768xf32>
      %122 = arith.mulf %121, %58 : vector<8x768xf32>
      %c2_64 = arith.constant 2 : index
      %c1_65 = arith.constant 1 : index
      %123 = memref.load %arg2[%c2_64, %c1_65] : memref<16x3xf32, #tpu.memory_space<smem>>
      %124 = vector.broadcast %123 : f32 to vector<8x768xf32>
      %125 = arith.mulf %124, %56 : vector<8x768xf32>
      %126 = arith.addf %122, %125 : vector<8x768xf32>
      %c2_66 = arith.constant 2 : index
      %c2_67 = arith.constant 2 : index
      %127 = memref.load %arg2[%c2_66, %c2_67] : memref<16x3xf32, #tpu.memory_space<smem>>
      %128 = vector.broadcast %127 : f32 to vector<8x768xf32>
      %129 = arith.mulf %128, %60 : vector<8x768xf32>
      %130 = arith.addf %126, %129 : vector<8x768xf32>
      %c2_68 = arith.constant 2 : index
      %131 = memref.load %arg3[%c2_68] : memref<16xf32, #tpu.memory_space<smem>>
      %132 = vector.broadcast %131 : f32 to vector<8x768xf32>
      %133 = arith.addf %130, %132 : vector<8x768xf32>
      %cst_69 = arith.constant 0.000000e+00 : f32
      %134 = vector.broadcast %cst_69 : f32 to vector<8x768xf32>
      %135 = arith.maximumf %133, %134 : vector<8x768xf32>
      %c2_70 = arith.constant 2 : index
      %c0_71 = arith.constant 0 : index
      %136 = memref.load %arg4[%c2_70, %c0_71] : memref<16x3xf32, #tpu.memory_space<smem>>
      %137 = vector.broadcast %136 : f32 to vector<8x768xf32>
      %138 = arith.mulf %137, %135 : vector<8x768xf32>
      %139 = arith.addf %111, %138 : vector<8x768xf32>
      %c2_72 = arith.constant 2 : index
      %c1_73 = arith.constant 1 : index
      %140 = memref.load %arg4[%c2_72, %c1_73] : memref<16x3xf32, #tpu.memory_space<smem>>
      %141 = vector.broadcast %140 : f32 to vector<8x768xf32>
      %142 = arith.mulf %141, %135 : vector<8x768xf32>
      %143 = arith.addf %115, %142 : vector<8x768xf32>
      %c2_74 = arith.constant 2 : index
      %c2_75 = arith.constant 2 : index
      %144 = memref.load %arg4[%c2_74, %c2_75] : memref<16x3xf32, #tpu.memory_space<smem>>
      %145 = vector.broadcast %144 : f32 to vector<8x768xf32>
      %146 = arith.mulf %145, %135 : vector<8x768xf32>
      %147 = arith.addf %119, %146 : vector<8x768xf32>
      %c3 = arith.constant 3 : index
      %c0_76 = arith.constant 0 : index
      %148 = memref.load %arg2[%c3, %c0_76] : memref<16x3xf32, #tpu.memory_space<smem>>
      %149 = vector.broadcast %148 : f32 to vector<8x768xf32>
      %150 = arith.mulf %149, %58 : vector<8x768xf32>
      %c3_77 = arith.constant 3 : index
      %c1_78 = arith.constant 1 : index
      %151 = memref.load %arg2[%c3_77, %c1_78] : memref<16x3xf32, #tpu.memory_space<smem>>
      %152 = vector.broadcast %151 : f32 to vector<8x768xf32>
      %153 = arith.mulf %152, %56 : vector<8x768xf32>
      %154 = arith.addf %150, %153 : vector<8x768xf32>
      %c3_79 = arith.constant 3 : index
      %c2_80 = arith.constant 2 : index
      %155 = memref.load %arg2[%c3_79, %c2_80] : memref<16x3xf32, #tpu.memory_space<smem>>
      %156 = vector.broadcast %155 : f32 to vector<8x768xf32>
      %157 = arith.mulf %156, %60 : vector<8x768xf32>
      %158 = arith.addf %154, %157 : vector<8x768xf32>
      %c3_81 = arith.constant 3 : index
      %159 = memref.load %arg3[%c3_81] : memref<16xf32, #tpu.memory_space<smem>>
      %160 = vector.broadcast %159 : f32 to vector<8x768xf32>
      %161 = arith.addf %158, %160 : vector<8x768xf32>
      %cst_82 = arith.constant 0.000000e+00 : f32
      %162 = vector.broadcast %cst_82 : f32 to vector<8x768xf32>
      %163 = arith.maximumf %161, %162 : vector<8x768xf32>
      %c3_83 = arith.constant 3 : index
      %c0_84 = arith.constant 0 : index
      %164 = memref.load %arg4[%c3_83, %c0_84] : memref<16x3xf32, #tpu.memory_space<smem>>
      %165 = vector.broadcast %164 : f32 to vector<8x768xf32>
      %166 = arith.mulf %165, %163 : vector<8x768xf32>
      %167 = arith.addf %139, %166 : vector<8x768xf32>
      %c3_85 = arith.constant 3 : index
      %c1_86 = arith.constant 1 : index
      %168 = memref.load %arg4[%c3_85, %c1_86] : memref<16x3xf32, #tpu.memory_space<smem>>
      %169 = vector.broadcast %168 : f32 to vector<8x768xf32>
      %170 = arith.mulf %169, %163 : vector<8x768xf32>
      %171 = arith.addf %143, %170 : vector<8x768xf32>
      %c3_87 = arith.constant 3 : index
      %c2_88 = arith.constant 2 : index
      %172 = memref.load %arg4[%c3_87, %c2_88] : memref<16x3xf32, #tpu.memory_space<smem>>
      %173 = vector.broadcast %172 : f32 to vector<8x768xf32>
      %174 = arith.mulf %173, %163 : vector<8x768xf32>
      %175 = arith.addf %147, %174 : vector<8x768xf32>
      %c4 = arith.constant 4 : index
      %c0_89 = arith.constant 0 : index
      %176 = memref.load %arg2[%c4, %c0_89] : memref<16x3xf32, #tpu.memory_space<smem>>
      %177 = vector.broadcast %176 : f32 to vector<8x768xf32>
      %178 = arith.mulf %177, %58 : vector<8x768xf32>
      %c4_90 = arith.constant 4 : index
      %c1_91 = arith.constant 1 : index
      %179 = memref.load %arg2[%c4_90, %c1_91] : memref<16x3xf32, #tpu.memory_space<smem>>
      %180 = vector.broadcast %179 : f32 to vector<8x768xf32>
      %181 = arith.mulf %180, %56 : vector<8x768xf32>
      %182 = arith.addf %178, %181 : vector<8x768xf32>
      %c4_92 = arith.constant 4 : index
      %c2_93 = arith.constant 2 : index
      %183 = memref.load %arg2[%c4_92, %c2_93] : memref<16x3xf32, #tpu.memory_space<smem>>
      %184 = vector.broadcast %183 : f32 to vector<8x768xf32>
      %185 = arith.mulf %184, %60 : vector<8x768xf32>
      %186 = arith.addf %182, %185 : vector<8x768xf32>
      %c4_94 = arith.constant 4 : index
      %187 = memref.load %arg3[%c4_94] : memref<16xf32, #tpu.memory_space<smem>>
      %188 = vector.broadcast %187 : f32 to vector<8x768xf32>
      %189 = arith.addf %186, %188 : vector<8x768xf32>
      %cst_95 = arith.constant 0.000000e+00 : f32
      %190 = vector.broadcast %cst_95 : f32 to vector<8x768xf32>
      %191 = arith.maximumf %189, %190 : vector<8x768xf32>
      %c4_96 = arith.constant 4 : index
      %c0_97 = arith.constant 0 : index
      %192 = memref.load %arg4[%c4_96, %c0_97] : memref<16x3xf32, #tpu.memory_space<smem>>
      %193 = vector.broadcast %192 : f32 to vector<8x768xf32>
      %194 = arith.mulf %193, %191 : vector<8x768xf32>
      %195 = arith.addf %167, %194 : vector<8x768xf32>
      %c4_98 = arith.constant 4 : index
      %c1_99 = arith.constant 1 : index
      %196 = memref.load %arg4[%c4_98, %c1_99] : memref<16x3xf32, #tpu.memory_space<smem>>
      %197 = vector.broadcast %196 : f32 to vector<8x768xf32>
      %198 = arith.mulf %197, %191 : vector<8x768xf32>
      %199 = arith.addf %171, %198 : vector<8x768xf32>
      %c4_100 = arith.constant 4 : index
      %c2_101 = arith.constant 2 : index
      %200 = memref.load %arg4[%c4_100, %c2_101] : memref<16x3xf32, #tpu.memory_space<smem>>
      %201 = vector.broadcast %200 : f32 to vector<8x768xf32>
      %202 = arith.mulf %201, %191 : vector<8x768xf32>
      %203 = arith.addf %175, %202 : vector<8x768xf32>
      %c5 = arith.constant 5 : index
      %c0_102 = arith.constant 0 : index
      %204 = memref.load %arg2[%c5, %c0_102] : memref<16x3xf32, #tpu.memory_space<smem>>
      %205 = vector.broadcast %204 : f32 to vector<8x768xf32>
      %206 = arith.mulf %205, %58 : vector<8x768xf32>
      %c5_103 = arith.constant 5 : index
      %c1_104 = arith.constant 1 : index
      %207 = memref.load %arg2[%c5_103, %c1_104] : memref<16x3xf32, #tpu.memory_space<smem>>
      %208 = vector.broadcast %207 : f32 to vector<8x768xf32>
      %209 = arith.mulf %208, %56 : vector<8x768xf32>
      %210 = arith.addf %206, %209 : vector<8x768xf32>
      %c5_105 = arith.constant 5 : index
      %c2_106 = arith.constant 2 : index
      %211 = memref.load %arg2[%c5_105, %c2_106] : memref<16x3xf32, #tpu.memory_space<smem>>
      %212 = vector.broadcast %211 : f32 to vector<8x768xf32>
      %213 = arith.mulf %212, %60 : vector<8x768xf32>
      %214 = arith.addf %210, %213 : vector<8x768xf32>
      %c5_107 = arith.constant 5 : index
      %215 = memref.load %arg3[%c5_107] : memref<16xf32, #tpu.memory_space<smem>>
      %216 = vector.broadcast %215 : f32 to vector<8x768xf32>
      %217 = arith.addf %214, %216 : vector<8x768xf32>
      %cst_108 = arith.constant 0.000000e+00 : f32
      %218 = vector.broadcast %cst_108 : f32 to vector<8x768xf32>
      %219 = arith.maximumf %217, %218 : vector<8x768xf32>
      %c5_109 = arith.constant 5 : index
      %c0_110 = arith.constant 0 : index
      %220 = memref.load %arg4[%c5_109, %c0_110] : memref<16x3xf32, #tpu.memory_space<smem>>
      %221 = vector.broadcast %220 : f32 to vector<8x768xf32>
      %222 = arith.mulf %221, %219 : vector<8x768xf32>
      %223 = arith.addf %195, %222 : vector<8x768xf32>
      %c5_111 = arith.constant 5 : index
      %c1_112 = arith.constant 1 : index
      %224 = memref.load %arg4[%c5_111, %c1_112] : memref<16x3xf32, #tpu.memory_space<smem>>
      %225 = vector.broadcast %224 : f32 to vector<8x768xf32>
      %226 = arith.mulf %225, %219 : vector<8x768xf32>
      %227 = arith.addf %199, %226 : vector<8x768xf32>
      %c5_113 = arith.constant 5 : index
      %c2_114 = arith.constant 2 : index
      %228 = memref.load %arg4[%c5_113, %c2_114] : memref<16x3xf32, #tpu.memory_space<smem>>
      %229 = vector.broadcast %228 : f32 to vector<8x768xf32>
      %230 = arith.mulf %229, %219 : vector<8x768xf32>
      %231 = arith.addf %203, %230 : vector<8x768xf32>
      %c6 = arith.constant 6 : index
      %c0_115 = arith.constant 0 : index
      %232 = memref.load %arg2[%c6, %c0_115] : memref<16x3xf32, #tpu.memory_space<smem>>
      %233 = vector.broadcast %232 : f32 to vector<8x768xf32>
      %234 = arith.mulf %233, %58 : vector<8x768xf32>
      %c6_116 = arith.constant 6 : index
      %c1_117 = arith.constant 1 : index
      %235 = memref.load %arg2[%c6_116, %c1_117] : memref<16x3xf32, #tpu.memory_space<smem>>
      %236 = vector.broadcast %235 : f32 to vector<8x768xf32>
      %237 = arith.mulf %236, %56 : vector<8x768xf32>
      %238 = arith.addf %234, %237 : vector<8x768xf32>
      %c6_118 = arith.constant 6 : index
      %c2_119 = arith.constant 2 : index
      %239 = memref.load %arg2[%c6_118, %c2_119] : memref<16x3xf32, #tpu.memory_space<smem>>
      %240 = vector.broadcast %239 : f32 to vector<8x768xf32>
      %241 = arith.mulf %240, %60 : vector<8x768xf32>
      %242 = arith.addf %238, %241 : vector<8x768xf32>
      %c6_120 = arith.constant 6 : index
      %243 = memref.load %arg3[%c6_120] : memref<16xf32, #tpu.memory_space<smem>>
      %244 = vector.broadcast %243 : f32 to vector<8x768xf32>
      %245 = arith.addf %242, %244 : vector<8x768xf32>
      %cst_121 = arith.constant 0.000000e+00 : f32
      %246 = vector.broadcast %cst_121 : f32 to vector<8x768xf32>
      %247 = arith.maximumf %245, %246 : vector<8x768xf32>
      %c6_122 = arith.constant 6 : index
      %c0_123 = arith.constant 0 : index
      %248 = memref.load %arg4[%c6_122, %c0_123] : memref<16x3xf32, #tpu.memory_space<smem>>
      %249 = vector.broadcast %248 : f32 to vector<8x768xf32>
      %250 = arith.mulf %249, %247 : vector<8x768xf32>
      %251 = arith.addf %223, %250 : vector<8x768xf32>
      %c6_124 = arith.constant 6 : index
      %c1_125 = arith.constant 1 : index
      %252 = memref.load %arg4[%c6_124, %c1_125] : memref<16x3xf32, #tpu.memory_space<smem>>
      %253 = vector.broadcast %252 : f32 to vector<8x768xf32>
      %254 = arith.mulf %253, %247 : vector<8x768xf32>
      %255 = arith.addf %227, %254 : vector<8x768xf32>
      %c6_126 = arith.constant 6 : index
      %c2_127 = arith.constant 2 : index
      %256 = memref.load %arg4[%c6_126, %c2_127] : memref<16x3xf32, #tpu.memory_space<smem>>
      %257 = vector.broadcast %256 : f32 to vector<8x768xf32>
      %258 = arith.mulf %257, %247 : vector<8x768xf32>
      %259 = arith.addf %231, %258 : vector<8x768xf32>
      %c7 = arith.constant 7 : index
      %c0_128 = arith.constant 0 : index
      %260 = memref.load %arg2[%c7, %c0_128] : memref<16x3xf32, #tpu.memory_space<smem>>
      %261 = vector.broadcast %260 : f32 to vector<8x768xf32>
      %262 = arith.mulf %261, %58 : vector<8x768xf32>
      %c7_129 = arith.constant 7 : index
      %c1_130 = arith.constant 1 : index
      %263 = memref.load %arg2[%c7_129, %c1_130] : memref<16x3xf32, #tpu.memory_space<smem>>
      %264 = vector.broadcast %263 : f32 to vector<8x768xf32>
      %265 = arith.mulf %264, %56 : vector<8x768xf32>
      %266 = arith.addf %262, %265 : vector<8x768xf32>
      %c7_131 = arith.constant 7 : index
      %c2_132 = arith.constant 2 : index
      %267 = memref.load %arg2[%c7_131, %c2_132] : memref<16x3xf32, #tpu.memory_space<smem>>
      %268 = vector.broadcast %267 : f32 to vector<8x768xf32>
      %269 = arith.mulf %268, %60 : vector<8x768xf32>
      %270 = arith.addf %266, %269 : vector<8x768xf32>
      %c7_133 = arith.constant 7 : index
      %271 = memref.load %arg3[%c7_133] : memref<16xf32, #tpu.memory_space<smem>>
      %272 = vector.broadcast %271 : f32 to vector<8x768xf32>
      %273 = arith.addf %270, %272 : vector<8x768xf32>
      %cst_134 = arith.constant 0.000000e+00 : f32
      %274 = vector.broadcast %cst_134 : f32 to vector<8x768xf32>
      %275 = arith.maximumf %273, %274 : vector<8x768xf32>
      %c7_135 = arith.constant 7 : index
      %c0_136 = arith.constant 0 : index
      %276 = memref.load %arg4[%c7_135, %c0_136] : memref<16x3xf32, #tpu.memory_space<smem>>
      %277 = vector.broadcast %276 : f32 to vector<8x768xf32>
      %278 = arith.mulf %277, %275 : vector<8x768xf32>
      %279 = arith.addf %251, %278 : vector<8x768xf32>
      %c7_137 = arith.constant 7 : index
      %c1_138 = arith.constant 1 : index
      %280 = memref.load %arg4[%c7_137, %c1_138] : memref<16x3xf32, #tpu.memory_space<smem>>
      %281 = vector.broadcast %280 : f32 to vector<8x768xf32>
      %282 = arith.mulf %281, %275 : vector<8x768xf32>
      %283 = arith.addf %255, %282 : vector<8x768xf32>
      %c7_139 = arith.constant 7 : index
      %c2_140 = arith.constant 2 : index
      %284 = memref.load %arg4[%c7_139, %c2_140] : memref<16x3xf32, #tpu.memory_space<smem>>
      %285 = vector.broadcast %284 : f32 to vector<8x768xf32>
      %286 = arith.mulf %285, %275 : vector<8x768xf32>
      %287 = arith.addf %259, %286 : vector<8x768xf32>
      %c8 = arith.constant 8 : index
      %c0_141 = arith.constant 0 : index
      %288 = memref.load %arg2[%c8, %c0_141] : memref<16x3xf32, #tpu.memory_space<smem>>
      %289 = vector.broadcast %288 : f32 to vector<8x768xf32>
      %290 = arith.mulf %289, %58 : vector<8x768xf32>
      %c8_142 = arith.constant 8 : index
      %c1_143 = arith.constant 1 : index
      %291 = memref.load %arg2[%c8_142, %c1_143] : memref<16x3xf32, #tpu.memory_space<smem>>
      %292 = vector.broadcast %291 : f32 to vector<8x768xf32>
      %293 = arith.mulf %292, %56 : vector<8x768xf32>
      %294 = arith.addf %290, %293 : vector<8x768xf32>
      %c8_144 = arith.constant 8 : index
      %c2_145 = arith.constant 2 : index
      %295 = memref.load %arg2[%c8_144, %c2_145] : memref<16x3xf32, #tpu.memory_space<smem>>
      %296 = vector.broadcast %295 : f32 to vector<8x768xf32>
      %297 = arith.mulf %296, %60 : vector<8x768xf32>
      %298 = arith.addf %294, %297 : vector<8x768xf32>
      %c8_146 = arith.constant 8 : index
      %299 = memref.load %arg3[%c8_146] : memref<16xf32, #tpu.memory_space<smem>>
      %300 = vector.broadcast %299 : f32 to vector<8x768xf32>
      %301 = arith.addf %298, %300 : vector<8x768xf32>
      %cst_147 = arith.constant 0.000000e+00 : f32
      %302 = vector.broadcast %cst_147 : f32 to vector<8x768xf32>
      %303 = arith.maximumf %301, %302 : vector<8x768xf32>
      %c8_148 = arith.constant 8 : index
      %c0_149 = arith.constant 0 : index
      %304 = memref.load %arg4[%c8_148, %c0_149] : memref<16x3xf32, #tpu.memory_space<smem>>
      %305 = vector.broadcast %304 : f32 to vector<8x768xf32>
      %306 = arith.mulf %305, %303 : vector<8x768xf32>
      %307 = arith.addf %279, %306 : vector<8x768xf32>
      %c8_150 = arith.constant 8 : index
      %c1_151 = arith.constant 1 : index
      %308 = memref.load %arg4[%c8_150, %c1_151] : memref<16x3xf32, #tpu.memory_space<smem>>
      %309 = vector.broadcast %308 : f32 to vector<8x768xf32>
      %310 = arith.mulf %309, %303 : vector<8x768xf32>
      %311 = arith.addf %283, %310 : vector<8x768xf32>
      %c8_152 = arith.constant 8 : index
      %c2_153 = arith.constant 2 : index
      %312 = memref.load %arg4[%c8_152, %c2_153] : memref<16x3xf32, #tpu.memory_space<smem>>
      %313 = vector.broadcast %312 : f32 to vector<8x768xf32>
      %314 = arith.mulf %313, %303 : vector<8x768xf32>
      %315 = arith.addf %287, %314 : vector<8x768xf32>
      %c9 = arith.constant 9 : index
      %c0_154 = arith.constant 0 : index
      %316 = memref.load %arg2[%c9, %c0_154] : memref<16x3xf32, #tpu.memory_space<smem>>
      %317 = vector.broadcast %316 : f32 to vector<8x768xf32>
      %318 = arith.mulf %317, %58 : vector<8x768xf32>
      %c9_155 = arith.constant 9 : index
      %c1_156 = arith.constant 1 : index
      %319 = memref.load %arg2[%c9_155, %c1_156] : memref<16x3xf32, #tpu.memory_space<smem>>
      %320 = vector.broadcast %319 : f32 to vector<8x768xf32>
      %321 = arith.mulf %320, %56 : vector<8x768xf32>
      %322 = arith.addf %318, %321 : vector<8x768xf32>
      %c9_157 = arith.constant 9 : index
      %c2_158 = arith.constant 2 : index
      %323 = memref.load %arg2[%c9_157, %c2_158] : memref<16x3xf32, #tpu.memory_space<smem>>
      %324 = vector.broadcast %323 : f32 to vector<8x768xf32>
      %325 = arith.mulf %324, %60 : vector<8x768xf32>
      %326 = arith.addf %322, %325 : vector<8x768xf32>
      %c9_159 = arith.constant 9 : index
      %327 = memref.load %arg3[%c9_159] : memref<16xf32, #tpu.memory_space<smem>>
      %328 = vector.broadcast %327 : f32 to vector<8x768xf32>
      %329 = arith.addf %326, %328 : vector<8x768xf32>
      %cst_160 = arith.constant 0.000000e+00 : f32
      %330 = vector.broadcast %cst_160 : f32 to vector<8x768xf32>
      %331 = arith.maximumf %329, %330 : vector<8x768xf32>
      %c9_161 = arith.constant 9 : index
      %c0_162 = arith.constant 0 : index
      %332 = memref.load %arg4[%c9_161, %c0_162] : memref<16x3xf32, #tpu.memory_space<smem>>
      %333 = vector.broadcast %332 : f32 to vector<8x768xf32>
      %334 = arith.mulf %333, %331 : vector<8x768xf32>
      %335 = arith.addf %307, %334 : vector<8x768xf32>
      %c9_163 = arith.constant 9 : index
      %c1_164 = arith.constant 1 : index
      %336 = memref.load %arg4[%c9_163, %c1_164] : memref<16x3xf32, #tpu.memory_space<smem>>
      %337 = vector.broadcast %336 : f32 to vector<8x768xf32>
      %338 = arith.mulf %337, %331 : vector<8x768xf32>
      %339 = arith.addf %311, %338 : vector<8x768xf32>
      %c9_165 = arith.constant 9 : index
      %c2_166 = arith.constant 2 : index
      %340 = memref.load %arg4[%c9_165, %c2_166] : memref<16x3xf32, #tpu.memory_space<smem>>
      %341 = vector.broadcast %340 : f32 to vector<8x768xf32>
      %342 = arith.mulf %341, %331 : vector<8x768xf32>
      %343 = arith.addf %315, %342 : vector<8x768xf32>
      %c10 = arith.constant 10 : index
      %c0_167 = arith.constant 0 : index
      %344 = memref.load %arg2[%c10, %c0_167] : memref<16x3xf32, #tpu.memory_space<smem>>
      %345 = vector.broadcast %344 : f32 to vector<8x768xf32>
      %346 = arith.mulf %345, %58 : vector<8x768xf32>
      %c10_168 = arith.constant 10 : index
      %c1_169 = arith.constant 1 : index
      %347 = memref.load %arg2[%c10_168, %c1_169] : memref<16x3xf32, #tpu.memory_space<smem>>
      %348 = vector.broadcast %347 : f32 to vector<8x768xf32>
      %349 = arith.mulf %348, %56 : vector<8x768xf32>
      %350 = arith.addf %346, %349 : vector<8x768xf32>
      %c10_170 = arith.constant 10 : index
      %c2_171 = arith.constant 2 : index
      %351 = memref.load %arg2[%c10_170, %c2_171] : memref<16x3xf32, #tpu.memory_space<smem>>
      %352 = vector.broadcast %351 : f32 to vector<8x768xf32>
      %353 = arith.mulf %352, %60 : vector<8x768xf32>
      %354 = arith.addf %350, %353 : vector<8x768xf32>
      %c10_172 = arith.constant 10 : index
      %355 = memref.load %arg3[%c10_172] : memref<16xf32, #tpu.memory_space<smem>>
      %356 = vector.broadcast %355 : f32 to vector<8x768xf32>
      %357 = arith.addf %354, %356 : vector<8x768xf32>
      %cst_173 = arith.constant 0.000000e+00 : f32
      %358 = vector.broadcast %cst_173 : f32 to vector<8x768xf32>
      %359 = arith.maximumf %357, %358 : vector<8x768xf32>
      %c10_174 = arith.constant 10 : index
      %c0_175 = arith.constant 0 : index
      %360 = memref.load %arg4[%c10_174, %c0_175] : memref<16x3xf32, #tpu.memory_space<smem>>
      %361 = vector.broadcast %360 : f32 to vector<8x768xf32>
      %362 = arith.mulf %361, %359 : vector<8x768xf32>
      %363 = arith.addf %335, %362 : vector<8x768xf32>
      %c10_176 = arith.constant 10 : index
      %c1_177 = arith.constant 1 : index
      %364 = memref.load %arg4[%c10_176, %c1_177] : memref<16x3xf32, #tpu.memory_space<smem>>
      %365 = vector.broadcast %364 : f32 to vector<8x768xf32>
      %366 = arith.mulf %365, %359 : vector<8x768xf32>
      %367 = arith.addf %339, %366 : vector<8x768xf32>
      %c10_178 = arith.constant 10 : index
      %c2_179 = arith.constant 2 : index
      %368 = memref.load %arg4[%c10_178, %c2_179] : memref<16x3xf32, #tpu.memory_space<smem>>
      %369 = vector.broadcast %368 : f32 to vector<8x768xf32>
      %370 = arith.mulf %369, %359 : vector<8x768xf32>
      %371 = arith.addf %343, %370 : vector<8x768xf32>
      %c11 = arith.constant 11 : index
      %c0_180 = arith.constant 0 : index
      %372 = memref.load %arg2[%c11, %c0_180] : memref<16x3xf32, #tpu.memory_space<smem>>
      %373 = vector.broadcast %372 : f32 to vector<8x768xf32>
      %374 = arith.mulf %373, %58 : vector<8x768xf32>
      %c11_181 = arith.constant 11 : index
      %c1_182 = arith.constant 1 : index
      %375 = memref.load %arg2[%c11_181, %c1_182] : memref<16x3xf32, #tpu.memory_space<smem>>
      %376 = vector.broadcast %375 : f32 to vector<8x768xf32>
      %377 = arith.mulf %376, %56 : vector<8x768xf32>
      %378 = arith.addf %374, %377 : vector<8x768xf32>
      %c11_183 = arith.constant 11 : index
      %c2_184 = arith.constant 2 : index
      %379 = memref.load %arg2[%c11_183, %c2_184] : memref<16x3xf32, #tpu.memory_space<smem>>
      %380 = vector.broadcast %379 : f32 to vector<8x768xf32>
      %381 = arith.mulf %380, %60 : vector<8x768xf32>
      %382 = arith.addf %378, %381 : vector<8x768xf32>
      %c11_185 = arith.constant 11 : index
      %383 = memref.load %arg3[%c11_185] : memref<16xf32, #tpu.memory_space<smem>>
      %384 = vector.broadcast %383 : f32 to vector<8x768xf32>
      %385 = arith.addf %382, %384 : vector<8x768xf32>
      %cst_186 = arith.constant 0.000000e+00 : f32
      %386 = vector.broadcast %cst_186 : f32 to vector<8x768xf32>
      %387 = arith.maximumf %385, %386 : vector<8x768xf32>
      %c11_187 = arith.constant 11 : index
      %c0_188 = arith.constant 0 : index
      %388 = memref.load %arg4[%c11_187, %c0_188] : memref<16x3xf32, #tpu.memory_space<smem>>
      %389 = vector.broadcast %388 : f32 to vector<8x768xf32>
      %390 = arith.mulf %389, %387 : vector<8x768xf32>
      %391 = arith.addf %363, %390 : vector<8x768xf32>
      %c11_189 = arith.constant 11 : index
      %c1_190 = arith.constant 1 : index
      %392 = memref.load %arg4[%c11_189, %c1_190] : memref<16x3xf32, #tpu.memory_space<smem>>
      %393 = vector.broadcast %392 : f32 to vector<8x768xf32>
      %394 = arith.mulf %393, %387 : vector<8x768xf32>
      %395 = arith.addf %367, %394 : vector<8x768xf32>
      %c11_191 = arith.constant 11 : index
      %c2_192 = arith.constant 2 : index
      %396 = memref.load %arg4[%c11_191, %c2_192] : memref<16x3xf32, #tpu.memory_space<smem>>
      %397 = vector.broadcast %396 : f32 to vector<8x768xf32>
      %398 = arith.mulf %397, %387 : vector<8x768xf32>
      %399 = arith.addf %371, %398 : vector<8x768xf32>
      %c12 = arith.constant 12 : index
      %c0_193 = arith.constant 0 : index
      %400 = memref.load %arg2[%c12, %c0_193] : memref<16x3xf32, #tpu.memory_space<smem>>
      %401 = vector.broadcast %400 : f32 to vector<8x768xf32>
      %402 = arith.mulf %401, %58 : vector<8x768xf32>
      %c12_194 = arith.constant 12 : index
      %c1_195 = arith.constant 1 : index
      %403 = memref.load %arg2[%c12_194, %c1_195] : memref<16x3xf32, #tpu.memory_space<smem>>
      %404 = vector.broadcast %403 : f32 to vector<8x768xf32>
      %405 = arith.mulf %404, %56 : vector<8x768xf32>
      %406 = arith.addf %402, %405 : vector<8x768xf32>
      %c12_196 = arith.constant 12 : index
      %c2_197 = arith.constant 2 : index
      %407 = memref.load %arg2[%c12_196, %c2_197] : memref<16x3xf32, #tpu.memory_space<smem>>
      %408 = vector.broadcast %407 : f32 to vector<8x768xf32>
      %409 = arith.mulf %408, %60 : vector<8x768xf32>
      %410 = arith.addf %406, %409 : vector<8x768xf32>
      %c12_198 = arith.constant 12 : index
      %411 = memref.load %arg3[%c12_198] : memref<16xf32, #tpu.memory_space<smem>>
      %412 = vector.broadcast %411 : f32 to vector<8x768xf32>
      %413 = arith.addf %410, %412 : vector<8x768xf32>
      %cst_199 = arith.constant 0.000000e+00 : f32
      %414 = vector.broadcast %cst_199 : f32 to vector<8x768xf32>
      %415 = arith.maximumf %413, %414 : vector<8x768xf32>
      %c12_200 = arith.constant 12 : index
      %c0_201 = arith.constant 0 : index
      %416 = memref.load %arg4[%c12_200, %c0_201] : memref<16x3xf32, #tpu.memory_space<smem>>
      %417 = vector.broadcast %416 : f32 to vector<8x768xf32>
      %418 = arith.mulf %417, %415 : vector<8x768xf32>
      %419 = arith.addf %391, %418 : vector<8x768xf32>
      %c12_202 = arith.constant 12 : index
      %c1_203 = arith.constant 1 : index
      %420 = memref.load %arg4[%c12_202, %c1_203] : memref<16x3xf32, #tpu.memory_space<smem>>
      %421 = vector.broadcast %420 : f32 to vector<8x768xf32>
      %422 = arith.mulf %421, %415 : vector<8x768xf32>
      %423 = arith.addf %395, %422 : vector<8x768xf32>
      %c12_204 = arith.constant 12 : index
      %c2_205 = arith.constant 2 : index
      %424 = memref.load %arg4[%c12_204, %c2_205] : memref<16x3xf32, #tpu.memory_space<smem>>
      %425 = vector.broadcast %424 : f32 to vector<8x768xf32>
      %426 = arith.mulf %425, %415 : vector<8x768xf32>
      %427 = arith.addf %399, %426 : vector<8x768xf32>
      %c13 = arith.constant 13 : index
      %c0_206 = arith.constant 0 : index
      %428 = memref.load %arg2[%c13, %c0_206] : memref<16x3xf32, #tpu.memory_space<smem>>
      %429 = vector.broadcast %428 : f32 to vector<8x768xf32>
      %430 = arith.mulf %429, %58 : vector<8x768xf32>
      %c13_207 = arith.constant 13 : index
      %c1_208 = arith.constant 1 : index
      %431 = memref.load %arg2[%c13_207, %c1_208] : memref<16x3xf32, #tpu.memory_space<smem>>
      %432 = vector.broadcast %431 : f32 to vector<8x768xf32>
      %433 = arith.mulf %432, %56 : vector<8x768xf32>
      %434 = arith.addf %430, %433 : vector<8x768xf32>
      %c13_209 = arith.constant 13 : index
      %c2_210 = arith.constant 2 : index
      %435 = memref.load %arg2[%c13_209, %c2_210] : memref<16x3xf32, #tpu.memory_space<smem>>
      %436 = vector.broadcast %435 : f32 to vector<8x768xf32>
      %437 = arith.mulf %436, %60 : vector<8x768xf32>
      %438 = arith.addf %434, %437 : vector<8x768xf32>
      %c13_211 = arith.constant 13 : index
      %439 = memref.load %arg3[%c13_211] : memref<16xf32, #tpu.memory_space<smem>>
      %440 = vector.broadcast %439 : f32 to vector<8x768xf32>
      %441 = arith.addf %438, %440 : vector<8x768xf32>
      %cst_212 = arith.constant 0.000000e+00 : f32
      %442 = vector.broadcast %cst_212 : f32 to vector<8x768xf32>
      %443 = arith.maximumf %441, %442 : vector<8x768xf32>
      %c13_213 = arith.constant 13 : index
      %c0_214 = arith.constant 0 : index
      %444 = memref.load %arg4[%c13_213, %c0_214] : memref<16x3xf32, #tpu.memory_space<smem>>
      %445 = vector.broadcast %444 : f32 to vector<8x768xf32>
      %446 = arith.mulf %445, %443 : vector<8x768xf32>
      %447 = arith.addf %419, %446 : vector<8x768xf32>
      %c13_215 = arith.constant 13 : index
      %c1_216 = arith.constant 1 : index
      %448 = memref.load %arg4[%c13_215, %c1_216] : memref<16x3xf32, #tpu.memory_space<smem>>
      %449 = vector.broadcast %448 : f32 to vector<8x768xf32>
      %450 = arith.mulf %449, %443 : vector<8x768xf32>
      %451 = arith.addf %423, %450 : vector<8x768xf32>
      %c13_217 = arith.constant 13 : index
      %c2_218 = arith.constant 2 : index
      %452 = memref.load %arg4[%c13_217, %c2_218] : memref<16x3xf32, #tpu.memory_space<smem>>
      %453 = vector.broadcast %452 : f32 to vector<8x768xf32>
      %454 = arith.mulf %453, %443 : vector<8x768xf32>
      %455 = arith.addf %427, %454 : vector<8x768xf32>
      %c14 = arith.constant 14 : index
      %c0_219 = arith.constant 0 : index
      %456 = memref.load %arg2[%c14, %c0_219] : memref<16x3xf32, #tpu.memory_space<smem>>
      %457 = vector.broadcast %456 : f32 to vector<8x768xf32>
      %458 = arith.mulf %457, %58 : vector<8x768xf32>
      %c14_220 = arith.constant 14 : index
      %c1_221 = arith.constant 1 : index
      %459 = memref.load %arg2[%c14_220, %c1_221] : memref<16x3xf32, #tpu.memory_space<smem>>
      %460 = vector.broadcast %459 : f32 to vector<8x768xf32>
      %461 = arith.mulf %460, %56 : vector<8x768xf32>
      %462 = arith.addf %458, %461 : vector<8x768xf32>
      %c14_222 = arith.constant 14 : index
      %c2_223 = arith.constant 2 : index
      %463 = memref.load %arg2[%c14_222, %c2_223] : memref<16x3xf32, #tpu.memory_space<smem>>
      %464 = vector.broadcast %463 : f32 to vector<8x768xf32>
      %465 = arith.mulf %464, %60 : vector<8x768xf32>
      %466 = arith.addf %462, %465 : vector<8x768xf32>
      %c14_224 = arith.constant 14 : index
      %467 = memref.load %arg3[%c14_224] : memref<16xf32, #tpu.memory_space<smem>>
      %468 = vector.broadcast %467 : f32 to vector<8x768xf32>
      %469 = arith.addf %466, %468 : vector<8x768xf32>
      %cst_225 = arith.constant 0.000000e+00 : f32
      %470 = vector.broadcast %cst_225 : f32 to vector<8x768xf32>
      %471 = arith.maximumf %469, %470 : vector<8x768xf32>
      %c14_226 = arith.constant 14 : index
      %c0_227 = arith.constant 0 : index
      %472 = memref.load %arg4[%c14_226, %c0_227] : memref<16x3xf32, #tpu.memory_space<smem>>
      %473 = vector.broadcast %472 : f32 to vector<8x768xf32>
      %474 = arith.mulf %473, %471 : vector<8x768xf32>
      %475 = arith.addf %447, %474 : vector<8x768xf32>
      %c14_228 = arith.constant 14 : index
      %c1_229 = arith.constant 1 : index
      %476 = memref.load %arg4[%c14_228, %c1_229] : memref<16x3xf32, #tpu.memory_space<smem>>
      %477 = vector.broadcast %476 : f32 to vector<8x768xf32>
      %478 = arith.mulf %477, %471 : vector<8x768xf32>
      %479 = arith.addf %451, %478 : vector<8x768xf32>
      %c14_230 = arith.constant 14 : index
      %c2_231 = arith.constant 2 : index
      %480 = memref.load %arg4[%c14_230, %c2_231] : memref<16x3xf32, #tpu.memory_space<smem>>
      %481 = vector.broadcast %480 : f32 to vector<8x768xf32>
      %482 = arith.mulf %481, %471 : vector<8x768xf32>
      %483 = arith.addf %455, %482 : vector<8x768xf32>
      %c15 = arith.constant 15 : index
      %c0_232 = arith.constant 0 : index
      %484 = memref.load %arg2[%c15, %c0_232] : memref<16x3xf32, #tpu.memory_space<smem>>
      %485 = vector.broadcast %484 : f32 to vector<8x768xf32>
      %486 = arith.mulf %485, %58 : vector<8x768xf32>
      %c15_233 = arith.constant 15 : index
      %c1_234 = arith.constant 1 : index
      %487 = memref.load %arg2[%c15_233, %c1_234] : memref<16x3xf32, #tpu.memory_space<smem>>
      %488 = vector.broadcast %487 : f32 to vector<8x768xf32>
      %489 = arith.mulf %488, %56 : vector<8x768xf32>
      %490 = arith.addf %486, %489 : vector<8x768xf32>
      %c15_235 = arith.constant 15 : index
      %c2_236 = arith.constant 2 : index
      %491 = memref.load %arg2[%c15_235, %c2_236] : memref<16x3xf32, #tpu.memory_space<smem>>
      %492 = vector.broadcast %491 : f32 to vector<8x768xf32>
      %493 = arith.mulf %492, %60 : vector<8x768xf32>
      %494 = arith.addf %490, %493 : vector<8x768xf32>
      %c15_237 = arith.constant 15 : index
      %495 = memref.load %arg3[%c15_237] : memref<16xf32, #tpu.memory_space<smem>>
      %496 = vector.broadcast %495 : f32 to vector<8x768xf32>
      %497 = arith.addf %494, %496 : vector<8x768xf32>
      %cst_238 = arith.constant 0.000000e+00 : f32
      %498 = vector.broadcast %cst_238 : f32 to vector<8x768xf32>
      %499 = arith.maximumf %497, %498 : vector<8x768xf32>
      %c15_239 = arith.constant 15 : index
      %c0_240 = arith.constant 0 : index
      %500 = memref.load %arg4[%c15_239, %c0_240] : memref<16x3xf32, #tpu.memory_space<smem>>
      %501 = vector.broadcast %500 : f32 to vector<8x768xf32>
      %502 = arith.mulf %501, %499 : vector<8x768xf32>
      %503 = arith.addf %475, %502 : vector<8x768xf32>
      %c15_241 = arith.constant 15 : index
      %c1_242 = arith.constant 1 : index
      %504 = memref.load %arg4[%c15_241, %c1_242] : memref<16x3xf32, #tpu.memory_space<smem>>
      %505 = vector.broadcast %504 : f32 to vector<8x768xf32>
      %506 = arith.mulf %505, %499 : vector<8x768xf32>
      %507 = arith.addf %479, %506 : vector<8x768xf32>
      %c15_243 = arith.constant 15 : index
      %c2_244 = arith.constant 2 : index
      %508 = memref.load %arg4[%c15_243, %c2_244] : memref<16x3xf32, #tpu.memory_space<smem>>
      %509 = vector.broadcast %508 : f32 to vector<8x768xf32>
      %510 = arith.mulf %509, %499 : vector<8x768xf32>
      %511 = arith.addf %483, %510 : vector<8x768xf32>
      %c0_245 = arith.constant 0 : index
      %512 = arith.index_cast %54 : i32 to index
      %513 = vector.load %arg9[%c0_245, %512] : memref<8x3840xf32, #tpu.memory_space<vmem>>, vector<8x768xf32>
      tpu.vector_store %arg9[%c0_245, %512], %503 {strides = array<i32>} : memref<8x3840xf32, #tpu.memory_space<vmem>>, vector<8x768xf32>,
      %c0_246 = arith.constant 0 : index
      %514 = arith.index_cast %54 : i32 to index
      %515 = vector.load %arg10[%c0_246, %514] : memref<8x3840xf32, #tpu.memory_space<vmem>>, vector<8x768xf32>
      tpu.vector_store %arg10[%c0_246, %514], %507 {strides = array<i32>} : memref<8x3840xf32, #tpu.memory_space<vmem>>, vector<8x768xf32>,
      %c0_247 = arith.constant 0 : index
      %516 = arith.index_cast %54 : i32 to index
      %517 = vector.load %arg11[%c0_247, %516] : memref<8x3840xf32, #tpu.memory_space<vmem>>, vector<8x768xf32>
      tpu.vector_store %arg11[%c0_247, %516], %511 {strides = array<i32>} : memref<8x3840xf32, #tpu.memory_space<vmem>>, vector<8x768xf32>,
    }
    %c5_i32_11 = arith.constant 5 : i32
    %17 = tpu.iota {dimensions = array<i32: 1>} : vector<8x3840xi32>
    %18 = tpu.iota {dimensions = array<i32: 0>} : vector<8x3840xi32>
    %c3840_i32 = arith.constant 3840 : i32
    %19 = vector.broadcast %c3840_i32 : i32 to vector<8x3840xi32>
    %20 = arith.muli %18, %19 : vector<8x3840xi32>
    %21 = arith.addi %20, %17 : vector<8x3840xi32>
    %c30135_i32 = arith.constant 30135 : i32
    %22 = vector.broadcast %c30135_i32 : i32 to vector<8x3840xi32>
    %23 = arith.cmpi slt, %21, %22 : vector<8x3840xi32>
    %c0_12 = arith.constant 0 : index
    %c0_13 = arith.constant 0 : index
    %24 = vector.load %arg9[%c0_12, %c0_13] : memref<8x3840xf32, #tpu.memory_space<vmem>>, vector<8x3840xf32>
    %cst = arith.constant 0.000000e+00 : f32
    %25 = vector.broadcast %cst : f32 to vector<8x3840xf32>
    %26 = arith.select %23, %24, %25 : vector<8x3840xi1>, vector<8x3840xf32>
    %c0_14 = arith.constant 0 : index
    %c0_15 = arith.constant 0 : index
    %27 = vector.load %arg10[%c0_14, %c0_15] : memref<8x3840xf32, #tpu.memory_space<vmem>>, vector<8x3840xf32>
    %cst_16 = arith.constant 0.000000e+00 : f32
    %28 = vector.broadcast %cst_16 : f32 to vector<8x3840xf32>
    %29 = arith.select %23, %27, %28 : vector<8x3840xi1>, vector<8x3840xf32>
    %c0_17 = arith.constant 0 : index
    %c0_18 = arith.constant 0 : index
    %30 = vector.load %arg11[%c0_17, %c0_18] : memref<8x3840xf32, #tpu.memory_space<vmem>>, vector<8x3840xf32>
    %cst_19 = arith.constant 0.000000e+00 : f32
    %31 = vector.broadcast %cst_19 : f32 to vector<8x3840xf32>
    %32 = arith.select %23, %30, %31 : vector<8x3840xi1>, vector<8x3840xf32>
    %33 = tpu.iota {dimensions = array<i32: 1>} : vector<8x3840xi32>
    %c1_i32_20 = arith.constant 1 : i32
    %34 = tpu.dynamic_rotate %26 by %c1_i32_20 dim 1 : vector<8x3840xf32>, i32 -> vector<8x3840xf32>
    %c1_i32_21 = arith.constant 1 : i32
    %35 = tpu.dynamic_rotate %34 by %c1_i32_21 dim 0 : vector<8x3840xf32>, i32 -> vector<8x3840xf32>
    %c0_i32_22 = arith.constant 0 : i32
    %36 = vector.broadcast %c0_i32_22 : i32 to vector<8x3840xi32>
    %37 = arith.cmpi eq, %33, %36 : vector<8x3840xi32>
    %38 = arith.select %37, %35, %34 : vector<8x3840xi1>, vector<8x3840xf32>
    %39 = arith.addf %38, %29 : vector<8x3840xf32>
    %40 = tpu.iota {dimensions = array<i32: 1>} : vector<8x3840xi32>
    %c3839_i32_23 = arith.constant 3839 : i32
    %41 = tpu.dynamic_rotate %32 by %c3839_i32_23 dim 1 : vector<8x3840xf32>, i32 -> vector<8x3840xf32>
    %c7_i32_24 = arith.constant 7 : i32
    %42 = tpu.dynamic_rotate %41 by %c7_i32_24 dim 0 : vector<8x3840xf32>, i32 -> vector<8x3840xf32>
    %c3839_i32_25 = arith.constant 3839 : i32
    %43 = vector.broadcast %c3839_i32_25 : i32 to vector<8x3840xi32>
    %44 = arith.cmpi eq, %40, %43 : vector<8x3840xi32>
    %45 = arith.select %44, %42, %41 : vector<8x3840xi1>, vector<8x3840xf32>
    %46 = arith.addf %39, %45 : vector<8x3840xf32>
    %c0_26 = arith.constant 0 : index
    %47 = memref.load %arg5[%c0_26] : memref<1xf32, #tpu.memory_space<smem>>
    %48 = vector.broadcast %47 : f32 to vector<8x3840xf32>
    %49 = arith.addf %46, %48 : vector<8x3840xf32>
    %cst_27 = arith.constant 0.000000e+00 : f32
    %50 = vector.broadcast %cst_27 : f32 to vector<8x3840xf32>
    %51 = arith.maximumf %49, %50 : vector<8x3840xf32>
    %c0_28 = arith.constant 0 : index
    %c0_29 = arith.constant 0 : index
    %52 = vector.load %arg6[%c0_28, %c0_29] : memref<8x3840xf32, #tpu.memory_space<vmem>>, vector<8x3840xf32>
    tpu.vector_store %arg6[%c0_28, %c0_29], %51 {strides = array<i32>} : memref<8x3840xf32, #tpu.memory_space<vmem>>, vector<8x3840xf32>,
    return
  }
  func.func @transform_0(%arg0: i32) -> (i32, i32) {
    %c0_i32 = arith.constant 0 : i32
    %c0_i32_0 = arith.constant 0 : i32
    return %arg0, %c0_i32 : i32, i32
  }
  func.func @transform_1(%arg0: i32) -> (i32, i32) {
    %c0_i32 = arith.constant 0 : i32
    %c0_i32_0 = arith.constant 0 : i32
    %c0_i32_1 = arith.constant 0 : i32
    return %c0_i32, %c0_i32_0 : i32, i32
  }
  func.func @transform_2(%arg0: i32) -> i32 {
    %c0_i32 = arith.constant 0 : i32
    %c0_i32_0 = arith.constant 0 : i32
    return %c0_i32 : i32
  }
  func.func @transform_3(%arg0: i32) -> (i32, i32) {
    %c0_i32 = arith.constant 0 : i32
    %c0_i32_0 = arith.constant 0 : i32
    %c0_i32_1 = arith.constant 0 : i32
    return %c0_i32, %c0_i32_0 : i32, i32
  }
  func.func @transform_4(%arg0: i32) -> i32 {
    %c0_i32 = arith.constant 0 : i32
    %c0_i32_0 = arith.constant 0 : i32
    return %c0_i32 : i32
  }
  func.func @transform_5(%arg0: i32) -> (i32, i32) {
    %c0_i32 = arith.constant 0 : i32
    %c0_i32_0 = arith.constant 0 : i32
    return %arg0, %c0_i32 : i32, i32
  }
}

</mosaic_0001>

<bundles_post_ra>
// kernel: matrix_to_feature.2
= control target key start
LH: loop header
LB: loop body
LE: loop exit
PB: predicated region body
PF: predicated region fallthrough
CT: control target
= control target key end

     0   :  { %s6212_s0 = inlined_call_operand.vmem [shape: f32[16,3840], index: 0, kind: input, shape index: {}]   ;;  %s6213_s1 = inlined_call_operand.vmem [shape: f32[16,3], index: 1, kind: input, shape index: {}]   ;;  %s6214_s2 = inlined_call_operand.hbm [shape: f32[16], index: 2, kind: input, shape index: {}]   ;;  %s6215_s3 = inlined_call_operand.vmem [shape: f32[16,3], index: 3, kind: input, shape index: {}]   ;;  %s6216_s4 = inlined_call_operand.<no memory space> [shape: f32[1], index: 4, kind: input, shape index: {}]   ;;  %s6217_s5 = inlined_call_operand.vmem [shape: f32[16,3840], index: 5, kind: output, shape index: {}]  }
   0x1   :  { %10 = sst [smem:[#allocation7]] %s6216_s4 }
   0x2   :  { %11 = vsyncpa [#allocation10], 0 }
   0x3   :  { %12 = vsyncpa [#allocation9], 0 }
   0x4   :  { %13 = vsyncpa [#allocation13], 0  ;;  %s3440_s20 = smov 0  }
   0x5 LB: > { %s172_s23 = sshll.u32 %s6213_s1, 4  ;;  %s3449_s24 = sadd.s32 4294967295, %s3394_s20   ;;  %s3394_s20 = sphi %s3440_s20, %s19_s20   ;;  %s173_s23 = int_to_ptr.vmem [resolvable:$true] %s172_s23 }
   0x6   : > { %p3113_p0 = scmp.ge.s32.totalorder %s3394_s20, 1  ;;  %p160_p1 = scmp.lt.s32.totalorder %s3394_s20, 3 }
   0x7   : > { %p3264_p3 = scmp.eq.s32.totalorder %s3449_s24, 0  ;;  %s194_s27 = sshll.u32 %s6215_s3, 4  ;;  %s3469_s27 = int_to_ptr.vmem [resolvable:$true] %s194_s27 }
   0x8   : > { %p3453_p2 = pnand %p3113_p0, %p160_p1  ;;  %s3329_s29 = scalar_lea.vmem %s173_s23, 256 }
   0x9   : > { %p3330_p6 = scmp.ne.s32.totalorder %s173_s23, %s3329_s29  ;;  %p3337_p10 = scmp.lt.s32.totalorder %s173_s23, %s173_s23 }
   0xa   : > { %p3254_p4 = pneg %p3453_p2  ;;  %p3338_p11 = scmp.lt.s32.totalorder %s3329_s29, %s3329_s29 }
   0xc   : > { %p3465_p5 = pnand %p3264_p3, %p3254_p4  ;;  %p3339_p12 = por %p3338_p11, %p3337_p10 }
   0xe   : > { %p3331_p7 = pneg %p3465_p5 }
  0x10   : > { %p3332_p8 = pnand %p3331_p7, %p3330_p6 }
  0x12   : > { %p3333_p9 = pneg %p3332_p8 }
  0x14   : > { %p3340_p13 = pnand %p3339_p12, %p3333_p9 }
  0x16   : > { %3343 = shalt.err (!%p3340_p13)
}
  0x17   : > { %s3400_s30 = smov [#allocation8]   ;;  %s3401_s6 = smov 128  }
  0x18   : > { %s3402_s7 = smov 8   ;;  %s3344_s10 = scalar_lea.hbm %s6214_s2, 16 }
  0x19   : > { %3257 = dma.vmem_to_smem (!%p3465_p5), %s173_s23, 256, %s3400_s30, [#allocation10], %s3401_s6, %s3401_s6, %s3402_s7  }
  0x1a   : > { %p3345_p0 = scmp.ne.s32.totalorder %s6214_s2, %s3344_s10  ;;  %p3351_p6 = scmp.lt.u32.totalorder %s3344_s10, %s6214_s2 }
  0x1c   : > { %p3347_p1 = pnand %p3345_p0, %p3331_p7 }
  0x1e   : > { %p3348_p4 = pneg %p3347_p1 }
  0x20   : > { %p3353_p8 = pnand %p3351_p6, %p3348_p4 }
  0x22   : > { %3356 = shalt.err (!%p3353_p8)
}
  0x23   : > { %s3403_s15 = smov [#allocation11]   ;;  %s3357_s18 = scalar_lea.vmem %s3469_s27, 256 }
  0x24   : > { %3260 = dma.hbm_to_smem (!%p3465_p5), %s6214_s2, 16, %s3403_s15, [#allocation9]  }
  0x25   : > { %p3358_p9 = scmp.ne.s32.totalorder %s3469_s27, %s3357_s18  ;;  %p3365_p12 = scmp.lt.s32.totalorder %s3469_s27, %s3469_s27 }
  0x26   : > { %p3366_p13 = scmp.lt.s32.totalorder %s3357_s18, %s3357_s18 }
  0x27   : > { %p3360_p10 = pnand %p3358_p9, %p3331_p7 }
  0x28   : > { %p3367_p0 = por %p3366_p13, %p3365_p12 }
  0x29   : > { %p3361_p11 = pneg %p3360_p10 }
  0x2b   : > { %p3368_p1 = pnand %p3367_p0, %p3361_p11 }
  0x2d   : > { %3371 = shalt.err (!%p3368_p1)
}
  0x2e   : > { %s3404_s19 = smov [#allocation12]   ;;  %221 = sbr.rel (%p3453_p2) target bundleno = 894 (0x37e), region = 40 }
  0x2f   : > { %3263 = dma.vmem_to_smem (!%p3465_p5), %s3469_s27, 256, %s3404_s19, [#allocation13], %s3401_s6, %s3401_s6, %s3402_s7  }
  0x35   : > { %3381 = dma.done.wait (%p3264_p3), [#allocation10], 256  }
  0x36   : > { %3383 = vsyncadd (%p3264_p3), [#allocation10], 4294967040 }
  0x37   : > { %3385 = dma.done.wait (%p3264_p3), [#allocation9], 16  }
  0x38   : > { %3387 = vsyncadd (%p3264_p3), [#allocation9], 4294967280 }
  0x39   : > { %3389 = dma.done.wait (%p3264_p3), [#allocation13], 256  }
  0x3a   : > { %3391 = vsyncadd (%p3264_p3), [#allocation13], 4294967040 }
  0x3b   : > { %235 = sfence }
  0x3c   : > { %p258_p2 = scmp.lt.s32.totalorder %s3449_s24, 1  ;;  %v6218_v0 = vlaneseq  ;;  %s3405_s27 = smov 1  }
  0x3d   : > { %s3406_s28 = smov 127   ;;  %s3863_s29 = smov 0  }
  0x3e   : > { %s6518_s24 = smov (!%p258_p2, %s3449_s24), 1  ;;  %v3522_v1 = vand.u32 127, %v6218_v0 }
  0x3f   : > { %s3241_s21 = smul.u32 240, %s6518_s24 }
  0x40   : > { %6292 = vst [vmem:[#allocation17_spill] sm:$0xff] %v3522_v1  ;;  %v3525_v2 = vadd.s32 128, %v3522_v1  ;;  %v3528_v3 = vadd.s32 256, %v3522_v1  ;;  %v3531_v4 = vadd.s32 384, %v3522_v1  ;;  %v3534_v5 = vadd.s32 512, %v3522_v1 }
  0x41   : > { %v3537_v6 = vadd.s32 640, %v3522_v1  ;;  %v3540_v7 = vadd.s32 768, %v3522_v1  ;;  %v3543_v8 = vadd.s32 896, %v3522_v1  ;;  %v3546_v9 = vadd.s32 1024, %v3522_v1  ;;  %s3551_s24 = scalar_lea.vmem %s6212_s0, %s3241_s21  ;;  %s3556_s26 = scalar_lea.vmem %s6217_s5, %s3241_s21 }
  0x42   : > { %6293 = vst [vmem:[#allocation18_spill] sm:$0xff] %v3525_v2  ;;  %6294 = vst [vmem:[#allocation19_spill] sm:$0xff] %v3528_v3  ;;  %v3559_v10 = vadd.s32 1152, %v3522_v1  ;;  %v3562_v11 = vadd.s32 1280, %v3522_v1  ;;  %v3565_v12 = vadd.s32 1408, %v3522_v1  ;;  %v3568_v13 = vadd.s32 1536, %v3522_v1 }
  0x43   : > { %6295 = vst [vmem:[#allocation20_spill] sm:$0xff] %v3531_v4  ;;  %6296 = vst [vmem:[#allocation21_spill] sm:$0xff] %v3534_v5  ;;  %v3571_v14 = vld [vmem:[%s3551_s24 + $0x10] sm:$0xff]  ;;  %v3574_v15 = vld [vmem:[%s3551_s24] sm:$0xff]  ;;  %v3577_v16 = vadd.s32 1664, %v3522_v1  ;;  %v3580_v17 = vadd.s32 1792, %v3522_v1 }
  0x44   : > { %6297 = vst [vmem:[#allocation22_spill] sm:$0xff] %v3537_v6  ;;  %6298 = vst [vmem:[#allocation23_spill] sm:$0xff] %v3540_v7  ;;  %v3583_v18 = vadd.s32 1920, %v3522_v1  ;;  %333 = vrot.lane.b32.xlu1 %v3571_v14, %s3405_s27  ;;  %329 = vrot.lane.b32.xlu0 %v3574_v15, %s3405_s27  ;;  %v3590_v19 = vadd.s32 2048, %v3522_v1  ;;  %v3593_v20 = vadd.s32 2176, %v3522_v1  ;;  %v3596_v21 = vadd.s32 2304, %v3522_v1 }
  0x45   : > { %6299 = vst [vmem:[#allocation24_spill] sm:$0xff] %v3543_v8  ;;  %6300 = vst [vmem:[#allocation25_spill] sm:$0xff] %v3546_v9  ;;  %v3599_v22 = vadd.s32 2432, %v3522_v1  ;;  %v3602_v23 = vld [vmem:[%s3551_s24 + $0x18] sm:$0xff]  ;;  %v3605_v24 = vld [vmem:[%s3551_s24 + $0x8] sm:$0xff]  ;;  %v3608_v25 = vadd.s32 2560, %v3522_v1 }
  0x46   : > { %6301 = vst [vmem:[#allocation26_spill] sm:$0xff] %v3559_v10  ;;  %6302 = vst [vmem:[#allocation27_spill] sm:$0xff] %v3562_v11  ;;  %v3611_v26 = vadd.s32 2688, %v3522_v1  ;;  %v3614_v27 = vadd.s32 2816, %v3522_v1  ;;  %v3617_v28 = vadd.s32 2944, %v3522_v1  ;;  %v3620_v29 = vadd.s32 3072, %v3522_v1 }
  0x47   : > { %6303 = vst [vmem:[#allocation28_spill] sm:$0xff] %v3565_v12  ;;  %6304 = vst [vmem:[#allocation29_spill] sm:$0xff] %v3568_v13  ;;  %v3623_v30 = vadd.s32 3200, %v3522_v1  ;;  %v3626_v31 = vadd.s32 3328, %v3522_v1  ;;  %v3629_v32 = vadd.s32 3456, %v3522_v1  ;;  %v3632_v33 = vadd.s32 3584, %v3522_v1 }
  0x48   : > { %6305 = vst [vmem:[#allocation30_spill] sm:$0xff] %v3577_v16  ;;  %6306 = vst [vmem:[#allocation31_spill] sm:$0xff] %v3580_v17  ;;  %335 = vrot.lane.b32.xlu1 %v3602_v23, %s3405_s27  ;;  %331 = vrot.lane.b32.xlu0 %v3605_v24, %s3405_s27  ;;  %v273_v34 = vld [vmem:[%s3551_s24 + $0x28] sm:$0xff]  ;;  %v272_v35 = vld [vmem:[%s3551_s24 + $0x20] sm:$0xff]  ;;  %vm6261_vm0 = vcmp.lt.s32.totalorder %v3522_v1, 1  ;;  %vm6259_vm1 = vcmp.eq.s32.totalorder %v3522_v1, 0 }
  0x49   : > { %6307 = vst [vmem:[#allocation32_spill] sm:$0xff] %v3583_v18  ;;  %6308 = vst [vmem:[#allocation33_spill] sm:$0xff] %v3590_v19  ;;  %v275_v36 = vld [vmem:[%s3551_s24 + $0x38] sm:$0xff]  ;;  %v274_v37 = vld [vmem:[%s3551_s24 + $0x30] sm:$0xff]  ;;  %vm6260_vm2 = vcmp.lt.s32.totalorder %v3522_v1, 127 }
  0x4a   : > { %6309 = vst [vmem:[#allocation34_spill] sm:$0xff] %v3593_v20  ;;  %6310 = vst [vmem:[#allocation35_spill] sm:$0xff] %v3596_v21  ;;  %v277_v38 = vld [vmem:[%s3551_s24 + $0x48] sm:$0xff]  ;;  %v276_v39 = vld [vmem:[%s3551_s24 + $0x40] sm:$0xff] }
  0x4b   : > { %6311 = vst [vmem:[#allocation36_spill] sm:$0xff] %v3599_v22  ;;  %6312 = vst [vmem:[#allocation37_spill] sm:$0xff] %v3608_v25  ;;  %v279_v40 = vld [vmem:[%s3551_s24 + $0x58] sm:$0xff]  ;;  %v278_v41 = vld [vmem:[%s3551_s24 + $0x50] sm:$0xff] }
  0x4c   : > { %6313 = vst [vmem:[#allocation38_spill] sm:$0xff] %v3611_v26  ;;  %6314 = vst [vmem:[#allocation39_spill] sm:$0xff] %v3614_v27  ;;  %339 = vrot.lane.b32.xlu1 %v273_v34, %s3405_s27  ;;  %337 = vrot.lane.b32.xlu0 %v272_v35, %s3405_s27  ;;  %v281_v42 = vld [vmem:[%s3551_s24 + $0x68] sm:$0xff]  ;;  %v280_v43 = vld [vmem:[%s3551_s24 + $0x60] sm:$0xff] }
  0x4d   : > { %6315 = vst [vmem:[#allocation40_spill] sm:$0xff] %v3617_v28  ;;  %6316 = vst [vmem:[#allocation41_spill] sm:$0xff] %v3620_v29  ;;  %v283_v44 = vld [vmem:[%s3551_s24 + $0x78] sm:$0xff]  ;;  %v282_v45 = vld [vmem:[%s3551_s24 + $0x70] sm:$0xff] }
  0x4e   : > { %6317 = vst [vmem:[#allocation42_spill] sm:$0xff] %v3623_v30  ;;  %6318 = vst [vmem:[#allocation43_spill] sm:$0xff] %v3626_v31  ;;  %v285_v46 = vld [vmem:[%s3551_s24 + $0x88] sm:$0xff]  ;;  %v284_v47 = vld [vmem:[%s3551_s24 + $0x80] sm:$0xff] }
  0x4f   : > { %6319 = vst [vmem:[#allocation44_spill] sm:$0xff] %v3629_v32  ;;  %6320 = vst [vmem:[#allocation45_spill] sm:$0xff] %v3632_v33  ;;  %v287_v48 = vld [vmem:[%s3551_s24 + $0x98] sm:$0xff]  ;;  %v286_v49 = vld [vmem:[%s3551_s24 + $0x90] sm:$0xff] }
  0x50   : > { %343 = vrot.lane.b32.xlu1 %v275_v36, %s3405_s27  ;;  %341 = vrot.lane.b32.xlu0 %v274_v37, %s3405_s27  ;;  %v289_v50 = vld [vmem:[%s3551_s24 + $0xa8] sm:$0xff]  ;;  %v288_v51 = vld [vmem:[%s3551_s24 + $0xa0] sm:$0xff] }
  0x51   : > { %v291_v52 = vld [vmem:[%s3551_s24 + $0xb8] sm:$0xff]  ;;  %v290_v53 = vld [vmem:[%s3551_s24 + $0xb0] sm:$0xff]  ;;  %v293_v54 = vld [vmem:[%s3551_s24 + $0xc8] sm:$0xff] }
  0x52   : > { %v292_v55 = vld [vmem:[%s3551_s24 + $0xc0] sm:$0xff]  ;;  %v295_v56 = vld [vmem:[%s3551_s24 + $0xd8] sm:$0xff]  ;;  %v294_v57 = vld [vmem:[%s3551_s24 + $0xd0] sm:$0xff] }
  0x53   : > { %v297_v58 = vld [vmem:[%s3551_s24 + $0xe8] sm:$0xff]  ;;  %v296_v59 = vld [vmem:[%s3551_s24 + $0xe0] sm:$0xff] }
  0x54   : > { %347 = vrot.lane.b32.xlu1 %v277_v38, %s3405_s27  ;;  %345 = vrot.lane.b32.xlu0 %v276_v39, %s3405_s27 }
  0x58   : > { %351 = vrot.lane.b32.xlu1 %v279_v40, %s3405_s27  ;;  %349 = vrot.lane.b32.xlu0 %v278_v41, %s3405_s27 }
  0x5c   : > { %355 = vrot.lane.b32.xlu1 %v281_v42, %s3405_s27  ;;  %353 = vrot.lane.b32.xlu0 %v280_v43, %s3405_s27 }
  0x60   : > { %359 = vrot.lane.b32.xlu1 %v283_v44, %s3405_s27  ;;  %357 = vrot.lane.b32.xlu0 %v282_v45, %s3405_s27 }
  0x64   : > { %363 = vrot.lane.b32.xlu1 %v285_v46, %s3405_s27  ;;  %361 = vrot.lane.b32.xlu0 %v284_v47, %s3405_s27 }
  0x68   : > { %367 = vrot.lane.b32.xlu1 %v287_v48, %s3405_s27  ;;  %365 = vrot.lane.b32.xlu0 %v286_v49, %s3405_s27 }
  0x6c   : > { %371 = vrot.lane.b32.xlu1 %v289_v50, %s3405_s27  ;;  %369 = vrot.lane.b32.xlu0 %v288_v51, %s3405_s27 }
  0x70   : > { %375 = vrot.lane.b32.xlu1 %v291_v52, %s3405_s27  ;;  %373 = vrot.lane.b32.xlu0 %v290_v53, %s3405_s27 }
  0x74   : > { %379 = vrot.lane.b32.xlu1 %v293_v54, %s3405_s27  ;;  %377 = vrot.lane.b32.xlu0 %v292_v55, %s3405_s27 }
  0x78   : > { %383 = vrot.lane.b32.xlu1 %v295_v56, %s3405_s27  ;;  %381 = vrot.lane.b32.xlu0 %v294_v57, %s3405_s27 }
  0x7c   : > { %387 = vrot.lane.b32.xlu1 %v297_v58, %s3405_s27  ;;  %385 = vrot.lane.b32.xlu0 %v296_v59, %s3405_s27 }
  0x80   : > { %628 = vrot.lane.b32.xlu1 %v297_v58, %s3406_s28  ;;  %570 = vrot.lane.b32.xlu0 %v3574_v15, %s3406_s28 }
  0x84   : > { %574 = vrot.lane.b32.xlu1 %v3571_v14, %s3406_s28  ;;  %572 = vrot.lane.b32.xlu0 %v3605_v24, %s3406_s28 }
  0x88   : > { %578 = vrot.lane.b32.xlu1 %v272_v35, %s3406_s28  ;;  %576 = vrot.lane.b32.xlu0 %v3602_v23, %s3406_s28 }
  0x8c   : > { %582 = vrot.lane.b32.xlu1 %v274_v37, %s3406_s28  ;;  %580 = vrot.lane.b32.xlu0 %v273_v34, %s3406_s28 }
  0x90   : > { %586 = vrot.lane.b32.xlu1 %v276_v39, %s3406_s28  ;;  %584 = vrot.lane.b32.xlu0 %v275_v36, %s3406_s28 }
  0x94   : > { %590 = vrot.lane.b32.xlu1 %v278_v41, %s3406_s28  ;;  %588 = vrot.lane.b32.xlu0 %v277_v38, %s3406_s28 }
  0x98   : > { %594 = vrot.lane.b32.xlu1 %v280_v43, %s3406_s28  ;;  %592 = vrot.lane.b32.xlu0 %v279_v40, %s3406_s28 }
  0x9c   : > { %598 = vrot.lane.b32.xlu1 %v282_v45, %s3406_s28  ;;  %596 = vrot.lane.b32.xlu0 %v281_v42, %s3406_s28 }
  0xa0   : > { %602 = vrot.lane.b32.xlu1 %v284_v47, %s3406_s28  ;;  %600 = vrot.lane.b32.xlu0 %v283_v44, %s3406_s28 }
  0xa4   : > { %606 = vrot.lane.b32.xlu1 %v286_v49, %s3406_s28  ;;  %604 = vrot.lane.b32.xlu0 %v285_v46, %s3406_s28 }
  0xa8   : > { %610 = vrot.lane.b32.xlu1 %v288_v51, %s3406_s28  ;;  %608 = vrot.lane.b32.xlu0 %v287_v48, %s3406_s28 }
  0xac   : > { %614 = vrot.lane.b32.xlu1 %v290_v53, %s3406_s28  ;;  %612 = vrot.lane.b32.xlu0 %v289_v50, %s3406_s28 }
  0xb0   : > { %618 = vrot.lane.b32.xlu1 %v292_v55, %s3406_s28  ;;  %616 = vrot.lane.b32.xlu0 %v291_v52, %s3406_s28 }
  0xb4   : > { %622 = vrot.lane.b32.xlu1 %v294_v57, %s3406_s28  ;;  %620 = vrot.lane.b32.xlu0 %v293_v54, %s3406_s28 }
  0xb6   : > { %v334_v60 = vpop.permute.xlu1 %333  ;;  %v3722_v61 = vpop.permute.xlu0 %329 }
  0xb8   : > { %626 = vrot.lane.b32.xlu1 %v296_v59, %s3406_s28  ;;  %624 = vrot.lane.b32.xlu0 %v295_v56, %s3406_s28 }
  0xba   : > { %v336_v62 = vpop.permute.xlu1 %335  ;;  %v332_v63 = vpop.permute.xlu0 %331 }
  0xbb   : > { %v416_v14 = vsel %vm6261_vm0, %v334_v60, %v336_v62  ;;  %v417_v15 = vsel %vm6261_vm0, %v332_v63, %v334_v60  ;;  %v418_v23 = vsel %vm6261_vm0, %v3722_v61, %v332_v63 }
  0xbc   : > { %513 = vst [vmem:[#allocation2 + $0x18] sm:$0xff] %v416_v14  ;;  %511 = vst [vmem:[#allocation2 + $0x8] sm:$0xff] %v418_v23 }
  0xbd   : > { %512 = vst [vmem:[#allocation2 + $0x10] sm:$0xff] %v417_v15 }
  0xbe   : > { %v340_v24 = vpop.permute.xlu1 %339  ;;  %v338_v34 = vpop.permute.xlu0 %337 }
  0xbf   : > { %v414_v35 = vsel %vm6261_vm0, %v338_v34, %v340_v24  ;;  %v415_v36 = vsel %vm6261_vm0, %v336_v62, %v338_v34 }
  0xc0   : > { %514 = vst [vmem:[#allocation2 + $0x20] sm:$0xff] %v415_v36  ;;  %515 = vst [vmem:[#allocation2 + $0x28] sm:$0xff] %v414_v35 }
  0xc2   : > { %v344_v37 = vpop.permute.xlu1 %343  ;;  %v342_v38 = vpop.permute.xlu0 %341 }
  0xc3   : > { %v412_v39 = vsel %vm6261_vm0, %v342_v38, %v344_v37  ;;  %v413_v40 = vsel %vm6261_vm0, %v340_v24, %v342_v38 }
  0xc4   : > { %516 = vst [vmem:[#allocation2 + $0x30] sm:$0xff] %v413_v40  ;;  %517 = vst [vmem:[#allocation2 + $0x38] sm:$0xff] %v412_v39 }
  0xc6   : > { %v348_v41 = vpop.permute.xlu1 %347  ;;  %v346_v42 = vpop.permute.xlu0 %345 }
  0xc7   : > { %v410_v43 = vsel %vm6261_vm0, %v346_v42, %v348_v41  ;;  %v411_v44 = vsel %vm6261_vm0, %v344_v37, %v346_v42 }
  0xc8   : > { %518 = vst [vmem:[#allocation2 + $0x40] sm:$0xff] %v411_v44  ;;  %519 = vst [vmem:[#allocation2 + $0x48] sm:$0xff] %v410_v43 }
  0xca   : > { %v352_v45 = vpop.permute.xlu1 %351  ;;  %v350_v46 = vpop.permute.xlu0 %349 }
  0xcb   : > { %v408_v47 = vsel %vm6261_vm0, %v350_v46, %v352_v45  ;;  %v409_v48 = vsel %vm6261_vm0, %v348_v41, %v350_v46 }
  0xcc   : > { %520 = vst [vmem:[#allocation2 + $0x50] sm:$0xff] %v409_v48  ;;  %521 = vst [vmem:[#allocation2 + $0x58] sm:$0xff] %v408_v47 }
  0xce   : > { %v356_v49 = vpop.permute.xlu1 %355  ;;  %v354_v50 = vpop.permute.xlu0 %353 }
  0xcf   : > { %v406_v51 = vsel %vm6261_vm0, %v354_v50, %v356_v49  ;;  %v407_v52 = vsel %vm6261_vm0, %v352_v45, %v354_v50 }
  0xd0   : > { %522 = vst [vmem:[#allocation2 + $0x60] sm:$0xff] %v407_v52  ;;  %523 = vst [vmem:[#allocation2 + $0x68] sm:$0xff] %v406_v51 }
  0xd2   : > { %v360_v53 = vpop.permute.xlu1 %359  ;;  %v358_v54 = vpop.permute.xlu0 %357 }
  0xd3   : > { %v404_v55 = vsel %vm6261_vm0, %v358_v54, %v360_v53  ;;  %v405_v56 = vsel %vm6261_vm0, %v356_v49, %v358_v54 }
  0xd4   : > { %524 = vst [vmem:[#allocation2 + $0x70] sm:$0xff] %v405_v56  ;;  %525 = vst [vmem:[#allocation2 + $0x78] sm:$0xff] %v404_v55 }
  0xd6   : > { %v364_v57 = vpop.permute.xlu1 %363  ;;  %v362_v58 = vpop.permute.xlu0 %361 }
  0xd7   : > { %v402_v59 = vsel %vm6261_vm0, %v362_v58, %v364_v57  ;;  %v403_v60 = vsel %vm6261_vm0, %v360_v53, %v362_v58  ;;  %v3791_v53 = vadd.s32 3712, %v3522_v1 }
  0xd8   : > { %526 = vst [vmem:[#allocation2 + $0x80] sm:$0xff] %v403_v60  ;;  %527 = vst [vmem:[#allocation2 + $0x88] sm:$0xff] %v402_v59 }
  0xd9   : > { %6321 = vst [vmem:[#allocation46_spill] sm:$0xff] %v3791_v53  ;;  %vm6258_vm3 = vcmp.eq.s32.totalorder %v3791_v53, 3839 }
  0xda   : > { %v368_v62 = vpop.permute.xlu1 %367  ;;  %v366_v63 = vpop.permute.xlu0 %365 }
  0xdb   : > { %v400_v14 = vsel %vm6261_vm0, %v366_v63, %v368_v62  ;;  %v401_v15 = vsel %vm6261_vm0, %v364_v57, %v366_v63 }
  0xdc   : > { %528 = vst [vmem:[#allocation2 + $0x90] sm:$0xff] %v401_v15  ;;  %529 = vst [vmem:[#allocation2 + $0x98] sm:$0xff] %v400_v14 }
  0xde   : > { %v372_v23 = vpop.permute.xlu1 %371  ;;  %v370_v24 = vpop.permute.xlu0 %369 }
  0xdf   : > { %v398_v34 = vsel %vm6261_vm0, %v370_v24, %v372_v23  ;;  %v399_v35 = vsel %vm6261_vm0, %v368_v62, %v370_v24 }
  0xe0   : > { %530 = vst [vmem:[#allocation2 + $0xa0] sm:$0xff] %v399_v35  ;;  %531 = vst [vmem:[#allocation2 + $0xa8] sm:$0xff] %v398_v34 }
  0xe2   : > { %v376_v36 = vpop.permute.xlu1 %375  ;;  %v374_v37 = vpop.permute.xlu0 %373 }
  0xe3   : > { %v396_v38 = vsel %vm6261_vm0, %v374_v37, %v376_v36  ;;  %v397_v39 = vsel %vm6261_vm0, %v372_v23, %v374_v37 }
  0xe4   : > { %532 = vst [vmem:[#allocation2 + $0xb0] sm:$0xff] %v397_v39  ;;  %533 = vst [vmem:[#allocation2 + $0xb8] sm:$0xff] %v396_v38 }
  0xe6   : > { %v380_v40 = vpop.permute.xlu1 %379  ;;  %v378_v41 = vpop.permute.xlu0 %377 }
  0xe7   : > { %v394_v42 = vsel %vm6261_vm0, %v378_v41, %v380_v40  ;;  %v395_v43 = vsel %vm6261_vm0, %v376_v36, %v378_v41 }
  0xe8   : > { %534 = vst [vmem:[#allocation2 + $0xc0] sm:$0xff] %v395_v43  ;;  %535 = vst [vmem:[#allocation2 + $0xc8] sm:$0xff] %v394_v42 }
  0xea   : > { %v384_v44 = vpop.permute.xlu1 %383  ;;  %v382_v45 = vpop.permute.xlu0 %381 }
  0xeb   : > { %v392_v46 = vsel %vm6261_vm0, %v382_v45, %v384_v44  ;;  %v393_v47 = vsel %vm6261_vm0, %v380_v40, %v382_v45 }
  0xec   : > { %536 = vst [vmem:[#allocation2 + $0xd0] sm:$0xff] %v393_v47  ;;  %537 = vst [vmem:[#allocation2 + $0xd8] sm:$0xff] %v392_v46 }
  0xee   : > { %v388_v48 = vpop.permute.xlu1 %387  ;;  %v386_v49 = vpop.permute.xlu0 %385 }
  0xef   : > { %v419_v50 = vsel %vm6261_vm0, %v388_v48, %v3722_v61  ;;  %v390_v51 = vsel %vm6261_vm0, %v386_v49, %v388_v48  ;;  %v391_v52 = vsel %vm6261_vm0, %v384_v44, %v386_v49 }
  0xf0   : > { %v420_v54 = vrot.slane %v419_v50, 7  ;;  %538 = vst [vmem:[#allocation2 + $0xe0] sm:$0xff] %v391_v52  ;;  %539 = vst [vmem:[#allocation2 + $0xe8] sm:$0xff] %v390_v51 }
  0xf2   : > { %v480_v55 = vsel %vm6259_vm1, %v420_v54, %v419_v50  ;;  %v3796_v56 = vpop.permute.xlu1 %628  ;;  %v571_v61 = vpop.permute.xlu0 %570 }
  0xf3   : > { %510 = vst [vmem:[#allocation2] sm:$0xff] %v480_v55  ;;  %v660_v57 = vsel %vm6260_vm2, %v3796_v56, %v571_v61 }
  0xf4   : > { %v690_v58 = vrot.slane %v660_v57, 1 }
  0xf6   : > { %v750_v59 = vsel %vm6258_vm3, %v690_v58, %v660_v57  ;;  %v575_v60 = vpop.permute.xlu1 %574  ;;  %v573_v62 = vpop.permute.xlu0 %572 }
  0xf7   : > { %780 = vst [vmem:[#allocation3 + $0xe8] sm:$0xff] %v750_v59  ;;  %v658_v63 = vsel %vm6260_vm2, %v573_v62, %v575_v60  ;;  %v659_v14 = vsel %vm6260_vm2, %v571_v61, %v573_v62 }
  0xf8   : > { %751 = vst [vmem:[#allocation3] sm:$0xff] %v659_v14  ;;  %752 = vst [vmem:[#allocation3 + $0x8] sm:$0xff] %v658_v63 }
  0xfa   : > { %v579_v15 = vpop.permute.xlu1 %578  ;;  %v577_v23 = vpop.permute.xlu0 %576 }
  0xfb   : > { %v656_v24 = vsel %vm6260_vm2, %v577_v23, %v579_v15  ;;  %v657_v34 = vsel %vm6260_vm2, %v575_v60, %v577_v23 }
  0xfc   : > { %753 = vst [vmem:[#allocation3 + $0x10] sm:$0xff] %v657_v34  ;;  %754 = vst [vmem:[#allocation3 + $0x18] sm:$0xff] %v656_v24 }
  0xfe   : > { %v583_v35 = vpop.permute.xlu1 %582  ;;  %v581_v36 = vpop.permute.xlu0 %580 }
  0xff   : > { %v654_v37 = vsel %vm6260_vm2, %v581_v36, %v583_v35  ;;  %v655_v38 = vsel %vm6260_vm2, %v579_v15, %v581_v36 }
 0x100   : > { %755 = vst [vmem:[#allocation3 + $0x20] sm:$0xff] %v655_v38  ;;  %756 = vst [vmem:[#allocation3 + $0x28] sm:$0xff] %v654_v37 }
 0x102   : > { %v587_v39 = vpop.permute.xlu1 %586  ;;  %v585_v40 = vpop.permute.xlu0 %584 }
 0x103   : > { %v652_v41 = vsel %vm6260_vm2, %v585_v40, %v587_v39  ;;  %v653_v42 = vsel %vm6260_vm2, %v583_v35, %v585_v40 }
 0x104   : > { %757 = vst [vmem:[#allocation3 + $0x30] sm:$0xff] %v653_v42  ;;  %758 = vst [vmem:[#allocation3 + $0x38] sm:$0xff] %v652_v41 }
 0x106   : > { %v591_v43 = vpop.permute.xlu1 %590  ;;  %v589_v44 = vpop.permute.xlu0 %588 }
 0x107   : > { %v650_v45 = vsel %vm6260_vm2, %v589_v44, %v591_v43  ;;  %v651_v46 = vsel %vm6260_vm2, %v587_v39, %v589_v44 }
 0x108   : > { %759 = vst [vmem:[#allocation3 + $0x40] sm:$0xff] %v651_v46  ;;  %760 = vst [vmem:[#allocation3 + $0x48] sm:$0xff] %v650_v45 }
 0x10a   : > { %v595_v47 = vpop.permute.xlu1 %594  ;;  %v593_v48 = vpop.permute.xlu0 %592 }
 0x10b   : > { %v648_v49 = vsel %vm6260_vm2, %v593_v48, %v595_v47  ;;  %v649_v50 = vsel %vm6260_vm2, %v591_v43, %v593_v48 }
 0x10c   : > { %761 = vst [vmem:[#allocation3 + $0x50] sm:$0xff] %v649_v50  ;;  %762 = vst [vmem:[#allocation3 + $0x58] sm:$0xff] %v648_v49 }
 0x10e   : > { %v599_v51 = vpop.permute.xlu1 %598  ;;  %v597_v52 = vpop.permute.xlu0 %596 }
 0x10f   : > { %v646_v54 = vsel %vm6260_vm2, %v597_v52, %v599_v51  ;;  %v647_v55 = vsel %vm6260_vm2, %v595_v47, %v597_v52 }
 0x110   : > { %763 = vst [vmem:[#allocation3 + $0x60] sm:$0xff] %v647_v55  ;;  %764 = vst [vmem:[#allocation3 + $0x68] sm:$0xff] %v646_v54 }
 0x112   : > { %v603_v61 = vpop.permute.xlu1 %602  ;;  %v601_v57 = vpop.permute.xlu0 %600 }
 0x113   : > { %v644_v58 = vsel %vm6260_vm2, %v601_v57, %v603_v61  ;;  %v645_v59 = vsel %vm6260_vm2, %v599_v51, %v601_v57 }
 0x114   : > { %765 = vst [vmem:[#allocation3 + $0x70] sm:$0xff] %v645_v59  ;;  %766 = vst [vmem:[#allocation3 + $0x78] sm:$0xff] %v644_v58 }
 0x116   : > { %v607_v60 = vpop.permute.xlu1 %606  ;;  %v605_v62 = vpop.permute.xlu0 %604 }
 0x117   : > { %v642_v63 = vsel %vm6260_vm2, %v605_v62, %v607_v60  ;;  %v643_v14 = vsel %vm6260_vm2, %v603_v61, %v605_v62 }
 0x118   : > { %767 = vst [vmem:[#allocation3 + $0x80] sm:$0xff] %v643_v14  ;;  %768 = vst [vmem:[#allocation3 + $0x88] sm:$0xff] %v642_v63 }
 0x11a   : > { %v611_v15 = vpop.permute.xlu1 %610  ;;  %v609_v23 = vpop.permute.xlu0 %608 }
 0x11b   : > { %v640_v24 = vsel %vm6260_vm2, %v609_v23, %v611_v15  ;;  %v641_v34 = vsel %vm6260_vm2, %v607_v60, %v609_v23 }
 0x11c   : > { %769 = vst [vmem:[#allocation3 + $0x90] sm:$0xff] %v641_v34  ;;  %770 = vst [vmem:[#allocation3 + $0x98] sm:$0xff] %v640_v24 }
 0x11e   : > { %v615_v35 = vpop.permute.xlu1 %614  ;;  %v613_v36 = vpop.permute.xlu0 %612 }
 0x11f   : > { %v638_v37 = vsel %vm6260_vm2, %v613_v36, %v615_v35  ;;  %v639_v38 = vsel %vm6260_vm2, %v611_v15, %v613_v36 }
 0x120   : > { %771 = vst [vmem:[#allocation3 + $0xa0] sm:$0xff] %v639_v38  ;;  %772 = vst [vmem:[#allocation3 + $0xa8] sm:$0xff] %v638_v37 }
 0x122   : > { %v619_v39 = vpop.permute.xlu1 %618  ;;  %v617_v40 = vpop.permute.xlu0 %616 }
 0x123   : > { %v636_v41 = vsel %vm6260_vm2, %v617_v40, %v619_v39  ;;  %v637_v42 = vsel %vm6260_vm2, %v615_v35, %v617_v40 }
 0x124   : > { %773 = vst [vmem:[#allocation3 + $0xb0] sm:$0xff] %v637_v42  ;;  %774 = vst [vmem:[#allocation3 + $0xb8] sm:$0xff] %v636_v41 }
 0x126   : > { %v623_v43 = vpop.permute.xlu1 %622  ;;  %v621_v44 = vpop.permute.xlu0 %620 }
 0x127   : > { %v634_v45 = vsel %vm6260_vm2, %v621_v44, %v623_v43  ;;  %v635_v46 = vsel %vm6260_vm2, %v619_v39, %v621_v44 }
 0x128   : > { %775 = vst [vmem:[#allocation3 + $0xc0] sm:$0xff] %v635_v46  ;;  %776 = vst [vmem:[#allocation3 + $0xc8] sm:$0xff] %v634_v45 }
 0x12a   : > { %v627_v47 = vpop.permute.xlu1 %626  ;;  %v625_v48 = vpop.permute.xlu0 %624 }
 0x12b   : > { %v631_v49 = vsel %vm6260_vm2, %v627_v47, %v3796_v56  ;;  %v632_v50 = vsel %vm6260_vm2, %v625_v48, %v627_v47  ;;  %v633_v51 = vsel %vm6260_vm2, %v623_v43, %v625_v48 }
 0x12c   : > { %779 = vst [vmem:[#allocation3 + $0xe0] sm:$0xff] %v631_v49  ;;  %777 = vst [vmem:[#allocation3 + $0xd0] sm:$0xff] %v633_v51 }
 0x12d   : > { %778 = vst [vmem:[#allocation3 + $0xd8] sm:$0xff] %v632_v50 }
 0x12e LB: >> { %s814_s30 = sld [smem:[#allocation8]]  ;;  %s3127_s6 = sld [smem:[#allocation8 + $0x1]]  ;;  %s3398_s29 = sphi %s3863_s29, %s786_s29  }
 0x12f   : >> { %s787_s7 = smul.u32 768, %s3398_s29  ;;  %s3128_s8 = sld [smem:[#allocation8 + $0x2]] }
 0x130   : >> { %s3869_s9 = sld [smem:[#allocation11]]  ;;  %s3902_s15 = sld [smem:[#allocation12 + $0x1]] }
 0x131   : >> { %s788_s10 = sshra.s32 %s787_s7, 7  ;;  %s3873_s12 = sld [smem:[#allocation12]] }
 0x132   : >> { %s3871_s11 = sshll.u32 %s788_s10, 3  ;;  %s3888_s14 = sld [smem:[#allocation8 + $0x80]] }
 0x133   : >> { %s3877_s13 = scalar_lea.vmem %s3551_s24, %s3871_s11  ;;  %s3905_s16 = scalar_lea.vmem [#allocation2], %s3871_s11 }
 0x134   : >> { %v815_v56 = vstv %s814_s30  ;;  %v3880_v52 = vld [vmem:[%s3877_s13] sm:$0xff]  ;;  %v3883_v54 = vld [vmem:[%s3877_s13 + $0x8] sm:$0xff]  ;;  %v3886_v55 = vld [vmem:[%s3877_s13 + $0x10] sm:$0xff]  ;;  %s3919_s17 = sld [smem:[#allocation12 + $0x2]]  ;;  %s3934_s18 = scalar_lea.vmem [#allocation3], %s3871_s11 }
 0x135   : >> { %v823_v61 = vstv %s3127_s6  ;;  %v3891_v57 = vld [vmem:[%s3877_s13 + $0x18] sm:$0xff]  ;;  %v3894_v58 = vld [vmem:[%s3877_s13 + $0x20] sm:$0xff]  ;;  %v3897_v59 = vld [vmem:[%s3877_s13 + $0x28] sm:$0xff]  ;;  %s3970_s19 = sld [smem:[#allocation8 + $0x81]]  ;;  %s3972_s21 = sld [smem:[#allocation8 + $0x82]] }
 0x136   : >> { %v824_v60 = vmul.f32 %v823_v61, %v3880_v52  ;;  %v825_v62 = vmul.f32 %v823_v61, %v3883_v54  ;;  %v826_v63 = vmul.f32 %v823_v61, %v3886_v55  ;;  %v3908_v14 = vld [vmem:[%s3905_s16] sm:$0xff]  ;;  %v3911_v15 = vld [vmem:[%s3905_s16 + $0x8] sm:$0xff]  ;;  %v3914_v23 = vld [vmem:[%s3905_s16 + $0x10] sm:$0xff]  ;;  %v827_v24 = vmul.f32 %v823_v61, %v3891_v57  ;;  %s3974_s22 = sld [smem:[#allocation11 + $0x1]]  ;;  %s4010_s23 = sld [smem:[#allocation12 + $0x80]] }
 0x137   : >> { %v828_v34 = vmul.f32 %v823_v61, %v3894_v58  ;;  %v829_v35 = vmul.f32 %v823_v61, %v3897_v59  ;;  %v837_v36 = vstv %s3128_s8  ;;  %v3922_v37 = vld [vmem:[%s3905_s16 + $0x18] sm:$0xff]  ;;  %v3925_v38 = vld [vmem:[%s3905_s16 + $0x20] sm:$0xff]  ;;  %v3928_v39 = vld [vmem:[%s3905_s16 + $0x28] sm:$0xff]  ;;  %v816_v40 = vmul.f32 %v815_v56, %v3908_v14  ;;  %s4026_s4 = sld [smem:[#allocation12 + $0x81]]  ;;  %s4028_s25 = sld [smem:[#allocation12 + $0x82]] }
 0x138   : >> { %v817_v41 = vmul.f32 %v815_v56, %v3911_v15  ;;  %v818_v42 = vmul.f32 %v815_v56, %v3914_v23  ;;  %v3937_v43 = vld [vmem:[%s3934_s18] sm:$0xff]  ;;  %v3940_v44 = vld [vmem:[%s3934_s18 + $0x8] sm:$0xff]  ;;  %v3943_v45 = vld [vmem:[%s3934_s18 + $0x10] sm:$0xff]  ;;  %v819_v46 = vmul.f32 %v815_v56, %v3922_v37  ;;  %v820_v47 = vmul.f32 %v815_v56, %v3925_v38  ;;  %s4038_s30 = sld [smem:[#allocation8 + $0x100]]  ;;  %s4040_s6 = sld [smem:[#allocation8 + $0x101]] }
 0x139   : >> { %6322 = vst [vmem:[#allocation47_spill] sm:$0xff] %v3937_v43  ;;  %6323 = vst [vmem:[#allocation48_spill] sm:$0xff] %v3940_v44  ;;  %v821_v48 = vmul.f32 %v815_v56, %v3928_v39  ;;  %v851_v49 = vstv %s3869_s9  ;;  %v3950_v50 = vld [vmem:[%s3934_s18 + $0x18] sm:$0xff]  ;;  %v3953_v51 = vld [vmem:[%s3934_s18 + $0x20] sm:$0xff]  ;;  %v830_v0 = vadd.f32 %v824_v60, %v816_v40  ;;  %v838_v30 = vmul.f32 %v837_v36, %v3937_v43  ;;  %s4068_s7 = sld [smem:[#allocation8 + $0x102]]  ;;  %s4110_s9 = sld [smem:[#allocation12 + $0x100]] }
 0x13a   : >> { %6324 = vst [vmem:[#allocation49_spill] sm:$0xff] %v3950_v50  ;;  %6325 = vst [vmem:[#allocation50_spill] sm:$0xff] %v3953_v51  ;;  %v3956_v61 = vld [vmem:[%s3934_s18 + $0x28] sm:$0xff]  ;;  %v831_v32 = vadd.f32 %v825_v62, %v817_v41  ;;  %v832_v33 = vadd.f32 %v826_v63, %v818_v42  ;;  %v833_v31 = vadd.f32 %v827_v24, %v819_v46  ;;  %v865_v63 = vstv %s3873_s12  ;;  %s4094_s8 = sld [smem:[#allocation11 + $0x2]]  ;;  %s4112_s10 = sld [smem:[#allocation8 + $0x180]] }
 0x13b   : >> { %6326 = vst [vmem:[#allocation51_spill] sm:$0xff] %v3956_v61  ;;  %v834_v29 = vadd.f32 %v828_v34, %v820_v47  ;;  %v835_v53 = vadd.f32 %v829_v35, %v821_v48  ;;  %v839_v56 = vmul.f32 %v837_v36, %v3940_v44  ;;  %v840_v27 = vmul.f32 %v837_v36, %v3943_v45  ;;  %s4122_s12 = sld [smem:[#allocation12 + $0x101]]  ;;  %s786_s29 = sadd.s32 1, %s3398_s29  }
 0x13c   : >> { %v841_v28 = vmul.f32 %v837_v36, %v3950_v50  ;;  %v842_v25 = vmul.f32 %v837_v36, %v3953_v51  ;;  %v843_v26 = vmul.f32 %v837_v36, %v3956_v61  ;;  %v844_v60 = vadd.f32 %v838_v30, %v830_v0  ;;  %p783_p3 = scmp.ge.s32.totalorder %s786_s29, 5  }
 0x13d   : >> { %v845_v62 = vadd.f32 %v839_v56, %v831_v32  ;;  %v907_v40 = vstv %s3888_s14  ;;  %v846_v41 = vadd.f32 %v840_v27, %v832_v33  ;;  %v879_v47 = vstv %s3902_s15  ;;  %s4124_s14 = sld [smem:[#allocation12 + $0x102]]  ;;  %s4146_s15 = sld [smem:[#allocation8 + $0x181]] }
 0x13e   : >> { %v847_v24 = vadd.f32 %v841_v28, %v833_v31  ;;  %v848_v34 = vadd.f32 %v842_v25, %v834_v29  ;;  %v849_v35 = vadd.f32 %v843_v26, %v835_v53  ;;  %v852_v42 = vadd.f32 %v851_v49, %v844_v60  ;;  %s2913_s24 = sld [smem:[#allocation7]] (%p783_p3) }
 0x13f   : >> { %v853_v46 = vadd.f32 %v851_v49, %v845_v62  ;;  %v3968_v48 = vstv %s3919_s17  ;;  %v854_v21 = vadd.f32 %v851_v49, %v846_v41  ;;  %v908_v25 = vmul.f32 %v907_v40, %v3908_v14  ;;  %s4148_s17 = sld [smem:[#allocation8 + $0x182]] }
 0x140   : >> { %v855_v22 = vadd.f32 %v851_v49, %v847_v24  ;;  %v856_v19 = vadd.f32 %v851_v49, %v848_v34  ;;  %v857_v20 = vadd.f32 %v851_v49, %v849_v35  ;;  %v858_v0 = vmax.f32 %v852_v42, 0.0 }
 0x141   : >> { %v859_v27 = vmax.f32 %v853_v46, 0.0  ;;  %v909_v26 = vmul.f32 %v907_v40, %v3911_v15  ;;  %v860_v28 = vmax.f32 %v854_v21, 0.0  ;;  %v910_v53 = vmul.f32 %v907_v40, %v3914_v23 }
 0x142   : >> { %v861_v29 = vmax.f32 %v855_v22, 0.0  ;;  %v862_v30 = vmax.f32 %v856_v19, 0.0  ;;  %v863_v31 = vmax.f32 %v857_v20, 0.0  ;;  %v3978_v32 = vmul.f32 %v865_v63, %v858_v0 }
 0x143   : >> { %v3980_v33 = vmul.f32 %v865_v63, %v859_v27  ;;  %v911_v36 = vmul.f32 %v907_v40, %v3922_v37  ;;  %v3984_v49 = vmul.f32 %v865_v63, %v860_v28  ;;  %v3988_v60 = vmul.f32 %v879_v47, %v858_v0 }
 0x144   : >> { %v3986_v56 = vmul.f32 %v865_v63, %v861_v29  ;;  %v3990_v62 = vmul.f32 %v879_v47, %v859_v27  ;;  %v3992_v19 = vmul.f32 %v865_v63, %v862_v30  ;;  %v3994_v20 = vmul.f32 %v865_v63, %v863_v31 }
 0x145   : >> { %v3996_v21 = vmul.f32 %v879_v47, %v860_v28  ;;  %v3998_v22 = vmul.f32 %v879_v47, %v861_v29  ;;  %v4000_v41 = vmul.f32 %v879_v47, %v862_v30  ;;  %v4002_v24 = vmul.f32 %v879_v47, %v863_v31 }
 0x146   : >> { %v4005_v34 = vmul.f32 %v3968_v48, %v858_v0  ;;  %v4008_v35 = vmul.f32 %v3968_v48, %v859_v27  ;;  %v4013_v42 = vmul.f32 %v3968_v48, %v860_v28  ;;  %v4016_v63 = vmul.f32 %v3968_v48, %v861_v29 }
 0x147   : >> { %v4019_v46 = vmul.f32 %v3968_v48, %v862_v30  ;;  %v912_v47 = vmul.f32 %v907_v40, %v3925_v38  ;;  %v913_v17 = vmul.f32 %v907_v40, %v3928_v39  ;;  %v915_v0 = vstv %s3970_s19  ;;  %s4188_s19 = sld [smem:[#allocation11 + $0x3]] }
 0x148   : >> { %v929_v18 = vstv %s3972_s21  ;;  %v943_v13 = vstv %s3974_s22  ;;  %v916_v27 = vmul.f32 %v915_v0, %v3880_v52  ;;  %v917_v28 = vmul.f32 %v915_v0, %v3883_v54  ;;  %s4206_s21 = sld [smem:[#allocation12 + $0x180]]  ;;  %s4208_s22 = sld [smem:[#allocation12 + $0x181]] }
 0x149   : >> { %v918_v29 = vmul.f32 %v915_v0, %v3886_v55  ;;  %v919_v30 = vmul.f32 %v915_v0, %v3891_v57  ;;  %v920_v16 = vmul.f32 %v915_v0, %v3894_v58  ;;  %v921_v11 = vmul.f32 %v915_v0, %v3897_v59 }
 0x14a   : >> { %v930_v40 = vmul.f32 %v929_v18, %v3937_v43  ;;  %v931_v12 = vmul.f32 %v929_v18, %v3940_v44  ;;  %v922_v9 = vadd.f32 %v916_v27, %v908_v25  ;;  %v923_v10 = vadd.f32 %v917_v28, %v909_v26 }
 0x14b   : >> { %v924_v7 = vadd.f32 %v918_v29, %v910_v53  ;;  %v925_v8 = vadd.f32 %v919_v30, %v911_v36  ;;  %v926_v5 = vadd.f32 %v920_v16, %v912_v47  ;;  %v927_v6 = vadd.f32 %v921_v11, %v913_v17 }
 0x14c   : >> { %v932_v2 = vmul.f32 %v929_v18, %v3943_v45  ;;  %v933_v0 = vmul.f32 %v929_v18, %v3950_v50  ;;  %v934_v4 = vmul.f32 %v929_v18, %v3953_v51  ;;  %v935_v1 = vmul.f32 %v929_v18, %v3956_v61 }
 0x14d   : >> { %v936_v3 = vadd.f32 %v930_v40, %v922_v9  ;;  %v937_v44 = vadd.f32 %v931_v12, %v923_v10  ;;  %v4047_v43 = vmul.f32 %v3968_v48, %v863_v31  ;;  %v957_v16 = vstv %s4010_s23  ;;  %s4218_s23 = sld [smem:[#allocation12 + $0x182]] }
 0x14e   : >> { %v938_v25 = vadd.f32 %v932_v2, %v924_v7  ;;  %v939_v26 = vadd.f32 %v933_v0, %v925_v8  ;;  %v940_v11 = vadd.f32 %v934_v4, %v926_v5  ;;  %v941_v17 = vadd.f32 %v935_v1, %v927_v6 }
 0x14f   : >> { %v944_v53 = vadd.f32 %v943_v13, %v936_v3  ;;  %v945_v36 = vadd.f32 %v943_v13, %v937_v44  ;;  %v971_v28 = vstv %s4026_s4  ;;  %v985_v29 = vstv %s4028_s25  ;;  %s4224_s4 = sld [smem:[#allocation8 + $0x200]]  ;;  %s4226_s25 = sld [smem:[#allocation8 + $0x201]] }
 0x150   : >> { %v946_v47 = vadd.f32 %v943_v13, %v938_v25  ;;  %v947_v27 = vadd.f32 %v943_v13, %v939_v26  ;;  %v948_v30 = vadd.f32 %v943_v13, %v940_v11  ;;  %v949_v18 = vadd.f32 %v943_v13, %v941_v17 }
 0x151   : >> { %v950_v9 = vmax.f32 %v944_v53, 0.0  ;;  %v951_v10 = vmax.f32 %v945_v36, 0.0  ;;  %v999_v31 = vstv %s4038_s30  ;;  %v1007_v2 = vstv %s4040_s6  ;;  %s4252_s30 = sld [smem:[#allocation8 + $0x202]]  ;;  %s4254_s6 = sld [smem:[#allocation11 + $0x4]] }
 0x152   : >> { %v952_v12 = vmax.f32 %v946_v47, 0.0  ;;  %v953_v48 = vmax.f32 %v947_v27, 0.0  ;;  %v954_v7 = vmax.f32 %v948_v30, 0.0  ;;  %v955_v8 = vmax.f32 %v949_v18, 0.0 }
 0x153   : >> { %v958_v40 = vmul.f32 %v957_v16, %v950_v9  ;;  %v959_v0 = vmul.f32 %v957_v16, %v951_v10  ;;  %v972_v3 = vmul.f32 %v971_v28, %v950_v9  ;;  %v973_v5 = vmul.f32 %v971_v28, %v951_v10 }
 0x154   : >> { %v960_v4 = vmul.f32 %v957_v16, %v952_v12  ;;  %v961_v1 = vmul.f32 %v957_v16, %v953_v48  ;;  %v962_v6 = vmul.f32 %v957_v16, %v954_v7  ;;  %v963_v44 = vmul.f32 %v957_v16, %v955_v8 }
 0x155   : >> { %v1000_v25 = vmul.f32 %v999_v31, %v3908_v14  ;;  %v1001_v13 = vmul.f32 %v999_v31, %v3911_v15  ;;  %v4057_v26 = vadd.f32 %v958_v40, %v3978_v32  ;;  %v4060_v11 = vadd.f32 %v959_v0, %v3980_v33 }
 0x156   : >> { %v974_v17 = vmul.f32 %v971_v28, %v952_v12  ;;  %v975_v53 = vmul.f32 %v971_v28, %v953_v48  ;;  %v4063_v36 = vadd.f32 %v960_v4, %v3984_v49  ;;  %v4066_v47 = vadd.f32 %v961_v1, %v3986_v56 }
 0x157   : >> { %v976_v27 = vmul.f32 %v971_v28, %v954_v7  ;;  %v977_v16 = vmul.f32 %v971_v28, %v955_v8  ;;  %v4071_v30 = vadd.f32 %v962_v6, %v3992_v19  ;;  %v4074_v32 = vadd.f32 %v963_v44, %v3994_v20 }
 0x158   : >> { %v4077_v33 = vadd.f32 %v972_v3, %v3988_v60  ;;  %v4080_v18 = vadd.f32 %v973_v5, %v3990_v62  ;;  %v4083_v49 = vadd.f32 %v974_v17, %v3996_v21  ;;  %v4086_v56 = vadd.f32 %v975_v53, %v3998_v22  ;;  %v6328_v53 = vld [vmem:[#allocation47_spill] sm:$0xff] }
 0x159   : >> { %v986_v28 = vmul.f32 %v985_v29, %v950_v9  ;;  %v987_v40 = vmul.f32 %v985_v29, %v951_v10  ;;  %v4089_v19 = vadd.f32 %v976_v27, %v4000_v41  ;;  %v4092_v20 = vadd.f32 %v977_v16, %v4002_v24 }
 0x15a   : >> { %v988_v0 = vmul.f32 %v985_v29, %v952_v12  ;;  %v989_v60 = vmul.f32 %v985_v29, %v953_v48  ;;  %v990_v62 = vmul.f32 %v985_v29, %v954_v7  ;;  %v991_v4 = vmul.f32 %v985_v29, %v955_v8 }
 0x15b   : >> { %v4097_v21 = vadd.f32 %v986_v28, %v4005_v34  ;;  %v4100_v22 = vadd.f32 %v987_v40, %v4008_v35  ;;  %v1002_v24 = vmul.f32 %v999_v31, %v3914_v23  ;;  %v1003_v10 = vmul.f32 %v999_v31, %v3922_v37 }
 0x15c   : >> { %v4103_v9 = vadd.f32 %v988_v0, %v4013_v42  ;;  %v4106_v41 = vadd.f32 %v989_v60, %v4016_v63  ;;  %v1004_v34 = vmul.f32 %v999_v31, %v3925_v38  ;;  %v1005_v35 = vmul.f32 %v999_v31, %v3928_v39 }
 0x15d   : >> { %v1008_v29 = vmul.f32 %v1007_v2, %v3880_v52  ;;  %v1009_v42 = vmul.f32 %v1007_v2, %v3883_v54  ;;  %v1010_v63 = vmul.f32 %v1007_v2, %v3886_v55  ;;  %v1011_v12 = vmul.f32 %v1007_v2, %v3891_v57 }
 0x15e   : >> { %v1012_v48 = vmul.f32 %v1007_v2, %v3894_v58  ;;  %v1013_v7 = vmul.f32 %v1007_v2, %v3897_v59  ;;  %v4127_v8 = vadd.f32 %v990_v62, %v4019_v46  ;;  %v1021_v3 = vstv %s4068_s7  ;;  %v6329_v2 = vld [vmem:[#allocation48_spill] sm:$0xff]  ;;  %s4298_s7 = sld [smem:[#allocation12 + $0x200]] }
 0x15f   : >> { %v1014_v31 = vadd.f32 %v1008_v29, %v1000_v25  ;;  %v1015_v1 = vadd.f32 %v1009_v42, %v1001_v13  ;;  %v1016_v5 = vadd.f32 %v1010_v63, %v1002_v24  ;;  %v1017_v6 = vadd.f32 %v1011_v12, %v1003_v10 }
 0x160   : >> { %6327 = vst [vmem:[#allocation52_spill] sm:$0xff] %v4127_v8  ;;  %v1018_v44 = vadd.f32 %v1012_v48, %v1004_v34  ;;  %v1019_v17 = vadd.f32 %v1013_v7, %v1005_v35  ;;  %v1022_v27 = vmul.f32 %v1021_v3, %v6328_v53  ;;  %v1023_v16 = vmul.f32 %v1021_v3, %v6329_v2 }
 0x161   : >> { %v1024_v28 = vmul.f32 %v1021_v3, %v3943_v45  ;;  %v1025_v40 = vmul.f32 %v1021_v3, %v3950_v50  ;;  %v4135_v46 = vadd.f32 %v991_v4, %v4047_v43  ;;  %v1026_v25 = vmul.f32 %v1021_v3, %v3953_v51 }
 0x162   : >> { %v1027_v13 = vmul.f32 %v1021_v3, %v3956_v61  ;;  %v1035_v0 = vstv %s4094_s8  ;;  %v1028_v60 = vadd.f32 %v1022_v27, %v1014_v31  ;;  %v1029_v62 = vadd.f32 %v1023_v16, %v1015_v1  ;;  %s4300_s8 = sld [smem:[#allocation12 + $0x201]] }
 0x163   : >> { %6330 = vst [vmem:[#allocation47_spill] sm:$0xff] %v4135_v46  ;;  %v1030_v24 = vadd.f32 %v1024_v28, %v1016_v5  ;;  %v1031_v10 = vadd.f32 %v1025_v40, %v1017_v6  ;;  %v1032_v34 = vadd.f32 %v1026_v25, %v1018_v44  ;;  %v1049_v29 = vstv %s4110_s9  ;;  %s4310_s9 = sld [smem:[#allocation12 + $0x202]] }
 0x164   : >> { %v1033_v35 = vadd.f32 %v1027_v13, %v1019_v17  ;;  %v1091_v42 = vstv %s4112_s10  ;;  %v1036_v63 = vadd.f32 %v1035_v0, %v1028_v60  ;;  %v1037_v12 = vadd.f32 %v1035_v0, %v1029_v62  ;;  %s4312_s10 = sld [smem:[#allocation8 + $0x280]] }
 0x165   : >> { %v1038_v48 = vadd.f32 %v1035_v0, %v1030_v24  ;;  %v1039_v43 = vadd.f32 %v1035_v0, %v1031_v10  ;;  %v1040_v4 = vadd.f32 %v1035_v0, %v1032_v34  ;;  %v1063_v46 = vstv %s4122_s12  ;;  %s4330_s12 = sld [smem:[#allocation8 + $0x281]] }
 0x166   : >> { %v1041_v7 = vadd.f32 %v1035_v0, %v1033_v35  ;;  %v1077_v8 = vstv %s4124_s14  ;;  %v1042_v3 = vmax.f32 %v1036_v63, 0.0  ;;  %v1043_v61 = vmax.f32 %v1037_v12, 0.0  ;;  %s4334_s14 = sld [smem:[#allocation8 + $0x282]] }
 0x167   : >> { %v1044_v51 = vmax.f32 %v1038_v48, 0.0  ;;  %v1045_v50 = vmax.f32 %v1039_v43, 0.0  ;;  %v1046_v31 = vmax.f32 %v1040_v4, 0.0  ;;  %v1092_v5 = vmul.f32 %v1091_v42, %v3908_v14 }
 0x168   : >> { %v1047_v1 = vmax.f32 %v1041_v7, 0.0  ;;  %v1093_v6 = vmul.f32 %v1091_v42, %v3911_v15  ;;  %v1050_v44 = vmul.f32 %v1049_v29, %v1042_v3  ;;  %v1051_v17 = vmul.f32 %v1049_v29, %v1043_v61 }
 0x169   : >> { %v1052_v27 = vmul.f32 %v1049_v29, %v1044_v51  ;;  %v1053_v16 = vmul.f32 %v1049_v29, %v1045_v50  ;;  %v1054_v28 = vmul.f32 %v1049_v29, %v1046_v31  ;;  %v1064_v25 = vmul.f32 %v1063_v46, %v1042_v3 }
 0x16a   : >> { %v1055_v40 = vmul.f32 %v1049_v29, %v1047_v1  ;;  %v1065_v13 = vmul.f32 %v1063_v46, %v1043_v61  ;;  %v4151_v0 = vadd.f32 %v1050_v44, %v4057_v26  ;;  %v4154_v60 = vadd.f32 %v1051_v17, %v4060_v11 }
 0x16b   : >> { %v1094_v62 = vmul.f32 %v1091_v42, %v3914_v23  ;;  %v1095_v24 = vmul.f32 %v1091_v42, %v3922_v37  ;;  %v4159_v10 = vadd.f32 %v1052_v27, %v4063_v36  ;;  %v4162_v34 = vadd.f32 %v1053_v16, %v4066_v47 }
 0x16c   : >> { %v1066_v35 = vmul.f32 %v1063_v46, %v1044_v51  ;;  %v1067_v29 = vmul.f32 %v1063_v46, %v1045_v50  ;;  %v4165_v63 = vadd.f32 %v1054_v28, %v4071_v30  ;;  %v4168_v26 = vadd.f32 %v1055_v40, %v4074_v32 }
 0x16d   : >> { %v1068_v11 = vmul.f32 %v1063_v46, %v1046_v31  ;;  %v1069_v12 = vmul.f32 %v1063_v46, %v1047_v1  ;;  %v4171_v48 = vadd.f32 %v1064_v25, %v4077_v33  ;;  %v4174_v43 = vadd.f32 %v1065_v13, %v4080_v18 }
 0x16e   : >> { %v1078_v36 = vmul.f32 %v1077_v8, %v1042_v3  ;;  %v1079_v4 = vmul.f32 %v1077_v8, %v1043_v61  ;;  %v4177_v47 = vadd.f32 %v1066_v35, %v4083_v49  ;;  %v4180_v30 = vadd.f32 %v1067_v29, %v4086_v56  ;;  %v6331_v35 = vld [vmem:[#allocation49_spill] sm:$0xff] }
 0x16f   : >> { %v1080_v32 = vmul.f32 %v1077_v8, %v1044_v51  ;;  %v1081_v7 = vmul.f32 %v1077_v8, %v1045_v50  ;;  %v4183_v46 = vadd.f32 %v1068_v11, %v4089_v19  ;;  %v4186_v33 = vadd.f32 %v1069_v12, %v4092_v20  ;;  %v6332_v11 = vld [vmem:[#allocation50_spill] sm:$0xff] }
 0x170   : >> { %v1082_v18 = vmul.f32 %v1077_v8, %v1046_v31  ;;  %v1083_v44 = vmul.f32 %v1077_v8, %v1047_v1  ;;  %v4191_v61 = vadd.f32 %v1078_v36, %v4097_v21  ;;  %v4194_v49 = vadd.f32 %v1079_v4, %v4100_v22  ;;  %v6333_v36 = vld [vmem:[#allocation51_spill] sm:$0xff] }
 0x171   : >> { %v4197_v56 = vadd.f32 %v1080_v32, %v4103_v9  ;;  %v4200_v50 = vadd.f32 %v1081_v7, %v4106_v41  ;;  %v1096_v51 = vmul.f32 %v1091_v42, %v3925_v38  ;;  %v1097_v19 = vmul.f32 %v1091_v42, %v3928_v39 }
 0x172   : >> { %v1099_v20 = vstv %s4146_s15  ;;  %v1113_v8 = vstv %s4148_s17  ;;  %s4336_s15 = sld [smem:[#allocation11 + $0x5]]  ;;  %s4386_s17 = sld [smem:[#allocation12 + $0x280]] }
 0x173   : >> { %v1100_v21 = vmul.f32 %v1099_v20, %v3880_v52  ;;  %v1101_v22 = vmul.f32 %v1099_v20, %v3883_v54  ;;  %v1102_v9 = vmul.f32 %v1099_v20, %v3886_v55  ;;  %v1103_v3 = vmul.f32 %v1099_v20, %v3891_v57 }
 0x174   : >> { %v1104_v41 = vmul.f32 %v1099_v20, %v3894_v58  ;;  %v1105_v31 = vmul.f32 %v1099_v20, %v3897_v59  ;;  %v1114_v42 = vmul.f32 %v1113_v8, %v6328_v53  ;;  %v1115_v1 = vmul.f32 %v1113_v8, %v6329_v2 }
 0x175   : >> { %v1106_v17 = vadd.f32 %v1100_v21, %v1092_v5  ;;  %v1107_v27 = vadd.f32 %v1101_v22, %v1093_v6  ;;  %v1108_v16 = vadd.f32 %v1102_v9, %v1094_v62  ;;  %v1109_v28 = vadd.f32 %v1103_v3, %v1095_v24  ;;  %v6334_v5 = vld [vmem:[#allocation52_spill] sm:$0xff] }
 0x176   : >> { %v1110_v40 = vadd.f32 %v1104_v41, %v1096_v51  ;;  %v1111_v25 = vadd.f32 %v1105_v31, %v1097_v19  ;;  %v1116_v13 = vmul.f32 %v1113_v8, %v3943_v45  ;;  %v1117_v29 = vmul.f32 %v1113_v8, %v6331_v35 }
 0x177   : >> { %v1118_v12 = vmul.f32 %v1113_v8, %v6332_v11  ;;  %v1119_v4 = vmul.f32 %v1113_v8, %v6333_v36  ;;  %v1120_v32 = vadd.f32 %v1114_v42, %v1106_v17  ;;  %v1121_v7 = vadd.f32 %v1115_v1, %v1107_v27  ;;  %v6335_v27 = vld [vmem:[#allocation47_spill] sm:$0xff] }
 0x178   : >> { %v4229_v6 = vadd.f32 %v1082_v18, %v6334_v5  ;;  %v1122_v62 = vadd.f32 %v1116_v13, %v1108_v16  ;;  %v1123_v24 = vadd.f32 %v1117_v29, %v1109_v28  ;;  %v1127_v51 = vstv %s4188_s19  ;;  %s4398_s19 = sld [smem:[#allocation12 + $0x281]] }
 0x179   : >> { %v1124_v19 = vadd.f32 %v1118_v12, %v1110_v40  ;;  %v1125_v20 = vadd.f32 %v1119_v4, %v1111_v25  ;;  %v1128_v21 = vadd.f32 %v1127_v51, %v1120_v32  ;;  %v1129_v22 = vadd.f32 %v1127_v51, %v1121_v7 }
 0x17a   : >> { %v1130_v9 = vadd.f32 %v1127_v51, %v1122_v62  ;;  %v1131_v8 = vadd.f32 %v1127_v51, %v1123_v24  ;;  %v1141_v3 = vstv %s4206_s21  ;;  %v1155_v41 = vstv %s4208_s22  ;;  %s4400_s21 = sld [smem:[#allocation12 + $0x282]]  ;;  %s4410_s22 = sld [smem:[#allocation8 + $0x300]] }
 0x17b   : >> { %v1132_v31 = vadd.f32 %v1127_v51, %v1124_v19  ;;  %v1133_v42 = vadd.f32 %v1127_v51, %v1125_v20  ;;  %v1134_v1 = vmax.f32 %v1128_v21, 0.0  ;;  %v1135_v17 = vmax.f32 %v1129_v22, 0.0 }
 0x17c   : >> { %v4235_v18 = vadd.f32 %v1083_v44, %v6335_v27  ;;  %v1136_v16 = vmax.f32 %v1130_v9, 0.0  ;;  %v1137_v28 = vmax.f32 %v1131_v8, 0.0  ;;  %v1169_v13 = vstv %s4218_s23  ;;  %s4412_s23 = sld [smem:[#allocation8 + $0x301]] }
 0x17d   : >> { %v1138_v40 = vmax.f32 %v1132_v31, 0.0  ;;  %v1139_v25 = vmax.f32 %v1133_v42, 0.0  ;;  %v1142_v29 = vmul.f32 %v1141_v3, %v1134_v1  ;;  %v1143_v12 = vmul.f32 %v1141_v3, %v1135_v17 }
 0x17e   : >> { %v1144_v4 = vmul.f32 %v1141_v3, %v1136_v16  ;;  %v1145_v32 = vmul.f32 %v1141_v3, %v1137_v28  ;;  %v1156_v7 = vmul.f32 %v1155_v41, %v1134_v1  ;;  %v1157_v5 = vmul.f32 %v1155_v41, %v1135_v17 }
 0x17f   : >> { %v1146_v62 = vmul.f32 %v1141_v3, %v1138_v40  ;;  %v1147_v24 = vmul.f32 %v1141_v3, %v1139_v25  ;;  %v1183_v51 = vstv %s4224_s4  ;;  %v1191_v19 = vstv %s4226_s25  ;;  %s4440_s4 = sld [smem:[#allocation8 + $0x302]]  ;;  %s4466_s25 = sld [smem:[#allocation11 + $0x6]] }
 0x180   : >> { %v4241_v20 = vadd.f32 %v1142_v29, %v4151_v0  ;;  %v4244_v44 = vadd.f32 %v1143_v12, %v4154_v60  ;;  %v1158_v21 = vmul.f32 %v1155_v41, %v1136_v16  ;;  %v1159_v22 = vmul.f32 %v1155_v41, %v1137_v28 }
 0x181   : >> { %v4247_v9 = vadd.f32 %v1144_v4, %v4159_v10  ;;  %v4250_v8 = vadd.f32 %v1145_v32, %v4162_v34  ;;  %v1160_v31 = vmul.f32 %v1155_v41, %v1138_v40  ;;  %v1161_v42 = vmul.f32 %v1155_v41, %v1139_v25 }
 0x182   : >> { %v4257_v0 = vadd.f32 %v1146_v62, %v4165_v63  ;;  %v4260_v60 = vadd.f32 %v1147_v24, %v4168_v26  ;;  %v4263_v3 = vadd.f32 %v1156_v7, %v4171_v48  ;;  %v4266_v10 = vadd.f32 %v1157_v5, %v4174_v43 }
 0x183   : >> { %v4269_v34 = vadd.f32 %v1158_v21, %v4177_v47  ;;  %v4272_v41 = vadd.f32 %v1159_v22, %v4180_v30  ;;  %v1170_v27 = vmul.f32 %v1169_v13, %v1134_v1  ;;  %v1171_v29 = vmul.f32 %v1169_v13, %v1135_v17 }
 0x184   : >> { %v4275_v63 = vadd.f32 %v1160_v31, %v4183_v46  ;;  %v4278_v26 = vadd.f32 %v1161_v42, %v4186_v33  ;;  %v1172_v12 = vmul.f32 %v1169_v13, %v1136_v16  ;;  %v1173_v48 = vmul.f32 %v1169_v13, %v1137_v28 }
 0x185   : >> { %v1174_v4 = vmul.f32 %v1169_v13, %v1138_v40  ;;  %v1175_v32 = vmul.f32 %v1169_v13, %v1139_v25  ;;  %v4281_v43 = vadd.f32 %v1170_v27, %v4191_v61  ;;  %v4284_v47 = vadd.f32 %v1171_v29, %v4194_v49 }
 0x186   : >> { %v4287_v30 = vadd.f32 %v1172_v12, %v4197_v56  ;;  %v4290_v46 = vadd.f32 %v1173_v48, %v4200_v50  ;;  %v1184_v33 = vmul.f32 %v1183_v51, %v3908_v14  ;;  %v1185_v1 = vmul.f32 %v1183_v51, %v3911_v15 }
 0x187   : >> { %v1186_v17 = vmul.f32 %v1183_v51, %v3914_v23  ;;  %v1187_v61 = vmul.f32 %v1183_v51, %v3922_v37  ;;  %v1188_v16 = vmul.f32 %v1183_v51, %v3925_v38  ;;  %v1189_v49 = vmul.f32 %v1183_v51, %v3928_v39 }
 0x188   : >> { %v1192_v56 = vmul.f32 %v1191_v19, %v3880_v52  ;;  %v1193_v50 = vmul.f32 %v1191_v19, %v3883_v54  ;;  %v1194_v28 = vmul.f32 %v1191_v19, %v3886_v55  ;;  %v1195_v13 = vmul.f32 %v1191_v19, %v3891_v57 }
 0x189   : >> { %v1196_v40 = vmul.f32 %v1191_v19, %v3894_v58  ;;  %v1197_v25 = vmul.f32 %v1191_v19, %v3897_v59  ;;  %v1205_v7 = vstv %s4252_s30  ;;  %v1219_v5 = vstv %s4254_s6  ;;  %s4488_s30 = sld [smem:[#allocation12 + $0x300]] }
 0x18a   : >> { %v1198_v62 = vadd.f32 %v1192_v56, %v1184_v33  ;;  %v1199_v24 = vadd.f32 %v1193_v50, %v1185_v1  ;;  %v1200_v51 = vadd.f32 %v1194_v28, %v1186_v17  ;;  %v1201_v21 = vadd.f32 %v1195_v13, %v1187_v61  ;;  %s4490_s6 = sld [smem:[#allocation8 + $0x380]] }
 0x18b   : >> { %v1202_v22 = vadd.f32 %v1196_v40, %v1188_v16  ;;  %v1203_v31 = vadd.f32 %v1197_v25, %v1189_v49  ;;  %v1206_v42 = vmul.f32 %v1205_v7, %v6328_v53  ;;  %v1207_v27 = vmul.f32 %v1205_v7, %v6329_v2 }
 0x18c   : >> { %v1208_v19 = vmul.f32 %v1205_v7, %v3943_v45  ;;  %v1209_v29 = vmul.f32 %v1205_v7, %v6331_v35  ;;  %v1210_v12 = vmul.f32 %v1205_v7, %v6332_v11  ;;  %v1211_v48 = vmul.f32 %v1205_v7, %v6333_v36 }
 0x18d   : >> { %v4321_v33 = vadd.f32 %v1174_v4, %v4229_v6  ;;  %v4324_v1 = vadd.f32 %v1175_v32, %v4235_v18  ;;  %v1212_v17 = vadd.f32 %v1206_v42, %v1198_v62  ;;  %v1213_v61 = vadd.f32 %v1207_v27, %v1199_v24 }
 0x18e   : >> { %v1214_v16 = vadd.f32 %v1208_v19, %v1200_v51  ;;  %v1215_v49 = vadd.f32 %v1209_v29, %v1201_v21  ;;  %v1216_v56 = vadd.f32 %v1210_v12, %v1202_v22  ;;  %v1217_v50 = vadd.f32 %v1211_v48, %v1203_v31 }
 0x18f   : >> { %v1220_v28 = vadd.f32 %v1219_v5, %v1212_v17  ;;  %v1221_v13 = vadd.f32 %v1219_v5, %v1213_v61  ;;  %v1233_v40 = vstv %s4298_s7  ;;  %v1247_v25 = vstv %s4300_s8  ;;  %s4524_s7 = sld [smem:[#allocation12 + $0x301]]  ;;  %s4526_s8 = sld [smem:[#allocation12 + $0x302]] }
 0x190   : >> { %v1222_v11 = vadd.f32 %v1219_v5, %v1214_v16  ;;  %v1223_v7 = vadd.f32 %v1219_v5, %v1215_v49  ;;  %v1224_v36 = vadd.f32 %v1219_v5, %v1216_v56  ;;  %v1225_v6 = vadd.f32 %v1219_v5, %v1217_v50 }
 0x191   : >> { %v1226_v4 = vmax.f32 %v1220_v28, 0.0  ;;  %v1227_v35 = vmax.f32 %v1221_v13, 0.0  ;;  %v1261_v18 = vstv %s4310_s9  ;;  %v1275_v32 = vstv %s4312_s10  ;;  %s4572_s9 = sld [smem:[#allocation8 + $0x381]]  ;;  %s4574_s10 = sld [smem:[#allocation8 + $0x382]] }
 0x192   : >> { %v1228_v62 = vmax.f32 %v1222_v11, 0.0  ;;  %v1229_v42 = vmax.f32 %v1223_v7, 0.0  ;;  %v1230_v24 = vmax.f32 %v1224_v36, 0.0  ;;  %v1231_v27 = vmax.f32 %v1225_v6, 0.0 }
 0x193   : >> { %v1234_v51 = vmul.f32 %v1233_v40, %v1226_v4  ;;  %v1235_v21 = vmul.f32 %v1233_v40, %v1227_v35  ;;  %v1248_v22 = vmul.f32 %v1247_v25, %v1226_v4  ;;  %v1249_v31 = vmul.f32 %v1247_v25, %v1227_v35 }
 0x194   : >> { %v1236_v19 = vmul.f32 %v1233_v40, %v1228_v62  ;;  %v1237_v29 = vmul.f32 %v1233_v40, %v1229_v42  ;;  %v1238_v12 = vmul.f32 %v1233_v40, %v1230_v24  ;;  %v1239_v48 = vmul.f32 %v1233_v40, %v1231_v27 }
 0x195   : >> { %v1250_v17 = vmul.f32 %v1247_v25, %v1228_v62  ;;  %v1251_v5 = vmul.f32 %v1247_v25, %v1229_v42  ;;  %v1276_v61 = vmul.f32 %v1275_v32, %v3908_v14  ;;  %v1277_v16 = vmul.f32 %v1275_v32, %v3911_v15 }
 0x196   : >> { %v4339_v11 = vadd.f32 %v1234_v51, %v4241_v20  ;;  %v4342_v36 = vadd.f32 %v1235_v21, %v4244_v44  ;;  %v4345_v49 = vadd.f32 %v1236_v19, %v4247_v9  ;;  %v4348_v56 = vadd.f32 %v1237_v29, %v4250_v8 }
 0x197   : >> { %v4351_v50 = vadd.f32 %v1238_v12, %v4257_v0  ;;  %v4354_v28 = vadd.f32 %v1239_v48, %v4260_v60  ;;  %v1252_v13 = vmul.f32 %v1247_v25, %v1230_v24  ;;  %v1253_v40 = vmul.f32 %v1247_v25, %v1231_v27 }
 0x198   : >> { %v4357_v20 = vadd.f32 %v1248_v22, %v4263_v3  ;;  %v4360_v44 = vadd.f32 %v1249_v31, %v4266_v10  ;;  %v1262_v7 = vmul.f32 %v1261_v18, %v1226_v4  ;;  %v1263_v9 = vmul.f32 %v1261_v18, %v1227_v35  ;;  %v6337_v31 = vld [vmem:[#allocation50_spill] sm:$0xff] }
 0x199   : >> { %v4363_v6 = vadd.f32 %v1250_v17, %v4269_v34  ;;  %v4366_v8 = vadd.f32 %v1251_v5, %v4272_v41  ;;  %v1264_v0 = vmul.f32 %v1261_v18, %v1228_v62  ;;  %v1265_v60 = vmul.f32 %v1261_v18, %v1229_v42 }
 0x19a   : >> { %v4369_v25 = vadd.f32 %v1252_v13, %v4275_v63  ;;  %v4372_v3 = vadd.f32 %v1253_v40, %v4278_v26  ;;  %v1266_v10 = vmul.f32 %v1261_v18, %v1230_v24  ;;  %v1267_v4 = vmul.f32 %v1261_v18, %v1231_v27 }
 0x19b   : >> { %v4375_v35 = vadd.f32 %v1262_v7, %v4281_v43  ;;  %v4378_v34 = vadd.f32 %v1263_v9, %v4284_v47  ;;  %v4381_v41 = vadd.f32 %v1264_v0, %v4287_v30  ;;  %v4384_v62 = vadd.f32 %v1265_v60, %v4290_v46 }
 0x19c   : >> { %v4389_v63 = vadd.f32 %v1266_v10, %v4321_v33  ;;  %v1278_v26 = vmul.f32 %v1275_v32, %v3914_v23  ;;  %v1279_v18 = vmul.f32 %v1275_v32, %v3922_v37  ;;  %v1280_v43 = vmul.f32 %v1275_v32, %v3925_v38 }
 0x19d   : >> { %v1281_v47 = vmul.f32 %v1275_v32, %v3928_v39  ;;  %v1283_v42 = vstv %s4330_s12  ;;  %v1297_v24 = vstv %s4334_s14  ;;  %v1311_v30 = vstv %s4336_s15  ;;  %s4614_s12 = sld [smem:[#allocation11 + $0x7]]  ;;  %s4632_s14 = sld [smem:[#allocation12 + $0x380]] }
 0x19e   : >> { %v1284_v46 = vmul.f32 %v1283_v42, %v3880_v52  ;;  %v1285_v33 = vmul.f32 %v1283_v42, %v3883_v54  ;;  %v1286_v27 = vmul.f32 %v1283_v42, %v3886_v55  ;;  %v1287_v23 = vmul.f32 %v1283_v42, %v3891_v57  ;;  %s4634_s15 = sld [smem:[#allocation12 + $0x381]] }
 0x19f   : >> { %v1288_v37 = vmul.f32 %v1283_v42, %v3894_v58  ;;  %v1289_v38 = vmul.f32 %v1283_v42, %v3897_v59  ;;  %v1298_v39 = vmul.f32 %v1297_v24, %v6328_v53  ;;  %v1299_v32 = vmul.f32 %v1297_v24, %v6329_v2  ;;  %v6336_v58 = vld [vmem:[#allocation49_spill] sm:$0xff]  ;;  %v6338_v2 = vld [vmem:[#allocation51_spill] sm:$0xff] }
 0x1a0   : >> { %v1290_v52 = vadd.f32 %v1284_v46, %v1276_v61  ;;  %v1291_v51 = vadd.f32 %v1285_v33, %v1277_v16  ;;  %v1292_v54 = vadd.f32 %v1286_v27, %v1278_v26  ;;  %v1293_v21 = vadd.f32 %v1287_v23, %v1279_v18 }
 0x1a1   : >> { %v1294_v55 = vadd.f32 %v1288_v37, %v1280_v43  ;;  %v1295_v22 = vadd.f32 %v1289_v38, %v1281_v47  ;;  %v1300_v57 = vmul.f32 %v1297_v24, %v3943_v45  ;;  %v1301_v59 = vmul.f32 %v1297_v24, %v6336_v58 }
 0x1a2   : >> { %v1302_v53 = vmul.f32 %v1297_v24, %v6337_v31  ;;  %v1303_v19 = vmul.f32 %v1297_v24, %v6338_v2  ;;  %v1304_v29 = vadd.f32 %v1298_v39, %v1290_v52  ;;  %v1305_v12 = vadd.f32 %v1299_v32, %v1291_v51 }
 0x1a3   : >> { %v4419_v48 = vadd.f32 %v1267_v4, %v4324_v1  ;;  %v1306_v17 = vadd.f32 %v1300_v57, %v1292_v54  ;;  %v1307_v5 = vadd.f32 %v1301_v59, %v1293_v21  ;;  %v1325_v61 = vstv %s4386_s17  ;;  %s4644_s17 = sld [smem:[#allocation12 + $0x382]] }
 0x1a4   : >> { %v1308_v16 = vadd.f32 %v1302_v53, %v1294_v55  ;;  %v1309_v45 = vadd.f32 %v1303_v19, %v1295_v22  ;;  %v1312_v13 = vadd.f32 %v1311_v30, %v1304_v29  ;;  %v1313_v40 = vadd.f32 %v1311_v30, %v1305_v12  ;;  %v4481_v12 = vld [vmem:[%s3905_s16 + $0x10] sm:$0xff] }
 0x1a5   : >> { %v1314_v7 = vadd.f32 %v1311_v30, %v1306_v17  ;;  %v1315_v9 = vadd.f32 %v1311_v30, %v1307_v5  ;;  %v1339_v0 = vstv %s4398_s19  ;;  %v1353_v60 = vstv %s4400_s21  ;;  %v4485_v5 = vld [vmem:[%s3905_s16 + $0x18] sm:$0xff]  ;;  %s4650_s19 = sld [smem:[#allocation8 + $0x400]]  ;;  %s4652_s21 = sld [smem:[#allocation8 + $0x401]] }
 0x1a6   : >> { %v1316_v10 = vadd.f32 %v1311_v30, %v1308_v16  ;;  %v1317_v26 = vadd.f32 %v1311_v30, %v1309_v45  ;;  %v1318_v18 = vmax.f32 %v1312_v13, 0.0  ;;  %v1319_v43 = vmax.f32 %v1313_v40, 0.0  ;;  %v4501_v16 = vld [vmem:[%s3877_s13] sm:$0xff]  ;;  %v4505_v13 = vld [vmem:[%s3877_s13 + $0x8] sm:$0xff] }
 0x1a7   : >> { %v1320_v47 = vmax.f32 %v1314_v7, 0.0  ;;  %v1321_v1 = vmax.f32 %v1315_v9, 0.0  ;;  %v1367_v4 = vstv %s4410_s22  ;;  %v1375_v42 = vstv %s4412_s23  ;;  %v4509_v7 = vld [vmem:[%s3877_s13 + $0x10] sm:$0xff]  ;;  %s4678_s22 = sld [smem:[#allocation8 + $0x402]]  ;;  %s4680_s23 = sld [smem:[#allocation11 + $0x8]] }
 0x1a8   : >> { %v1322_v24 = vmax.f32 %v1316_v10, 0.0  ;;  %v1323_v46 = vmax.f32 %v1317_v26, 0.0  ;;  %v1326_v33 = vmul.f32 %v1325_v61, %v1318_v18  ;;  %v1327_v27 = vmul.f32 %v1325_v61, %v1319_v43  ;;  %v4517_v10 = vld [vmem:[%s3877_s13 + $0x20] sm:$0xff] }
 0x1a9   : >> { %v1328_v23 = vmul.f32 %v1325_v61, %v1320_v47  ;;  %v1329_v37 = vmul.f32 %v1325_v61, %v1321_v1  ;;  %v1340_v38 = vmul.f32 %v1339_v0, %v1318_v18  ;;  %v1341_v39 = vmul.f32 %v1339_v0, %v1319_v43 }
 0x1aa   : >> { %v1330_v32 = vmul.f32 %v1325_v61, %v1322_v24  ;;  %v1331_v52 = vmul.f32 %v1325_v61, %v1323_v46  ;;  %v1368_v51 = vmul.f32 %v1367_v4, %v3908_v14  ;;  %v1369_v30 = vmul.f32 %v1367_v4, %v3911_v15 }
 0x1ab   : >> { %v4429_v54 = vadd.f32 %v1326_v33, %v4339_v11  ;;  %v4432_v21 = vadd.f32 %v1327_v27, %v4342_v36  ;;  %v1342_v55 = vmul.f32 %v1339_v0, %v1320_v47  ;;  %v1343_v22 = vmul.f32 %v1339_v0, %v1321_v1 }
 0x1ac   : >> { %v4435_v57 = vadd.f32 %v1328_v23, %v4345_v49  ;;  %v4438_v58 = vadd.f32 %v1329_v37, %v4348_v56  ;;  %v1344_v59 = vmul.f32 %v1339_v0, %v1322_v24  ;;  %v1345_v31 = vmul.f32 %v1339_v0, %v1323_v46  ;;  %v4513_v0 = vld [vmem:[%s3877_s13 + $0x18] sm:$0xff]  ;;  %v4533_v37 = vld [vmem:[%s3934_s18] sm:$0xff] }
 0x1ad   : >> { %v4443_v14 = vadd.f32 %v1330_v32, %v4351_v50  ;;  %v4446_v15 = vadd.f32 %v1331_v52, %v4354_v28  ;;  %v4449_v11 = vadd.f32 %v1340_v38, %v4357_v20  ;;  %v4452_v36 = vadd.f32 %v1341_v39, %v4360_v44  ;;  %6339 = vst [vmem:[#allocation48_spill] sm:$0xff] %v4533_v37  ;;  %v4537_v38 = vld [vmem:[%s3934_s18 + $0x8] sm:$0xff]  ;;  %v4545_v52 = vld [vmem:[%s3934_s18 + $0x18] sm:$0xff] }
 0x1ae   : >> { %v4455_v49 = vadd.f32 %v1342_v55, %v4363_v6  ;;  %v4458_v56 = vadd.f32 %v1343_v22, %v4366_v8  ;;  %v1354_v53 = vmul.f32 %v1353_v60, %v1318_v18  ;;  %v1355_v50 = vmul.f32 %v1353_v60, %v1319_v43  ;;  %v4521_v18 = vld [vmem:[%s3877_s13 + $0x28] sm:$0xff]  ;;  %6340 = vst [vmem:[#allocation52_spill] sm:$0xff] %v4537_v38  ;;  %v4552_v55 = vld [vmem:[%s3934_s18 + $0x20] sm:$0xff] }
 0x1af   : >> { %v4461_v2 = vadd.f32 %v1344_v59, %v4369_v25  ;;  %v4464_v28 = vadd.f32 %v1345_v31, %v4372_v3  ;;  %v1356_v20 = vmul.f32 %v1353_v60, %v1320_v47  ;;  %v1357_v44 = vmul.f32 %v1353_v60, %v1321_v1  ;;  %6341 = vst [vmem:[#allocation47_spill] sm:$0xff] %v4545_v52  ;;  %v4556_v59 = vld [vmem:[%s3934_s18 + $0x28] sm:$0xff] }
 0x1b0   : >> { %v1358_v6 = vmul.f32 %v1353_v60, %v1322_v24  ;;  %v1359_v19 = vmul.f32 %v1353_v60, %v1323_v46  ;;  %v4469_v8 = vadd.f32 %v1354_v53, %v4375_v35  ;;  %v4472_v29 = vadd.f32 %v1355_v50, %v4378_v34  ;;  %v4493_v34 = vld [vmem:[%s3905_s16 + $0x20] sm:$0xff]  ;;  %6343 = vst [vmem:[#allocation50_spill] sm:$0xff] %v4552_v55 }
 0x1b1   : >> { %v4475_v25 = vadd.f32 %v1356_v20, %v4381_v41  ;;  %v4478_v3 = vadd.f32 %v1357_v44, %v4384_v62  ;;  %v1370_v17 = vmul.f32 %v4481_v12, %v1367_v4  ;;  %v1371_v35 = vmul.f32 %v4485_v5, %v1367_v4  ;;  %v4497_v62 = vld [vmem:[%s3905_s16 + $0x28] sm:$0xff]  ;;  %6344 = vst [vmem:[#allocation51_spill] sm:$0xff] %v4556_v59 }
 0x1b2   : >> { %v1372_v41 = vmul.f32 %v4493_v34, %v1367_v4  ;;  %v1373_v61 = vmul.f32 %v4497_v62, %v1367_v4  ;;  %v1376_v45 = vmul.f32 %v4501_v16, %v1375_v42  ;;  %v1377_v40 = vmul.f32 %v4505_v13, %v1375_v42 }
 0x1b3   : >> { %v1378_v9 = vmul.f32 %v4509_v7, %v1375_v42  ;;  %v1379_v60 = vmul.f32 %v4513_v0, %v1375_v42  ;;  %v1380_v26 = vmul.f32 %v4517_v10, %v1375_v42  ;;  %v1381_v43 = vmul.f32 %v4521_v18, %v1375_v42 }
 0x1b4   : >> { %v4529_v47 = vadd.f32 %v1358_v6, %v4389_v63  ;;  %v1382_v1 = vadd.f32 %v1376_v45, %v1368_v51  ;;  %v1383_v4 = vadd.f32 %v1377_v40, %v1369_v30  ;;  %v1389_v24 = vstv %s4440_s4  ;;  %v4541_v63 = vld [vmem:[%s3934_s18 + $0x10] sm:$0xff]  ;;  %s4724_s4 = sld [smem:[#allocation12 + $0x400]] }
 0x1b5   : >> { %v1384_v46 = vadd.f32 %v1378_v9, %v1370_v17  ;;  %v1385_v33 = vadd.f32 %v1379_v60, %v1371_v35  ;;  %v1386_v27 = vadd.f32 %v1380_v26, %v1372_v41  ;;  %v1387_v23 = vadd.f32 %v1381_v43, %v1373_v61 }
 0x1b6   : >> { %v1390_v42 = vmul.f32 %v4533_v37, %v1389_v24  ;;  %v1391_v39 = vmul.f32 %v4537_v38, %v1389_v24  ;;  %v1392_v32 = vmul.f32 %v4541_v63, %v1389_v24  ;;  %v1393_v51 = vmul.f32 %v4545_v52, %v1389_v24 }
 0x1b7   : >> { %v4549_v30 = vadd.f32 %v1359_v19, %v4419_v48  ;;  %v1394_v22 = vmul.f32 %v4552_v55, %v1389_v24  ;;  %v1395_v31 = vmul.f32 %v4556_v59, %v1389_v24  ;;  %v1403_v53 = vstv %s4466_s25  ;;  %s4726_s25 = sld [smem:[#allocation12 + $0x401]] }
 0x1b8   : >> { %v1396_v50 = vadd.f32 %v1390_v42, %v1382_v1  ;;  %v1397_v20 = vadd.f32 %v1391_v39, %v1383_v4  ;;  %v1398_v44 = vadd.f32 %v1392_v32, %v1384_v46  ;;  %v1399_v6 = vadd.f32 %v1393_v51, %v1385_v33  ;;  %v4569_v42 = vld [vmem:[%s3905_s16 + $0x8] sm:$0xff] }
 0x1b9   : >> { %6342 = vst [vmem:[#allocation49_spill] sm:$0xff] %v4549_v30  ;;  %v1400_v17 = vadd.f32 %v1394_v22, %v1386_v27  ;;  %v1401_v35 = vadd.f32 %v1395_v31, %v1387_v23  ;;  %v1417_v41 = vstv %s4488_s30  ;;  %v1459_v48 = vstv %s4490_s6  ;;  %v4565_v27 = vld [vmem:[%s3905_s16] sm:$0xff]  ;;  %s4736_s30 = sld [smem:[#allocation12 + $0x402]]  ;;  %s4738_s6 = sld [smem:[#allocation8 + $0x480]] }
 0x1ba   : >> { %v1404_v19 = vadd.f32 %v1403_v53, %v1396_v50  ;;  %v1405_v61 = vadd.f32 %v1403_v53, %v1397_v20  ;;  %v1406_v45 = vadd.f32 %v1403_v53, %v1398_v44  ;;  %v1407_v40 = vadd.f32 %v1403_v53, %v1399_v6 }
 0x1bb   : >> { %v1408_v9 = vadd.f32 %v1403_v53, %v1400_v17  ;;  %v1409_v60 = vadd.f32 %v1403_v53, %v1401_v35  ;;  %v1431_v26 = vstv %s4524_s7  ;;  %v1445_v43 = vstv %s4526_s8  ;;  %s4756_s7 = sld [smem:[#allocation8 + $0x481]]  ;;  %s4760_s8 = sld [smem:[#allocation8 + $0x482]] }
 0x1bc   : >> { %v1410_v24 = vmax.f32 %v1404_v19, 0.0  ;;  %v1411_v30 = vmax.f32 %v1405_v61, 0.0  ;;  %v1412_v1 = vmax.f32 %v1406_v45, 0.0  ;;  %v1413_v4 = vmax.f32 %v1407_v40, 0.0 }
 0x1bd   : >> { %v1414_v46 = vmax.f32 %v1408_v9, 0.0  ;;  %v1415_v33 = vmax.f32 %v1409_v60, 0.0  ;;  %v1460_v23 = vmul.f32 %v4565_v27, %v1459_v48  ;;  %v1461_v39 = vmul.f32 %v4569_v42, %v1459_v48 }
 0x1be   : >> { %v1418_v32 = vmul.f32 %v1417_v41, %v1410_v24  ;;  %v1419_v51 = vmul.f32 %v1417_v41, %v1411_v30  ;;  %v1420_v22 = vmul.f32 %v1417_v41, %v1412_v1  ;;  %v1421_v31 = vmul.f32 %v1417_v41, %v1413_v4 }
 0x1bf   : >> { %v1422_v53 = vmul.f32 %v1417_v41, %v1414_v46  ;;  %v1423_v50 = vmul.f32 %v1417_v41, %v1415_v33  ;;  %v1432_v20 = vmul.f32 %v1431_v26, %v1410_v24  ;;  %v1433_v44 = vmul.f32 %v1431_v26, %v1411_v30 }
 0x1c0   : >> { %v4577_v6 = vadd.f32 %v1418_v32, %v4429_v54  ;;  %v4580_v17 = vadd.f32 %v1419_v51, %v4432_v21  ;;  %v1462_v35 = vmul.f32 %v4481_v12, %v1459_v48  ;;  %v1463_v19 = vmul.f32 %v4485_v5, %v1459_v48 }
 0x1c1   : >> { %v4585_v61 = vadd.f32 %v1420_v22, %v4435_v57  ;;  %v4588_v41 = vadd.f32 %v1421_v31, %v4438_v58  ;;  %v1434_v45 = vmul.f32 %v1431_v26, %v1412_v1  ;;  %v1435_v40 = vmul.f32 %v1431_v26, %v1413_v4 }
 0x1c2   : >> { %v4591_v9 = vadd.f32 %v1422_v53, %v4443_v14  ;;  %v4594_v54 = vadd.f32 %v1423_v50, %v4446_v15  ;;  %v1436_v21 = vmul.f32 %v1431_v26, %v1414_v46  ;;  %v1437_v60 = vmul.f32 %v1431_v26, %v1415_v33 }
 0x1c3   : >> { %v4597_v32 = vadd.f32 %v1432_v20, %v4449_v11  ;;  %v4600_v51 = vadd.f32 %v1433_v44, %v4452_v36  ;;  %v1446_v57 = vmul.f32 %v1445_v43, %v1410_v24  ;;  %v1447_v22 = vmul.f32 %v1445_v43, %v1411_v30 }
 0x1c4   : >> { %v4603_v58 = vadd.f32 %v1434_v45, %v4455_v49  ;;  %v4606_v14 = vadd.f32 %v1435_v40, %v4458_v56  ;;  %v1448_v15 = vmul.f32 %v1445_v43, %v1412_v1  ;;  %v1449_v31 = vmul.f32 %v1445_v43, %v1413_v4 }
 0x1c5   : >> { %v4609_v26 = vadd.f32 %v1436_v21, %v4461_v2  ;;  %v4612_v11 = vadd.f32 %v1437_v60, %v4464_v28  ;;  %v1450_v36 = vmul.f32 %v1445_v43, %v1414_v46  ;;  %v1451_v53 = vmul.f32 %v1445_v43, %v1415_v33 }
 0x1c6   : >> { %v4617_v30 = vadd.f32 %v1446_v57, %v4469_v8  ;;  %v4620_v49 = vadd.f32 %v1447_v22, %v4472_v29  ;;  %v4623_v56 = vadd.f32 %v1448_v15, %v4475_v25  ;;  %v4626_v24 = vadd.f32 %v1449_v31, %v4478_v3 }
 0x1c7   : >> { %v1464_v2 = vmul.f32 %v4493_v34, %v1459_v48  ;;  %v1465_v28 = vmul.f32 %v4497_v62, %v1459_v48  ;;  %v1467_v1 = vstv %s4572_s9  ;;  %v1481_v43 = vstv %s4574_s10  ;;  %s4762_s9 = sld [smem:[#allocation11 + $0x9]]  ;;  %s4812_s10 = sld [smem:[#allocation12 + $0x480]] }
 0x1c8   : >> { %v1468_v8 = vmul.f32 %v4501_v16, %v1467_v1  ;;  %v1469_v29 = vmul.f32 %v4505_v13, %v1467_v1  ;;  %v1470_v25 = vmul.f32 %v4509_v7, %v1467_v1  ;;  %v1471_v4 = vmul.f32 %v4513_v0, %v1467_v1 }
 0x1c9   : >> { %v1472_v3 = vmul.f32 %v4517_v10, %v1467_v1  ;;  %v1473_v46 = vmul.f32 %v4521_v18, %v1467_v1  ;;  %v1482_v48 = vmul.f32 %v4533_v37, %v1481_v43  ;;  %v1483_v33 = vmul.f32 %v4537_v38, %v1481_v43 }
 0x1ca   : >> { %v1474_v50 = vadd.f32 %v1468_v8, %v1460_v23  ;;  %v1475_v20 = vadd.f32 %v1469_v29, %v1461_v39  ;;  %v1476_v44 = vadd.f32 %v1470_v25, %v1462_v35  ;;  %v1477_v45 = vadd.f32 %v1471_v4, %v1463_v19 }
 0x1cb   : >> { %v1478_v40 = vadd.f32 %v1472_v3, %v1464_v2  ;;  %v1479_v21 = vadd.f32 %v1473_v46, %v1465_v28  ;;  %v1484_v60 = vmul.f32 %v4541_v63, %v1481_v43  ;;  %v1485_v57 = vmul.f32 %v4545_v52, %v1481_v43 }
 0x1cc   : >> { %v1486_v22 = vmul.f32 %v4552_v55, %v1481_v43  ;;  %v1487_v15 = vmul.f32 %v4556_v59, %v1481_v43  ;;  %v1488_v31 = vadd.f32 %v1482_v48, %v1474_v50  ;;  %v1489_v1 = vadd.f32 %v1483_v33, %v1475_v20  ;;  %v6345_v20 = vld [vmem:[#allocation49_spill] sm:$0xff] }
 0x1cd   : >> { %v4655_v23 = vadd.f32 %v1450_v36, %v4529_v47  ;;  %v1490_v39 = vadd.f32 %v1484_v60, %v1476_v44  ;;  %v1491_v35 = vadd.f32 %v1485_v57, %v1477_v45  ;;  %v1495_v19 = vstv %s4614_s12  ;;  %s4824_s12 = sld [smem:[#allocation12 + $0x481]] }
 0x1ce   : >> { %v1492_v2 = vadd.f32 %v1486_v22, %v1478_v40  ;;  %v1493_v28 = vadd.f32 %v1487_v15, %v1479_v21  ;;  %v1496_v8 = vadd.f32 %v1495_v19, %v1488_v31  ;;  %v1497_v29 = vadd.f32 %v1495_v19, %v1489_v1 }
 0x1cf   : >> { %v1498_v25 = vadd.f32 %v1495_v19, %v1490_v39  ;;  %v1499_v43 = vadd.f32 %v1495_v19, %v1491_v35  ;;  %v1509_v4 = vstv %s4632_s14  ;;  %v1523_v3 = vstv %s4634_s15  ;;  %s4826_s14 = sld [smem:[#allocation12 + $0x482]]  ;;  %s4836_s15 = sld [smem:[#allocation8 + $0x500]] }
 0x1d0   : >> { %v1500_v46 = vadd.f32 %v1495_v19, %v1492_v2  ;;  %v1501_v48 = vadd.f32 %v1495_v19, %v1493_v28  ;;  %v1502_v33 = vmax.f32 %v1496_v8, 0.0  ;;  %v1503_v50 = vmax.f32 %v1497_v29, 0.0 }
 0x1d1   : >> { %v4661_v47 = vadd.f32 %v1451_v53, %v6345_v20  ;;  %v1504_v36 = vmax.f32 %v1498_v25, 0.0  ;;  %v1505_v44 = vmax.f32 %v1499_v43, 0.0  ;;  %v1537_v45 = vstv %s4644_s17  ;;  %s4838_s17 = sld [smem:[#allocation8 + $0x501]] }
 0x1d2   : >> { %v1506_v40 = vmax.f32 %v1500_v46, 0.0  ;;  %v1507_v21 = vmax.f32 %v1501_v48, 0.0  ;;  %v1510_v60 = vmul.f32 %v1509_v4, %v1502_v33  ;;  %v1511_v57 = vmul.f32 %v1509_v4, %v1503_v50 }
 0x1d3   : >> { %v1512_v22 = vmul.f32 %v1509_v4, %v1504_v36  ;;  %v1513_v15 = vmul.f32 %v1509_v4, %v1505_v44  ;;  %v1524_v31 = vmul.f32 %v1523_v3, %v1502_v33  ;;  %v1525_v1 = vmul.f32 %v1523_v3, %v1503_v50 }
 0x1d4   : >> { %v1514_v39 = vmul.f32 %v1509_v4, %v1506_v40  ;;  %v1515_v35 = vmul.f32 %v1509_v4, %v1507_v21  ;;  %v1551_v19 = vstv %s4650_s19  ;;  %v1559_v2 = vstv %s4652_s21  ;;  %s4866_s19 = sld [smem:[#allocation8 + $0x502]] }
 0x1d5   : >> { %v4667_v28 = vadd.f32 %v1510_v60, %v4577_v6  ;;  %v4670_v53 = vadd.f32 %v1511_v57, %v4580_v17  ;;  %v1526_v8 = vmul.f32 %v1523_v3, %v1504_v36  ;;  %v1527_v29 = vmul.f32 %v1523_v3, %v1505_v44  ;;  %s4892_s21 = sld [smem:[#allocation11 + $0xa]] }
 0x1d6   : >> { %v4673_v25 = vadd.f32 %v1512_v22, %v4585_v61  ;;  %v4676_v43 = vadd.f32 %v1513_v15, %v4588_v41  ;;  %v1528_v46 = vmul.f32 %v1523_v3, %v1506_v40  ;;  %v1529_v48 = vmul.f32 %v1523_v3, %v1507_v21 }
 0x1d7   : >> { %v4683_v6 = vadd.f32 %v1514_v39, %v4591_v9  ;;  %v4686_v17 = vadd.f32 %v1515_v35, %v4594_v54  ;;  %v4689_v4 = vadd.f32 %v1524_v31, %v4597_v32  ;;  %v4692_v61 = vadd.f32 %v1525_v1, %v4600_v51 }
 0x1d8   : >> { %v4695_v41 = vadd.f32 %v1526_v8, %v4603_v58  ;;  %v4698_v3 = vadd.f32 %v1527_v29, %v4606_v14  ;;  %v1538_v20 = vmul.f32 %v1537_v45, %v1502_v33  ;;  %v1539_v60 = vmul.f32 %v1537_v45, %v1503_v50 }
 0x1d9   : >> { %v4701_v9 = vadd.f32 %v1528_v46, %v4609_v26  ;;  %v4704_v54 = vadd.f32 %v1529_v48, %v4612_v11  ;;  %v1540_v57 = vmul.f32 %v1537_v45, %v1504_v36  ;;  %v1541_v32 = vmul.f32 %v1537_v45, %v1505_v44 }
 0x1da   : >> { %v1542_v22 = vmul.f32 %v1537_v45, %v1506_v40  ;;  %v1543_v15 = vmul.f32 %v1537_v45, %v1507_v21  ;;  %v4707_v51 = vadd.f32 %v1538_v20, %v4617_v30  ;;  %v4710_v58 = vadd.f32 %v1539_v60, %v4620_v49 }
 0x1db   : >> { %v4713_v14 = vadd.f32 %v1540_v57, %v4623_v56  ;;  %v4716_v26 = vadd.f32 %v1541_v32, %v4626_v24  ;;  %v1552_v11 = vmul.f32 %v4565_v27, %v1551_v19  ;;  %v1553_v33 = vmul.f32 %v4569_v42, %v1551_v19 }
 0x1dc   : >> { %v1554_v50 = vmul.f32 %v4481_v12, %v1551_v19  ;;  %v1555_v30 = vmul.f32 %v4485_v5, %v1551_v19  ;;  %v1556_v36 = vmul.f32 %v4493_v34, %v1551_v19  ;;  %v1557_v49 = vmul.f32 %v4497_v62, %v1551_v19 }
 0x1dd   : >> { %v1560_v56 = vmul.f32 %v4501_v16, %v1559_v2  ;;  %v1561_v24 = vmul.f32 %v4505_v13, %v1559_v2  ;;  %v1562_v44 = vmul.f32 %v4509_v7, %v1559_v2  ;;  %v1563_v45 = vmul.f32 %v4513_v0, %v1559_v2 }
 0x1de   : >> { %v1564_v40 = vmul.f32 %v4517_v10, %v1559_v2  ;;  %v1565_v21 = vmul.f32 %v4521_v18, %v1559_v2  ;;  %v1573_v31 = vstv %s4678_s22  ;;  %v1587_v1 = vstv %s4680_s23  ;;  %s4908_s22 = sld [smem:[#allocation12 + $0x500]] }
 0x1df   : >> { %v1566_v39 = vadd.f32 %v1560_v56, %v1552_v11  ;;  %v1567_v35 = vadd.f32 %v1561_v24, %v1553_v33  ;;  %v1568_v19 = vadd.f32 %v1562_v44, %v1554_v50  ;;  %v1569_v8 = vadd.f32 %v1563_v45, %v1555_v30  ;;  %s4910_s23 = sld [smem:[#allocation8 + $0x580]] }
 0x1e0   : >> { %v1570_v29 = vadd.f32 %v1564_v40, %v1556_v36  ;;  %v1571_v46 = vadd.f32 %v1565_v21, %v1557_v49  ;;  %v1574_v48 = vmul.f32 %v4533_v37, %v1573_v31  ;;  %v1575_v20 = vmul.f32 %v4537_v38, %v1573_v31 }
 0x1e1   : >> { %v1576_v2 = vmul.f32 %v4541_v63, %v1573_v31  ;;  %v1577_v60 = vmul.f32 %v4545_v52, %v1573_v31  ;;  %v1578_v57 = vmul.f32 %v4552_v55, %v1573_v31  ;;  %v1579_v32 = vmul.f32 %v4556_v59, %v1573_v31 }
 0x1e2   : >> { %v4747_v11 = vadd.f32 %v1542_v22, %v4655_v23  ;;  %v4750_v33 = vadd.f32 %v1543_v15, %v4661_v47  ;;  %v1580_v50 = vadd.f32 %v1574_v48, %v1566_v39  ;;  %v1581_v30 = vadd.f32 %v1575_v20, %v1567_v35 }
 0x1e3   : >> { %v1582_v36 = vadd.f32 %v1576_v2, %v1568_v19  ;;  %v1583_v49 = vadd.f32 %v1577_v60, %v1569_v8  ;;  %v1584_v56 = vadd.f32 %v1578_v57, %v1570_v29  ;;  %v1585_v24 = vadd.f32 %v1579_v32, %v1571_v46 }
 0x1e4   : >> { %v1588_v44 = vadd.f32 %v1587_v1, %v1580_v50  ;;  %v1589_v45 = vadd.f32 %v1587_v1, %v1581_v30  ;;  %v1601_v40 = vstv %s4724_s4  ;;  %v1615_v21 = vstv %s4726_s25  ;;  %s4920_s4 = sld [smem:[#allocation12 + $0x501]]  ;;  %s4922_s25 = sld [smem:[#allocation12 + $0x502]] }
 0x1e5   : >> { %v1590_v55 = vadd.f32 %v1587_v1, %v1582_v36  ;;  %v1591_v31 = vadd.f32 %v1587_v1, %v1583_v49  ;;  %v1592_v59 = vadd.f32 %v1587_v1, %v1584_v56  ;;  %v1593_v23 = vadd.f32 %v1587_v1, %v1585_v24 }
 0x1e6   : >> { %v1594_v22 = vmax.f32 %v1588_v44, 0.0  ;;  %v1595_v52 = vmax.f32 %v1589_v45, 0.0  ;;  %v1629_v47 = vstv %s4736_s30  ;;  %v1643_v15 = vstv %s4738_s6  ;;  %s4944_s30 = sld [smem:[#allocation8 + $0x581]]  ;;  %s4946_s6 = sld [smem:[#allocation8 + $0x582]] }
 0x1e7   : >> { %v1596_v39 = vmax.f32 %v1590_v55, 0.0  ;;  %v1597_v48 = vmax.f32 %v1591_v31, 0.0  ;;  %v1598_v35 = vmax.f32 %v1592_v59, 0.0  ;;  %v1599_v20 = vmax.f32 %v1593_v23, 0.0 }
 0x1e8   : >> { %v1602_v19 = vmul.f32 %v1601_v40, %v1594_v22  ;;  %v1603_v8 = vmul.f32 %v1601_v40, %v1595_v52  ;;  %v1616_v29 = vmul.f32 %v1615_v21, %v1594_v22  ;;  %v1617_v46 = vmul.f32 %v1615_v21, %v1595_v52 }
 0x1e9   : >> { %v1604_v2 = vmul.f32 %v1601_v40, %v1596_v39  ;;  %v1605_v60 = vmul.f32 %v1601_v40, %v1597_v48  ;;  %v1606_v57 = vmul.f32 %v1601_v40, %v1598_v35  ;;  %v1607_v32 = vmul.f32 %v1601_v40, %v1599_v20 }
 0x1ea   : >> { %v1618_v50 = vmul.f32 %v1615_v21, %v1596_v39  ;;  %v1619_v1 = vmul.f32 %v1615_v21, %v1597_v48  ;;  %v1644_v30 = vmul.f32 %v4565_v27, %v1643_v15  ;;  %v1645_v36 = vmul.f32 %v4569_v42, %v1643_v15 }
 0x1eb   : >> { %v4765_v55 = vadd.f32 %v1602_v19, %v4667_v28  ;;  %v4768_v59 = vadd.f32 %v1603_v8, %v4670_v53  ;;  %v4771_v49 = vadd.f32 %v1604_v2, %v4673_v25  ;;  %v4774_v56 = vadd.f32 %v1605_v60, %v4676_v43 }
 0x1ec   : >> { %v4777_v24 = vadd.f32 %v1606_v57, %v4683_v6  ;;  %v4780_v44 = vadd.f32 %v1607_v32, %v4686_v17  ;;  %v1620_v45 = vmul.f32 %v1615_v21, %v1598_v35  ;;  %v1621_v40 = vmul.f32 %v1615_v21, %v1599_v20 }
 0x1ed   : >> { %v4783_v28 = vadd.f32 %v1616_v29, %v4689_v4  ;;  %v4786_v53 = vadd.f32 %v1617_v46, %v4692_v61  ;;  %v1630_v31 = vmul.f32 %v1629_v47, %v1594_v22  ;;  %v1631_v25 = vmul.f32 %v1629_v47, %v1595_v52 }
 0x1ee   : >> { %v4789_v23 = vadd.f32 %v1618_v50, %v4695_v41  ;;  %v4792_v43 = vadd.f32 %v1619_v1, %v4698_v3  ;;  %v1632_v6 = vmul.f32 %v1629_v47, %v1596_v39  ;;  %v1633_v17 = vmul.f32 %v1629_v47, %v1597_v48 }
 0x1ef   : >> { %v4795_v21 = vadd.f32 %v1620_v45, %v4701_v9  ;;  %v4798_v4 = vadd.f32 %v1621_v40, %v4704_v54  ;;  %v1634_v61 = vmul.f32 %v1629_v47, %v1598_v35  ;;  %v1635_v22 = vmul.f32 %v1629_v47, %v1599_v20  ;;  %v6346_v40 = vld [vmem:[#allocation47_spill] sm:$0xff] }
 0x1f0   : >> { %v4801_v52 = vadd.f32 %v1630_v31, %v4707_v51  ;;  %v4804_v41 = vadd.f32 %v1631_v25, %v4710_v58  ;;  %v4807_v3 = vadd.f32 %v1632_v6, %v4713_v14  ;;  %v4810_v39 = vadd.f32 %v1633_v17, %v4716_v26  ;;  %v6347_v25 = vld [vmem:[#allocation50_spill] sm:$0xff]  ;;  %v6348_v17 = vld [vmem:[#allocation51_spill] sm:$0xff] }
 0x1f1   : >> { %v4815_v9 = vadd.f32 %v1634_v61, %v4747_v11  ;;  %v1646_v54 = vmul.f32 %v4481_v12, %v1643_v15  ;;  %v1647_v47 = vmul.f32 %v4485_v5, %v1643_v15  ;;  %v1648_v51 = vmul.f32 %v4493_v34, %v1643_v15 }
 0x1f2   : >> { %v1649_v58 = vmul.f32 %v4497_v62, %v1643_v15  ;;  %v1651_v48 = vstv %s4756_s7  ;;  %v1665_v35 = vstv %s4760_s8  ;;  %v1679_v14 = vstv %s4762_s9  ;;  %s4986_s7 = sld [smem:[#allocation11 + $0xb]]  ;;  %s5004_s8 = sld [smem:[#allocation12 + $0x580]] }
 0x1f3   : >> { %v1652_v26 = vmul.f32 %v4501_v16, %v1651_v48  ;;  %v1653_v11 = vmul.f32 %v4505_v13, %v1651_v48  ;;  %v1654_v20 = vmul.f32 %v4509_v7, %v1651_v48  ;;  %v1655_v19 = vmul.f32 %v4513_v0, %v1651_v48  ;;  %s5006_s9 = sld [smem:[#allocation12 + $0x581]] }
 0x1f4   : >> { %v1656_v8 = vmul.f32 %v4517_v10, %v1651_v48  ;;  %v1657_v29 = vmul.f32 %v4521_v18, %v1651_v48  ;;  %v1666_v15 = vmul.f32 %v4533_v37, %v1665_v35  ;;  %v1667_v46 = vmul.f32 %v4537_v38, %v1665_v35 }
 0x1f5   : >> { %v1658_v2 = vadd.f32 %v1652_v26, %v1644_v30  ;;  %v1659_v60 = vadd.f32 %v1653_v11, %v1645_v36  ;;  %v1660_v57 = vadd.f32 %v1654_v20, %v1646_v54  ;;  %v1661_v32 = vadd.f32 %v1655_v19, %v1647_v47 }
 0x1f6   : >> { %v1662_v50 = vadd.f32 %v1656_v8, %v1648_v51  ;;  %v1663_v1 = vadd.f32 %v1657_v29, %v1649_v58  ;;  %v1668_v45 = vmul.f32 %v4541_v63, %v1665_v35  ;;  %v1669_v31 = vmul.f32 %v6346_v40, %v1665_v35 }
 0x1f7   : >> { %v1670_v6 = vmul.f32 %v6347_v25, %v1665_v35  ;;  %v1671_v61 = vmul.f32 %v6348_v17, %v1665_v35  ;;  %v1672_v48 = vadd.f32 %v1666_v15, %v1658_v2  ;;  %v1673_v38 = vadd.f32 %v1667_v46, %v1659_v60 }
 0x1f8   : >> { %v4845_v37 = vadd.f32 %v1635_v22, %v4750_v33  ;;  %v1674_v30 = vadd.f32 %v1668_v45, %v1660_v57  ;;  %v1675_v36 = vadd.f32 %v1669_v31, %v1661_v32  ;;  %v1693_v54 = vstv %s4812_s10  ;;  %s5016_s10 = sld [smem:[#allocation12 + $0x582]] }
 0x1f9   : >> { %v1676_v47 = vadd.f32 %v1670_v6, %v1662_v50  ;;  %v1677_v51 = vadd.f32 %v1671_v61, %v1663_v1  ;;  %v1680_v58 = vadd.f32 %v1679_v14, %v1672_v48  ;;  %v1681_v26 = vadd.f32 %v1679_v14, %v1673_v38 }
 0x1fa   : >> { %v1682_v11 = vadd.f32 %v1679_v14, %v1674_v30  ;;  %v1683_v20 = vadd.f32 %v1679_v14, %v1675_v36  ;;  %v1707_v19 = vstv %s4824_s12  ;;  %v1721_v8 = vstv %s4826_s14  ;;  %s5022_s12 = sld [smem:[#allocation8 + $0x600]]  ;;  %s5024_s14 = sld [smem:[#allocation8 + $0x601]] }
 0x1fb   : >> { %v1684_v29 = vadd.f32 %v1679_v14, %v1676_v47  ;;  %v1685_v35 = vadd.f32 %v1679_v14, %v1677_v51  ;;  %v1686_v15 = vmax.f32 %v1680_v58, 0.0  ;;  %v1687_v46 = vmax.f32 %v1681_v26, 0.0 }
 0x1fc   : >> { %v1688_v2 = vmax.f32 %v1682_v11, 0.0  ;;  %v1689_v33 = vmax.f32 %v1683_v20, 0.0  ;;  %v1735_v22 = vstv %s4836_s15  ;;  %v1743_v60 = vstv %s4838_s17  ;;  %s5050_s15 = sld [smem:[#allocation8 + $0x602]]  ;;  %s5052_s17 = sld [smem:[#allocation11 + $0xc]] }
 0x1fd   : >> { %v1690_v57 = vmax.f32 %v1684_v29, 0.0  ;;  %v1691_v32 = vmax.f32 %v1685_v35, 0.0  ;;  %v1694_v45 = vmul.f32 %v1693_v54, %v1686_v15  ;;  %v1695_v31 = vmul.f32 %v1693_v54, %v1687_v46 }
 0x1fe   : >> { %v1696_v50 = vmul.f32 %v1693_v54, %v1688_v2  ;;  %v1697_v1 = vmul.f32 %v1693_v54, %v1689_v33  ;;  %v1708_v6 = vmul.f32 %v1707_v19, %v1686_v15  ;;  %v1709_v38 = vmul.f32 %v1707_v19, %v1687_v46 }
 0x1ff   : >> { %v1698_v61 = vmul.f32 %v1693_v54, %v1690_v57  ;;  %v1699_v48 = vmul.f32 %v1693_v54, %v1691_v32  ;;  %v1736_v30 = vmul.f32 %v4565_v27, %v1735_v22  ;;  %v1737_v14 = vmul.f32 %v4569_v42, %v1735_v22 }
 0x200   : >> { %v4855_v36 = vadd.f32 %v1694_v45, %v4765_v55  ;;  %v4858_v47 = vadd.f32 %v1695_v31, %v4768_v59  ;;  %v1710_v51 = vmul.f32 %v1707_v19, %v1688_v2  ;;  %v1711_v58 = vmul.f32 %v1707_v19, %v1689_v33 }
 0x201   : >> { %v4861_v26 = vadd.f32 %v1696_v50, %v4771_v49  ;;  %v4864_v11 = vadd.f32 %v1697_v1, %v4774_v56  ;;  %v1712_v20 = vmul.f32 %v1707_v19, %v1690_v57  ;;  %v1713_v54 = vmul.f32 %v1707_v19, %v1691_v32 }
 0x202   : >> { %v4869_v29 = vadd.f32 %v1698_v61, %v4777_v24  ;;  %v4872_v55 = vadd.f32 %v1699_v48, %v4780_v44  ;;  %v4875_v59 = vadd.f32 %v1708_v6, %v4783_v28  ;;  %v4878_v35 = vadd.f32 %v1709_v38, %v4786_v53 }
 0x203   : >> { %v4881_v49 = vadd.f32 %v1710_v51, %v4789_v23  ;;  %v4884_v56 = vadd.f32 %v1711_v58, %v4792_v43  ;;  %v1722_v19 = vmul.f32 %v1721_v8, %v1686_v15  ;;  %v1723_v45 = vmul.f32 %v1721_v8, %v1687_v46  ;;  %v6350_v58 = vld [vmem:[#allocation48_spill] sm:$0xff] }
 0x204   : >> { %v4887_v24 = vadd.f32 %v1712_v20, %v4795_v21  ;;  %v4890_v44 = vadd.f32 %v1713_v54, %v4798_v4  ;;  %v1724_v31 = vmul.f32 %v1721_v8, %v1688_v2  ;;  %v1725_v28 = vmul.f32 %v1721_v8, %v1689_v33 }
 0x205   : >> { %v1726_v53 = vmul.f32 %v1721_v8, %v1690_v57  ;;  %v1727_v50 = vmul.f32 %v1721_v8, %v1691_v32  ;;  %v4895_v23 = vadd.f32 %v1722_v19, %v4801_v52  ;;  %v4898_v43 = vadd.f32 %v1723_v45, %v4804_v41 }
 0x206   : >> { %v4901_v15 = vadd.f32 %v1724_v31, %v4807_v3  ;;  %v4904_v21 = vadd.f32 %v1725_v28, %v4810_v39  ;;  %v1738_v4 = vmul.f32 %v4481_v12, %v1735_v22  ;;  %v1739_v46 = vmul.f32 %v4485_v5, %v1735_v22 }
 0x207   : >> { %v1740_v52 = vmul.f32 %v4493_v34, %v1735_v22  ;;  %v1741_v41 = vmul.f32 %v4497_v62, %v1735_v22  ;;  %v1744_v8 = vmul.f32 %v4501_v16, %v1743_v60  ;;  %v1745_v3 = vmul.f32 %v4505_v13, %v1743_v60 }
 0x208   : >> { %v1746_v39 = vmul.f32 %v4509_v7, %v1743_v60  ;;  %v1747_v2 = vmul.f32 %v4513_v0, %v1743_v60  ;;  %v1748_v33 = vmul.f32 %v4517_v10, %v1743_v60  ;;  %v1749_v57 = vmul.f32 %v4521_v18, %v1743_v60  ;;  %v6351_v60 = vld [vmem:[#allocation52_spill] sm:$0xff] }
 0x209   : >> { %v4925_v32 = vadd.f32 %v1726_v53, %v4815_v9  ;;  %v1750_v22 = vadd.f32 %v1744_v8, %v1736_v30  ;;  %v1751_v1 = vadd.f32 %v1745_v3, %v1737_v14  ;;  %v1757_v6 = vstv %s4866_s19  ;;  %s5108_s19 = sld [smem:[#allocation12 + $0x600]] }
 0x20a   : >> { %v1752_v38 = vadd.f32 %v1746_v39, %v1738_v4  ;;  %v1753_v61 = vadd.f32 %v1747_v2, %v1739_v46  ;;  %v1754_v48 = vadd.f32 %v1748_v33, %v1740_v52  ;;  %v1755_v51 = vadd.f32 %v1749_v57, %v1741_v41 }
 0x20b   : >> { %6349 = vst [vmem:[#allocation49_spill] sm:$0xff] %v4925_v32  ;;  %v1758_v20 = vmul.f32 %v6350_v58, %v1757_v6  ;;  %v1759_v54 = vmul.f32 %v6351_v60, %v1757_v6  ;;  %v1760_v19 = vmul.f32 %v4541_v63, %v1757_v6  ;;  %v1761_v45 = vmul.f32 %v6346_v40, %v1757_v6 }
 0x20c   : >> { %v4933_v9 = vadd.f32 %v1727_v50, %v4845_v37  ;;  %v1762_v30 = vmul.f32 %v6347_v25, %v1757_v6  ;;  %v1763_v14 = vmul.f32 %v6348_v17, %v1757_v6  ;;  %v1771_v31 = vstv %s4892_s21  ;;  %s5110_s21 = sld [smem:[#allocation12 + $0x601]] }
 0x20d   : >> { %v1764_v28 = vadd.f32 %v1758_v20, %v1750_v22  ;;  %v1765_v53 = vadd.f32 %v1759_v54, %v1751_v1  ;;  %v1766_v4 = vadd.f32 %v1760_v19, %v1752_v38  ;;  %v1767_v46 = vadd.f32 %v1761_v45, %v1753_v61 }
 0x20e   : >> { %6352 = vst [vmem:[#allocation48_spill] sm:$0xff] %v4933_v9  ;;  %v1768_v52 = vadd.f32 %v1762_v30, %v1754_v48  ;;  %v1769_v41 = vadd.f32 %v1763_v14, %v1755_v51  ;;  %v1785_v8 = vstv %s4908_s22  ;;  %v1827_v3 = vstv %s4910_s23  ;;  %s5138_s22 = sld [smem:[#allocation12 + $0x602]]  ;;  %s5140_s23 = sld [smem:[#allocation8 + $0x680]] }
 0x20f   : >> { %v1772_v39 = vadd.f32 %v1771_v31, %v1764_v28  ;;  %v1773_v2 = vadd.f32 %v1771_v31, %v1765_v53  ;;  %v1774_v33 = vadd.f32 %v1771_v31, %v1766_v4  ;;  %v1775_v37 = vadd.f32 %v1771_v31, %v1767_v46 }
 0x210   : >> { %v1776_v50 = vadd.f32 %v1771_v31, %v1768_v52  ;;  %v1777_v57 = vadd.f32 %v1771_v31, %v1769_v41  ;;  %v1799_v9 = vstv %s4920_s4  ;;  %v1813_v32 = vstv %s4922_s25  ;;  %s5188_s4 = sld [smem:[#allocation11 + $0xd]]  ;;  %s5250_s25 = sld [smem:[#allocation12 + $0x681]] }
 0x211   : >> { %v1778_v6 = vmax.f32 %v1772_v39, 0.0  ;;  %v1779_v17 = vmax.f32 %v1773_v2, 0.0  ;;  %v1780_v25 = vmax.f32 %v1774_v33, 0.0  ;;  %v1781_v40 = vmax.f32 %v1775_v37, 0.0 }
 0x212   : >> { %v1782_v22 = vmax.f32 %v1776_v50, 0.0  ;;  %v1783_v1 = vmax.f32 %v1777_v57, 0.0  ;;  %v1828_v38 = vmul.f32 %v4565_v27, %v1827_v3  ;;  %v1829_v61 = vmul.f32 %v4569_v42, %v1827_v3 }
 0x213   : >> { %v1786_v48 = vmul.f32 %v1785_v8, %v1778_v6  ;;  %v1787_v51 = vmul.f32 %v1785_v8, %v1779_v17  ;;  %v1788_v20 = vmul.f32 %v1785_v8, %v1780_v25  ;;  %v1789_v54 = vmul.f32 %v1785_v8, %v1781_v40 }
 0x214   : >> { %v1790_v19 = vmul.f32 %v1785_v8, %v1782_v22  ;;  %v1791_v45 = vmul.f32 %v1785_v8, %v1783_v1  ;;  %v1800_v30 = vmul.f32 %v1799_v9, %v1778_v6  ;;  %v1801_v14 = vmul.f32 %v1799_v9, %v1779_v17 }
 0x215   : >> { %v4949_v31 = vadd.f32 %v1786_v48, %v4855_v36  ;;  %v4952_v28 = vadd.f32 %v1787_v51, %v4858_v47  ;;  %v1830_v53 = vmul.f32 %v4481_v12, %v1827_v3  ;;  %v1831_v4 = vmul.f32 %v4485_v5, %v1827_v3 }
 0x216   : >> { %v4957_v46 = vadd.f32 %v1788_v20, %v4861_v26  ;;  %v4960_v52 = vadd.f32 %v1789_v54, %v4864_v11  ;;  %v1802_v41 = vmul.f32 %v1799_v9, %v1780_v25  ;;  %v1803_v8 = vmul.f32 %v1799_v9, %v1781_v40 }
 0x217   : >> { %v4963_v39 = vadd.f32 %v1790_v19, %v4869_v29  ;;  %v4966_v36 = vadd.f32 %v1791_v45, %v4872_v55  ;;  %v1804_v47 = vmul.f32 %v1799_v9, %v1782_v22  ;;  %v1805_v2 = vmul.f32 %v1799_v9, %v1783_v1 }
 0x218   : >> { %v4969_v12 = vadd.f32 %v1800_v30, %v4875_v59  ;;  %v4972_v5 = vadd.f32 %v1801_v14, %v4878_v35  ;;  %v1814_v26 = vmul.f32 %v1813_v32, %v1778_v6  ;;  %v1815_v33 = vmul.f32 %v1813_v32, %v1779_v17 }
 0x219   : >> { %v4975_v11 = vadd.f32 %v1802_v41, %v4881_v49  ;;  %v4978_v29 = vadd.f32 %v1803_v8, %v4884_v56  ;;  %v1816_v55 = vmul.f32 %v1813_v32, %v1780_v25  ;;  %v1817_v37 = vmul.f32 %v1813_v32, %v1781_v40 }
 0x21a   : >> { %v4981_v9 = vadd.f32 %v1804_v47, %v4887_v24  ;;  %v4984_v59 = vadd.f32 %v1805_v2, %v4890_v44  ;;  %v1818_v35 = vmul.f32 %v1813_v32, %v1782_v22  ;;  %v1819_v50 = vmul.f32 %v1813_v32, %v1783_v1 }
 0x21b   : >> { %v4989_v17 = vadd.f32 %v1814_v26, %v4895_v23  ;;  %v4992_v49 = vadd.f32 %v1815_v33, %v4898_v43  ;;  %v4995_v56 = vadd.f32 %v1816_v55, %v4901_v15  ;;  %v4998_v40 = vadd.f32 %v1817_v37, %v4904_v21 }
 0x21c   : >> { %v1832_v25 = vmul.f32 %v4493_v34, %v1827_v3  ;;  %v1833_v24 = vmul.f32 %v4497_v62, %v1827_v3  ;;  %v1835_v44 = vstv %s4944_s30  ;;  %v1849_v32 = vstv %s4946_s6  ;;  %s5252_s30 = sld [smem:[#allocation12 + $0x682]]  ;;  %s5262_s6 = sld [smem:[#allocation8 + $0x700]] }
 0x21d   : >> { %v1836_v23 = vmul.f32 %v4501_v16, %v1835_v44  ;;  %v1837_v43 = vmul.f32 %v4505_v13, %v1835_v44  ;;  %v1838_v15 = vmul.f32 %v4509_v7, %v1835_v44  ;;  %v1839_v57 = vmul.f32 %v4513_v0, %v1835_v44  ;;  %v6353_v0 = vld [vmem:[#allocation47_spill] sm:$0xff] }
 0x21e   : >> { %v1840_v21 = vmul.f32 %v4517_v10, %v1835_v44  ;;  %v1841_v34 = vmul.f32 %v4521_v18, %v1835_v44  ;;  %v1850_v62 = vmul.f32 %v6350_v58, %v1849_v32  ;;  %v1851_v3 = vmul.f32 %v6351_v60, %v1849_v32  ;;  %v6354_v10 = vld [vmem:[#allocation50_spill] sm:$0xff]  ;;  %v6355_v18 = vld [vmem:[#allocation51_spill] sm:$0xff] }
 0x21f   : >> { %v1842_v6 = vadd.f32 %v1836_v23, %v1828_v38  ;;  %v1843_v22 = vadd.f32 %v1837_v43, %v1829_v61  ;;  %v1844_v16 = vadd.f32 %v1838_v15, %v1830_v53  ;;  %v1845_v1 = vadd.f32 %v1839_v57, %v1831_v4  ;;  %v6356_v38 = vld [vmem:[#allocation49_spill] sm:$0xff] }
 0x220   : >> { %v1846_v13 = vadd.f32 %v1840_v21, %v1832_v25  ;;  %v1847_v48 = vadd.f32 %v1841_v34, %v1833_v24  ;;  %v1852_v7 = vmul.f32 %v4541_v63, %v1849_v32  ;;  %v1853_v51 = vmul.f32 %v6353_v0, %v1849_v32  ;;  %v6357_v25 = vld [vmem:[#allocation48_spill] sm:$0xff] }
 0x221   : >> { %v1854_v20 = vmul.f32 %v6354_v10, %v1849_v32  ;;  %v1855_v58 = vmul.f32 %v6355_v18, %v1849_v32  ;;  %v1856_v60 = vadd.f32 %v1850_v62, %v1842_v6  ;;  %v1857_v54 = vadd.f32 %v1851_v3, %v1843_v22 }
 0x222   : >> { %v5027_v61 = vadd.f32 %v1818_v35, %v6356_v38  ;;  %v1858_v19 = vadd.f32 %v1852_v7, %v1844_v16  ;;  %v1859_v45 = vadd.f32 %v1853_v51, %v1845_v1  ;;  %v1863_v63 = vstv %s4986_s7  ;;  %s5264_s7 = sld [smem:[#allocation8 + $0x701]] }
 0x223   : >> { %v1860_v30 = vadd.f32 %v1854_v20, %v1846_v13  ;;  %v1861_v14 = vadd.f32 %v1855_v58, %v1847_v48  ;;  %v1864_v53 = vadd.f32 %v1863_v63, %v1856_v60  ;;  %v1865_v4 = vadd.f32 %v1863_v63, %v1857_v54 }
 0x224   : >> { %v1866_v41 = vadd.f32 %v1863_v63, %v1858_v19  ;;  %v1867_v8 = vadd.f32 %v1863_v63, %v1859_v45  ;;  %v1877_v47 = vstv %s5004_s8  ;;  %v1891_v2 = vstv %s5006_s9  ;;  %s5292_s8 = sld [smem:[#allocation8 + $0x702]]  ;;  %s5318_s9 = sld [smem:[#allocation11 + $0xe]] }
 0x225   : >> { %v1868_v26 = vadd.f32 %v1863_v63, %v1860_v30  ;;  %v1869_v33 = vadd.f32 %v1863_v63, %v1861_v14  ;;  %v1870_v55 = vmax.f32 %v1864_v53, 0.0  ;;  %v1871_v37 = vmax.f32 %v1865_v4, 0.0  ;;  %v5093_v30 = vld [vmem:[%s3905_s16 + $0x10] sm:$0xff]  ;;  %v5097_v14 = vld [vmem:[%s3905_s16 + $0x18] sm:$0xff]  ;;  %v5105_v53 = vld [vmem:[%s3905_s16 + $0x28] sm:$0xff] }
 0x226   : >> { %v5033_v35 = vadd.f32 %v1819_v50, %v6357_v25  ;;  %v1872_v24 = vmax.f32 %v1866_v41, 0.0  ;;  %v1873_v44 = vmax.f32 %v1867_v8, 0.0  ;;  %v1905_v32 = vstv %s5016_s10  ;;  %v5117_v41 = vld [vmem:[%s3877_s13 + $0x8] sm:$0xff]  ;;  %s5334_s10 = sld [smem:[#allocation12 + $0x700]] }
 0x227   : >> { %v1874_v23 = vmax.f32 %v1868_v26, 0.0  ;;  %v1875_v43 = vmax.f32 %v1869_v33, 0.0  ;;  %v1878_v15 = vmul.f32 %v1877_v47, %v1870_v55  ;;  %v1879_v57 = vmul.f32 %v1877_v47, %v1871_v37  ;;  %v5125_v26 = vld [vmem:[%s3877_s13 + $0x18] sm:$0xff]  ;;  %v5133_v25 = vld [vmem:[%s3877_s13 + $0x28] sm:$0xff] }
 0x228   : >> { %v1880_v21 = vmul.f32 %v1877_v47, %v1872_v24  ;;  %v1881_v34 = vmul.f32 %v1877_v47, %v1873_v44  ;;  %v1892_v62 = vmul.f32 %v1891_v2, %v1870_v55  ;;  %v1893_v3 = vmul.f32 %v1891_v2, %v1871_v37 }
 0x229   : >> { %v1882_v6 = vmul.f32 %v1877_v47, %v1874_v23  ;;  %v1883_v22 = vmul.f32 %v1877_v47, %v1875_v43  ;;  %v1919_v16 = vstv %s5022_s12  ;;  %v1927_v1 = vstv %s5024_s14  ;;  %v5121_v47 = vld [vmem:[%s3877_s13 + $0x10] sm:$0xff]  ;;  %s5336_s12 = sld [smem:[#allocation8 + $0x780]]  ;;  %s5346_s14 = sld [smem:[#allocation12 + $0x701]] }
 0x22a   : >> { %v5039_v13 = vadd.f32 %v1878_v15, %v4949_v31  ;;  %v5042_v50 = vadd.f32 %v1879_v57, %v4952_v28  ;;  %v1894_v48 = vmul.f32 %v1891_v2, %v1872_v24  ;;  %v1895_v7 = vmul.f32 %v1891_v2, %v1873_v44 }
 0x22b   : >> { %v5045_v0 = vadd.f32 %v1880_v21, %v4957_v46  ;;  %v5048_v51 = vadd.f32 %v1881_v34, %v4960_v52  ;;  %v1896_v10 = vmul.f32 %v1891_v2, %v1874_v23  ;;  %v1897_v20 = vmul.f32 %v1891_v2, %v1875_v43 }
 0x22c   : >> { %v5055_v31 = vadd.f32 %v1882_v6, %v4963_v39  ;;  %v5058_v28 = vadd.f32 %v1883_v22, %v4966_v36  ;;  %v5061_v18 = vadd.f32 %v1892_v62, %v4969_v12  ;;  %v5064_v46 = vadd.f32 %v1893_v3, %v4972_v5  ;;  %v5143_v62 = vld [vmem:[%s3934_s18] sm:$0xff]  ;;  %v5147_v6 = vld [vmem:[%s3934_s18 + $0x8] sm:$0xff] }
 0x22d   : >> { %v5067_v52 = vadd.f32 %v1894_v48, %v4975_v11  ;;  %v5070_v58 = vadd.f32 %v1895_v7, %v4978_v29  ;;  %v1906_v60 = vmul.f32 %v1905_v32, %v1870_v55  ;;  %v1907_v39 = vmul.f32 %v1905_v32, %v1871_v37  ;;  %v5129_v55 = vld [vmem:[%s3877_s13 + $0x20] sm:$0xff]  ;;  %6358 = vst [vmem:[#allocation52_spill] sm:$0xff] %v5143_v62  ;;  %v5155_v48 = vld [vmem:[%s3934_s18 + $0x18] sm:$0xff] }
 0x22e   : >> { %v5073_v54 = vadd.f32 %v1896_v10, %v4981_v9  ;;  %v5076_v36 = vadd.f32 %v1897_v20, %v4984_v59  ;;  %v1908_v12 = vmul.f32 %v1905_v32, %v1872_v24  ;;  %v1909_v5 = vmul.f32 %v1905_v32, %v1873_v44  ;;  %6359 = vst [vmem:[#allocation47_spill] sm:$0xff] %v5147_v6  ;;  %v5159_v10 = vld [vmem:[%s3934_s18 + $0x20] sm:$0xff] }
 0x22f   : >> { %v1910_v38 = vmul.f32 %v1905_v32, %v1874_v23  ;;  %v1911_v11 = vmul.f32 %v1905_v32, %v1875_v43  ;;  %v5079_v19 = vadd.f32 %v1906_v60, %v4989_v17  ;;  %v5082_v29 = vadd.f32 %v1907_v39, %v4992_v49  ;;  %6360 = vst [vmem:[#allocation50_spill] sm:$0xff] %v5155_v48  ;;  %v5163_v60 = vld [vmem:[%s3934_s18 + $0x28] sm:$0xff] }
 0x230   : >> { %v5085_v45 = vadd.f32 %v1908_v12, %v4995_v56  ;;  %v5088_v9 = vadd.f32 %v1909_v5, %v4998_v40  ;;  %v1920_v59 = vmul.f32 %v4565_v27, %v1919_v16  ;;  %v1921_v63 = vmul.f32 %v4569_v42, %v1919_v16  ;;  %v5101_v56 = vld [vmem:[%s3905_s16 + $0x20] sm:$0xff]  ;;  %6361 = vst [vmem:[#allocation51_spill] sm:$0xff] %v5159_v10 }
 0x231   : >> { %v1922_v17 = vmul.f32 %v5093_v30, %v1919_v16  ;;  %v1923_v49 = vmul.f32 %v5097_v14, %v1919_v16  ;;  %v1924_v40 = vmul.f32 %v5101_v56, %v1919_v16  ;;  %v1925_v27 = vmul.f32 %v5105_v53, %v1919_v16  ;;  %v5113_v42 = vld [vmem:[%s3877_s13] sm:$0xff]  ;;  %v5151_v16 = vld [vmem:[%s3934_s18 + $0x10] sm:$0xff]  ;;  %6362 = vst [vmem:[#allocation49_spill] sm:$0xff] %v5163_v60  ;;  %s5176_s13 = sld [smem:[#allocation8 + $0x681]]  ;;  %s5186_s18 = sld [smem:[#allocation8 + $0x682]] }
 0x232   : >> { %v1928_v4 = vmul.f32 %v5113_v42, %v1927_v1  ;;  %v1929_v8 = vmul.f32 %v5117_v41, %v1927_v1  ;;  %v1930_v2 = vmul.f32 %v5121_v47, %v1927_v1  ;;  %v1931_v33 = vmul.f32 %v5125_v26, %v1927_v1 }
 0x233   : >> { %v1932_v37 = vmul.f32 %v5129_v55, %v1927_v1  ;;  %v1933_v24 = vmul.f32 %v5133_v25, %v1927_v1  ;;  %v1941_v44 = vstv %s5050_s15  ;;  %v1955_v32 = vstv %s5052_s17  ;;  %s5348_s15 = sld [smem:[#allocation12 + $0x702]]  ;;  %s5370_s17 = sld [smem:[#allocation8 + $0x781]] }
 0x234   : >> { %v1934_v23 = vadd.f32 %v1928_v4, %v1920_v59  ;;  %v1935_v43 = vadd.f32 %v1929_v8, %v1921_v63  ;;  %v1936_v15 = vadd.f32 %v1930_v2, %v1922_v17  ;;  %v1937_v57 = vadd.f32 %v1931_v33, %v1923_v49 }
 0x235   : >> { %v1938_v21 = vadd.f32 %v1932_v37, %v1924_v40  ;;  %v1939_v34 = vadd.f32 %v1933_v24, %v1925_v27  ;;  %v1942_v3 = vmul.f32 %v5143_v62, %v1941_v44  ;;  %v1943_v22 = vmul.f32 %v5147_v6, %v1941_v44 }
 0x236   : >> { %v1944_v1 = vmul.f32 %v5151_v16, %v1941_v44  ;;  %v1945_v7 = vmul.f32 %v5155_v48, %v1941_v44  ;;  %v1946_v20 = vmul.f32 %v5159_v10, %v1941_v44  ;;  %v1947_v39 = vmul.f32 %v5163_v60, %v1941_v44 }
 0x237   : >> { %v5167_v12 = vadd.f32 %v1910_v38, %v5027_v61  ;;  %v5170_v5 = vadd.f32 %v1911_v11, %v5033_v35  ;;  %v1948_v59 = vadd.f32 %v1942_v3, %v1934_v23  ;;  %v1949_v63 = vadd.f32 %v1943_v22, %v1935_v43 }
 0x238   : >> { %v1950_v17 = vadd.f32 %v1944_v1, %v1936_v15  ;;  %v1951_v49 = vadd.f32 %v1945_v7, %v1937_v57  ;;  %v1952_v40 = vadd.f32 %v1946_v20, %v1938_v21  ;;  %v1953_v27 = vadd.f32 %v1947_v39, %v1939_v34 }
 0x239   : >> { %v1956_v4 = vadd.f32 %v1955_v32, %v1948_v59  ;;  %v1957_v8 = vadd.f32 %v1955_v32, %v1949_v63  ;;  %v1969_v2 = vstv %s5108_s19  ;;  %v1983_v33 = vstv %s5110_s21  ;;  %v5179_v63 = vld [vmem:[%s3905_s16] sm:$0xff]  ;;  %s5372_s19 = sld [smem:[#allocation8 + $0x782]]  ;;  %s5412_s21 = sld [smem:[#allocation11 + $0xf]] }
 0x23a   : >> { %v1958_v37 = vadd.f32 %v1955_v32, %v1950_v17  ;;  %v1959_v24 = vadd.f32 %v1955_v32, %v1951_v49  ;;  %v1960_v44 = vadd.f32 %v1955_v32, %v1952_v40  ;;  %v1961_v61 = vadd.f32 %v1955_v32, %v1953_v27  ;;  %v5183_v49 = vld [vmem:[%s3905_s16 + $0x8] sm:$0xff]  ;;  %s5238_s16 = sld [smem:[#allocation12 + $0x680]] }
 0x23b   : >> { %v1962_v38 = vmax.f32 %v1956_v4, 0.0  ;;  %v1963_v60 = vmax.f32 %v1957_v8, 0.0  ;;  %v1997_v35 = vstv %s5138_s22  ;;  %v2011_v11 = vstv %s5140_s23  ;;  %s5430_s22 = sld [smem:[#allocation12 + $0x780]]  ;;  %s5432_s23 = sld [smem:[#allocation12 + $0x781]] }
 0x23c   : >> { %v1964_v23 = vmax.f32 %v1958_v37, 0.0  ;;  %v1965_v43 = vmax.f32 %v1959_v24, 0.0  ;;  %v1966_v15 = vmax.f32 %v1960_v44, 0.0  ;;  %v1967_v57 = vmax.f32 %v1961_v61, 0.0 }
 0x23d   : >> { %v1970_v21 = vmul.f32 %v1969_v2, %v1962_v38  ;;  %v1971_v34 = vmul.f32 %v1969_v2, %v1963_v60  ;;  %v1984_v3 = vmul.f32 %v1983_v33, %v1962_v38  ;;  %v1985_v22 = vmul.f32 %v1983_v33, %v1963_v60 }
 0x23e   : >> { %v1972_v1 = vmul.f32 %v1969_v2, %v1964_v23  ;;  %v1973_v7 = vmul.f32 %v1969_v2, %v1965_v43  ;;  %v1974_v20 = vmul.f32 %v1969_v2, %v1966_v15  ;;  %v1975_v39 = vmul.f32 %v1969_v2, %v1967_v57 }
 0x23f   : >> { %v1986_v32 = vmul.f32 %v1983_v33, %v1964_v23  ;;  %v1987_v59 = vmul.f32 %v1983_v33, %v1965_v43  ;;  %v2012_v17 = vmul.f32 %v5179_v63, %v2011_v11  ;;  %v2013_v40 = vmul.f32 %v5183_v49, %v2011_v11 }
 0x240   : >> { %v5191_v27 = vadd.f32 %v1970_v21, %v5039_v13  ;;  %v5194_v4 = vadd.f32 %v1971_v34, %v5042_v50  ;;  %v5197_v8 = vadd.f32 %v1972_v1, %v5045_v0  ;;  %v5200_v2 = vadd.f32 %v1973_v7, %v5048_v51 }
 0x241   : >> { %v5203_v37 = vadd.f32 %v1974_v20, %v5055_v31  ;;  %v5206_v24 = vadd.f32 %v1975_v39, %v5058_v28  ;;  %v1988_v44 = vmul.f32 %v1983_v33, %v1966_v15  ;;  %v1989_v61 = vmul.f32 %v1983_v33, %v1967_v57 }
 0x242   : >> { %v5209_v13 = vadd.f32 %v1984_v3, %v5061_v18  ;;  %v5212_v50 = vadd.f32 %v1985_v22, %v5064_v46  ;;  %v1998_v21 = vmul.f32 %v1997_v35, %v1962_v38  ;;  %v1999_v0 = vmul.f32 %v1997_v35, %v1963_v60 }
 0x243   : >> { %v5215_v34 = vadd.f32 %v1986_v32, %v5067_v52  ;;  %v5218_v51 = vadd.f32 %v1987_v59, %v5070_v58  ;;  %v2000_v31 = vmul.f32 %v1997_v35, %v1964_v23  ;;  %v2001_v28 = vmul.f32 %v1997_v35, %v1965_v43 }
 0x244   : >> { %v5221_v33 = vadd.f32 %v1988_v44, %v5073_v54  ;;  %v5224_v18 = vadd.f32 %v1989_v61, %v5076_v36  ;;  %v2002_v46 = vmul.f32 %v1997_v35, %v1966_v15  ;;  %v2003_v38 = vmul.f32 %v1997_v35, %v1967_v57 }
 0x245   : >> { %v5227_v60 = vadd.f32 %v1998_v21, %v5079_v19  ;;  %v5230_v52 = vadd.f32 %v1999_v0, %v5082_v29  ;;  %v5233_v58 = vadd.f32 %v2000_v31, %v5085_v45  ;;  %v5236_v23 = vadd.f32 %v2001_v28, %v5088_v9  ;;  %v6363_v28 = vld [vmem:[#allocation49_spill] sm:$0xff] }
 0x246   : >> { %v5241_v54 = vadd.f32 %v2002_v46, %v5167_v12  ;;  %v2014_v36 = vmul.f32 %v5093_v30, %v2011_v11  ;;  %v2015_v35 = vmul.f32 %v5097_v14, %v2011_v11  ;;  %v2016_v19 = vmul.f32 %v5101_v56, %v2011_v11 }
 0x247   : >> { %v2017_v29 = vmul.f32 %v5105_v53, %v2011_v11  ;;  %v2019_v43 = vstv %s5176_s13  ;;  %v2033_v15 = vstv %s5186_s18  ;;  %v2047_v45 = vstv %s5188_s4  ;;  %s5442_s13 = sld [smem:[#allocation12 + $0x782]]  ;;  %s2287_s18 = scalar_lea.vmem [#allocation4], %s3871_s11 }
 0x248   : >> { %v2020_v9 = vmul.f32 %v5113_v42, %v2019_v43  ;;  %v2021_v12 = vmul.f32 %v5117_v41, %v2019_v43  ;;  %v2022_v57 = vmul.f32 %v5121_v47, %v2019_v43  ;;  %v2023_v3 = vmul.f32 %v5125_v26, %v2019_v43  ;;  %s2295_s4 = scalar_lea.vmem [#allocation5], %s3871_s11 }
 0x249   : >> { %v2024_v22 = vmul.f32 %v5129_v55, %v2019_v43  ;;  %v2025_v1 = vmul.f32 %v5133_v25, %v2019_v43  ;;  %v2034_v11 = vmul.f32 %v5143_v62, %v2033_v15  ;;  %v2035_v7 = vmul.f32 %v5147_v6, %v2033_v15 }
 0x24a   : >> { %v2026_v20 = vadd.f32 %v2020_v9, %v2012_v17  ;;  %v2027_v39 = vadd.f32 %v2021_v12, %v2013_v40  ;;  %v2028_v32 = vadd.f32 %v2022_v57, %v2014_v36  ;;  %v2029_v59 = vadd.f32 %v2023_v3, %v2015_v35 }
 0x24b   : >> { %v2030_v44 = vadd.f32 %v2024_v22, %v2016_v19  ;;  %v2031_v61 = vadd.f32 %v2025_v1, %v2017_v29  ;;  %v2036_v21 = vmul.f32 %v5151_v16, %v2033_v15  ;;  %v2037_v0 = vmul.f32 %v5155_v48, %v2033_v15 }
 0x24c   : >> { %v2038_v31 = vmul.f32 %v5159_v10, %v2033_v15  ;;  %v2039_v46 = vmul.f32 %v6363_v28, %v2033_v15  ;;  %v2040_v43 = vadd.f32 %v2034_v11, %v2026_v20  ;;  %v2041_v6 = vadd.f32 %v2035_v7, %v2027_v39 }
 0x24d   : >> { %v5271_v62 = vadd.f32 %v2003_v38, %v5170_v5  ;;  %v2042_v17 = vadd.f32 %v2036_v21, %v2028_v32  ;;  %v2043_v40 = vadd.f32 %v2037_v0, %v2029_v59  ;;  %v2061_v36 = vstv %s5238_s16  ;;  %s2303_s16 = scalar_lea.vmem [#allocation6], %s3871_s11 }
 0x24e   : >> { %v2044_v35 = vadd.f32 %v2038_v31, %v2030_v44  ;;  %v2045_v19 = vadd.f32 %v2039_v46, %v2031_v61  ;;  %v2048_v29 = vadd.f32 %v2047_v45, %v2040_v43  ;;  %v2049_v9 = vadd.f32 %v2047_v45, %v2041_v6 }
 0x24f   : >> { %v2050_v12 = vadd.f32 %v2047_v45, %v2042_v17  ;;  %v2051_v57 = vadd.f32 %v2047_v45, %v2043_v40  ;;  %v2075_v3 = vstv %s5250_s25  ;;  %v2089_v22 = vstv %s5252_s30 }
 0x250   : >> { %v2052_v1 = vadd.f32 %v2047_v45, %v2044_v35  ;;  %v2053_v15 = vadd.f32 %v2047_v45, %v2045_v19  ;;  %v2054_v11 = vmax.f32 %v2048_v29, 0.0  ;;  %v2055_v7 = vmax.f32 %v2049_v9, 0.0 }
 0x251   : >> { %v2056_v20 = vmax.f32 %v2050_v12, 0.0  ;;  %v2057_v5 = vmax.f32 %v2051_v57, 0.0  ;;  %v2103_v38 = vstv %s5262_s6  ;;  %v2111_v39 = vstv %s5264_s7 }
 0x252   : >> { %v2058_v32 = vmax.f32 %v2052_v1, 0.0  ;;  %v2059_v59 = vmax.f32 %v2053_v15, 0.0  ;;  %v2062_v21 = vmul.f32 %v2061_v36, %v2054_v11  ;;  %v2063_v0 = vmul.f32 %v2061_v36, %v2055_v7 }
 0x253   : >> { %v2064_v44 = vmul.f32 %v2061_v36, %v2056_v20  ;;  %v2065_v61 = vmul.f32 %v2061_v36, %v2057_v5  ;;  %v2076_v31 = vmul.f32 %v2075_v3, %v2054_v11  ;;  %v2077_v6 = vmul.f32 %v2075_v3, %v2055_v7 }
 0x254   : >> { %v2066_v46 = vmul.f32 %v2061_v36, %v2058_v32  ;;  %v2067_v43 = vmul.f32 %v2061_v36, %v2059_v59  ;;  %v2104_v17 = vmul.f32 %v5179_v63, %v2103_v38  ;;  %v2105_v45 = vmul.f32 %v5183_v49, %v2103_v38 }
 0x255   : >> { %v5281_v40 = vadd.f32 %v2062_v21, %v5191_v27  ;;  %v5284_v35 = vadd.f32 %v2063_v0, %v5194_v4  ;;  %v2078_v19 = vmul.f32 %v2075_v3, %v2056_v20  ;;  %v2079_v29 = vmul.f32 %v2075_v3, %v2057_v5 }
 0x256   : >> { %v5287_v9 = vadd.f32 %v2064_v44, %v5197_v8  ;;  %v5290_v12 = vadd.f32 %v2065_v61, %v5200_v2  ;;  %v2080_v57 = vmul.f32 %v2075_v3, %v2058_v32  ;;  %v2081_v36 = vmul.f32 %v2075_v3, %v2059_v59 }
 0x257   : >> { %v5295_v1 = vadd.f32 %v2066_v46, %v5203_v37  ;;  %v5298_v27 = vadd.f32 %v2067_v43, %v5206_v24  ;;  %v5301_v4 = vadd.f32 %v2076_v31, %v5209_v13  ;;  %v5304_v15 = vadd.f32 %v2077_v6, %v5212_v50 }
 0x258   : >> { %v5307_v8 = vadd.f32 %v2078_v19, %v5215_v34  ;;  %v5310_v2 = vadd.f32 %v2079_v29, %v5218_v51  ;;  %v2090_v3 = vmul.f32 %v2089_v22, %v2054_v11  ;;  %v2091_v21 = vmul.f32 %v2089_v22, %v2055_v7  ;;  %v6365_v29 = vld [vmem:[#allocation52_spill] sm:$0xff] }
 0x259   : >> { %v5313_v37 = vadd.f32 %v2080_v57, %v5221_v33  ;;  %v5316_v24 = vadd.f32 %v2081_v36, %v5224_v18  ;;  %v2092_v0 = vmul.f32 %v2089_v22, %v2056_v20  ;;  %v2093_v13 = vmul.f32 %v2089_v22, %v2057_v5 }
 0x25a   : >> { %v2094_v50 = vmul.f32 %v2089_v22, %v2058_v32  ;;  %v2095_v44 = vmul.f32 %v2089_v22, %v2059_v59  ;;  %v5321_v34 = vadd.f32 %v2090_v3, %v5227_v60  ;;  %v5324_v51 = vadd.f32 %v2091_v21, %v5230_v52 }
 0x25b   : >> { %v5327_v11 = vadd.f32 %v2092_v0, %v5233_v58  ;;  %v5330_v33 = vadd.f32 %v2093_v13, %v5236_v23  ;;  %v2106_v18 = vmul.f32 %v5093_v30, %v2103_v38  ;;  %v2107_v7 = vmul.f32 %v5097_v14, %v2103_v38 }
 0x25c   : >> { %v2108_v60 = vmul.f32 %v5101_v56, %v2103_v38  ;;  %v2109_v52 = vmul.f32 %v5105_v53, %v2103_v38  ;;  %v2112_v22 = vmul.f32 %v5113_v42, %v2111_v39  ;;  %v2113_v58 = vmul.f32 %v5117_v41, %v2111_v39 }
 0x25d   : >> { %v2114_v23 = vmul.f32 %v5121_v47, %v2111_v39  ;;  %v2115_v20 = vmul.f32 %v5125_v26, %v2111_v39  ;;  %v2116_v5 = vmul.f32 %v5129_v55, %v2111_v39  ;;  %v2117_v32 = vmul.f32 %v5133_v25, %v2111_v39  ;;  %v6366_v39 = vld [vmem:[#allocation47_spill] sm:$0xff] }
 0x25e   : >> { %v5351_v59 = vadd.f32 %v2094_v50, %v5241_v54  ;;  %v2118_v38 = vadd.f32 %v2112_v22, %v2104_v17  ;;  %v2119_v61 = vadd.f32 %v2113_v58, %v2105_v45  ;;  %v2125_v31 = vstv %s5292_s8 }
 0x25f   : >> { %v2120_v6 = vadd.f32 %v2114_v23, %v2106_v18  ;;  %v2121_v46 = vadd.f32 %v2115_v20, %v2107_v7  ;;  %v2122_v43 = vadd.f32 %v2116_v5, %v2108_v60  ;;  %v2123_v19 = vadd.f32 %v2117_v32, %v2109_v52 }
 0x260   : >> { %6364 = vst [vmem:[#allocation48_spill] sm:$0xff] %v5351_v59  ;;  %v2126_v57 = vmul.f32 %v6365_v29, %v2125_v31  ;;  %v2127_v36 = vmul.f32 %v6366_v39, %v2125_v31  ;;  %v2128_v3 = vmul.f32 %v5151_v16, %v2125_v31  ;;  %v2129_v21 = vmul.f32 %v5155_v48, %v2125_v31 }
 0x261   : >> { %v5359_v54 = vadd.f32 %v2095_v44, %v5271_v62  ;;  %v2130_v17 = vmul.f32 %v5159_v10, %v2125_v31  ;;  %v2131_v45 = vmul.f32 %v6363_v28, %v2125_v31  ;;  %v2139_v0 = vstv %s5318_s9 }
 0x262   : >> { %v2132_v13 = vadd.f32 %v2126_v57, %v2118_v38  ;;  %v2133_v50 = vadd.f32 %v2127_v36, %v2119_v61  ;;  %v2134_v18 = vadd.f32 %v2128_v3, %v2120_v6  ;;  %v2135_v7 = vadd.f32 %v2129_v21, %v2121_v46 }
 0x263   : >> { %6367 = vst [vmem:[#allocation52_spill] sm:$0xff] %v5359_v54  ;;  %v2136_v60 = vadd.f32 %v2130_v17, %v2122_v43  ;;  %v2137_v52 = vadd.f32 %v2131_v45, %v2123_v19  ;;  %v2153_v22 = vstv %s5334_s10  ;;  %v2195_v58 = vstv %s5336_s12 }
 0x264   : >> { %v2140_v23 = vadd.f32 %v2139_v0, %v2132_v13  ;;  %v2141_v20 = vadd.f32 %v2139_v0, %v2133_v50  ;;  %v2142_v5 = vadd.f32 %v2139_v0, %v2134_v18  ;;  %v2143_v62 = vadd.f32 %v2139_v0, %v2135_v7 }
 0x265   : >> { %v2144_v44 = vadd.f32 %v2139_v0, %v2136_v60  ;;  %v2145_v32 = vadd.f32 %v2139_v0, %v2137_v52  ;;  %v2167_v54 = vstv %s5346_s14  ;;  %v2181_v59 = vstv %s5348_s15 }
 0x266   : >> { %v2146_v31 = vmax.f32 %v2140_v23, 0.0  ;;  %v2147_v28 = vmax.f32 %v2141_v20, 0.0  ;;  %v2148_v10 = vmax.f32 %v2142_v5, 0.0  ;;  %v2149_v48 = vmax.f32 %v2143_v62, 0.0 }
 0x267   : >> { %v2150_v38 = vmax.f32 %v2144_v44, 0.0  ;;  %v2151_v61 = vmax.f32 %v2145_v32, 0.0  ;;  %v2196_v6 = vmul.f32 %v5179_v63, %v2195_v58  ;;  %v2197_v46 = vmul.f32 %v5183_v49, %v2195_v58 }
 0x268   : >> { %v2154_v43 = vmul.f32 %v2153_v22, %v2146_v31  ;;  %v2155_v19 = vmul.f32 %v2153_v22, %v2147_v28  ;;  %v2156_v57 = vmul.f32 %v2153_v22, %v2148_v10  ;;  %v2157_v36 = vmul.f32 %v2153_v22, %v2149_v48 }
 0x269   : >> { %v2158_v3 = vmul.f32 %v2153_v22, %v2150_v38  ;;  %v2159_v21 = vmul.f32 %v2153_v22, %v2151_v61  ;;  %v2168_v17 = vmul.f32 %v2167_v54, %v2146_v31  ;;  %v2169_v45 = vmul.f32 %v2167_v54, %v2147_v28 }
 0x26a   : >> { %v5375_v0 = vadd.f32 %v2154_v43, %v5281_v40  ;;  %v5378_v13 = vadd.f32 %v2155_v19, %v5284_v35  ;;  %v2198_v63 = vmul.f32 %v5093_v30, %v2195_v58  ;;  %v2199_v49 = vmul.f32 %v5097_v14, %v2195_v58 }
 0x26b   : >> { %v5383_v50 = vadd.f32 %v2156_v57, %v5287_v9  ;;  %v5386_v18 = vadd.f32 %v2157_v36, %v5290_v12  ;;  %v2170_v7 = vmul.f32 %v2167_v54, %v2148_v10  ;;  %v2171_v60 = vmul.f32 %v2167_v54, %v2149_v48  ;;  %v6371_v57 = vld [vmem:[#allocation48_spill] sm:$0xff] }
 0x26c   : >> { %v5389_v52 = vadd.f32 %v2158_v3, %v5295_v1  ;;  %v5392_v40 = vadd.f32 %v2159_v21, %v5298_v27  ;;  %v2172_v35 = vmul.f32 %v2167_v54, %v2150_v38  ;;  %v2173_v22 = vmul.f32 %v2167_v54, %v2151_v61 }
 0x26d   : >> { %v5395_v30 = vadd.f32 %v2168_v17, %v5301_v4  ;;  %v5398_v14 = vadd.f32 %v2169_v45, %v5304_v15  ;;  %v2182_v9 = vmul.f32 %v2181_v59, %v2146_v31  ;;  %v2183_v23 = vmul.f32 %v2181_v59, %v2147_v28 }
 0x26e   : >> { %v5401_v12 = vadd.f32 %v2170_v7, %v5307_v8  ;;  %v5404_v1 = vadd.f32 %v2171_v60, %v5310_v2  ;;  %v2184_v27 = vmul.f32 %v2181_v59, %v2148_v10  ;;  %v2185_v20 = vmul.f32 %v2181_v59, %v2149_v48 }
 0x26f   : >> { %v5407_v54 = vadd.f32 %v2172_v35, %v5313_v37  ;;  %v5410_v4 = vadd.f32 %v2173_v22, %v5316_v24  ;;  %v2186_v15 = vmul.f32 %v2181_v59, %v2150_v38  ;;  %v2187_v5 = vmul.f32 %v2181_v59, %v2151_v61  ;;  %v6369_v61 = vld [vmem:[#allocation51_spill] sm:$0xff] }
 0x270   : >> { %v5415_v28 = vadd.f32 %v2182_v9, %v5321_v34  ;;  %v5418_v8 = vadd.f32 %v2183_v23, %v5324_v51  ;;  %v5421_v2 = vadd.f32 %v2184_v27, %v5327_v11  ;;  %v5424_v48 = vadd.f32 %v2185_v20, %v5330_v33  ;;  %v6372_v27 = vld [vmem:[#allocation52_spill] sm:$0xff] }
 0x271   : >> { %v2200_v10 = vmul.f32 %v5101_v56, %v2195_v58  ;;  %v2201_v37 = vmul.f32 %v5105_v53, %v2195_v58  ;;  %v2203_v24 = vstv %s5370_s17  ;;  %v2217_v59 = vstv %s5372_s19 }
 0x272   : >> { %v2204_v34 = vmul.f32 %v5113_v42, %v2203_v24  ;;  %v2205_v51 = vmul.f32 %v5117_v41, %v2203_v24  ;;  %v2206_v11 = vmul.f32 %v5121_v47, %v2203_v24  ;;  %v2207_v62 = vmul.f32 %v5125_v26, %v2203_v24  ;;  %v6368_v26 = vld [vmem:[#allocation50_spill] sm:$0xff] }
 0x273   : >> { %v2208_v33 = vmul.f32 %v5129_v55, %v2203_v24  ;;  %v2209_v56 = vmul.f32 %v5133_v25, %v2203_v24  ;;  %v2218_v53 = vmul.f32 %v6365_v29, %v2217_v59  ;;  %v2219_v58 = vmul.f32 %v6366_v39, %v2217_v59  ;;  %v6370_v29 = vld [vmem:[#allocation49_spill] sm:$0xff] }
 0x274   : >> { %v2210_v44 = vadd.f32 %v2204_v34, %v2196_v6  ;;  %v2211_v32 = vadd.f32 %v2205_v51, %v2197_v46  ;;  %v2212_v42 = vadd.f32 %v2206_v11, %v2198_v63  ;;  %v2213_v31 = vadd.f32 %v2207_v62, %v2199_v49 }
 0x275   : >> { %v2214_v41 = vadd.f32 %v2208_v33, %v2200_v10  ;;  %v2215_v38 = vadd.f32 %v2209_v56, %v2201_v37  ;;  %v2220_v47 = vmul.f32 %v5151_v16, %v2217_v59  ;;  %v2221_v55 = vmul.f32 %v6368_v26, %v2217_v59 }
 0x276   : >> { %v2222_v25 = vmul.f32 %v6369_v61, %v2217_v59  ;;  %v2223_v43 = vmul.f32 %v6370_v29, %v2217_v59  ;;  %v2224_v39 = vadd.f32 %v2218_v53, %v2210_v44  ;;  %v2225_v19 = vadd.f32 %v2219_v58, %v2211_v32 }
 0x277   : >> { %v5449_v36 = vadd.f32 %v2186_v15, %v6371_v57  ;;  %v2226_v6 = vadd.f32 %v2220_v47, %v2212_v42  ;;  %v2227_v46 = vadd.f32 %v2221_v55, %v2213_v31  ;;  %v2231_v3 = vstv %s5412_s21 }
 0x278   : >> { %v2228_v21 = vadd.f32 %v2222_v25, %v2214_v41  ;;  %v2229_v17 = vadd.f32 %v2223_v43, %v2215_v38  ;;  %v2232_v16 = vadd.f32 %v2231_v3, %v2224_v39  ;;  %v2233_v45 = vadd.f32 %v2231_v3, %v2225_v19 }
 0x279   : >> { %v2234_v63 = vadd.f32 %v2231_v3, %v2226_v6  ;;  %v2235_v49 = vadd.f32 %v2231_v3, %v2227_v46  ;;  %v2245_v7 = vstv %s5430_s22  ;;  %v2259_v60 = vstv %s5432_s23  ;;  %v6375_v6 = vld [vmem:[#allocation17_spill] sm:$0xff] (%p783_p3) }
 0x27a   : >> { %v2236_v35 = vadd.f32 %v2231_v3, %v2228_v21  ;;  %v2237_v22 = vadd.f32 %v2231_v3, %v2229_v17  ;;  %v2238_v9 = vmax.f32 %v2232_v16, 0.0  ;;  %v2239_v23 = vmax.f32 %v2233_v45, 0.0  ;;  %v6376_v21 = vld [vmem:[#allocation20_spill] sm:$0xff] (%p783_p3)  ;;  %v6377_v16 = vld [vmem:[#allocation18_spill] sm:$0xff] (%p783_p3) }
 0x27b   : >> { %v2193_v20 = vadd.f32 %v2187_v5, %v6372_v27  ;;  %v2240_v15 = vmax.f32 %v2234_v63, 0.0  ;;  %v2241_v10 = vmax.f32 %v2235_v49, 0.0  ;;  %v2273_v37 = vstv %s5442_s13  ;;  %v6378_v63 = vld [vmem:[#allocation22_spill] sm:$0xff] (%p783_p3) }
 0x27c   : >> { %v2242_v24 = vmax.f32 %v2236_v35, 0.0  ;;  %v2243_v59 = vmax.f32 %v2237_v22, 0.0  ;;  %v2246_v34 = vmul.f32 %v2245_v7, %v2238_v9  ;;  %v2247_v51 = vmul.f32 %v2245_v7, %v2239_v23 }
 0x27d   : >> { %v2248_v11 = vmul.f32 %v2245_v7, %v2240_v15  ;;  %v2249_v62 = vmul.f32 %v2245_v7, %v2241_v10  ;;  %v2260_v33 = vmul.f32 %v2259_v60, %v2238_v9  ;;  %v2261_v56 = vmul.f32 %v2259_v60, %v2239_v23 }
 0x27e   : >> { %v2250_v53 = vmul.f32 %v2245_v7, %v2242_v24  ;;  %v2251_v58 = vmul.f32 %v2245_v7, %v2243_v59  ;;  %v2252_v44 = vadd.f32 %v2246_v34, %v5375_v0  ;;  %v2253_v32 = vadd.f32 %v2247_v51, %v5378_v13  ;;  %v6379_v7 = vld [vmem:[#allocation21_spill] sm:$0xff] (%p783_p3) }
 0x27f   : >> { %v2254_v5 = vadd.f32 %v2248_v11, %v5383_v50  ;;  %v2255_v42 = vadd.f32 %v2249_v62, %v5386_v18  ;;  %v2262_v31 = vmul.f32 %v2259_v60, %v2240_v15  ;;  %v2263_v41 = vmul.f32 %v2259_v60, %v2241_v10 }
 0x280   : >> { %v2256_v38 = vadd.f32 %v2250_v53, %v5389_v52  ;;  %v2257_v47 = vadd.f32 %v2251_v58, %v5392_v40  ;;  %v2264_v26 = vmul.f32 %v2259_v60, %v2242_v24  ;;  %v2265_v55 = vmul.f32 %v2259_v60, %v2243_v59  ;;  %2288 = vst [vmem:[%s2287_s18] sm:$0xff] %v2252_v44  ;;  %v6383_v58 = vld [vmem:[#allocation25_spill] sm:$0xff] (%p783_p3) }
 0x281   : >> { %2289 = vst [vmem:[%s2287_s18 + $0x8] sm:$0xff] %v2253_v32  ;;  %v2266_v61 = vadd.f32 %v2260_v33, %v5395_v30  ;;  %v2267_v0 = vadd.f32 %v2261_v56, %v5398_v14  ;;  %v2268_v13 = vadd.f32 %v2262_v31, %v5401_v12  ;;  %v2269_v50 = vadd.f32 %v2263_v41, %v5404_v1  ;;  %v6382_v56 = vld [vmem:[#allocation26_spill] sm:$0xff] (%p783_p3)  ;;  %v6384_v41 = vld [vmem:[#allocation28_spill] sm:$0xff] (%p783_p3) }
 0x282   : >> { %2290 = vst [vmem:[%s2287_s18 + $0x10] sm:$0xff] %v2254_v5  ;;  %2291 = vst [vmem:[%s2287_s18 + $0x18] sm:$0xff] %v2255_v42  ;;  %v2270_v18 = vadd.f32 %v2264_v26, %v5407_v54  ;;  %v2271_v52 = vadd.f32 %v2265_v55, %v5410_v4  ;;  %v2274_v40 = vmul.f32 %v2273_v37, %v2238_v9 }
 0x283   : >> { %v2275_v25 = vmul.f32 %v2273_v37, %v2239_v23  ;;  %2292 = vst [vmem:[%s2287_s18 + $0x20] sm:$0xff] %v2256_v38  ;;  %2293 = vst [vmem:[%s2287_s18 + $0x28] sm:$0xff] %v2257_v47  ;;  %v2276_v29 = vmul.f32 %v2273_v37, %v2240_v15  ;;  %v2277_v43 = vmul.f32 %v2273_v37, %v2241_v10  ;;  %785 = sbr.rel (!%p783_p3) target bundleno = 302 (0x12e), region = 97  ;;  %v6385_v47 = vld [vmem:[#allocation27_spill] sm:$0xff] (%p783_p3) }
 0x284   : >> { %v2278_v30 = vmul.f32 %v2273_v37, %v2242_v24  ;;  %v2279_v39 = vmul.f32 %v2273_v37, %v2243_v59  ;;  %2296 = vst [vmem:[%s2295_s4] sm:$0xff] %v2266_v61  ;;  %2297 = vst [vmem:[%s2295_s4 + $0x8] sm:$0xff] %v2267_v0  ;;  %v2280_v14 = vadd.f32 %v2274_v40, %v5415_v28  ;;  %v6373_v28 = vlaneseq (%p783_p3)  ;;  %v6380_v37 = vld [vmem:[#allocation24_spill] sm:$0xff] (%p783_p3)  ;;  %v6381_v59 = vld [vmem:[#allocation23_spill] sm:$0xff] (%p783_p3) }
 0x285   : >> { %2298 = vst [vmem:[%s2295_s4 + $0x10] sm:$0xff] %v2268_v13  ;;  %2299 = vst [vmem:[%s2295_s4 + $0x18] sm:$0xff] %v2269_v50  ;;  %v2281_v12 = vadd.f32 %v2275_v25, %v5418_v8  ;;  %v2282_v1 = vadd.f32 %v2276_v29, %v5421_v2  ;;  %v2283_v54 = vadd.f32 %v2277_v43, %v5424_v48  ;;  %v6374_v48 = vld [vmem:[#allocation19_spill] sm:$0xff] (%p783_p3)  ;;  %v6386_v50 = vld [vmem:[#allocation30_spill] sm:$0xff] (%p783_p3) }
 0x286   : >> { %2300 = vst [vmem:[%s2295_s4 + $0x20] sm:$0xff] %v2270_v18  ;;  %2301 = vst [vmem:[%s2295_s4 + $0x28] sm:$0xff] %v2271_v52  ;;  %v2284_v4 = vadd.f32 %v2278_v30, %v5449_v36  ;;  %v2285_v19 = vadd.f32 %v2279_v39, %v2193_v20  ;;  %v2311_v8 = vshrl.u32 (%p783_p3), %v6373_v28, 7  ;;  %v6387_v52 = vld [vmem:[#allocation29_spill] sm:$0xff] (%p783_p3)  ;;  %v6388_v39 = vld [vmem:[#allocation32_spill] sm:$0xff] (%p783_p3) }
 0x287   : >> { %2304 = vst [vmem:[%s2303_s16] sm:$0xff] %v2280_v14  ;;  %2305 = vst [vmem:[%s2303_s16 + $0x8] sm:$0xff] %v2281_v12  ;;  %v6389_v12 = vld [vmem:[#allocation31_spill] sm:$0xff] (%p783_p3) }
 0x288   : >> { %2306 = vst [vmem:[%s2303_s16 + $0x10] sm:$0xff] %v2282_v1  ;;  %2307 = vst [vmem:[%s2303_s16 + $0x18] sm:$0xff] %v2283_v54  ;;  %v5480_v2 = vmul.u32 (%p783_p3), 3840, %v2311_v8  ;;  %v6390_v8 = vld [vmem:[#allocation34_spill] sm:$0xff] (%p783_p3) }
 0x289   : >> { %2308 = vst [vmem:[%s2303_s16 + $0x20] sm:$0xff] %v2284_v4  ;;  %2309 = vst [vmem:[%s2303_s16 + $0x28] sm:$0xff] %v2285_v19 }
 0x28a   : > { %v5484_v57 = vadd.s32 %v5480_v2, %v6374_v48  ;;  %v2375_v36 = vld [vmem:[#allocation4 + $0x10] sm:$0xff]  ;;  %v5488_v46 = vadd.s32 %v5480_v2, %v6375_v6  ;;  %v2373_v3 = vld [vmem:[#allocation4] sm:$0xff]  ;;  %v5492_v17 = vadd.s32 %v5480_v2, %v6376_v21  ;;  %v5496_v45 = vadd.s32 %v5480_v2, %v6377_v16  ;;  %v2376_v35 = vld [vmem:[#allocation4 + $0x18] sm:$0xff] }
 0x28b   : > { %v5500_v49 = vadd.s32 %v5480_v2, %v6378_v63  ;;  %v5504_v60 = vadd.s32 %v5480_v2, %v6379_v7  ;;  %v2374_v22 = vld [vmem:[#allocation4 + $0x8] sm:$0xff]  ;;  %v2377_v10 = vld [vmem:[#allocation4 + $0x20] sm:$0xff]  ;;  %v5524_v24 = vadd.s32 %v5480_v2, %v6380_v37  ;;  %v5528_v34 = vadd.s32 %v5480_v2, %v6381_v59  ;;  %v2380_v62 = vld [vmem:[#allocation4 + $0x38] sm:$0xff] }
 0x28c   : > { %vm2345_vm4 = vcmp.lt.s32.totalorder %v5484_v57, 30135  ;;  %vm6274_vm5 = vcmp.lt.s32.totalorder %v5488_v46, 30135  ;;  %vm2346_vm6 = vcmp.lt.s32.totalorder %v5492_v17, 30135  ;;  %vm6279_vm7 = vcmp.lt.s32.totalorder %v5496_v45, 30135  ;;  %v2378_v15 = vld [vmem:[#allocation4 + $0x28] sm:$0xff]  ;;  %v2379_v33 = vld [vmem:[#allocation4 + $0x30] sm:$0xff] }
 0x28d   : > { %v2405_v9 = vsel %vm2345_vm4, %v2375_v36, 0.0  ;;  %v2403_v23 = vsel %vm6274_vm5, %v2373_v3, 0.0  ;;  %v2406_v27 = vsel %vm2346_vm6, %v2376_v35, 0.0  ;;  %v2404_v20 = vsel %vm6279_vm7, %v2374_v22, 0.0  ;;  %v2382_v42 = vld [vmem:[#allocation4 + $0x48] sm:$0xff]  ;;  %v2381_v31 = vld [vmem:[#allocation4 + $0x40] sm:$0xff] }
 0x28e   : > { %2557 = vrot.lane.b32.xlu1 %v2405_v9, %s3405_s27  ;;  %2553 = vrot.lane.b32.xlu0 %v2403_v23, %s3405_s27  ;;  %vm6278_vm8 = vcmp.lt.s32.totalorder %v5500_v49, 30135  ;;  %vm2347_vm9 = vcmp.lt.s32.totalorder %v5504_v60, 30135  ;;  %vm6276_vm10 = vcmp.lt.s32.totalorder %v5524_v24, 30135  ;;  %vm2349_vm11 = vcmp.lt.s32.totalorder %v5528_v34, 30135  ;;  %v2384_v0 = vld [vmem:[#allocation4 + $0x58] sm:$0xff]  ;;  %v2383_v13 = vld [vmem:[#allocation4 + $0x50] sm:$0xff] }
 0x28f   : > { %v2408_v51 = vsel %vm6278_vm8, %v2378_v15, 0.0  ;;  %v2407_v11 = vsel %vm2347_vm9, %v2377_v10, 0.0  ;;  %v5540_v53 = vadd.s32 %v5480_v2, %v6382_v56  ;;  %v5544_v44 = vadd.s32 %v5480_v2, %v6383_v58  ;;  %v2386_v43 = vld [vmem:[#allocation4 + $0x68] sm:$0xff]  ;;  %v2385_v30 = vld [vmem:[#allocation4 + $0x60] sm:$0xff]  ;;  %v2388_v19 = vld [vmem:[#allocation4 + $0x78] sm:$0xff] }
 0x290   : > { %v2410_v32 = vsel %vm6276_vm10, %v2380_v62, 0.0  ;;  %v2409_v5 = vsel %vm2349_vm11, %v2379_v33, 0.0  ;;  %v5556_v38 = vadd.s32 %v5480_v2, %v6384_v41  ;;  %v5560_v26 = vadd.s32 %v5480_v2, %v6385_v47  ;;  %v2387_v28 = vld [vmem:[#allocation4 + $0x70] sm:$0xff]  ;;  %v2390_v63 = vld [vmem:[#allocation4 + $0x88] sm:$0xff]  ;;  %v2389_v7 = vld [vmem:[#allocation4 + $0x80] sm:$0xff] }
 0x291   : > { %vm6277_vm12 = vcmp.lt.s32.totalorder %v5540_v53, 30135  ;;  %vm2351_vm13 = vcmp.lt.s32.totalorder %v5544_v44, 30135  ;;  %v5572_v18 = vadd.s32 %v5480_v2, %v6386_v50  ;;  %v5576_v40 = vadd.s32 %v5480_v2, %v6387_v52  ;;  %v6391_v36 = vld [vmem:[#allocation33_spill] sm:$0xff]  ;;  %v6392_v35 = vld [vmem:[#allocation36_spill] sm:$0xff]  ;;  %v6393_v9 = vld [vmem:[#allocation35_spill] sm:$0xff] }
 0x292   : > { %2559 = vrot.lane.b32.xlu1 %v2406_v27, %s3405_s27  ;;  %2555 = vrot.lane.b32.xlu0 %v2404_v20, %s3405_s27  ;;  %v2412_v55 = vsel %vm6277_vm12, %v2382_v42, 0.0  ;;  %v2411_v61 = vsel %vm2351_vm13, %v2381_v31, 0.0  ;;  %vm6263_vm14 = vcmp.lt.s32.totalorder %v5556_v38, 30135  ;;  %vm2353_vm15 = vcmp.lt.s32.totalorder %v5560_v26, 30135  ;;  %v2392_v15 = vld [vmem:[#allocation4 + $0x98] sm:$0xff]  ;;  %v2391_v10 = vld [vmem:[#allocation4 + $0x90] sm:$0xff] }
 0x293   : > { %v2414_v25 = vsel %vm6263_vm14, %v2384_v0, 0.0  ;;  %v2413_v29 = vsel %vm2353_vm15, %v2383_v13, 0.0  ;;  %vm6262_vm3 = vcmp.lt.s32.totalorder %v5572_v18, 30135  ;;  %vm2355_vm1 = vcmp.lt.s32.totalorder %v5576_v40, 30135  ;;  %v6394_v37 = vld [vmem:[#allocation38_spill] sm:$0xff]  ;;  %v2394_v56 = vld [vmem:[#allocation4 + $0xa8] sm:$0xff] }
 0x294   : > { %v5588_v14 = vadd.s32 %v5480_v2, %v6388_v39  ;;  %v5592_v1 = vadd.s32 %v5480_v2, %v6389_v12  ;;  %v2416_v54 = vsel %vm6262_vm3, %v2386_v43, 0.0  ;;  %v2415_v4 = vsel %vm2355_vm1, %v2385_v30, 0.0  ;;  %v2393_v58 = vld [vmem:[#allocation4 + $0xa0] sm:$0xff]  ;;  %v6398_v0 = vld [vmem:[#allocation46_spill] sm:$0xff]  ;;  %v6399_v50 = vld [vmem:[#allocation41_spill] sm:$0xff] }
 0x295   : > { %v5604_v48 = vadd.s32 %v5480_v2, %v6390_v8  ;;  %v5608_v3 = vadd.s32 %v5480_v2, %v6391_v36  ;;  %v5620_v22 = vadd.s32 %v5480_v2, %v6392_v35  ;;  %v5624_v23 = vadd.s32 %v5480_v2, %v6393_v9  ;;  %v6397_v42 = vld [vmem:[#allocation39_spill] sm:$0xff]  ;;  %v2402_v43 = vld [vmem:[#allocation4 + $0xe8] sm:$0xff]  ;;  %v6402_v8 = vld [vmem:[#allocation42_spill] sm:$0xff] }
 0x296   : > { %2563 = vrot.lane.b32.xlu1 %v2408_v51, %s3405_s27  ;;  %2561 = vrot.lane.b32.xlu0 %v2407_v11, %s3405_s27  ;;  %vm6264_vm2 = vcmp.lt.s32.totalorder %v5588_v14, 30135  ;;  %vm6265_vm0 = vcmp.lt.s32.totalorder %v5592_v1, 30135  ;;  %v5636_v59 = vadd.s32 %v5480_v2, %v6394_v37  ;;  %v6395_v51 = vld [vmem:[#allocation37_spill] sm:$0xff]  ;;  %v5656_v31 = vadd.s32 %v5480_v2, %v6397_v42  ;;  %v2397_v30 = vld [vmem:[#allocation4 + $0xc0] sm:$0xff] }
 0x297   : > { %v2418_v21 = vsel %vm6264_vm2, %v2388_v19, 0.0  ;;  %v2417_v16 = vsel %vm6265_vm0, %v2387_v28, 0.0  ;;  %vm6266_vm3 = vcmp.lt.s32.totalorder %v5604_v48, 30135  ;;  %vm6267_vm14 = vcmp.lt.s32.totalorder %v5608_v3, 30135  ;;  %v6400_v19 = vld [vmem:[#allocation43_spill] sm:$0xff]  ;;  %v6404_v35 = vld [vmem:[#allocation45_spill] sm:$0xff] }
 0x298   : > { %v2420_v27 = vsel %vm6266_vm3, %v2390_v63, 0.0  ;;  %v2419_v20 = vsel %vm6267_vm14, %v2389_v7, 0.0  ;;  %vm6268_vm2 = vcmp.lt.s32.totalorder %v5620_v22, 30135  ;;  %vm6269_vm0 = vcmp.lt.s32.totalorder %v5624_v23, 30135  ;;  %v2399_v63 = vld [vmem:[#allocation4 + $0xd0] sm:$0xff]  ;;  %v2398_v7 = vld [vmem:[#allocation4 + $0xc8] sm:$0xff] }
 0x299   : > { %v5640_v11 = vadd.s32 %v5480_v2, %v6395_v51  ;;  %v2422_v62 = vsel %vm6268_vm2, %v2392_v15, 0.0  ;;  %v2421_v33 = vsel %vm6269_vm0, %v2391_v10, 0.0  ;;  %vm6270_vm3 = vcmp.lt.s32.totalorder %v5636_v59, 30135  ;;  %v2401_v37 = vld [vmem:[#allocation4 + $0xe0] sm:$0xff]  ;;  %v2400_v51 = vld [vmem:[#allocation4 + $0xd8] sm:$0xff]  ;;  %v2441_v60 = vld [vmem:[#allocation5 + $0x40] sm:$0xff] }
 0x29a   : > { %2567 = vrot.lane.b32.xlu1 %v2410_v32, %s3405_s27  ;;  %2565 = vrot.lane.b32.xlu0 %v2409_v5, %s3405_s27  ;;  %v6396_v32 = vld [vmem:[#allocation40_spill] sm:$0xff]  ;;  %v2424_v41 = vsel %vm6270_vm3, %v2394_v56, 0.0  ;;  %vm2365_vm0 = vcmp.lt.s32.totalorder %v5656_v31, 30135  ;;  %v5668_v13 = vadd.s32 %v5480_v2, %v6398_v0  ;;  %v5672_v52 = vadd.s32 %v5480_v2, %v6399_v50  ;;  %v2497_v42 = vld [vmem:[#allocation6 + $0x20] sm:$0xff]  ;;  %v2445_v44 = vld [vmem:[#allocation5 + $0x60] sm:$0xff] }
 0x29b   : > { %vm6271_vm14 = vcmp.lt.s32.totalorder %v5640_v11, 30135  ;;  %v5652_v5 = vadd.s32 %v5480_v2, %v6396_v32  ;;  %v5690_v28 = vadd.s32 %v5480_v2, %v6400_v19  ;;  %v5694_v36 = vadd.s32 %v5480_v2, %v6402_v8  ;;  %v2494_v56 = vld [vmem:[#allocation6 + $0x8] sm:$0xff]  ;;  %v2443_v34 = vld [vmem:[#allocation5 + $0x50] sm:$0xff]  ;;  %v2449_v40 = vld [vmem:[#allocation5 + $0x80] sm:$0xff] }
 0x29c   : > { %v2423_v47 = vsel %vm6271_vm14, %v2393_v58, 0.0  ;;  %vm6275_vm3 = vcmp.lt.s32.totalorder %v5668_v13, 30135  ;;  %vm6273_vm14 = vcmp.lt.s32.totalorder %v5672_v52, 30135  ;;  %v5706_v9 = vadd.s32 %v5480_v2, %v6404_v35  ;;  %v2498_v50 = vld [vmem:[#allocation6 + $0x28] sm:$0xff]  ;;  %v2507_v35 = vld [vmem:[#allocation6 + $0x70] sm:$0xff]  ;;  %v2447_v26 = vld [vmem:[#allocation5 + $0x70] sm:$0xff] }
 0x29d   : > { %vm6272_vm2 = vcmp.lt.s32.totalorder %v5652_v5, 30135  ;;  %v2432_v39 = vsel %vm6275_vm3, %v2402_v43, 0.0  ;;  %v2427_v12 = vsel %vm6273_vm14, %v2397_v30, 0.0  ;;  %6401 = vst [vmem:[#allocation19_spill] sm:$0xff] %v5690_v28  ;;  %6403 = vst [vmem:[#allocation17_spill] sm:$0xff] %v5694_v36  ;;  %vm2368_vm14 = vcmp.lt.s32.totalorder %v5694_v36, 30135 }
 0x29e   : > { %2571 = vrot.lane.b32.xlu1 %v2412_v55, %s3405_s27  ;;  %2569 = vrot.lane.b32.xlu0 %v2411_v61, %s3405_s27  ;;  %v2396_v55 = vld [vmem:[#allocation4 + $0xb8] sm:$0xff]  ;;  %v2395_v61 = vld [vmem:[#allocation4 + $0xb0] sm:$0xff]  ;;  %6405 = vst [vmem:[#allocation20_spill] sm:$0xff] %v5706_v9  ;;  %v2428_v10 = vsel %vm2368_vm14, %v2398_v7, 0.0  ;;  %v2524_v32 = vsel %vm6279_vm7, %v2494_v56, 0.0  ;;  %v2501_v43 = vld [vmem:[#allocation6 + $0x40] sm:$0xff] }
 0x29f   : > { %v2500_v30 = vld [vmem:[#allocation6 + $0x38] sm:$0xff]  ;;  %vm6412_vm7 = vcmp.lt.s32.totalorder %v5588_v14, 30135  ;;  %v2510_v56 = vld [vmem:[#allocation6 + $0x88] sm:$0xff] }
 0x2a2   : > { %2575 = vrot.lane.b32.xlu1 %v2414_v25, %s3405_s27  ;;  %2573 = vrot.lane.b32.xlu0 %v2413_v29, %s3405_s27  ;;  %v2426_v25 = vsel %vm6272_vm2, %v2396_v55, 0.0  ;;  %v2425_v29 = vsel %vm2365_vm0, %v2395_v61, 0.0  ;;  %vm2369_vm2 = vcmp.lt.s32.totalorder %v5690_v28, 30135  ;;  %v2499_v61 = vld [vmem:[#allocation6 + $0x30] sm:$0xff] }
 0x2a3   : > { %v2429_v15 = vsel %vm2369_vm2, %v2399_v63, 0.0 }
 0x2a6   : > { %2579 = vrot.lane.b32.xlu1 %v2416_v54, %s3405_s27  ;;  %2577 = vrot.lane.b32.xlu0 %v2415_v4, %s3405_s27  ;;  %v2522_v54 = vld [vmem:[#allocation6 + $0xe8] sm:$0xff]  ;;  %v2493_v4 = vld [vmem:[#allocation6] sm:$0xff] }
 0x2aa   : > { %2583 = vrot.lane.b32.xlu1 %v2418_v21, %s3405_s27  ;;  %2581 = vrot.lane.b32.xlu0 %v2417_v16, %s3405_s27  ;;  %v2552_v21 = vsel %vm6275_vm3, %v2522_v54, 0.0  ;;  %v2523_v16 = vsel %vm6274_vm5, %v2493_v4, 0.0  ;;  %vm2371_vm5 = vcmp.lt.s32.totalorder %v5706_v9, 30135  ;;  %v2503_v54 = vld [vmem:[#allocation6 + $0x50] sm:$0xff]  ;;  %v2502_v4 = vld [vmem:[#allocation6 + $0x48] sm:$0xff]  ;;  %v2462_v9 = vld [vmem:[#allocation5 + $0xe8] sm:$0xff] }
 0x2ab   : > { %v2533_v19 = vsel %vm2353_vm15, %v2503_v54, 0.0  ;;  %v2532_v8 = vsel %vm6277_vm12, %v2502_v4, 0.0  ;;  %vm6409_vm12 = vcmp.lt.s32.totalorder %v5592_v1, 30135  ;;  %v2519_v54 = vld [vmem:[#allocation6 + $0xd0] sm:$0xff]  ;;  %v2518_v4 = vld [vmem:[#allocation6 + $0xc8] sm:$0xff] }
 0x2ae   : > { %2587 = vrot.lane.b32.xlu1 %v2420_v27, %s3405_s27  ;;  %2585 = vrot.lane.b32.xlu0 %v2419_v20, %s3405_s27  ;;  %v6406_v27 = vld [vmem:[#allocation44_spill] sm:$0xff] }
 0x2af   : > { %v5710_v20 = vadd.s32 %v5480_v2, %v6406_v27  ;;  %v2431_v2 = vsel %vm2371_vm5, %v2401_v37, 0.0  ;;  %v2506_v27 = vld [vmem:[#allocation6 + $0x68] sm:$0xff]  ;;  %v2509_v37 = vld [vmem:[#allocation6 + $0x80] sm:$0xff] }
 0x2b1   : > { %6407 = vst [vmem:[#allocation18_spill] sm:$0xff] %v5710_v20  ;;  %vm2370_vm3 = vcmp.lt.s32.totalorder %v5710_v20, 30135  ;;  %v2433_v20 = vld [vmem:[#allocation5] sm:$0xff] }
 0x2b2   : > { %2591 = vrot.lane.b32.xlu1 %v2422_v62, %s3405_s27  ;;  %2589 = vrot.lane.b32.xlu0 %v2421_v33, %s3405_s27  ;;  %v2430_v62 = vsel %vm2370_vm3, %v2400_v51, 0.0  ;;  %v2495_v33 = vld [vmem:[#allocation6 + $0x10] sm:$0xff]  ;;  %v2508_v51 = vld [vmem:[#allocation6 + $0x78] sm:$0xff] }
 0x2b3   : > { %v2525_v58 = vsel %vm2345_vm4, %v2495_v33, 0.0  ;;  %v2511_v33 = vld [vmem:[#allocation6 + $0x90] sm:$0xff] }
 0x2b6   : > { %2595 = vrot.lane.b32.xlu1 %v2424_v41, %s3405_s27  ;;  %2593 = vrot.lane.b32.xlu0 %v2423_v47, %s3405_s27  ;;  %v2496_v41 = vld [vmem:[#allocation6 + $0x18] sm:$0xff]  ;;  %v2527_v47 = vsel %vm2347_vm9, %v2497_v42, 0.0  ;;  %v2513_v42 = vld [vmem:[#allocation6 + $0xa0] sm:$0xff] }
 0x2b7   : > { %v2526_v55 = vsel %vm2346_vm6, %v2496_v41, 0.0  ;;  %v2512_v41 = vld [vmem:[#allocation6 + $0x98] sm:$0xff] }
 0x2ba   : > { %2599 = vrot.lane.b32.xlu1 %v2426_v25, %s3405_s27  ;;  %2597 = vrot.lane.b32.xlu0 %v2425_v29, %s3405_s27  ;;  %v2529_v25 = vsel %vm2349_vm11, %v2499_v61, 0.0  ;;  %v2528_v29 = vsel %vm6278_vm8, %v2498_v50, 0.0  ;;  %vm6410_vm8 = vcmp.lt.s32.totalorder %v5572_v18, 30135  ;;  %v2515_v61 = vld [vmem:[#allocation6 + $0xb0] sm:$0xff]  ;;  %v2514_v50 = vld [vmem:[#allocation6 + $0xa8] sm:$0xff] }
 0x2be   : > { %2611 = vrot.lane.b32.xlu1 %v2432_v39, %s3405_s27  ;;  %2601 = vrot.lane.b32.xlu0 %v2427_v12, %s3405_s27  ;;  %v2531_v39 = vsel %vm2351_vm13, %v2501_v43, 0.0  ;;  %v2530_v12 = vsel %vm6276_vm10, %v2500_v30, 0.0  ;;  %vm6408_vm10 = vcmp.lt.s32.totalorder %v5556_v38, 30135  ;;  %v2517_v43 = vld [vmem:[#allocation6 + $0xc0] sm:$0xff]  ;;  %v2516_v30 = vld [vmem:[#allocation6 + $0xb8] sm:$0xff] }
 0x2c2   : > { %2791 = vrot.lane.b32.xlu1 %v2552_v21, %s3406_s28  ;;  %2733 = vrot.lane.b32.xlu0 %v2523_v16, %s3406_s28  ;;  %v2505_v21 = vld [vmem:[#allocation6 + $0x60] sm:$0xff]  ;;  %v2504_v16 = vld [vmem:[#allocation6 + $0x58] sm:$0xff] }
 0x2c3   : > { %v2535_v63 = vsel %vm2355_vm1, %v2505_v21, 0.0  ;;  %v2534_v7 = vsel %vm6408_vm10, %v2504_v16, 0.0  ;;  %vm6411_vm10 = vcmp.lt.s32.totalorder %v5608_v3, 30135  ;;  %v2521_v21 = vld [vmem:[#allocation6 + $0xe0] sm:$0xff]  ;;  %v2520_v16 = vld [vmem:[#allocation6 + $0xd8] sm:$0xff] }
 0x2c6   : > { %2605 = vrot.lane.b32.xlu1 %v2429_v15, %s3405_s27  ;;  %2603 = vrot.lane.b32.xlu0 %v2428_v10, %s3405_s27  ;;  %v2537_v15 = vsel %vm6409_vm12, %v2507_v35, 0.0  ;;  %v2536_v10 = vsel %vm6410_vm8, %v2506_v27, 0.0  ;;  %vm6413_vm8 = vcmp.lt.s32.totalorder %v5624_v23, 30135  ;;  %vm6414_vm12 = vcmp.lt.s32.totalorder %v5604_v48, 30135 }
 0x2ca   : > { %2609 = vrot.lane.b32.xlu1 %v2431_v2, %s3405_s27  ;;  %2607 = vrot.lane.b32.xlu0 %v2430_v62, %s3405_s27  ;;  %v2539_v2 = vsel %vm6411_vm10, %v2509_v37, 0.0  ;;  %v2538_v62 = vsel %vm6412_vm7, %v2508_v51, 0.0  ;;  %vm6415_vm7 = vcmp.lt.s32.totalorder %v5640_v11, 30135  ;;  %vm6416_vm10 = vcmp.lt.s32.totalorder %v5620_v22, 30135 }
 0x2ce   : > { %2737 = vrot.lane.b32.xlu1 %v2525_v58, %s3406_s28  ;;  %2735 = vrot.lane.b32.xlu0 %v2524_v32, %s3406_s28  ;;  %v2541_v58 = vsel %vm6413_vm8, %v2511_v33, 0.0  ;;  %v2540_v32 = vsel %vm6414_vm12, %v2510_v56, 0.0  ;;  %vm6417_vm8 = vcmp.lt.s32.totalorder %v5636_v59, 30135  ;;  %vm6418_vm12 = vcmp.lt.s32.totalorder %v5672_v52, 30135  ;;  %v2437_v33 = vld [vmem:[#allocation5 + $0x20] sm:$0xff] }
 0x2cf   : > { %v2467_v17 = vsel %vm2347_vm9, %v2437_v33, 0.0 }
 0x2d2   : > { %2741 = vrot.lane.b32.xlu1 %v2527_v47, %s3406_s28  ;;  %2739 = vrot.lane.b32.xlu0 %v2526_v55, %s3406_s28  ;;  %v2543_v47 = vsel %vm6415_vm7, %v2513_v42, 0.0  ;;  %v2542_v55 = vsel %vm6416_vm10, %v2512_v41, 0.0  ;;  %vm6419_vm7 = vcmp.lt.s32.totalorder %v5652_v5, 30135  ;;  %vm6420_vm10 = vcmp.lt.s32.totalorder %v6375_v6, 1 }
 0x2d6   : > { %2745 = vrot.lane.b32.xlu1 %v2529_v25, %s3406_s28  ;;  %2743 = vrot.lane.b32.xlu0 %v2528_v29, %s3406_s28  ;;  %v2545_v25 = vsel %vm2365_vm0, %v2515_v61, 0.0  ;;  %v2544_v29 = vsel %vm6417_vm8, %v2514_v50, 0.0  ;;  %vm6421_vm8 = vmmov %vm6420_vm10 }
 0x2da   : > { %2749 = vrot.lane.b32.xlu1 %v2531_v39, %s3406_s28  ;;  %2747 = vrot.lane.b32.xlu0 %v2530_v12, %s3406_s28  ;;  %v2547_v39 = vsel %vm6418_vm12, %v2517_v43, 0.0  ;;  %v2546_v12 = vsel %vm6419_vm7, %v2516_v30, 0.0  ;;  %vm6429_vm12 = vcmp.lt.s32.totalorder %v5608_v3, 30135  ;;  %v2453_v3 = vld [vmem:[#allocation5 + $0xa0] sm:$0xff] }
 0x2de   : > { %2753 = vrot.lane.b32.xlu1 %v2533_v19, %s3406_s28  ;;  %2751 = vrot.lane.b32.xlu0 %v2532_v8, %s3406_s28  ;;  %v2549_v19 = vsel %vm2369_vm2, %v2519_v54, 0.0  ;;  %v2548_v8 = vsel %vm2368_vm14, %v2518_v4, 0.0 }
 0x2e2   : > { %2757 = vrot.lane.b32.xlu1 %v2535_v63, %s3406_s28  ;;  %2755 = vrot.lane.b32.xlu0 %v2534_v7, %s3406_s28  ;;  %v2551_v63 = vsel %vm2371_vm5, %v2521_v21, 0.0  ;;  %v2550_v7 = vsel %vm2370_vm3, %v2520_v16, 0.0 }
 0x2e6   : > { %2761 = vrot.lane.b32.xlu1 %v2537_v15, %s3406_s28  ;;  %2759 = vrot.lane.b32.xlu0 %v2536_v10, %s3406_s28  ;;  %v2436_v15 = vld [vmem:[#allocation5 + $0x18] sm:$0xff]  ;;  %v2435_v10 = vld [vmem:[#allocation5 + $0x10] sm:$0xff] }
 0x2e7   : > { %v2466_v37 = vsel %vm2346_vm6, %v2436_v15, 0.0  ;;  %v2465_v51 = vsel %vm2345_vm4, %v2435_v10, 0.0  ;;  %vm6422_vm4 = vmmov %vm6421_vm8 }
 0x2e8   : > { %vm6423_vm6 = vmmov %vm6422_vm4 }
 0x2e9   : > { %vm6424_vm9 = vmmov %vm6422_vm4 }
 0x2ea   : > { %2765 = vrot.lane.b32.xlu1 %v2539_v2, %s3406_s28  ;;  %2763 = vrot.lane.b32.xlu0 %v2538_v62, %s3406_s28 }
 0x2ee   : > { %2769 = vrot.lane.b32.xlu1 %v2541_v58, %s3406_s28  ;;  %2767 = vrot.lane.b32.xlu0 %v2540_v32, %s3406_s28 }
 0x2f2   : > { %2773 = vrot.lane.b32.xlu1 %v2543_v47, %s3406_s28  ;;  %2771 = vrot.lane.b32.xlu0 %v2542_v55, %s3406_s28  ;;  %v2439_v47 = vld [vmem:[#allocation5 + $0x30] sm:$0xff] }
 0x2f3   : > { %v2469_v50 = vsel %vm2349_vm11, %v2439_v47, 0.0  ;;  %vm6425_vm11 = vmmov %vm6422_vm4  ;;  %v2479_v47 = vsel %vm6429_vm12, %v2449_v40, 0.0  ;;  %vm6449_vm12 = vcmp.lt.s32.totalorder %v5488_v46, 30135 }
 0x2f6   : > { %2777 = vrot.lane.b32.xlu1 %v2545_v25, %s3406_s28  ;;  %2775 = vrot.lane.b32.xlu0 %v2544_v29, %s3406_s28 }
 0x2fa   : > { %2781 = vrot.lane.b32.xlu1 %v2547_v39, %s3406_s28  ;;  %2779 = vrot.lane.b32.xlu0 %v2546_v12, %s3406_s28  ;;  %v2471_v39 = vsel %vm2351_vm13, %v2441_v60, 0.0  ;;  %vm6426_vm13 = vmmov %vm6422_vm4 }
 0x2fe   : > { %2785 = vrot.lane.b32.xlu1 %v2549_v19, %s3406_s28  ;;  %2783 = vrot.lane.b32.xlu0 %v2548_v8, %s3406_s28  ;;  %v2473_v8 = vsel %vm2353_vm15, %v2443_v34, 0.0  ;;  %vm6427_vm15 = vcmp.lt.s32.totalorder %v5592_v1, 30135  ;;  %v2451_v1 = vld [vmem:[#allocation5 + $0x90] sm:$0xff] }
 0x300   : > { %v2558_v35 = vpop.permute.xlu1 %2557  ;;  %v5810_v27 = vpop.permute.xlu0 %2553 }
 0x302   : > { %2789 = vrot.lane.b32.xlu1 %v2551_v63, %s3406_s28  ;;  %2787 = vrot.lane.b32.xlu0 %v2550_v7, %s3406_s28 }
 0x304   : > { %v2560_v2 = vpop.permute.xlu1 %2559  ;;  %v5818_v62 = vpop.permute.xlu0 %2555 }
 0x305   : > { %v2639_v56 = vsel %vm6420_vm10, %v2558_v35, %v2560_v2  ;;  %v2640_v58 = vsel %vm6421_vm8, %v5818_v62, %v2558_v35  ;;  %v2475_v35 = vsel %vm2355_vm1, %v2445_v44, 0.0  ;;  %vm6428_vm1 = vmmov %vm6422_vm4  ;;  %vm6431_vm10 = vcmp.lt.s32.totalorder %v5624_v23, 30135  ;;  %v2455_v23 = vld [vmem:[#allocation5 + $0xb0] sm:$0xff] }
 0x306   : > { %v5825_v32 = vadd.f32 %v2639_v56, %v2466_v37  ;;  %v5827_v42 = vadd.f32 %v2640_v58, %v2465_v51  ;;  %vm6430_vm7 = vmmov %vm6428_vm1  ;;  %v2485_v40 = vsel %vm2365_vm0, %v2455_v23, 0.0 }
 0x307   : > { %vm6432_vm8 = vmmov %vm6428_vm1 }
 0x308   : > { %v5831_v57 = vpop.permute.xlu1 %2563  ;;  %v5833_v41 = vpop.permute.xlu0 %2561  ;;  %vm6441_vm0 = vmmov %vm6428_vm1 }
 0x309   : > { %v2638_v55 = vsel %vm6422_vm4, %v2560_v2, %v5833_v41  ;;  %v2477_v2 = vsel %vm6427_vm15, %v2447_v26, 0.0  ;;  %vm6433_vm4 = vcmp.lt.s32.totalorder %v5640_v11, 30135  ;;  %v2457_v11 = vld [vmem:[#allocation5 + $0xc0] sm:$0xff]  ;;  %vm6445_vm15 = vcmp.lt.s32.totalorder %v6375_v6, 127 }
 0x30a   : > { %v5838_v61 = vadd.f32 %v2638_v55, %v2467_v17 }
 0x30c   : > { %v5842_v25 = vpop.permute.xlu1 %2567  ;;  %v5844_v29 = vpop.permute.xlu0 %2565 }
 0x30d   : > { %v2636_v43 = vsel %vm6423_vm6, %v5831_v57, %v5844_v29  ;;  %vm6434_vm6 = vmmov %vm6428_vm1 }
 0x30e   : > { %v5850_v30 = vadd.f32 %v2636_v43, %v2469_v50 }
 0x310   : > { %v5854_v12 = vpop.permute.xlu1 %2571  ;;  %v5856_v54 = vpop.permute.xlu0 %2569 }
 0x311   : > { %v2634_v4 = vsel %vm6424_vm9, %v5842_v25, %v5856_v54  ;;  %vm6437_vm9 = vmmov %vm6428_vm1 }
 0x312   : > { %v5862_v19 = vadd.f32 %v2634_v4, %v2471_v39  ;;  %v2481_v39 = vsel %vm6431_vm10, %v2451_v1, 0.0  ;;  %vm6452_vm10 = vmmov %vm6441_vm0 }
 0x314   : > { %v5866_v21 = vpop.permute.xlu1 %2575  ;;  %v5868_v16 = vpop.permute.xlu0 %2573 }
 0x315   : > { %v2632_v63 = vsel %vm6425_vm11, %v5854_v12, %v5868_v16  ;;  %vm6439_vm11 = vcmp.lt.s32.totalorder %v5672_v52, 30135 }
 0x316   : > { %v5874_v7 = vadd.f32 %v2632_v63, %v2473_v8  ;;  %v2483_v63 = vsel %vm6433_vm4, %v2453_v3, 0.0  ;;  %vm6454_vm4 = vmmov %vm6441_vm0 }
 0x318   : > { %v5878_v15 = vpop.permute.xlu1 %2579  ;;  %v5880_v10 = vpop.permute.xlu0 %2577 }
 0x319   : > { %v2630_v37 = vsel %vm6426_vm13, %v5866_v21, %v5880_v10  ;;  %vm6444_vm13 = vmmov %vm6441_vm0 }
 0x31a   : > { %v5886_v51 = vadd.f32 %v2630_v37, %v2475_v35 }
 0x31c   : > { %v5890_v33 = vpop.permute.xlu1 %2583  ;;  %v5892_v56 = vpop.permute.xlu0 %2581 }
 0x31d   : > { %v2628_v58 = vsel %vm6428_vm1, %v5878_v15, %v5892_v56  ;;  %vm6448_vm1 = vcmp.lt.s32.totalorder %v5668_v13, 30135 }
 0x31e   : > { %v5898_v17 = vadd.f32 %v2628_v58, %v2477_v2  ;;  %v2492_v28 = vsel %vm6448_vm1, %v2462_v9, 0.0 }
 0x320   : > { %v5902_v55 = vpop.permute.xlu1 %2587  ;;  %v5904_v50 = vpop.permute.xlu0 %2585 }
 0x321   : > { %v2626_v60 = vsel %vm6430_vm7, %v5890_v33, %v5904_v50  ;;  %vm6451_vm7 = vcmp.lt.s32.totalorder %v5496_v45, 30135 }
 0x322   : > { %v5910_v43 = vadd.f32 %v2626_v60, %v2479_v47 }
 0x324   : > { %v5914_v34 = vpop.permute.xlu1 %2591  ;;  %v5916_v4 = vpop.permute.xlu0 %2589 }
 0x325   : > { %v2624_v8 = vsel %vm6432_vm8, %v5902_v55, %v5916_v4  ;;  %vm6453_vm8 = vcmp.eq.s32.totalorder %v6375_v6, 0 }
 0x326   : > { %v5922_v44 = vadd.f32 %v2624_v8, %v2481_v39  ;;  %v2487_v39 = vsel %vm6439_vm11, %v2457_v11, 0.0 }
 0x328   : > { %v5926_v35 = vpop.permute.xlu1 %2595  ;;  %v5928_v26 = vpop.permute.xlu0 %2593 }
 0x329   : > { %v2622_v37 = vsel %vm6434_vm6, %v5914_v34, %v5928_v26  ;;  %vm6455_vm6 = vcmp.eq.s32.totalorder %v6398_v0, 3839 }
 0x32a   : > { %v5934_v2 = vadd.f32 %v2622_v37, %v2483_v63 }
 0x32c   : > { %6435 = vst [vmem:[#allocation22_spill] sm:$0xff] %v5934_v2  ;;  %v5938_v58 = vpop.permute.xlu1 %2599  ;;  %v5940_v47 = vpop.permute.xlu0 %2597 }
 0x32d   : > { %6436 = vst [vmem:[#allocation21_spill] sm:$0xff] %v5940_v47  ;;  %v2620_v1 = vsel %vm6437_vm9, %v5926_v35, %v5940_v47  ;;  %vm6456_vm9 = vmmov %vm6445_vm15 }
 0x32e   : > { %v5946_v60 = vadd.f32 %v2620_v1, %v2485_v40  ;;  %vm6457_vm11 = vmmov %vm6456_vm9 }
 0x32f   : > { %vm6461_vm1 = vmmov %vm6456_vm9 }
 0x330   : > { %6438 = vst [vmem:[#allocation24_spill] sm:$0xff] %v5946_v60  ;;  %v2612_v3 = vpop.permute.xlu1 %2611  ;;  %v5950_v8 = vpop.permute.xlu0 %2601  ;;  %v2463_v60 = vsel %vm6449_vm12, %v2433_v20, 0.0  ;;  %v5991_v20 = vstv %s2913_s24  ;;  %vm6462_vm12 = vcmp.lt.s32.totalorder %v5524_v24, 30135 }
 0x331   : > { %6440 = vst [vmem:[#allocation23_spill] sm:$0xff] %v5950_v8  ;;  %v2618_v31 = vsel %vm6441_vm0, %v5938_v58, %v5950_v8  ;;  %v2642_v40 = vsel %vm6444_vm13, %v2612_v3, %v5810_v27  ;;  %vm6458_vm0 = vcmp.lt.s32.totalorder %v5500_v49, 30135  ;;  %vm6459_vm13 = vmmov %vm6454_vm4 }
 0x332   : > { %v5956_v63 = vadd.f32 %v2618_v31, %v2487_v39  ;;  %v2643_v39 = vrot.slane %v2642_v40, 7  ;;  %v2434_v31 = vld [vmem:[#allocation5 + $0x8] sm:$0xff] }
 0x334   : > { %6442 = vst [vmem:[#allocation26_spill] sm:$0xff] %v5956_v63  ;;  %v5958_v23 = vpop.permute.xlu1 %2791  ;;  %v2734_v37 = vpop.permute.xlu0 %2733 }
 0x335   : > { %6443 = vst [vmem:[#allocation25_spill] sm:$0xff] %v5958_v23  ;;  %v2822_v52 = vsel %vm6445_vm15, %v5958_v23, %v2734_v37  ;;  %v2464_v23 = vsel %vm6451_vm7, %v2434_v31, 0.0  ;;  %vm6460_vm15 = vmmov %vm6456_vm9 }
 0x336   : > { %v2852_v63 = vrot.slane %v2822_v52, 1  ;;  %vm6463_vm7 = vmmov %vm6454_vm4 }
 0x338   : > { %v5966_v11 = vpop.permute.xlu1 %2605  ;;  %v5968_v1 = vpop.permute.xlu0 %2603  ;;  %v2882_v9 = vsel %vm6455_vm6, %v2852_v63, %v2822_v52  ;;  %vm6467_vm6 = vmmov %vm6463_vm7 }
 0x339   : > { %6446 = vst [vmem:[#allocation28_spill] sm:$0xff] %v5966_v11  ;;  %6447 = vst [vmem:[#allocation27_spill] sm:$0xff] %v5968_v1  ;;  %v2641_v11 = vsel %vm6452_vm10, %v5810_v27, %v5818_v62  ;;  %v2673_v1 = vsel %vm6453_vm8, %v2643_v39, %v2642_v40  ;;  %v2438_v40 = vld [vmem:[#allocation5 + $0x28] sm:$0xff]  ;;  %v2440_v39 = vld [vmem:[#allocation5 + $0x38] sm:$0xff] }
 0x33a   : > { %v2704_v45 = vadd.f32 %v2641_v11, %v2464_v23  ;;  %v2703_v31 = vadd.f32 %v2673_v1, %v2463_v60  ;;  %v2468_v1 = vsel %vm6458_vm0, %v2438_v40, 0.0  ;;  %vm6464_vm10 = vmmov %vm6461_vm1  ;;  %v2442_v40 = vld [vmem:[#allocation5 + $0x48] sm:$0xff]  ;;  %vm6470_vm0 = vcmp.lt.s32.totalorder %v5556_v38, 30135 }
 0x33b   : > { %vm6465_vm8 = vmmov %vm6461_vm1 }
 0x33c   : > { %v5974_v8 = vpop.permute.xlu1 %2609  ;;  %v5976_v36 = vpop.permute.xlu0 %2607 }
 0x33d   : > { %6450 = vst [vmem:[#allocation30_spill] sm:$0xff] %v5976_v36  ;;  %v2613_v46 = vsel %vm6454_vm4, %v5974_v8, %v2612_v3  ;;  %vm6466_vm4 = vcmp.lt.s32.totalorder %v5540_v53, 30135 }
 0x33e   : > { %v2732_v13 = vadd.f32 %v2613_v46, %v2492_v28 }
 0x340   : > { %v2912_v36 = vadd.f32 %v2882_v9, %v2732_v13  ;;  %v2738_v2 = vpop.permute.xlu1 %2737  ;;  %v2736_v47 = vpop.permute.xlu0 %2735 }
 0x341   : > { %v2820_v27 = vsel %vm6456_vm9, %v2736_v47, %v2738_v2  ;;  %v2821_v62 = vsel %vm6457_vm11, %v2734_v37, %v2736_v47  ;;  %v2637_v47 = vsel %vm6459_vm13, %v5833_v41, %v5831_v57  ;;  %vm6468_vm9 = vmmov %vm6461_vm1 }
 0x342   : > { %v2944_v28 = vadd.f32 %v5991_v20, %v2912_v36  ;;  %v2883_v3 = vadd.f32 %v2821_v62, %v2703_v31  ;;  %v2884_v0 = vadd.f32 %v2820_v27, %v2704_v45  ;;  %v2708_v45 = vadd.f32 %v2637_v47, %v2468_v1  ;;  %vm6469_vm11 = vmmov %vm6461_vm1  ;;  %v2444_v47 = vld [vmem:[#allocation5 + $0x58] sm:$0xff] }
 0x343   : > { %vm6471_vm13 = vmmov %vm6467_vm6 }
 0x344   : > { %v2974_v63 = vmax.f32 %v2944_v28, 0.0  ;;  %v2915_v23 = vadd.f32 %v5991_v20, %v2883_v3  ;;  %v2916_v60 = vadd.f32 %v5991_v20, %v2884_v0  ;;  %v2742_v52 = vpop.permute.xlu1 %2741  ;;  %v2740_v11 = vpop.permute.xlu0 %2739 }
 0x345   : > { %v2818_v36 = vsel %vm6460_vm15, %v2740_v11, %v2742_v52  ;;  %v2819_v37 = vsel %vm6461_vm1, %v2738_v2, %v2740_v11  ;;  %v2470_v2 = vsel %vm6462_vm12, %v2440_v39, 0.0  ;;  %vm6472_vm15 = vmmov %vm6461_vm1  ;;  %vm6473_vm12 = vcmp.lt.s32.totalorder %v5572_v18, 30135 }
 0x346   : > { %3004 = vst [vmem:[%s3556_s26 + $0xe8] sm:$0xff] %v2974_v63  ;;  %v2945_v46 = vmax.f32 %v2915_v23, 0.0  ;;  %v2946_v13 = vmax.f32 %v2916_v60, 0.0  ;;  %v2885_v9 = vadd.f32 %v2819_v37, %v5827_v42  ;;  %v2886_v49 = vadd.f32 %v2818_v36, %v5825_v32 }
 0x347   : > { %v2635_v42 = vsel %vm6463_vm7, %v5844_v29, %v5842_v25  ;;  %vm6474_vm7 = vmmov %vm6467_vm6 }
 0x348   : > { %2975 = vst [vmem:[%s3556_s26] sm:$0xff] %v2945_v46  ;;  %2976 = vst [vmem:[%s3556_s26 + $0x8] sm:$0xff] %v2946_v13  ;;  %v2917_v57 = vadd.f32 %v5991_v20, %v2885_v9  ;;  %v2918_v41 = vadd.f32 %v5991_v20, %v2886_v49  ;;  %v2746_v31 = vpop.permute.xlu1 %2745  ;;  %v2744_v27 = vpop.permute.xlu0 %2743  ;;  %v2710_v23 = vadd.f32 %v2635_v42, %v2470_v2  ;;  %v2474_v49 = vsel %vm6470_vm0, %v2444_v47, 0.0 }
 0x349   : > { %v2816_v32 = vsel %vm6464_vm10, %v2744_v27, %v2746_v31  ;;  %v2817_v62 = vsel %vm6465_vm8, %v2742_v52, %v2744_v27  ;;  %v2472_v52 = vsel %vm6466_vm4, %v2442_v40, 0.0  ;;  %vm6475_vm10 = vmmov %vm6461_vm1  ;;  %vm6477_vm4 = vcmp.lt.s32.totalorder %v5588_v14, 30135 }
 0x34a   : > { %v2947_v28 = vmax.f32 %v2917_v57, 0.0  ;;  %v2948_v3 = vmax.f32 %v2918_v41, 0.0  ;;  %v2887_v0 = vadd.f32 %v2817_v62, %v5838_v61  ;;  %v2888_v63 = vadd.f32 %v2816_v32, %v2708_v45  ;;  %v2446_v41 = vld [vmem:[#allocation5 + $0x68] sm:$0xff]  ;;  %vm6476_vm8 = vmmov %vm6461_vm1 }
 0x34b   : > { %v2633_v61 = vsel %vm6467_vm6, %v5856_v54, %v5854_v12  ;;  %v2476_v40 = vsel %vm6473_vm12, %v2446_v41, 0.0  ;;  %vm6480_vm0 = vcmp.lt.s32.totalorder %v5604_v48, 30135  ;;  %vm6483_vm12 = vcmp.lt.s32.totalorder %v5620_v22, 30135 }
 0x34c   : > { %2977 = vst [vmem:[%s3556_s26 + $0x10] sm:$0xff] %v2947_v28  ;;  %2978 = vst [vmem:[%s3556_s26 + $0x18] sm:$0xff] %v2948_v3  ;;  %v2919_v24 = vadd.f32 %v5991_v20, %v2887_v0  ;;  %v2920_v25 = vadd.f32 %v5991_v20, %v2888_v63  ;;  %v2750_v29 = vpop.permute.xlu1 %2749  ;;  %v2748_v60 = vpop.permute.xlu0 %2747  ;;  %v2712_v13 = vadd.f32 %v2633_v61, %v2472_v52  ;;  %v2448_v0 = vld [vmem:[#allocation5 + $0x78] sm:$0xff] }
 0x34d   : > { %v2814_v11 = vsel %vm6468_vm9, %v2748_v60, %v2750_v29  ;;  %v2815_v1 = vsel %vm6469_vm11, %v2746_v31, %v2748_v60  ;;  %v2478_v52 = vsel %vm6477_vm4, %v2448_v0, 0.0  ;;  %vm6478_vm9 = vmmov %vm6461_vm1  ;;  %vm6487_vm4 = vcmp.lt.s32.totalorder %v5636_v59, 30135 }
 0x34e   : > { %v2949_v36 = vmax.f32 %v2919_v24, 0.0  ;;  %v2950_v37 = vmax.f32 %v2920_v25, 0.0  ;;  %v2889_v39 = vadd.f32 %v2815_v1, %v5850_v30  ;;  %v2890_v46 = vadd.f32 %v2814_v11, %v2710_v23  ;;  %vm6479_vm11 = vmmov %vm6461_vm1  ;;  %v2450_v1 = vld [vmem:[#allocation5 + $0x88] sm:$0xff] }
 0x34f   : > { %v2631_v30 = vsel %vm6471_vm13, %v5868_v16, %v5866_v21  ;;  %vm6481_vm13 = vmmov %vm6467_vm6 }
 0x350   : > { %2979 = vst [vmem:[%s3556_s26 + $0x20] sm:$0xff] %v2949_v36  ;;  %2980 = vst [vmem:[%s3556_s26 + $0x28] sm:$0xff] %v2950_v37  ;;  %v2921_v53 = vadd.f32 %v5991_v20, %v2889_v39  ;;  %v2922_v12 = vadd.f32 %v5991_v20, %v2890_v46  ;;  %v2754_v54 = vpop.permute.xlu1 %2753  ;;  %v2752_v9 = vpop.permute.xlu0 %2751  ;;  %v2714_v32 = vadd.f32 %v2631_v30, %v2474_v49 }
 0x351   : > { %v2812_v45 = vsel %vm6472_vm15, %v2752_v9, %v2754_v54  ;;  %v2813_v57 = vsel %vm6461_vm1, %v2750_v29, %v2752_v9  ;;  %vm6482_vm15 = vmmov %vm6461_vm1  ;;  %v2452_v9 = vld [vmem:[#allocation5 + $0x98] sm:$0xff] }
 0x352   : > { %v2951_v31 = vmax.f32 %v2921_v53, 0.0  ;;  %v2952_v27 = vmax.f32 %v2922_v12, 0.0  ;;  %v2891_v2 = vadd.f32 %v2813_v57, %v5862_v19  ;;  %v2892_v42 = vadd.f32 %v2812_v45, %v2712_v13 }
 0x353   : > { %v2629_v19 = vsel %vm6474_vm7, %v5880_v10, %v5878_v15  ;;  %v2480_v53 = vsel %vm6480_vm0, %v2450_v1, 0.0  ;;  %vm6484_vm7 = vmmov %vm6467_vm6  ;;  %vm6490_vm0 = vcmp.lt.s32.totalorder %v5652_v5, 30135  ;;  %v2459_v5 = vld [vmem:[#allocation5 + $0xd0] sm:$0xff] }
 0x354   : > { %2981 = vst [vmem:[%s3556_s26 + $0x30] sm:$0xff] %v2951_v31  ;;  %2982 = vst [vmem:[%s3556_s26 + $0x38] sm:$0xff] %v2952_v27  ;;  %v2923_v38 = vadd.f32 %v5991_v20, %v2891_v2  ;;  %v2924_v21 = vadd.f32 %v5991_v20, %v2892_v42  ;;  %v2758_v16 = vpop.permute.xlu1 %2757  ;;  %v2756_v62 = vpop.permute.xlu0 %2755  ;;  %v2716_v29 = vadd.f32 %v2629_v19, %v2476_v40  ;;  %v2482_v27 = vsel %vm6483_vm12, %v2452_v9, 0.0 }
 0x355   : > { %v2810_v28 = vsel %vm6475_vm10, %v2756_v62, %v2758_v16  ;;  %v2811_v3 = vsel %vm6476_vm8, %v2754_v54, %v2756_v62  ;;  %vm6485_vm10 = vmmov %vm6461_vm1 }
 0x356   : > { %v2953_v63 = vmax.f32 %v2923_v38, 0.0  ;;  %v2954_v23 = vmax.f32 %v2924_v21, 0.0  ;;  %v2893_v24 = vadd.f32 %v2811_v3, %v5874_v7  ;;  %v2894_v25 = vadd.f32 %v2810_v28, %v2714_v32  ;;  %vm6486_vm8 = vmmov %vm6461_vm1  ;;  %v2454_v32 = vld [vmem:[#allocation5 + $0xa8] sm:$0xff] }
 0x357   : > { %v2627_v7 = vsel %vm6467_vm6, %v5892_v56, %v5890_v33  ;;  %v2484_v28 = vsel %vm6487_vm4, %v2454_v32, 0.0  ;;  %vm6498_vm12 = vmmov %vm6467_vm6  ;;  %v6505_v32 = vld [vmem:[#allocation28_spill] sm:$0xff] }
 0x358   : > { %2983 = vst [vmem:[%s3556_s26 + $0x40] sm:$0xff] %v2953_v63  ;;  %2984 = vst [vmem:[%s3556_s26 + $0x48] sm:$0xff] %v2954_v23  ;;  %v2925_v18 = vadd.f32 %v5991_v20, %v2893_v24  ;;  %v2926_v15 = vadd.f32 %v5991_v20, %v2894_v25  ;;  %v2762_v10 = vpop.permute.xlu1 %2761  ;;  %v2760_v60 = vpop.permute.xlu0 %2759  ;;  %v2718_v46 = vadd.f32 %v2627_v7, %v2478_v52  ;;  %v2456_v63 = vld [vmem:[#allocation5 + $0xb8] sm:$0xff] }
 0x359   : > { %v2808_v61 = vsel %vm6478_vm9, %v2760_v60, %v2762_v10  ;;  %v2809_v11 = vsel %vm6479_vm11, %v2758_v16, %v2760_v60  ;;  %vm6488_vm9 = vmmov %vm6461_vm1  ;;  %v6491_v60 = vld [vmem:[#allocation21_spill] sm:$0xff] }
 0x35a   : > { %v2955_v47 = vmax.f32 %v2925_v18, 0.0  ;;  %v2956_v36 = vmax.f32 %v2926_v15, 0.0  ;;  %v2895_v37 = vadd.f32 %v2809_v11, %v5886_v51  ;;  %v2896_v39 = vadd.f32 %v2808_v61, %v2716_v29  ;;  %vm6489_vm11 = vmmov %vm6461_vm1  ;;  %v2458_v61 = vld [vmem:[#allocation5 + $0xc8] sm:$0xff] }
 0x35b   : > { %v2625_v51 = vsel %vm6481_vm13, %v5904_v50, %v5902_v55  ;;  %vm6492_vm13 = vmmov %vm6467_vm6 }
 0x35c   : > { %2985 = vst [vmem:[%s3556_s26 + $0x50] sm:$0xff] %v2955_v47  ;;  %2986 = vst [vmem:[%s3556_s26 + $0x58] sm:$0xff] %v2956_v36  ;;  %v2927_v14 = vadd.f32 %v5991_v20, %v2895_v37  ;;  %v2928_v33 = vadd.f32 %v5991_v20, %v2896_v39  ;;  %v2766_v56 = vpop.permute.xlu1 %2765  ;;  %v2764_v13 = vpop.permute.xlu0 %2763  ;;  %v2720_v41 = vadd.f32 %v2625_v51, %v2480_v53  ;;  %v6494_v47 = vld [vmem:[#allocation22_spill] sm:$0xff]  ;;  %v2488_v51 = vsel %vm2368_vm14, %v2458_v61, 0.0 }
 0x35d   : > { %v2806_v12 = vsel %vm6482_vm15, %v2764_v13, %v2766_v56  ;;  %v2807_v54 = vsel %vm6461_vm1, %v2762_v10, %v2764_v13  ;;  %v2486_v10 = vsel %vm6490_vm0, %v2456_v63, 0.0  ;;  %vm6493_vm15 = vmmov %vm6461_vm1  ;;  %v6512_v63 = vld [vmem:[#allocation26_spill] sm:$0xff] }
 0x35e   : > { %v2957_v49 = vmax.f32 %v2927_v14, 0.0  ;;  %v2958_v30 = vmax.f32 %v2928_v33, 0.0  ;;  %v2897_v45 = vadd.f32 %v2807_v54, %v5898_v17  ;;  %v2898_v57 = vadd.f32 %v2806_v12, %v2718_v46  ;;  %v2460_v46 = vld [vmem:[#allocation5 + $0xd8] sm:$0xff]  ;;  %v2461_v14 = vld [vmem:[#allocation5 + $0xe0] sm:$0xff]  ;;  %v6496_v12 = vld [vmem:[#allocation27_spill] sm:$0xff] }
 0x35f   : > { %v2623_v17 = vsel %vm6484_vm7, %v5916_v4, %v5914_v34  ;;  %v6497_v54 = vld [vmem:[#allocation23_spill] sm:$0xff]  ;;  %vm6499_vm7 = vmmov %vm6461_vm1 }
 0x360   : > { %2987 = vst [vmem:[%s3556_s26 + $0x60] sm:$0xff] %v2957_v49  ;;  %2988 = vst [vmem:[%s3556_s26 + $0x68] sm:$0xff] %v2958_v30  ;;  %v2929_v48 = vadd.f32 %v5991_v20, %v2897_v45  ;;  %v2930_v55 = vadd.f32 %v5991_v20, %v2898_v57  ;;  %v2770_v50 = vpop.permute.xlu1 %2769  ;;  %v2768_v31 = vpop.permute.xlu0 %2767  ;;  %v2722_v40 = vadd.f32 %v2623_v17, %v2482_v27  ;;  %v2490_v17 = vsel %vm2370_vm3, %v2460_v46, 0.0 }
 0x361   : > { %v2804_v2 = vsel %vm6485_vm10, %v2768_v31, %v2770_v50  ;;  %v2805_v42 = vsel %vm6486_vm8, %v2766_v56, %v2768_v31  ;;  %v2617_v9 = vsel %vm6498_vm12, %v6497_v54, %v6496_v12  ;;  %vm6500_vm10 = vmmov %vm6461_vm1  ;;  %v2489_v31 = vsel %vm2369_vm2, %v2459_v5, 0.0 }
 0x362   : > { %v2959_v38 = vmax.f32 %v2929_v48, 0.0  ;;  %v2960_v21 = vmax.f32 %v2930_v55, 0.0  ;;  %v2899_v16 = vadd.f32 %v2805_v42, %v5910_v43  ;;  %v2900_v62 = vadd.f32 %v2804_v2, %v2720_v41  ;;  %v6501_v41 = vld [vmem:[#allocation24_spill] sm:$0xff]  ;;  %vm6506_vm14 = vmmov %vm6467_vm6 }
 0x363   : > { %v2621_v43 = vsel %vm6467_vm6, %v5928_v26, %v5926_v35  ;;  %v2491_v42 = vsel %vm2371_vm5, %v2461_v14, 0.0  ;;  %vm6508_vm2 = vmmov %vm6467_vm6 }
 0x364   : > { %2989 = vst [vmem:[%s3556_s26 + $0x70] sm:$0xff] %v2959_v38  ;;  %2990 = vst [vmem:[%s3556_s26 + $0x78] sm:$0xff] %v2960_v21  ;;  %v2931_v22 = vadd.f32 %v5991_v20, %v2899_v16  ;;  %v2932_v34 = vadd.f32 %v5991_v20, %v2900_v62  ;;  %v2774_v4 = vpop.permute.xlu1 %2773  ;;  %v2772_v19 = vpop.permute.xlu0 %2771  ;;  %v2724_v18 = vadd.f32 %v2621_v43, %v2484_v28 }
 0x365   : > { %v2802_v3 = vsel %vm6488_vm9, %v2772_v19, %v2774_v4  ;;  %v2803_v0 = vsel %vm6489_vm11, %v2770_v50, %v2772_v19  ;;  %v2616_v38 = vsel %vm6506_vm14, %v6496_v12, %v6505_v32  ;;  %v2728_v21 = vadd.f32 %v2617_v9, %v2488_v51  ;;  %vm6509_vm3 = vmmov %vm6508_vm2 }
 0x366   : > { %v2961_v23 = vmax.f32 %v2931_v22, 0.0  ;;  %v2962_v24 = vmax.f32 %v2932_v34, 0.0  ;;  %v2901_v25 = vadd.f32 %v2803_v0, %v5922_v44  ;;  %v2902_v29 = vadd.f32 %v2802_v3, %v2722_v40  ;;  %v6507_v34 = vld [vmem:[#allocation30_spill] sm:$0xff]  ;;  %vm6510_vm5 = vmmov %vm6461_vm1 }
 0x367   : > { %v2619_v44 = vsel %vm6492_vm13, %v6491_v60, %v5938_v58  ;;  %v2615_v19 = vsel %vm6509_vm3, %v6505_v32, %v6507_v34  ;;  %vm6511_vm8 = vmmov %vm6461_vm1 }
 0x368   : > { %2991 = vst [vmem:[%s3556_s26 + $0x80] sm:$0xff] %v2961_v23  ;;  %2992 = vst [vmem:[%s3556_s26 + $0x88] sm:$0xff] %v2962_v24  ;;  %v2933_v59 = vadd.f32 %v5991_v20, %v2901_v25  ;;  %v2934_v15 = vadd.f32 %v5991_v20, %v2902_v29  ;;  %v2778_v35 = vpop.permute.xlu1 %2777  ;;  %v2776_v26 = vpop.permute.xlu0 %2775  ;;  %v2726_v39 = vadd.f32 %v2619_v44, %v2486_v10 }
 0x369   : > { %v2800_v52 = vsel %vm6493_vm15, %v2776_v26, %v2778_v35  ;;  %v2801_v7 = vsel %vm6461_vm1, %v2774_v4, %v2776_v26  ;;  %v2614_v4 = vsel %vm6508_vm2, %v6507_v34, %v5974_v8  ;;  %v2729_v25 = vadd.f32 %v2616_v38, %v2489_v31  ;;  %v6513_v26 = vld [vmem:[#allocation25_spill] sm:$0xff]  ;;  %vm6514_vm4 = vmmov %vm6461_vm1 }
 0x36a   : > { %v2963_v11 = vmax.f32 %v2933_v59, 0.0  ;;  %v2964_v1 = vmax.f32 %v2934_v15, 0.0  ;;  %v2903_v36 = vadd.f32 %v2801_v7, %v6494_v47  ;;  %v2904_v37 = vadd.f32 %v2800_v52, %v2724_v18  ;;  %vm6515_vm6 = vmmov %vm6461_vm1 }
 0x36b   : > { %v2731_v29 = vadd.f32 %v2614_v4, %v2491_v42  ;;  %vm6516_vm9 = vmmov %vm6461_vm1 }
 0x36c   : > { %2993 = vst [vmem:[%s3556_s26 + $0x90] sm:$0xff] %v2963_v11  ;;  %2994 = vst [vmem:[%s3556_s26 + $0x98] sm:$0xff] %v2964_v1  ;;  %v2935_v58 = vadd.f32 %v5991_v20, %v2903_v36  ;;  %v2936_v33 = vadd.f32 %v5991_v20, %v2904_v37  ;;  %v2782_v56 = vpop.permute.xlu1 %2781  ;;  %v2780_v13 = vpop.permute.xlu0 %2779 }
 0x36d   : > { %v2798_v49 = vsel %vm6499_vm7, %v2780_v13, %v2782_v56  ;;  %v2799_v30 = vsel %vm6500_vm10, %v2778_v35, %v2780_v13  ;;  %v2730_v35 = vadd.f32 %v2615_v19, %v2490_v17 }
 0x36e   : > { %v2965_v45 = vmax.f32 %v2935_v58, 0.0  ;;  %v2966_v57 = vmax.f32 %v2936_v33, 0.0  ;;  %v2905_v48 = vadd.f32 %v2799_v30, %v6501_v41  ;;  %v2906_v55 = vadd.f32 %v2798_v49, %v2726_v39 }
 0x370   : > { %2995 = vst [vmem:[%s3556_s26 + $0xa0] sm:$0xff] %v2965_v45  ;;  %2996 = vst [vmem:[%s3556_s26 + $0xa8] sm:$0xff] %v2966_v57  ;;  %v2937_v16 = vadd.f32 %v5991_v20, %v2905_v48  ;;  %v2938_v62 = vadd.f32 %v5991_v20, %v2906_v55  ;;  %v2786_v40 = vpop.permute.xlu1 %2785  ;;  %v2784_v22 = vpop.permute.xlu0 %2783 }
 0x371   : > { %v2796_v28 = vsel %vm6510_vm5, %v2784_v22, %v2786_v40  ;;  %v2797_v43 = vsel %vm6511_vm8, %v2782_v56, %v2784_v22 }
 0x372   : > { %v2967_v3 = vmax.f32 %v2937_v16, 0.0  ;;  %v2968_v0 = vmax.f32 %v2938_v62, 0.0  ;;  %v2907_v23 = vadd.f32 %v2797_v43, %v6512_v63  ;;  %v2908_v24 = vadd.f32 %v2796_v28, %v2728_v21 }
 0x374   : > { %2997 = vst [vmem:[%s3556_s26 + $0xb0] sm:$0xff] %v2967_v3  ;;  %2998 = vst [vmem:[%s3556_s26 + $0xb8] sm:$0xff] %v2968_v0  ;;  %v2939_v8 = vadd.f32 %v5991_v20, %v2907_v23  ;;  %v2940_v18 = vadd.f32 %v5991_v20, %v2908_v24  ;;  %v2790_v59 = vpop.permute.xlu1 %2789  ;;  %v2788_v15 = vpop.permute.xlu0 %2787 }
 0x375   : > { %v2793_v10 = vsel %vm6514_vm4, %v2790_v59, %v6513_v26  ;;  %v2794_v60 = vsel %vm6515_vm6, %v2788_v15, %v2790_v59  ;;  %v2795_v44 = vsel %vm6516_vm9, %v2786_v40, %v2788_v15 }
 0x376   : > { %v2969_v52 = vmax.f32 %v2939_v8, 0.0  ;;  %v2970_v7 = vmax.f32 %v2940_v18, 0.0  ;;  %v2911_v61 = vadd.f32 %v2793_v10, %v2731_v29  ;;  %v2909_v11 = vadd.f32 %v2795_v44, %v2729_v25 }
 0x377   : > { %v2910_v1 = vadd.f32 %v2794_v60, %v2730_v35 }
 0x378   : > { %2999 = vst [vmem:[%s3556_s26 + $0xc0] sm:$0xff] %v2969_v52  ;;  %3000 = vst [vmem:[%s3556_s26 + $0xc8] sm:$0xff] %v2970_v7  ;;  %v2943_v47 = vadd.f32 %v5991_v20, %v2911_v61  ;;  %v2941_v36 = vadd.f32 %v5991_v20, %v2909_v11 }
 0x379   : > { %v2942_v37 = vadd.f32 %v5991_v20, %v2910_v1 }
 0x37a   : > { %v2973_v39 = vmax.f32 %v2943_v47, 0.0  ;;  %v2971_v5 = vmax.f32 %v2941_v36, 0.0 }
 0x37b   : > { %v2972_v46 = vmax.f32 %v2942_v37, 0.0 }
 0x37c   : > { %3003 = vst [vmem:[%s3556_s26 + $0xe0] sm:$0xff] %v2973_v39  ;;  %3001 = vst [vmem:[%s3556_s26 + $0xd0] sm:$0xff] %v2971_v5 }
 0x37d   : > { %3002 = vst [vmem:[%s3556_s26 + $0xd8] sm:$0xff] %v2972_v46 }
 0x37e PF: > { %s19_s20 = sadd.s32 1, %s3394_s20  }
 0x37f   : > { %p16_p5 = scmp.ge.s32.totalorder %s19_s20, 4  }
 0x381   :  { %18 = sbr.rel (!%p16_p5) target bundleno = 5 (0x5), region = 108 }
 0x388   :  { %3026 = vsyncpa [#allocation9], 1 }
 0x389   :  { %3028 = vsyncpa [#allocation9 + $0x1], 1 }
 0x38a   :  { %3029 = vsyncpa [#allocation10], 1 }
 0x38b   :  { %3031 = vsyncpa [#allocation10 + $0x1], 1 }
 0x38c   :  { %3032 = vsyncpa [#allocation13], 1 }

// kernel: matrix_to_feature.3
= control target key start
LH: loop header
LB: loop body
LE: loop exit
PB: predicated region body
PF: predicated region fallthrough
CT: control target
= control target key end

     0   :  { %7 = vsyncpa [#allocation3], 0  ;;  %s15886_s0 = inlined_call_operand.vmem [shape: f32[2,30720], index: 0, kind: input, shape index: {}]   ;;  %s15887_s1 = inlined_call_operand.hbm [shape: bf16[30720,128], index: 1, kind: input, shape index: {}]   ;;  %s15888_s2 = inlined_call_operand.vmem [shape: f32[2,2,128], index: 2, kind: output, shape index: {}]  }
   0x1   :  { %9 = vsyncpa [#allocation3 + $0x1], 0  ;;  %s14637_s9 = smov 0   ;;  %s14639_s10 = smov 0  }
   0x2   :  { %s14641_s11 = smov 0   ;;  %s14643_s12 = smov 0  }
   0x3   :  { %s14645_s13 = smov 0   ;;  %s14647_s14 = smov 0  }
   0x4 LB: > { %s11193_s15 = sadd.s32 4294967295, %s14615_s14   ;;  %s27_s16 = sadd.s32 1, %s14611_s13  ;;  %s14615_s14 = sphi %s14647_s14, %s15_s14   ;;  %s14611_s13 = sphi %s14645_s13, %s15895_s13   ;;  %s14607_s12 = sphi %s14643_s12, %s15894_s12   ;;  %s14603_s11 = sphi %s14641_s11, %s15893_s11   ;;  %s14599_s10 = sphi %s14639_s10, %s15892_s10   ;;  %s14595_s9 = sphi %s14637_s9, %s15891_s9  }
   0x5   : > { %p29_p0 = scmp.ge.s32.totalorder %s27_s16, 2  ;;  %s64_s17 = sadd.s32 1, %s14603_s11 }
   0x6   : > { %p71_p1 = scmp.ne.s32.totalorder %s14603_s11, %s14599_s10  ;;  %p72_p2 = scmp.eq.s32.totalorder %s14615_s14, 0 }
   0x7   : > { %s15897_s16 = smov (%p29_p0, %s27_s16), 0  ;;  %p77_p4 = scmp.ne.s32.totalorder %s14599_s10, %s14595_s9 }
   0x8   : > { %p73_p3 = por %p72_p2, %p71_p1  ;;  %s61_s18 = ssub.s32 %s14611_s13, %s15897_s16 }
   0x9   : > { %p78_p5 = scmp.eq.s32.totalorder %s11193_s15, 0  ;;  %p62_p6 = scmp.eq.s32.totalorder %s61_s18, 0 }
   0xa   : > { %p13492_p8 = scmp.lt.s32.totalorder %s14615_s14, 2  ;;  %s138_s21 = sand.u32 1, %s14603_s11  }
   0xb   : > { %p14676_p7 = por %p78_p5, %p77_p4  ;;  %s12163_s22 = smul.u32 122880, %s14611_s13 }
   0xc   : > { %s14682_s20 = scalar_select %p62_p6, %s14603_s11, %s64_s17  }
   0xd   : > { %s13484_s23 = smul.u32 7680, %s138_s21  ;;  %s14689_s26 = scalar_lea.hbm %s15887_s1, %s12163_s22 }
   0xe   : > { %p14691_p9 = pnand %p13492_p8, %p73_p3  ;;  %s14697_s30 = scalar_lea.sflag [#allocation3], %s138_s21 }
   0xf   : > { %s142_s28 = scalar_lea.vmem [#allocation2], %s13484_s23  ;;  %s14535_s3 = scalar_lea.hbm %s14689_s26, 122880 }
  0x10   : > { %s150_s29 = sshll.u32 %s142_s28, 4  ;;  %p14536_p10 = scmp.ne.s32.totalorder %s14689_s26, %s14535_s3  ;;  %s14695_s29 = int_to_ptr.vmem [resolvable:$true] %s150_s29 }
  0x11   : > { %p14537_p11 = pneg %p14691_p9  ;;  %s14540_s6 = scalar_lea.hbm %s15887_s1, 245760 }
  0x12   : > { %p14541_p0 = scmp.lt.u32.totalorder %s14689_s26, %s15887_s1  ;;  %p14542_p1 = scmp.lt.u32.totalorder %s14540_s6, %s14535_s3 }
  0x13   : > { %p14538_p12 = pnand %p14537_p11, %p14536_p10  ;;  %p14544_p3 = scmp.lt.u32.totalorder %s14535_s3, %s14689_s26 }
  0x14   : > { %p14543_p2 = por %p14542_p1, %p14541_p0 }
  0x15   : > { %p14539_p13 = pneg %p14538_p12 }
  0x16   : > { %p14545_p4 = por %p14544_p3, %p14543_p2 }
  0x18   : > { %p14546_p5 = pnand %p14545_p4, %p14539_p13 }
  0x1a   : > { %14549 = shalt.err (!%p14546_p5)
}
  0x1b   : > { %s14550_s9 = scalar_lea.vmem %s14695_s29, 122880  ;;  %s14617_s15 = smov [#allocation2]  }
  0x1c   : > { %p14551_p6 = scmp.ne.s32.totalorder %s14695_s29, %s14550_s9  ;;  %s14555_s17 = sshll.u32 %s14617_s15, 4  ;;  %s14556_s17 = int_to_ptr.vmem [resolvable:$false] %s14555_s17 }
  0x1d   : > { %s14557_s18 = scalar_lea.vmem %s14556_s17, 245760  ;;  %p14558_p12 = scmp.lt.s32.totalorder %s14695_s29, %s14556_s17 }
  0x1e   : > { %p14553_p8 = pnand %p14551_p6, %p14537_p11  ;;  %p14559_p0 = scmp.lt.s32.totalorder %s14557_s18, %s14550_s9 }
  0x20   : > { %p14554_p10 = pneg %p14553_p8  ;;  %p14560_p1 = por %p14559_p0, %p14558_p12 }
  0x22   : > { %p14561_p2 = pnand %p14560_p1, %p14554_p10 }
  0x24   : > { %14564 = shalt.err (!%p14561_p2)
}
  0x25   : > { %s14618_s21 = smov 64   ;;  %s14619_s22 = smov 4  }
  0x26   : > { %13491 = dma.hbm_to_vmem [thread:$0]  (!%p14691_p9), %s14689_s26, 122880, %s14695_s29, %s14697_s30, %s14618_s21, %s14618_s21, %s14619_s22  }
  0x27   : > { %p11198_p11 = scmp.ge.s32.totalorder %s14615_s14, 1  ;;  %p158_p13 = scmp.lt.s32.totalorder %s14615_s14, 3 }
  0x29   : > { %p159_p3 = pnand %p11198_p11, %p158_p13 }
  0x2a   : > { %s164_s23 = sand.u32 (!%p159_p3), 1, %s14599_s10  }
  0x2b   : > { %162 = sbr.rel (%p159_p3) target bundleno = 1235 (0x4d3), region = 28  ;;  %s165_s25 = scalar_lea.sflag (!%p159_p3), [#allocation3], %s164_s23 }
  0x2c   : > { %s13485_s24 = smul.u32 (!%p159_p3), 7680, %s164_s23 }
  0x2e   : > { %s14728_s28 = scalar_lea.vmem (!%p159_p3), [#allocation2], %s13485_s24 }
  0x32   : > { %14590 = dma.done.wait (%p14676_p7), %s165_s25, 122880  }
  0x33   : > { %14592 = vsyncadd (%p14676_p7), %s165_s25, 4294844416  ;;  %v13545_v0 = vld [vmem:[%s14728_s28 + $0x40] sm:$0xff]   ;;  %v13549_v4 = vld [vmem:[%s14728_s28 + $0x48] sm:$0xff]   ;;  %s195_s19 = smul.u32 120, %s14607_s12  ;;  %v14620_v22 = vmov 1983009808   ;;  %v278_v24 = vlaneseq }
  0x34   : > { %v13546_v1 = vld [vmem:[%s14728_s28 + $0xc0] sm:$0xff]   ;;  %12164 = vmatprep.subr.bf16.mxu0 %v13545_v0  ;;  %v13550_v5 = vld [vmem:[%s14728_s28 + $0xc8] sm:$0xff]   ;;  %v13553_v8 = vld [vmem:[%s14728_s28 + $0x50] sm:$0xff]   ;;  %v276_v23 = vunpack.c.l.s4 %v14620_v22  ;;  %p204_p9 = scmp.lt.s32.totalorder %s14607_s12, 1 }
  0x35   : > { %v13547_v2 = vld [vmem:[%s14728_s28] sm:$0xff]   ;;  %12186 = vmatprep.subr.bf16.mxu1 %v13546_v1  ;;  %v13551_v6 = vld [vmem:[%s14728_s28 + $0x8] sm:$0xff]   ;;  %v13554_v9 = vld [vmem:[%s14728_s28 + $0xd0] sm:$0xff]   ;;  %p196_p7 = scmp.lt.s32.totalorder %s195_s19, 239  ;;  %v279_v30 = vshrl.u32 %v278_v24, 7 }
  0x36   : > { %v13548_v3 = vld [vmem:[%s14728_s28 + $0x80] sm:$0xff]   ;;  %12165 = vmatpush3.bf16.msra.mxu0 %v13547_v2  ;;  %v13552_v7 = vld [vmem:[%s14728_s28 + $0x88] sm:$0xff]   ;;  %v13555_v10 = vld [vmem:[%s14728_s28 + $0x10] sm:$0xff]   ;;  %v277_v29 = vunpack.c.0.s8 %v276_v23  ;;  %s15901_s12 = smov (!%p204_p9, %s14607_s12), 1 }
  0x37   : > { %12187 = vmatpush3.bf16.msra.mxu1 %v13548_v3  ;;  %12166 = vmatprep.subr.bf16.mxu0 %v13549_v4  ;;  %v13556_v11 = vld [vmem:[%s14728_s28 + $0x90] sm:$0xff]   ;;  %v13557_v12 = vld [vmem:[%s14728_s28 + $0x58] sm:$0xff]   ;;  %v13561_v16 = vld [vmem:[%s14728_s28 + $0x60] sm:$0xff]   ;;  %s15899_s19 = smov (!%p196_p7, %s195_s19), 239  ;;  %s11200_s3 = sshll.u32 %s15901_s12, 1 }
  0x38   : > { %12188 = vmatprep.subr.bf16.mxu1 %v13550_v5  ;;  %v13558_v13 = vld [vmem:[%s14728_s28 + $0xd8] sm:$0xff]   ;;  %v13562_v17 = vld [vmem:[%s14728_s28 + $0xe0] sm:$0xff]   ;;  %v13565_v20 = vld [vmem:[%s14728_s28 + $0x68] sm:$0xff]   ;;  %s11199_s26 = sshll.u32 %s15899_s19, 1  ;;  %v14770_v35 = vsub.s32 %v277_v29, %v279_v30  ;;  %s15863_s6 = scalar_lea.vmem %s15888_s2, %s11200_s3 }
  0x39   : > { %v13559_v14 = vld [vmem:[%s14728_s28 + $0x18] sm:$0xff]   ;;  %v13563_v18 = vld [vmem:[%s14728_s28 + $0x20] sm:$0xff]   ;;  %v13566_v21 = vld [vmem:[%s14728_s28 + $0xe8] sm:$0xff]   ;;  %s14768_s30 = scalar_lea.vmem %s15886_s0, %s11199_s26 }
  0x3a   : > { %12167 = vmatpush3.bf16.msra.mxu0 %v13551_v6  ;;  %v13560_v15 = vld [vmem:[%s14728_s28 + $0x98] sm:$0xff]   ;;  %v13564_v19 = vld [vmem:[%s14728_s28 + $0xa0] sm:$0xff]   ;;  %v13567_v25 = vld [vmem:[%s14728_s28 + $0x28] sm:$0xff]  }
  0x3b   : > { %12189 = vmatpush3.bf16.msra.mxu1 %v13552_v7  ;;  %12168 = vmatprep.subr.bf16.mxu0 %v13553_v8  ;;  %v13568_v26 = vld [vmem:[%s14728_s28 + $0xa8] sm:$0xff]   ;;  %v13569_v27 = vld [vmem:[%s14728_s28 + $0x70] sm:$0xff]   ;;  %v13573_v33 = vld [vmem:[%s14728_s28 + $0x78] sm:$0xff]  }
  0x3c   : > { %12190 = vmatprep.subr.bf16.mxu1 %v13554_v9  ;;  %v13570_v28 = vld [vmem:[%s14728_s28 + $0xf0] sm:$0xff]   ;;  %v13574_v34 = vld [vmem:[%s14728_s28 + $0xf8] sm:$0xff]   ;;  %v214_v38 = vld [vmem:[%s14768_s30] sm:$0xff] }
  0x3d   : > { %v13571_v31 = vld [vmem:[%s14728_s28 + $0x30] sm:$0xff]   ;;  %v13575_v36 = vld [vmem:[%s14728_s28 + $0x38] sm:$0xff]   ;;  %v281_v39 = vrot.slane %v214_v38, %v14770_v35  ;;  %v274_v40 = vcombine.high %v214_v38, %v214_v38  ;;  %v13578_v41 = vld [vmem:[%s14728_s28 + $0x140] sm:$0xff]  }
  0x3e   : > { %12169 = vmatpush3.bf16.msra.mxu0 %v13555_v10  ;;  %v13572_v32 = vld [vmem:[%s14728_s28 + $0xb0] sm:$0xff]   ;;  %v13576_v37 = vld [vmem:[%s14728_s28 + $0xb8] sm:$0xff]   ;;  %v13579_v42 = vld [vmem:[%s14728_s28 + $0x1c0] sm:$0xff]  }
  0x3f   : > { %12191 = vmatpush3.bf16.msra.mxu1 %v13556_v11  ;;  %12170 = vmatprep.subr.bf16.mxu0 %v13557_v12  ;;  %v289_v43 = vcombine.high %v281_v39, %v281_v39  ;;  %v288_v44 = vrot.slane %v274_v40, %v14770_v35  ;;  %v904_v45 = vpack.c.bf16 %v281_v39, %v281_v39  ;;  %v13580_v46 = vld [vmem:[%s14728_s28 + $0x100] sm:$0xff]   ;;  %v13582_v51 = vld [vmem:[%s14728_s28 + $0x148] sm:$0xff]   ;;  %v13586_v56 = vld [vmem:[%s14728_s28 + $0x150] sm:$0xff]  }
  0x40   : > { %12192 = vmatprep.subr.bf16.mxu1 %v13558_v13  ;;  %v13581_v49 = vld [vmem:[%s14728_s28 + $0x180] sm:$0xff]   ;;  %v13583_v53 = vld [vmem:[%s14728_s28 + $0x1c8] sm:$0xff]   ;;  %v13587_v57 = vld [vmem:[%s14728_s28 + $0x1d0] sm:$0xff]  }
  0x41   : > { %v905_v47 = vpack.c.bf16 %v289_v43, %v289_v43  ;;  %v290_v48 = vcombine.high %v288_v44, %v288_v44  ;;  %v906_v50 = vpack.c.bf16 %v288_v44, %v288_v44  ;;  %v13584_v54 = vld [vmem:[%s14728_s28 + $0x108] sm:$0xff]   ;;  %v13588_v58 = vld [vmem:[%s14728_s28 + $0x110] sm:$0xff]   ;;  %v13590_v60 = vld [vmem:[%s14728_s28 + $0x158] sm:$0xff]  }
  0x42   : > { %12171 = vmatpush3.bf16.msra.mxu0 %v13559_v14  ;;  %v13585_v55 = vld [vmem:[%s14728_s28 + $0x188] sm:$0xff]   ;;  %v13589_v59 = vld [vmem:[%s14728_s28 + $0x190] sm:$0xff]   ;;  %v13591_v61 = vld [vmem:[%s14728_s28 + $0x1d8] sm:$0xff]  }
  0x43   : > { %12193 = vmatpush3.bf16.msra.mxu1 %v13560_v15  ;;  %12172 = vmatprep.subr.bf16.mxu0 %v13561_v16  ;;  %v907_v52 = vpack.c.bf16 %v290_v48, %v290_v48  ;;  %v13592_v62 = vld [vmem:[%s14728_s28 + $0x118] sm:$0xff]   ;;  %v13594_v0 = vld [vmem:[%s14728_s28 + $0x160] sm:$0xff]   ;;  %v13598_v4 = vld [vmem:[%s14728_s28 + $0x168] sm:$0xff]  }
  0x44   : > { %12194 = vmatprep.subr.bf16.mxu1 %v13562_v17  ;;  %8737 = vmatprep.mubr.bf16.mxu0 %v905_v47  ;;  %v13593_v63 = vld [vmem:[%s14728_s28 + $0x198] sm:$0xff]   ;;  %v13595_v1 = vld [vmem:[%s14728_s28 + $0x1e0] sm:$0xff]   ;;  %v13599_v5 = vld [vmem:[%s14728_s28 + $0x1e8] sm:$0xff]  }
  0x45   : > { %8777 = vmatprep.mubr.bf16.mxu1 %v907_v52  ;;  %v13596_v2 = vld [vmem:[%s14728_s28 + $0x120] sm:$0xff]   ;;  %v13600_v6 = vld [vmem:[%s14728_s28 + $0x128] sm:$0xff]   ;;  %v13602_v8 = vld [vmem:[%s14728_s28 + $0x170] sm:$0xff]  }
  0x46   : > { %12173 = vmatpush3.bf16.msra.mxu0 %v13563_v18  ;;  %v13597_v3 = vld [vmem:[%s14728_s28 + $0x1a0] sm:$0xff]   ;;  %v13601_v7 = vld [vmem:[%s14728_s28 + $0x1a8] sm:$0xff]   ;;  %v13603_v9 = vld [vmem:[%s14728_s28 + $0x1f0] sm:$0xff]  }
  0x47   : > { %12195 = vmatpush3.bf16.msra.mxu1 %v13564_v19  ;;  %12174 = vmatprep.subr.bf16.mxu0 %v13565_v20  ;;  %v13604_v10 = vld [vmem:[%s14728_s28 + $0x130] sm:$0xff]   ;;  %v13606_v12 = vld [vmem:[%s14728_s28 + $0x178] sm:$0xff]   ;;  %v215_v15 = vld [vmem:[%s14768_s30 + $0x8] sm:$0xff] }
  0x48   : > { %12196 = vmatprep.subr.bf16.mxu1 %v13566_v21  ;;  %v13605_v11 = vld [vmem:[%s14728_s28 + $0x1b0] sm:$0xff]   ;;  %v13607_v13 = vld [vmem:[%s14728_s28 + $0x1f8] sm:$0xff]   ;;  %v298_v17 = vrot.slane %v215_v15, %v14770_v35  ;;  %v291_v18 = vcombine.high %v215_v15, %v215_v15  ;;  %v13611_v19 = vld [vmem:[%s14728_s28 + $0x240] sm:$0xff]  }
  0x49   : > { %v13608_v14 = vld [vmem:[%s14728_s28 + $0x138] sm:$0xff]   ;;  %v13612_v22 = vld [vmem:[%s14728_s28 + $0x2c0] sm:$0xff]   ;;  %v13615_v29 = vld [vmem:[%s14728_s28 + $0x248] sm:$0xff]  }
  0x4a   : > { %12175 = vmatpush3.bf16.msra.mxu0 %v13567_v25  ;;  %v13609_v16 = vld [vmem:[%s14728_s28 + $0x1b8] sm:$0xff]   ;;  %v306_v20 = vcombine.high %v298_v17, %v298_v17  ;;  %v305_v21 = vrot.slane %v291_v18, %v14770_v35  ;;  %v908_v23 = vpack.c.bf16 %v298_v17, %v298_v17  ;;  %v13613_v24 = vld [vmem:[%s14728_s28 + $0x200] sm:$0xff]   ;;  %v13622_v38 = vld [vmem:[%s14728_s28 + $0x290] sm:$0xff]  }
  0x4b   : > { %12197 = vmatpush3.bf16.msra.mxu1 %v13568_v26  ;;  %12176 = vmatprep.subr.bf16.mxu0 %v13569_v27  ;;  %v13614_v27 = vld [vmem:[%s14728_s28 + $0x280] sm:$0xff]   ;;  %v13623_v39 = vld [vmem:[%s14728_s28 + $0x258] sm:$0xff]   ;;  %v13631_v47 = vld [vmem:[%s14728_s28 + $0x268] sm:$0xff]  }
  0x4c   : > { %12198 = vmatprep.subr.bf16.mxu1 %v13570_v28  ;;  %v909_v25 = vpack.c.bf16 %v306_v20, %v306_v20  ;;  %v307_v26 = vcombine.high %v305_v21, %v305_v21  ;;  %v910_v28 = vpack.c.bf16 %v305_v21, %v305_v21  ;;  %v13624_v40 = vld [vmem:[%s14728_s28 + $0x2d8] sm:$0xff]   ;;  %v13627_v43 = vld [vmem:[%s14728_s28 + $0x260] sm:$0xff]   ;;  %v13632_v48 = vld [vmem:[%s14728_s28 + $0x2e8] sm:$0xff]  }
  0x4d   : > { %v13628_v44 = vld [vmem:[%s14728_s28 + $0x2e0] sm:$0xff]   ;;  %v13636_v52 = vld [vmem:[%s14728_s28 + $0x2f0] sm:$0xff]   ;;  %v13656_v17 = vld [vmem:[%s14728_s28 + $0x358] sm:$0xff]  }
  0x4e   : > { %12177 = vmatpush3.bf16.msra.mxu0 %v13571_v31  ;;  %v911_v30 = vpack.c.bf16 %v307_v26, %v307_v26  ;;  %v13616_v31 = vld [vmem:[%s14728_s28 + $0x2c8] sm:$0xff]   ;;  %v13654_v15 = vld [vmem:[%s14728_s28 + $0x310] sm:$0xff]   ;;  %v13657_v18 = vld [vmem:[%s14728_s28 + $0x3d8] sm:$0xff]  }
  0x4f   : > { %12199 = vmatpush3.bf16.msra.mxu1 %v13572_v32  ;;  %12178 = vmatprep.subr.bf16.mxu0 %v13573_v33  ;;  %v13617_v32 = vld [vmem:[%s14728_s28 + $0x208] sm:$0xff]   ;;  %v13659_v20 = vld [vmem:[%s14728_s28 + $0x398] sm:$0xff]   ;;  %v13660_v21 = vld [vmem:[%s14728_s28 + $0x360] sm:$0xff]  }
  0x50   : > { %12200 = vmatprep.subr.bf16.mxu1 %v13574_v34  ;;  %v13618_v33 = vld [vmem:[%s14728_s28 + $0x288] sm:$0xff]   ;;  %v13619_v34 = vld [vmem:[%s14728_s28 + $0x250] sm:$0xff]  }
  0x51   : > { %v13665_v26 = vld [vmem:[%s14728_s28 + $0x3e8] sm:$0xff]  }
  0x52   : > { %12179 = vmatpush3.bf16.msra.mxu0 %v13575_v36  ;;  %v13620_v36 = vld [vmem:[%s14728_s28 + $0x2d0] sm:$0xff]  }
  0x53   : > { %12201 = vmatpush3.bf16.msra.mxu1 %v13576_v37  ;;  %12208 = vmatprep.subr.bf16.mxu0 %v13578_v41  ;;  %v13621_v37 = vld [vmem:[%s14728_s28 + $0x210] sm:$0xff]   ;;  %v13625_v41 = vld [vmem:[%s14728_s28 + $0x218] sm:$0xff]  }
  0x54   : > { %12230 = vmatprep.subr.bf16.mxu1 %v13579_v42  ;;  %v13626_v42 = vld [vmem:[%s14728_s28 + $0x298] sm:$0xff]  }
  0x55   : > { %8738 = vmatmul.mubr.bf16.vlgmr.msra.gmra.mrb[0].mxu0 %v904_v45  ;;  %v13629_v45 = vld [vmem:[%s14728_s28 + $0x220] sm:$0xff]  }
  0x56   : > { %12209 = vmatpush3.bf16.msra.mxu0 %v13580_v46  ;;  %8778 = vmatmul.mubr.bf16.vlgmr.msra.gmra.mrb[0].mxu1 %v906_v50  ;;  %v13630_v46 = vld [vmem:[%s14728_s28 + $0x2a0] sm:$0xff]   ;;  %v13634_v50 = vld [vmem:[%s14728_s28 + $0x2a8] sm:$0xff]  }
  0x57   : > { %12210 = vmatprep.subr.bf16.mxu0 %v13582_v51  ;;  %12231 = vmatpush3.bf16.msra.mxu1 %v13581_v49  ;;  %v13633_v49 = vld [vmem:[%s14728_s28 + $0x228] sm:$0xff]   ;;  %v13635_v51 = vld [vmem:[%s14728_s28 + $0x270] sm:$0xff]  }
  0x58   : > { %12232 = vmatprep.subr.bf16.mxu1 %v13583_v53  ;;  %8817 = vmatprep.mubr.bf16.mxu0 %v909_v25  ;;  %v13637_v53 = vld [vmem:[%s14728_s28 + $0x230] sm:$0xff]   ;;  %v13664_v25 = vld [vmem:[%s14728_s28 + $0x368] sm:$0xff]  }
  0x59   : > { %8857 = vmatprep.mubr.bf16.mxu1 %v911_v30  ;;  %v13669_v30 = vld [vmem:[%s14728_s28 + $0x3f0] sm:$0xff]  }
  0x5a   : > { %12211 = vmatpush3.bf16.msra.mxu0 %v13584_v54  ;;  %v13638_v54 = vld [vmem:[%s14728_s28 + $0x2b0] sm:$0xff]  }
  0x5b   : > { %12212 = vmatprep.subr.bf16.mxu0 %v13586_v56  ;;  %12233 = vmatpush3.bf16.msra.mxu1 %v13585_v55  ;;  %v13639_v55 = vld [vmem:[%s14728_s28 + $0x278] sm:$0xff]  }
  0x5c   : > { %12234 = vmatprep.subr.bf16.mxu1 %v13587_v57  ;;  %v13640_v56 = vld [vmem:[%s14728_s28 + $0x2f8] sm:$0xff]  }
  0x5d   : > { %v13641_v57 = vld [vmem:[%s14728_s28 + $0x238] sm:$0xff]  }
  0x5e   : > { %12213 = vmatpush3.bf16.msra.mxu0 %v13588_v58  ;;  %v216_v58 = vld [vmem:[%s14768_s30 + $0x10] sm:$0xff] }
  0x5f   : > { %12214 = vmatprep.subr.bf16.mxu0 %v13590_v60  ;;  %12235 = vmatpush3.bf16.msra.mxu1 %v13589_v59  ;;  %v13642_v59 = vld [vmem:[%s14728_s28 + $0x2b8] sm:$0xff]   ;;  %v315_v60 = vrot.slane %v216_v58, %v14770_v35 }
  0x60   : > { %12236 = vmatprep.subr.bf16.mxu1 %v13591_v61  ;;  %v308_v61 = vcombine.high %v216_v58, %v216_v58  ;;  %v13687_v58 = vld [vmem:[%s14728_s28 + $0x410] sm:$0xff]  }
  0x62   : > { %12215 = vmatpush3.bf16.msra.mxu0 %v13592_v62  ;;  %v13644_v62 = vld [vmem:[%s14728_s28 + $0x340] sm:$0xff]  }
  0x63   : > { %12216 = vmatprep.subr.bf16.mxu0 %v13594_v0  ;;  %12237 = vmatpush3.bf16.msra.mxu1 %v13593_v63  ;;  %v323_v63 = vcombine.high %v315_v60, %v315_v60  ;;  %v322_v0 = vrot.slane %v308_v61, %v14770_v35  ;;  %v13690_v61 = vld [vmem:[%s14728_s28 + $0x4d8] sm:$0xff]  }
  0x64   : > { %12238 = vmatprep.subr.bf16.mxu1 %v13595_v1  ;;  %v13645_v1 = vld [vmem:[%s14728_s28 + $0x3c0] sm:$0xff]  }
  0x66   : > { %12217 = vmatpush3.bf16.msra.mxu0 %v13596_v2  ;;  %v912_v2 = vpack.c.bf16 %v315_v60, %v315_v60  ;;  %v13689_v60 = vld [vmem:[%s14728_s28 + $0x458] sm:$0xff]  }
  0x67   : > { %12218 = vmatprep.subr.bf16.mxu0 %v13598_v4  ;;  %12239 = vmatpush3.bf16.msra.mxu1 %v13597_v3  ;;  %v13646_v3 = vld [vmem:[%s14728_s28 + $0x300] sm:$0xff]   ;;  %v913_v4 = vpack.c.bf16 %v323_v63, %v323_v63  ;;  %v13692_v63 = vld [vmem:[%s14728_s28 + $0x498] sm:$0xff]  }
  0x68   : > { %12240 = vmatprep.subr.bf16.mxu1 %v13599_v5  ;;  %v324_v5 = vcombine.high %v322_v0, %v322_v0 }
  0x6a   : > { %12219 = vmatpush3.bf16.msra.mxu0 %v13600_v6  ;;  %v13647_v6 = vld [vmem:[%s14728_s28 + $0x380] sm:$0xff]  }
  0x6b   : > { %12220 = vmatprep.subr.bf16.mxu0 %v13602_v8  ;;  %12241 = vmatpush3.bf16.msra.mxu1 %v13601_v7  ;;  %v914_v7 = vpack.c.bf16 %v322_v0, %v322_v0  ;;  %v13648_v8 = vld [vmem:[%s14728_s28 + $0x348] sm:$0xff]   ;;  %v13693_v0 = vld [vmem:[%s14728_s28 + $0x460] sm:$0xff]  }
  0x6c   : > { %12242 = vmatprep.subr.bf16.mxu1 %v13603_v9  ;;  %v915_v9 = vpack.c.bf16 %v324_v5, %v324_v5  ;;  %v13698_v5 = vld [vmem:[%s14728_s28 + $0x4e8] sm:$0xff]  }
  0x6e   : > { %12221 = vmatpush3.bf16.msra.mxu0 %v13604_v10  ;;  %v13649_v10 = vld [vmem:[%s14728_s28 + $0x3c8] sm:$0xff]  }
  0x6f   : > { %12222 = vmatprep.subr.bf16.mxu0 %v13606_v12  ;;  %12243 = vmatpush3.bf16.msra.mxu1 %v13605_v11  ;;  %v13650_v11 = vld [vmem:[%s14728_s28 + $0x308] sm:$0xff]  }
  0x70   : > { %12244 = vmatprep.subr.bf16.mxu1 %v13607_v13  ;;  %v13651_v12 = vld [vmem:[%s14728_s28 + $0x388] sm:$0xff]   ;;  %v13652_v13 = vld [vmem:[%s14728_s28 + $0x350] sm:$0xff]  }
  0x72   : > { %12223 = vmatpush3.bf16.msra.mxu0 %v13608_v14  ;;  %v13653_v14 = vld [vmem:[%s14728_s28 + $0x3d0] sm:$0xff]  }
  0x73   : > { %12252 = vmatprep.subr.bf16.mxu0 %v13611_v19  ;;  %12245 = vmatpush3.bf16.msra.mxu1 %v13609_v16  ;;  %v13655_v16 = vld [vmem:[%s14728_s28 + $0x390] sm:$0xff]   ;;  %v13658_v19 = vld [vmem:[%s14728_s28 + $0x318] sm:$0xff]  }
  0x74   : > { %12274 = vmatprep.subr.bf16.mxu1 %v13612_v22  ;;  %v13661_v22 = vld [vmem:[%s14728_s28 + $0x3e0] sm:$0xff]  }
  0x75   : > { %8818 = vmatmul.mubr.bf16.vlgmr.msra.gmra.mrb[4].mxu0 %v908_v23  ;;  %v13662_v23 = vld [vmem:[%s14728_s28 + $0x320] sm:$0xff]  }
  0x76   : > { %12253 = vmatpush3.bf16.msra.mxu0 %v13613_v24  ;;  %8858 = vmatmul.mubr.bf16.vlgmr.msra.gmra.mrb[4].mxu1 %v910_v28  ;;  %v13663_v24 = vld [vmem:[%s14728_s28 + $0x3a0] sm:$0xff]   ;;  %v13667_v28 = vld [vmem:[%s14728_s28 + $0x3a8] sm:$0xff]  }
  0x77   : > { %12254 = vmatprep.subr.bf16.mxu0 %v13615_v29  ;;  %12275 = vmatpush3.bf16.msra.mxu1 %v13614_v27  ;;  %v13666_v27 = vld [vmem:[%s14728_s28 + $0x328] sm:$0xff]   ;;  %v13668_v29 = vld [vmem:[%s14728_s28 + $0x370] sm:$0xff]  }
  0x78   : > { %12276 = vmatprep.subr.bf16.mxu1 %v13616_v31  ;;  %8897 = vmatprep.mubr.bf16.mxu0 %v913_v4  ;;  %v13670_v31 = vld [vmem:[%s14728_s28 + $0x330] sm:$0xff]   ;;  %v13697_v4 = vld [vmem:[%s14728_s28 + $0x468] sm:$0xff]  }
  0x79   : > { %8937 = vmatprep.mubr.bf16.mxu1 %v915_v9  ;;  %v13702_v9 = vld [vmem:[%s14728_s28 + $0x4f0] sm:$0xff]  }
  0x7a   : > { %12255 = vmatpush3.bf16.msra.mxu0 %v13617_v32  ;;  %v13671_v32 = vld [vmem:[%s14728_s28 + $0x3b0] sm:$0xff]  }
  0x7b   : > { %12256 = vmatprep.subr.bf16.mxu0 %v13619_v34  ;;  %12277 = vmatpush3.bf16.msra.mxu1 %v13618_v33  ;;  %v13672_v33 = vld [vmem:[%s14728_s28 + $0x378] sm:$0xff]  }
  0x7c   : > { %12278 = vmatprep.subr.bf16.mxu1 %v13620_v36  ;;  %v13673_v34 = vld [vmem:[%s14728_s28 + $0x3f8] sm:$0xff]  }
  0x7d   : > { %v13674_v36 = vld [vmem:[%s14728_s28 + $0x338] sm:$0xff]  }
  0x7e   : > { %12257 = vmatpush3.bf16.msra.mxu0 %v13621_v37  ;;  %v217_v37 = vld [vmem:[%s14768_s30 + $0x18] sm:$0xff] }
  0x7f   : > { %12258 = vmatprep.subr.bf16.mxu0 %v13623_v39  ;;  %12279 = vmatpush3.bf16.msra.mxu1 %v13622_v38  ;;  %v332_v38 = vrot.slane %v217_v37, %v14770_v35  ;;  %v325_v39 = vcombine.high %v217_v37, %v217_v37  ;;  %v13720_v37 = vld [vmem:[%s14728_s28 + $0x510] sm:$0xff]  }
  0x80   : > { %12280 = vmatprep.subr.bf16.mxu1 %v13624_v40  ;;  %v13677_v40 = vld [vmem:[%s14728_s28 + $0x440] sm:$0xff]  }
  0x82   : > { %12259 = vmatpush3.bf16.msra.mxu0 %v13625_v41  ;;  %v13675_v41 = vld [vmem:[%s14728_s28 + $0x3b8] sm:$0xff]  }
  0x83   : > { %12260 = vmatprep.subr.bf16.mxu0 %v13627_v43  ;;  %12281 = vmatpush3.bf16.msra.mxu1 %v13626_v42  ;;  %v340_v42 = vcombine.high %v332_v38, %v332_v38  ;;  %v339_v43 = vrot.slane %v325_v39, %v14770_v35  ;;  %v13722_v39 = vld [vmem:[%s14728_s28 + $0x558] sm:$0xff]  }
  0x84   : > { %12282 = vmatprep.subr.bf16.mxu1 %v13628_v44  ;;  %v13678_v44 = vld [vmem:[%s14728_s28 + $0x4c0] sm:$0xff]  }
  0x86   : > { %12261 = vmatpush3.bf16.msra.mxu0 %v13629_v45  ;;  %v916_v45 = vpack.c.bf16 %v332_v38, %v332_v38  ;;  %v13721_v38 = vld [vmem:[%s14728_s28 + $0x590] sm:$0xff]  }
  0x87   : > { %12262 = vmatprep.subr.bf16.mxu0 %v13631_v47  ;;  %12283 = vmatpush3.bf16.msra.mxu1 %v13630_v46  ;;  %v13679_v46 = vld [vmem:[%s14728_s28 + $0x400] sm:$0xff]   ;;  %v917_v47 = vpack.c.bf16 %v340_v42, %v340_v42  ;;  %v13725_v42 = vld [vmem:[%s14728_s28 + $0x598] sm:$0xff]  }
  0x88   : > { %12284 = vmatprep.subr.bf16.mxu1 %v13632_v48  ;;  %v341_v48 = vcombine.high %v339_v43, %v339_v43 }
  0x8a   : > { %12263 = vmatpush3.bf16.msra.mxu0 %v13633_v49  ;;  %v13680_v49 = vld [vmem:[%s14728_s28 + $0x480] sm:$0xff]  }
  0x8b   : > { %12264 = vmatprep.subr.bf16.mxu0 %v13635_v51  ;;  %12285 = vmatpush3.bf16.msra.mxu1 %v13634_v50  ;;  %v918_v50 = vpack.c.bf16 %v339_v43, %v339_v43  ;;  %v13681_v51 = vld [vmem:[%s14728_s28 + $0x448] sm:$0xff]   ;;  %v13726_v43 = vld [vmem:[%s14728_s28 + $0x560] sm:$0xff]  }
  0x8c   : > { %12286 = vmatprep.subr.bf16.mxu1 %v13636_v52  ;;  %v919_v52 = vpack.c.bf16 %v341_v48, %v341_v48  ;;  %v13731_v48 = vld [vmem:[%s14728_s28 + $0x5e8] sm:$0xff]  }
  0x8e   : > { %12265 = vmatpush3.bf16.msra.mxu0 %v13637_v53  ;;  %v13682_v53 = vld [vmem:[%s14728_s28 + $0x4c8] sm:$0xff]  }
  0x8f   : > { %12266 = vmatprep.subr.bf16.mxu0 %v13639_v55  ;;  %12287 = vmatpush3.bf16.msra.mxu1 %v13638_v54  ;;  %v13683_v54 = vld [vmem:[%s14728_s28 + $0x408] sm:$0xff]  }
  0x90   : > { %12288 = vmatprep.subr.bf16.mxu1 %v13640_v56  ;;  %v13684_v55 = vld [vmem:[%s14728_s28 + $0x488] sm:$0xff]   ;;  %v13685_v56 = vld [vmem:[%s14728_s28 + $0x450] sm:$0xff]  }
  0x92   : > { %12267 = vmatpush3.bf16.msra.mxu0 %v13641_v57  ;;  %v13686_v57 = vld [vmem:[%s14728_s28 + $0x4d0] sm:$0xff]  }
  0x93   : > { %12296 = vmatprep.subr.bf16.mxu0 %v13644_v62  ;;  %12289 = vmatpush3.bf16.msra.mxu1 %v13642_v59  ;;  %v13688_v59 = vld [vmem:[%s14728_s28 + $0x490] sm:$0xff]   ;;  %v13691_v62 = vld [vmem:[%s14728_s28 + $0x418] sm:$0xff]  }
  0x94   : > { %12318 = vmatprep.subr.bf16.mxu1 %v13645_v1  ;;  %v13694_v1 = vld [vmem:[%s14728_s28 + $0x4e0] sm:$0xff]  }
  0x95   : > { %8898 = vmatmul.mubr.bf16.vlgmr.msra.gmra.mrb[8].mxu0 %v912_v2  ;;  %v13695_v2 = vld [vmem:[%s14728_s28 + $0x420] sm:$0xff]  }
  0x96   : > { %12297 = vmatpush3.bf16.msra.mxu0 %v13646_v3  ;;  %8938 = vmatmul.mubr.bf16.vlgmr.msra.gmra.mrb[8].mxu1 %v914_v7  ;;  %v13696_v3 = vld [vmem:[%s14728_s28 + $0x4a0] sm:$0xff]   ;;  %v13700_v7 = vld [vmem:[%s14728_s28 + $0x4a8] sm:$0xff]  }
  0x97   : > { %12298 = vmatprep.subr.bf16.mxu0 %v13648_v8  ;;  %12319 = vmatpush3.bf16.msra.mxu1 %v13647_v6  ;;  %v13699_v6 = vld [vmem:[%s14728_s28 + $0x428] sm:$0xff]   ;;  %v13701_v8 = vld [vmem:[%s14728_s28 + $0x470] sm:$0xff]  }
  0x98   : > { %12320 = vmatprep.subr.bf16.mxu1 %v13649_v10  ;;  %8977 = vmatprep.mubr.bf16.mxu0 %v917_v47  ;;  %v13703_v10 = vld [vmem:[%s14728_s28 + $0x430] sm:$0xff]   ;;  %v13730_v47 = vld [vmem:[%s14728_s28 + $0x568] sm:$0xff]  }
  0x99   : > { %9017 = vmatprep.mubr.bf16.mxu1 %v919_v52  ;;  %v13735_v52 = vld [vmem:[%s14728_s28 + $0x5f0] sm:$0xff]  }
  0x9a   : > { %12299 = vmatpush3.bf16.msra.mxu0 %v13650_v11  ;;  %v13704_v11 = vld [vmem:[%s14728_s28 + $0x4b0] sm:$0xff]  }
  0x9b   : > { %12300 = vmatprep.subr.bf16.mxu0 %v13652_v13  ;;  %12321 = vmatpush3.bf16.msra.mxu1 %v13651_v12  ;;  %v13705_v12 = vld [vmem:[%s14728_s28 + $0x478] sm:$0xff]  }
  0x9c   : > { %12322 = vmatprep.subr.bf16.mxu1 %v13653_v14  ;;  %v13706_v13 = vld [vmem:[%s14728_s28 + $0x4f8] sm:$0xff]  }
  0x9d   : > { %v13707_v14 = vld [vmem:[%s14728_s28 + $0x438] sm:$0xff]  }
  0x9e   : > { %12301 = vmatpush3.bf16.msra.mxu0 %v13654_v15  ;;  %v218_v15 = vld [vmem:[%s14768_s30 + $0x20] sm:$0xff] }
  0x9f   : > { %12302 = vmatprep.subr.bf16.mxu0 %v13656_v17  ;;  %12323 = vmatpush3.bf16.msra.mxu1 %v13655_v16  ;;  %v13708_v16 = vld [vmem:[%s14728_s28 + $0x4b8] sm:$0xff]   ;;  %v349_v17 = vrot.slane %v218_v15, %v14770_v35 }
  0xa0   : > { %12324 = vmatprep.subr.bf16.mxu1 %v13657_v18  ;;  %v342_v18 = vcombine.high %v218_v15, %v218_v15  ;;  %v13753_v15 = vld [vmem:[%s14728_s28 + $0x610] sm:$0xff]  }
  0xa2   : > { %12303 = vmatpush3.bf16.msra.mxu0 %v13658_v19  ;;  %v13710_v19 = vld [vmem:[%s14728_s28 + $0x540] sm:$0xff]  }
  0xa3   : > { %12304 = vmatprep.subr.bf16.mxu0 %v13660_v21  ;;  %12325 = vmatpush3.bf16.msra.mxu1 %v13659_v20  ;;  %v357_v20 = vcombine.high %v349_v17, %v349_v17  ;;  %v356_v21 = vrot.slane %v342_v18, %v14770_v35  ;;  %v13756_v18 = vld [vmem:[%s14728_s28 + $0x6d8] sm:$0xff]  }
  0xa4   : > { %12326 = vmatprep.subr.bf16.mxu1 %v13661_v22  ;;  %v13711_v22 = vld [vmem:[%s14728_s28 + $0x5c0] sm:$0xff]  }
  0xa6   : > { %12305 = vmatpush3.bf16.msra.mxu0 %v13662_v23  ;;  %v920_v23 = vpack.c.bf16 %v349_v17, %v349_v17  ;;  %v13755_v17 = vld [vmem:[%s14728_s28 + $0x658] sm:$0xff]  }
  0xa7   : > { %12306 = vmatprep.subr.bf16.mxu0 %v13664_v25  ;;  %12327 = vmatpush3.bf16.msra.mxu1 %v13663_v24  ;;  %v13712_v24 = vld [vmem:[%s14728_s28 + $0x500] sm:$0xff]   ;;  %v921_v25 = vpack.c.bf16 %v357_v20, %v357_v20  ;;  %v13758_v20 = vld [vmem:[%s14728_s28 + $0x698] sm:$0xff]  }
  0xa8   : > { %12328 = vmatprep.subr.bf16.mxu1 %v13665_v26  ;;  %v358_v26 = vcombine.high %v356_v21, %v356_v21 }
  0xaa   : > { %12307 = vmatpush3.bf16.msra.mxu0 %v13666_v27  ;;  %v13713_v27 = vld [vmem:[%s14728_s28 + $0x580] sm:$0xff]  }
  0xab   : > { %12308 = vmatprep.subr.bf16.mxu0 %v13668_v29  ;;  %12329 = vmatpush3.bf16.msra.mxu1 %v13667_v28  ;;  %v922_v28 = vpack.c.bf16 %v356_v21, %v356_v21  ;;  %v13714_v29 = vld [vmem:[%s14728_s28 + $0x548] sm:$0xff]   ;;  %v13759_v21 = vld [vmem:[%s14728_s28 + $0x660] sm:$0xff]  }
  0xac   : > { %12330 = vmatprep.subr.bf16.mxu1 %v13669_v30  ;;  %v923_v30 = vpack.c.bf16 %v358_v26, %v358_v26  ;;  %v13764_v26 = vld [vmem:[%s14728_s28 + $0x6e8] sm:$0xff]  }
  0xae   : > { %12309 = vmatpush3.bf16.msra.mxu0 %v13670_v31  ;;  %v13715_v31 = vld [vmem:[%s14728_s28 + $0x5c8] sm:$0xff]  }
  0xaf   : > { %12310 = vmatprep.subr.bf16.mxu0 %v13672_v33  ;;  %12331 = vmatpush3.bf16.msra.mxu1 %v13671_v32  ;;  %v13716_v32 = vld [vmem:[%s14728_s28 + $0x508] sm:$0xff]  }
  0xb0   : > { %12332 = vmatprep.subr.bf16.mxu1 %v13673_v34  ;;  %v13717_v33 = vld [vmem:[%s14728_s28 + $0x588] sm:$0xff]   ;;  %v13718_v34 = vld [vmem:[%s14728_s28 + $0x550] sm:$0xff]  }
  0xb2   : > { %12311 = vmatpush3.bf16.msra.mxu0 %v13674_v36  ;;  %v13719_v36 = vld [vmem:[%s14728_s28 + $0x5d0] sm:$0xff]  }
  0xb3   : > { %12340 = vmatprep.subr.bf16.mxu0 %v13677_v40  ;;  %12333 = vmatpush3.bf16.msra.mxu1 %v13675_v41  ;;  %v13723_v40 = vld [vmem:[%s14728_s28 + $0x5d8] sm:$0xff]  }
  0xb4   : > { %12362 = vmatprep.subr.bf16.mxu1 %v13678_v44  ;;  %v13724_v41 = vld [vmem:[%s14728_s28 + $0x518] sm:$0xff]   ;;  %v13727_v44 = vld [vmem:[%s14728_s28 + $0x5e0] sm:$0xff]  }
  0xb5   : > { %8978 = vmatmul.mubr.bf16.vlgmr.msra.gmra.mrb[12].mxu0 %v916_v45  ;;  %v13728_v45 = vld [vmem:[%s14728_s28 + $0x520] sm:$0xff]  }
  0xb6   : > { %12341 = vmatpush3.bf16.msra.mxu0 %v13679_v46  ;;  %9018 = vmatmul.mubr.bf16.vlgmr.msra.gmra.mrb[12].mxu1 %v918_v50  ;;  %v13729_v46 = vld [vmem:[%s14728_s28 + $0x5a0] sm:$0xff]   ;;  %v13733_v50 = vld [vmem:[%s14728_s28 + $0x5a8] sm:$0xff]  }
  0xb7   : > { %12342 = vmatprep.subr.bf16.mxu0 %v13681_v51  ;;  %12363 = vmatpush3.bf16.msra.mxu1 %v13680_v49  ;;  %v13732_v49 = vld [vmem:[%s14728_s28 + $0x528] sm:$0xff]   ;;  %v13734_v51 = vld [vmem:[%s14728_s28 + $0x570] sm:$0xff]  }
  0xb8   : > { %12364 = vmatprep.subr.bf16.mxu1 %v13682_v53  ;;  %9057 = vmatprep.mubr.bf16.mxu0 %v921_v25  ;;  %v13736_v53 = vld [vmem:[%s14728_s28 + $0x530] sm:$0xff]   ;;  %v13763_v25 = vld [vmem:[%s14728_s28 + $0x668] sm:$0xff]  }
  0xb9   : > { %9097 = vmatprep.mubr.bf16.mxu1 %v923_v30  ;;  %v13768_v30 = vld [vmem:[%s14728_s28 + $0x6f0] sm:$0xff]  }
  0xba   : > { %12343 = vmatpush3.bf16.msra.mxu0 %v13683_v54  ;;  %v13737_v54 = vld [vmem:[%s14728_s28 + $0x5b0] sm:$0xff]  }
  0xbb   : > { %12344 = vmatprep.subr.bf16.mxu0 %v13685_v56  ;;  %12365 = vmatpush3.bf16.msra.mxu1 %v13684_v55  ;;  %v13738_v55 = vld [vmem:[%s14728_s28 + $0x578] sm:$0xff]  }
  0xbc   : > { %12366 = vmatprep.subr.bf16.mxu1 %v13686_v57  ;;  %v13739_v56 = vld [vmem:[%s14728_s28 + $0x5f8] sm:$0xff]  }
  0xbd   : > { %v13740_v57 = vld [vmem:[%s14728_s28 + $0x538] sm:$0xff]  }
  0xbe   : > { %12345 = vmatpush3.bf16.msra.mxu0 %v13687_v58  ;;  %v219_v58 = vld [vmem:[%s14768_s30 + $0x28] sm:$0xff] }
  0xbf   : > { %12346 = vmatprep.subr.bf16.mxu0 %v13689_v60  ;;  %12367 = vmatpush3.bf16.msra.mxu1 %v13688_v59  ;;  %v13741_v59 = vld [vmem:[%s14728_s28 + $0x5b8] sm:$0xff]   ;;  %v366_v60 = vrot.slane %v219_v58, %v14770_v35 }
  0xc0   : > { %12368 = vmatprep.subr.bf16.mxu1 %v13690_v61  ;;  %v359_v61 = vcombine.high %v219_v58, %v219_v58  ;;  %v13786_v58 = vld [vmem:[%s14728_s28 + $0x710] sm:$0xff]  }
  0xc2   : > { %12347 = vmatpush3.bf16.msra.mxu0 %v13691_v62  ;;  %v13743_v62 = vld [vmem:[%s14728_s28 + $0x640] sm:$0xff]  }
  0xc3   : > { %12348 = vmatprep.subr.bf16.mxu0 %v13693_v0  ;;  %12369 = vmatpush3.bf16.msra.mxu1 %v13692_v63  ;;  %v374_v63 = vcombine.high %v366_v60, %v366_v60  ;;  %v373_v0 = vrot.slane %v359_v61, %v14770_v35  ;;  %v13789_v61 = vld [vmem:[%s14728_s28 + $0x7d8] sm:$0xff]  }
  0xc4   : > { %12370 = vmatprep.subr.bf16.mxu1 %v13694_v1  ;;  %v13744_v1 = vld [vmem:[%s14728_s28 + $0x6c0] sm:$0xff]  }
  0xc6   : > { %12349 = vmatpush3.bf16.msra.mxu0 %v13695_v2  ;;  %v924_v2 = vpack.c.bf16 %v366_v60, %v366_v60  ;;  %v13788_v60 = vld [vmem:[%s14728_s28 + $0x758] sm:$0xff]  }
  0xc7   : > { %12350 = vmatprep.subr.bf16.mxu0 %v13697_v4  ;;  %12371 = vmatpush3.bf16.msra.mxu1 %v13696_v3  ;;  %v13745_v3 = vld [vmem:[%s14728_s28 + $0x600] sm:$0xff]   ;;  %v925_v4 = vpack.c.bf16 %v374_v63, %v374_v63  ;;  %v13791_v63 = vld [vmem:[%s14728_s28 + $0x798] sm:$0xff]  }
  0xc8   : > { %12372 = vmatprep.subr.bf16.mxu1 %v13698_v5  ;;  %v375_v5 = vcombine.high %v373_v0, %v373_v0 }
  0xca   : > { %12351 = vmatpush3.bf16.msra.mxu0 %v13699_v6  ;;  %v13746_v6 = vld [vmem:[%s14728_s28 + $0x680] sm:$0xff]  }
  0xcb   : > { %12352 = vmatprep.subr.bf16.mxu0 %v13701_v8  ;;  %12373 = vmatpush3.bf16.msra.mxu1 %v13700_v7  ;;  %v926_v7 = vpack.c.bf16 %v373_v0, %v373_v0  ;;  %v13747_v8 = vld [vmem:[%s14728_s28 + $0x648] sm:$0xff]   ;;  %v13792_v0 = vld [vmem:[%s14728_s28 + $0x760] sm:$0xff]  }
  0xcc   : > { %12374 = vmatprep.subr.bf16.mxu1 %v13702_v9  ;;  %v927_v9 = vpack.c.bf16 %v375_v5, %v375_v5  ;;  %v13797_v5 = vld [vmem:[%s14728_s28 + $0x7e8] sm:$0xff]  }
  0xce   : > { %12353 = vmatpush3.bf16.msra.mxu0 %v13703_v10  ;;  %v13748_v10 = vld [vmem:[%s14728_s28 + $0x6c8] sm:$0xff]  }
  0xcf   : > { %12354 = vmatprep.subr.bf16.mxu0 %v13705_v12  ;;  %12375 = vmatpush3.bf16.msra.mxu1 %v13704_v11  ;;  %v13749_v11 = vld [vmem:[%s14728_s28 + $0x608] sm:$0xff]  }
  0xd0   : > { %12376 = vmatprep.subr.bf16.mxu1 %v13706_v13  ;;  %v13750_v12 = vld [vmem:[%s14728_s28 + $0x688] sm:$0xff]   ;;  %v13751_v13 = vld [vmem:[%s14728_s28 + $0x650] sm:$0xff]  }
  0xd2   : > { %12355 = vmatpush3.bf16.msra.mxu0 %v13707_v14  ;;  %v13752_v14 = vld [vmem:[%s14728_s28 + $0x6d0] sm:$0xff]  }
  0xd3   : > { %12384 = vmatprep.subr.bf16.mxu0 %v13710_v19  ;;  %12377 = vmatpush3.bf16.msra.mxu1 %v13708_v16  ;;  %v13754_v16 = vld [vmem:[%s14728_s28 + $0x690] sm:$0xff]   ;;  %v13757_v19 = vld [vmem:[%s14728_s28 + $0x618] sm:$0xff]  }
  0xd4   : > { %12406 = vmatprep.subr.bf16.mxu1 %v13711_v22  ;;  %v13760_v22 = vld [vmem:[%s14728_s28 + $0x6e0] sm:$0xff]  }
  0xd5   : > { %9058 = vmatmul.mubr.bf16.vlgmr.msra.gmra.mrb[16].mxu0 %v920_v23  ;;  %v13761_v23 = vld [vmem:[%s14728_s28 + $0x620] sm:$0xff]  }
  0xd6   : > { %12385 = vmatpush3.bf16.msra.mxu0 %v13712_v24  ;;  %9098 = vmatmul.mubr.bf16.vlgmr.msra.gmra.mrb[16].mxu1 %v922_v28  ;;  %v13762_v24 = vld [vmem:[%s14728_s28 + $0x6a0] sm:$0xff]   ;;  %v13766_v28 = vld [vmem:[%s14728_s28 + $0x6a8] sm:$0xff]  }
  0xd7   : > { %12386 = vmatprep.subr.bf16.mxu0 %v13714_v29  ;;  %12407 = vmatpush3.bf16.msra.mxu1 %v13713_v27  ;;  %v13765_v27 = vld [vmem:[%s14728_s28 + $0x628] sm:$0xff]   ;;  %v13767_v29 = vld [vmem:[%s14728_s28 + $0x670] sm:$0xff]  }
  0xd8   : > { %12408 = vmatprep.subr.bf16.mxu1 %v13715_v31  ;;  %9137 = vmatprep.mubr.bf16.mxu0 %v925_v4  ;;  %v13769_v31 = vld [vmem:[%s14728_s28 + $0x630] sm:$0xff]   ;;  %v13796_v4 = vld [vmem:[%s14728_s28 + $0x768] sm:$0xff]  }
  0xd9   : > { %9177 = vmatprep.mubr.bf16.mxu1 %v927_v9 }
  0xda   : > { %12387 = vmatpush3.bf16.msra.mxu0 %v13716_v32  ;;  %v13770_v32 = vld [vmem:[%s14728_s28 + $0x6b0] sm:$0xff]  }
  0xdb   : > { %12388 = vmatprep.subr.bf16.mxu0 %v13718_v34  ;;  %12409 = vmatpush3.bf16.msra.mxu1 %v13717_v33  ;;  %v13771_v33 = vld [vmem:[%s14728_s28 + $0x678] sm:$0xff]  }
  0xdc   : > { %12410 = vmatprep.subr.bf16.mxu1 %v13719_v36  ;;  %v13772_v34 = vld [vmem:[%s14728_s28 + $0x6f8] sm:$0xff]  }
  0xdd   : > { %v13773_v36 = vld [vmem:[%s14728_s28 + $0x638] sm:$0xff]  }
  0xde   : > { %12389 = vmatpush3.bf16.msra.mxu0 %v13720_v37  ;;  %v220_v37 = vld [vmem:[%s14768_s30 + $0x30] sm:$0xff] }
  0xdf   : > { %12390 = vmatprep.subr.bf16.mxu0 %v13722_v39  ;;  %12411 = vmatpush3.bf16.msra.mxu1 %v13721_v38  ;;  %v383_v38 = vrot.slane %v220_v37, %v14770_v35  ;;  %v376_v39 = vcombine.high %v220_v37, %v220_v37 }
  0xe0   : > { %12412 = vmatprep.subr.bf16.mxu1 %v13723_v40  ;;  %v13776_v40 = vld [vmem:[%s14728_s28 + $0x740] sm:$0xff]  }
  0xe2   : > { %12391 = vmatpush3.bf16.msra.mxu0 %v13724_v41  ;;  %v13774_v41 = vld [vmem:[%s14728_s28 + $0x6b8] sm:$0xff]  }
  0xe3   : > { %12392 = vmatprep.subr.bf16.mxu0 %v13726_v43  ;;  %12413 = vmatpush3.bf16.msra.mxu1 %v13725_v42  ;;  %v391_v42 = vcombine.high %v383_v38, %v383_v38  ;;  %v390_v43 = vrot.slane %v376_v39, %v14770_v35  ;;  %v13812_v39 = vld [vmem:[%s14728_s28 + $0x880] sm:$0xff]  }
  0xe4   : > { %12414 = vmatprep.subr.bf16.mxu1 %v13727_v44  ;;  %v13777_v44 = vld [vmem:[%s14728_s28 + $0x7c0] sm:$0xff]  }
  0xe6   : > { %12393 = vmatpush3.bf16.msra.mxu0 %v13728_v45  ;;  %v928_v45 = vpack.c.bf16 %v383_v38, %v383_v38 }
  0xe7   : > { %12394 = vmatprep.subr.bf16.mxu0 %v13730_v47  ;;  %12415 = vmatpush3.bf16.msra.mxu1 %v13729_v46  ;;  %v13778_v46 = vld [vmem:[%s14728_s28 + $0x700] sm:$0xff]   ;;  %v929_v47 = vpack.c.bf16 %v391_v42, %v391_v42 }
  0xe8   : > { %12416 = vmatprep.subr.bf16.mxu1 %v13731_v48  ;;  %v392_v48 = vcombine.high %v390_v43, %v390_v43 }
  0xea   : > { %12395 = vmatpush3.bf16.msra.mxu0 %v13732_v49  ;;  %v13779_v49 = vld [vmem:[%s14728_s28 + $0x780] sm:$0xff]  }
  0xeb   : > { %12396 = vmatprep.subr.bf16.mxu0 %v13734_v51  ;;  %12417 = vmatpush3.bf16.msra.mxu1 %v13733_v50  ;;  %v930_v50 = vpack.c.bf16 %v390_v43, %v390_v43  ;;  %v13780_v51 = vld [vmem:[%s14728_s28 + $0x748] sm:$0xff]  }
  0xec   : > { %12418 = vmatprep.subr.bf16.mxu1 %v13735_v52  ;;  %v931_v52 = vpack.c.bf16 %v392_v48, %v392_v48  ;;  %v13814_v43 = vld [vmem:[%s14728_s28 + $0x8c8] sm:$0xff]   ;;  %v13819_v48 = vld [vmem:[%s14728_s28 + $0x810] sm:$0xff]  }
  0xee   : > { %12397 = vmatpush3.bf16.msra.mxu0 %v13736_v53  ;;  %v13781_v53 = vld [vmem:[%s14728_s28 + $0x7c8] sm:$0xff]  }
  0xef   : > { %12398 = vmatprep.subr.bf16.mxu0 %v13738_v55  ;;  %12419 = vmatpush3.bf16.msra.mxu1 %v13737_v54  ;;  %v13782_v54 = vld [vmem:[%s14728_s28 + $0x708] sm:$0xff]  }
  0xf0   : > { %12420 = vmatprep.subr.bf16.mxu1 %v13739_v56  ;;  %v13783_v55 = vld [vmem:[%s14728_s28 + $0x788] sm:$0xff]   ;;  %v13784_v56 = vld [vmem:[%s14728_s28 + $0x750] sm:$0xff]  }
  0xf2   : > { %12399 = vmatpush3.bf16.msra.mxu0 %v13740_v57  ;;  %v13785_v57 = vld [vmem:[%s14728_s28 + $0x7d0] sm:$0xff]  }
  0xf3   : > { %12428 = vmatprep.subr.bf16.mxu0 %v13743_v62  ;;  %12421 = vmatpush3.bf16.msra.mxu1 %v13741_v59  ;;  %v13787_v59 = vld [vmem:[%s14728_s28 + $0x790] sm:$0xff]   ;;  %v13790_v62 = vld [vmem:[%s14728_s28 + $0x718] sm:$0xff]  }
  0xf4   : > { %12450 = vmatprep.subr.bf16.mxu1 %v13744_v1  ;;  %v13793_v1 = vld [vmem:[%s14728_s28 + $0x7e0] sm:$0xff]  }
  0xf5   : > { %9138 = vmatmul.mubr.bf16.vlgmr.msra.gmra.mrb[20].mxu0 %v924_v2  ;;  %v13794_v2 = vld [vmem:[%s14728_s28 + $0x720] sm:$0xff]  }
  0xf6   : > { %12429 = vmatpush3.bf16.msra.mxu0 %v13745_v3  ;;  %9178 = vmatmul.mubr.bf16.vlgmr.msra.gmra.mrb[20].mxu1 %v926_v7  ;;  %v13795_v3 = vld [vmem:[%s14728_s28 + $0x7a0] sm:$0xff]  }
  0xf7   : > { %12430 = vmatprep.subr.bf16.mxu0 %v13747_v8  ;;  %12451 = vmatpush3.bf16.msra.mxu1 %v13746_v6  ;;  %v13798_v6 = vld [vmem:[%s14728_s28 + $0x728] sm:$0xff]  }
  0xf8   : > { %12452 = vmatprep.subr.bf16.mxu1 %v13748_v10  ;;  %9217 = vmatprep.mubr.bf16.mxu0 %v929_v47  ;;  %v13799_v8 = vld [vmem:[%s14728_s28 + $0x7a8] sm:$0xff]   ;;  %v13800_v10 = vld [vmem:[%s14728_s28 + $0x770] sm:$0xff]  }
  0xf9   : > { %9257 = vmatprep.mubr.bf16.mxu1 %v931_v52  ;;  %v13818_v47 = vld [vmem:[%s14728_s28 + $0x8d0] sm:$0xff]   ;;  %v13823_v52 = vld [vmem:[%s14728_s28 + $0x818] sm:$0xff]  }
  0xfa   : > { %12431 = vmatpush3.bf16.msra.mxu0 %v13749_v11 }
  0xfb   : > { %12432 = vmatprep.subr.bf16.mxu0 %v13751_v13  ;;  %12453 = vmatpush3.bf16.msra.mxu1 %v13750_v12 }
  0xfc   : > { %12454 = vmatprep.subr.bf16.mxu1 %v13752_v14  ;;  %v13801_v14 = vld [vmem:[%s14728_s28 + $0x7f0] sm:$0xff]  }
  0xfe   : > { %12433 = vmatpush3.bf16.msra.mxu0 %v13753_v15  ;;  %v13802_v15 = vld [vmem:[%s14728_s28 + $0x730] sm:$0xff]  }
  0xff   : > { %12434 = vmatprep.subr.bf16.mxu0 %v13755_v17  ;;  %12455 = vmatpush3.bf16.msra.mxu1 %v13754_v16 }
 0x100   : > { %12456 = vmatprep.subr.bf16.mxu1 %v13756_v18 }
 0x102   : > { %12435 = vmatpush3.bf16.msra.mxu0 %v13757_v19 }
 0x103   : > { %12436 = vmatprep.subr.bf16.mxu0 %v13759_v21  ;;  %12457 = vmatpush3.bf16.msra.mxu1 %v13758_v20  ;;  %v13803_v20 = vld [vmem:[%s14728_s28 + $0x7b0] sm:$0xff]  }
 0x104   : > { %12458 = vmatprep.subr.bf16.mxu1 %v13760_v22  ;;  %v13804_v22 = vld [vmem:[%s14728_s28 + $0x778] sm:$0xff]  }
 0x106   : > { %12437 = vmatpush3.bf16.msra.mxu0 %v13761_v23 }
 0x107   : > { %12438 = vmatprep.subr.bf16.mxu0 %v13763_v25  ;;  %12459 = vmatpush3.bf16.msra.mxu1 %v13762_v24  ;;  %v13805_v24 = vld [vmem:[%s14728_s28 + $0x7f8] sm:$0xff]  }
 0x108   : > { %12460 = vmatprep.subr.bf16.mxu1 %v13764_v26  ;;  %v13806_v25 = vld [vmem:[%s14728_s28 + $0x738] sm:$0xff]  }
 0x109   : > { %v221_v26 = vld [vmem:[%s14768_s30 + $0x38] sm:$0xff] }
 0x10a   : > { %12439 = vmatpush3.bf16.msra.mxu0 %v13765_v27  ;;  %v13807_v27 = vld [vmem:[%s14728_s28 + $0x7b8] sm:$0xff]  }
 0x10b   : > { %12440 = vmatprep.subr.bf16.mxu0 %v13767_v29  ;;  %12461 = vmatpush3.bf16.msra.mxu1 %v13766_v28  ;;  %v400_v28 = vrot.slane %v221_v26, %v14770_v35  ;;  %v393_v29 = vcombine.high %v221_v26, %v221_v26  ;;  %v13844_v26 = vld [vmem:[%s14728_s28 + $0x900] sm:$0xff]  }
 0x10c   : > { %12462 = vmatprep.subr.bf16.mxu1 %v13768_v30  ;;  %v13809_v30 = vld [vmem:[%s14728_s28 + $0x840] sm:$0xff]  }
 0x10e   : > { %12441 = vmatpush3.bf16.msra.mxu0 %v13769_v31  ;;  %v408_v31 = vcombine.high %v400_v28, %v400_v28 }
 0x10f   : > { %12442 = vmatprep.subr.bf16.mxu0 %v13771_v33  ;;  %12463 = vmatpush3.bf16.msra.mxu1 %v13770_v32  ;;  %v407_v32 = vrot.slane %v393_v29, %v14770_v35  ;;  %v13810_v33 = vld [vmem:[%s14728_s28 + $0x8c0] sm:$0xff]  }
 0x110   : > { %12464 = vmatprep.subr.bf16.mxu1 %v13772_v34  ;;  %v932_v34 = vpack.c.bf16 %v400_v28, %v400_v28  ;;  %v933_v37 = vpack.c.bf16 %v408_v31, %v408_v31  ;;  %v13845_v29 = vld [vmem:[%s14728_s28 + $0x980] sm:$0xff]   ;;  %v13846_v31 = vld [vmem:[%s14728_s28 + $0x948] sm:$0xff]  }
 0x111   : > { %v409_v38 = vcombine.high %v407_v32, %v407_v32 }
 0x112   : > { %12443 = vmatpush3.bf16.msra.mxu0 %v13773_v36  ;;  %v13811_v36 = vld [vmem:[%s14728_s28 + $0x800] sm:$0xff]  }
 0x113   : > { %12472 = vmatprep.subr.bf16.mxu0 %v13776_v40  ;;  %12465 = vmatpush3.bf16.msra.mxu1 %v13774_v41  ;;  %v934_v40 = vpack.c.bf16 %v407_v32, %v407_v32  ;;  %v13813_v41 = vld [vmem:[%s14728_s28 + $0x848] sm:$0xff]   ;;  %v935_v42 = vpack.c.bf16 %v409_v38, %v409_v38  ;;  %v13851_v38 = vld [vmem:[%s14728_s28 + $0x9d0] sm:$0xff]  }
 0x114   : > { %12494 = vmatprep.subr.bf16.mxu1 %v13777_v44  ;;  %v13815_v44 = vld [vmem:[%s14728_s28 + $0x808] sm:$0xff]  }
 0x115   : > { %9218 = vmatmul.mubr.bf16.vlgmr.msra.gmra.mrb[24].mxu0 %v928_v45  ;;  %v13816_v45 = vld [vmem:[%s14728_s28 + $0x888] sm:$0xff]  }
 0x116   : > { %12473 = vmatpush3.bf16.msra.mxu0 %v13778_v46  ;;  %9258 = vmatmul.mubr.bf16.vlgmr.msra.gmra.mrb[24].mxu1 %v930_v50  ;;  %v13817_v46 = vld [vmem:[%s14728_s28 + $0x850] sm:$0xff]   ;;  %v13821_v50 = vld [vmem:[%s14728_s28 + $0x858] sm:$0xff]  }
 0x117   : > { %12474 = vmatprep.subr.bf16.mxu0 %v13780_v51  ;;  %12495 = vmatpush3.bf16.msra.mxu1 %v13779_v49  ;;  %v13820_v49 = vld [vmem:[%s14728_s28 + $0x890] sm:$0xff]   ;;  %v13822_v51 = vld [vmem:[%s14728_s28 + $0x8d8] sm:$0xff]  }
 0x118   : > { %12496 = vmatprep.subr.bf16.mxu1 %v13781_v53  ;;  %9297 = vmatprep.mubr.bf16.mxu0 %v933_v37  ;;  %v13824_v53 = vld [vmem:[%s14728_s28 + $0x898] sm:$0xff]   ;;  %v13850_v37 = vld [vmem:[%s14728_s28 + $0x950] sm:$0xff]  }
 0x119   : > { %9337 = vmatprep.mubr.bf16.mxu1 %v935_v42  ;;  %v13855_v42 = vld [vmem:[%s14728_s28 + $0x9d8] sm:$0xff]  }
 0x11a   : > { %12475 = vmatpush3.bf16.msra.mxu0 %v13782_v54  ;;  %v13825_v54 = vld [vmem:[%s14728_s28 + $0x860] sm:$0xff]  }
 0x11b   : > { %12476 = vmatprep.subr.bf16.mxu0 %v13784_v56  ;;  %12497 = vmatpush3.bf16.msra.mxu1 %v13783_v55  ;;  %v13826_v55 = vld [vmem:[%s14728_s28 + $0x8e0] sm:$0xff]  }
 0x11c   : > { %12498 = vmatprep.subr.bf16.mxu1 %v13785_v57  ;;  %v13827_v56 = vld [vmem:[%s14728_s28 + $0x820] sm:$0xff]  }
 0x11d   : > { %v13828_v57 = vld [vmem:[%s14728_s28 + $0x8a0] sm:$0xff]  }
 0x11e   : > { %12477 = vmatpush3.bf16.msra.mxu0 %v13786_v58  ;;  %v13829_v58 = vld [vmem:[%s14728_s28 + $0x868] sm:$0xff]  }
 0x11f   : > { %12478 = vmatprep.subr.bf16.mxu0 %v13788_v60  ;;  %12499 = vmatpush3.bf16.msra.mxu1 %v13787_v59  ;;  %v13830_v59 = vld [vmem:[%s14728_s28 + $0x8e8] sm:$0xff]  }
 0x120   : > { %12500 = vmatprep.subr.bf16.mxu1 %v13789_v61  ;;  %v13831_v60 = vld [vmem:[%s14728_s28 + $0x828] sm:$0xff]  }
 0x122   : > { %12479 = vmatpush3.bf16.msra.mxu0 %v13790_v62  ;;  %v13832_v62 = vld [vmem:[%s14728_s28 + $0x8a8] sm:$0xff]  }
 0x123   : > { %12480 = vmatprep.subr.bf16.mxu0 %v13792_v0  ;;  %12501 = vmatpush3.bf16.msra.mxu1 %v13791_v63  ;;  %v13833_v0 = vld [vmem:[%s14728_s28 + $0x870] sm:$0xff]  }
 0x124   : > { %12502 = vmatprep.subr.bf16.mxu1 %v13793_v1 }
 0x126   : > { %12481 = vmatpush3.bf16.msra.mxu0 %v13794_v2 }
 0x127   : > { %12482 = vmatprep.subr.bf16.mxu0 %v13796_v4  ;;  %12503 = vmatpush3.bf16.msra.mxu1 %v13795_v3 }
 0x128   : > { %v12180_v7 = vpop.f32.mrb[0].mxu0  ;;  %12504 = vmatprep.subr.bf16.mxu1 %v13797_v5 }
 0x129   : > { %v12181_v9 = vpop.f32.mrb[1].mxu0  ;;  %v12202_v11 = vpop.f32.mrb[0].mxu1 }
 0x12a   : > { %v12182_v12 = vadd.f32 %v12181_v9, %v12180_v7  ;;  %v12183_v13 = vpop.f32.mrb[2].mxu0  ;;  %v12203_v16 = vpop.f32.mrb[1].mxu1  ;;  %12483 = vmatpush3.bf16.msra.mxu0 %v13798_v6  ;;  %v13834_v6 = vld [vmem:[%s14728_s28 + $0x8f0] sm:$0xff]  }
 0x12b   : > { %v12184_v17 = vpop.f32.mrb[3].mxu0  ;;  %v12204_v18 = vadd.f32 %v12203_v16, %v12202_v11  ;;  %v12205_v19 = vpop.f32.mrb[2].mxu1  ;;  %12484 = vmatprep.subr.bf16.mxu0 %v13800_v10  ;;  %12505 = vmatpush3.bf16.msra.mxu1 %v13799_v8  ;;  %v13835_v7 = vld [vmem:[%s14728_s28 + $0x830] sm:$0xff]   ;;  %v13837_v13 = vld [vmem:[%s14728_s28 + $0x878] sm:$0xff]  }
 0x12c   : > { %v12206_v21 = vpop.f32.mrb[3].mxu1  ;;  %12506 = vmatprep.subr.bf16.mxu1 %v13801_v14  ;;  %v13836_v11 = vld [vmem:[%s14728_s28 + $0x8b0] sm:$0xff]   ;;  %v13839_v16 = vld [vmem:[%s14728_s28 + $0x838] sm:$0xff]   ;;  %v222_v17 = vld [vmem:[%s14768_s30 + $0x40] sm:$0xff] }
 0x12d   : > { %v15016_v23 = vadd.f32 %v12204_v18, %v12182_v12  ;;  %v417_v18 = vrot.slane %v222_v17, %v14770_v35  ;;  %v410_v19 = vcombine.high %v222_v17, %v222_v17  ;;  %v13840_v21 = vld [vmem:[%s14728_s28 + $0x8b8] sm:$0xff]   ;;  %v13877_v17 = vld [vmem:[%s14728_s28 + $0xa00] sm:$0xff]  }
 0x12e   : > { %12485 = vmatpush3.bf16.msra.mxu0 %v13802_v15  ;;  %v13838_v15 = vld [vmem:[%s14728_s28 + $0x8f8] sm:$0xff]  }
 0x12f   : > { %12486 = vmatprep.subr.bf16.mxu0 %v13804_v22  ;;  %12507 = vmatpush3.bf16.msra.mxu1 %v13803_v20  ;;  %v13842_v20 = vld [vmem:[%s14728_s28 + $0x940] sm:$0xff]   ;;  %v425_v22 = vcombine.high %v417_v18, %v417_v18 }
 0x130   : > { %12508 = vmatprep.subr.bf16.mxu1 %v13805_v24  ;;  %v13843_v24 = vld [vmem:[%s14728_s28 + $0x9c0] sm:$0xff]  }
 0x132   : > { %12487 = vmatpush3.bf16.msra.mxu0 %v13806_v25  ;;  %v936_v25 = vpack.c.bf16 %v417_v18, %v417_v18 }
 0x133   : > { %12516 = vmatprep.subr.bf16.mxu0 %v13809_v30  ;;  %12509 = vmatpush3.bf16.msra.mxu1 %v13807_v27  ;;  %v937_v27 = vpack.c.bf16 %v425_v22, %v425_v22  ;;  %v13879_v22 = vld [vmem:[%s14728_s28 + $0xa48] sm:$0xff]  }
 0x134   : > { %12538 = vmatprep.subr.bf16.mxu1 %v13810_v33  ;;  %v13847_v33 = vld [vmem:[%s14728_s28 + $0x9c8] sm:$0xff]  }
 0x135   : > { %9298 = vmatmul.mubr.bf16.vlgmr.msra.gmra.mrb[28].mxu0 %v932_v34  ;;  %v13848_v34 = vld [vmem:[%s14728_s28 + $0x908] sm:$0xff]  }
 0x136   : > { %12517 = vmatpush3.bf16.msra.mxu0 %v13811_v36  ;;  %9338 = vmatmul.mubr.bf16.vlgmr.msra.gmra.mrb[28].mxu1 %v934_v40  ;;  %v13849_v36 = vld [vmem:[%s14728_s28 + $0x988] sm:$0xff]   ;;  %v13853_v40 = vld [vmem:[%s14728_s28 + $0x990] sm:$0xff]  }
 0x137   : > { %12518 = vmatprep.subr.bf16.mxu0 %v13813_v41  ;;  %12539 = vmatpush3.bf16.msra.mxu1 %v13812_v39  ;;  %v13852_v39 = vld [vmem:[%s14728_s28 + $0x910] sm:$0xff]   ;;  %v13854_v41 = vld [vmem:[%s14728_s28 + $0x958] sm:$0xff]  }
 0x138   : > { %12540 = vmatprep.subr.bf16.mxu1 %v13814_v43  ;;  %9377 = vmatprep.mubr.bf16.mxu0 %v937_v27  ;;  %v13856_v43 = vld [vmem:[%s14728_s28 + $0x918] sm:$0xff]   ;;  %v13883_v27 = vld [vmem:[%s14728_s28 + $0xa50] sm:$0xff]  }
 0x13a   : > { %12519 = vmatpush3.bf16.msra.mxu0 %v13815_v44  ;;  %v13857_v44 = vld [vmem:[%s14728_s28 + $0x998] sm:$0xff]  }
 0x13b   : > { %12520 = vmatprep.subr.bf16.mxu0 %v13817_v46  ;;  %12541 = vmatpush3.bf16.msra.mxu1 %v13816_v45  ;;  %v13858_v45 = vld [vmem:[%s14728_s28 + $0x960] sm:$0xff]  }
 0x13c   : > { %12542 = vmatprep.subr.bf16.mxu1 %v13818_v47  ;;  %v13859_v46 = vld [vmem:[%s14728_s28 + $0x9e0] sm:$0xff]  }
 0x13d   : > { %v13860_v47 = vld [vmem:[%s14728_s28 + $0x920] sm:$0xff]  }
 0x13e   : > { %12521 = vmatpush3.bf16.msra.mxu0 %v13819_v48  ;;  %v13861_v48 = vld [vmem:[%s14728_s28 + $0x9a0] sm:$0xff]  }
 0x13f   : > { %12522 = vmatprep.subr.bf16.mxu0 %v13821_v50  ;;  %12543 = vmatpush3.bf16.msra.mxu1 %v13820_v49  ;;  %v13862_v49 = vld [vmem:[%s14728_s28 + $0x968] sm:$0xff]  }
 0x140   : > { %12544 = vmatprep.subr.bf16.mxu1 %v13822_v51  ;;  %v13863_v50 = vld [vmem:[%s14728_s28 + $0x9e8] sm:$0xff]  }
 0x142   : > { %12523 = vmatpush3.bf16.msra.mxu0 %v13823_v52  ;;  %v13864_v52 = vld [vmem:[%s14728_s28 + $0x928] sm:$0xff]  }
 0x143   : > { %12524 = vmatprep.subr.bf16.mxu0 %v13825_v54  ;;  %12545 = vmatpush3.bf16.msra.mxu1 %v13824_v53  ;;  %v13865_v54 = vld [vmem:[%s14728_s28 + $0x9a8] sm:$0xff]  }
 0x144   : > { %12546 = vmatprep.subr.bf16.mxu1 %v13826_v55 }
 0x146   : > { %12525 = vmatpush3.bf16.msra.mxu0 %v13827_v56 }
 0x147   : > { %12526 = vmatprep.subr.bf16.mxu0 %v13829_v58  ;;  %12547 = vmatpush3.bf16.msra.mxu1 %v13828_v57  ;;  %v13866_v58 = vld [vmem:[%s14728_s28 + $0x970] sm:$0xff]  }
 0x148   : > { %v12224_v61 = vpop.f32.mrb[4].mxu0  ;;  %12548 = vmatprep.subr.bf16.mxu1 %v13830_v59  ;;  %v13867_v59 = vld [vmem:[%s14728_s28 + $0x9f0] sm:$0xff]  }
 0x149   : > { %v12225_v63 = vpop.f32.mrb[5].mxu0  ;;  %v12246_v1 = vpop.f32.mrb[4].mxu1 }
 0x14a   : > { %v12226_v2 = vadd.f32 %v12225_v63, %v12224_v61  ;;  %v12227_v3 = vpop.f32.mrb[6].mxu0  ;;  %v12247_v4 = vpop.f32.mrb[5].mxu1  ;;  %12527 = vmatpush3.bf16.msra.mxu0 %v13831_v60 }
 0x14b   : > { %v12228_v5 = vpop.f32.mrb[7].mxu0  ;;  %v12248_v9 = vadd.f32 %v12247_v4, %v12246_v1  ;;  %v12249_v10 = vpop.f32.mrb[6].mxu1  ;;  %12528 = vmatprep.subr.bf16.mxu0 %v13833_v0  ;;  %12549 = vmatpush3.bf16.msra.mxu1 %v13832_v62  ;;  %v13868_v1 = vld [vmem:[%s14728_s28 + $0x930] sm:$0xff]  }
 0x14c   : > { %v8820_v8 = vadd.f32 %v12226_v2, %v15016_v23  ;;  %v12250_v12 = vpop.f32.mrb[7].mxu1  ;;  %12550 = vmatprep.subr.bf16.mxu1 %v13834_v6  ;;  %v424_v23 = vrot.slane %v410_v19, %v14770_v35  ;;  %v13869_v3 = vld [vmem:[%s14728_s28 + $0x9b0] sm:$0xff]   ;;  %v13870_v5 = vld [vmem:[%s14728_s28 + $0x978] sm:$0xff]  }
 0x14d   : > { %v13871_v6 = vld [vmem:[%s14728_s28 + $0x9f8] sm:$0xff]  }
 0x14e   : > { %v15054_v14 = vadd.f32 %v12248_v9, %v8820_v8  ;;  %12529 = vmatpush3.bf16.msra.mxu0 %v13835_v7  ;;  %v426_v28 = vcombine.high %v424_v23, %v424_v23  ;;  %v938_v30 = vpack.c.bf16 %v424_v23, %v424_v23  ;;  %v13872_v7 = vld [vmem:[%s14728_s28 + $0x938] sm:$0xff]   ;;  %v223_v8 = vld [vmem:[%s14768_s30 + $0x48] sm:$0xff] }
 0x14f   : > { %12530 = vmatprep.subr.bf16.mxu0 %v13837_v13  ;;  %12551 = vmatpush3.bf16.msra.mxu1 %v13836_v11  ;;  %v434_v9 = vrot.slane %v223_v8, %v14770_v35  ;;  %v427_v10 = vcombine.high %v223_v8, %v223_v8  ;;  %v13875_v11 = vld [vmem:[%s14728_s28 + $0xa40] sm:$0xff]   ;;  %v13873_v12 = vld [vmem:[%s14728_s28 + $0x9b8] sm:$0xff]  }
 0x150   : > { %12552 = vmatprep.subr.bf16.mxu1 %v13838_v15  ;;  %v939_v32 = vpack.c.bf16 %v426_v28, %v426_v28  ;;  %v13876_v15 = vld [vmem:[%s14728_s28 + $0xac0] sm:$0xff]   ;;  %v13884_v28 = vld [vmem:[%s14728_s28 + $0xad0] sm:$0xff]  }
 0x151   : > { %v442_v13 = vcombine.high %v434_v9, %v434_v9  ;;  %v13910_v8 = vld [vmem:[%s14728_s28 + $0xb00] sm:$0xff]  }
 0x152   : > { %12531 = vmatpush3.bf16.msra.mxu0 %v13839_v16  ;;  %9417 = vmatprep.mubr.bf16.mxu1 %v939_v32  ;;  %v940_v16 = vpack.c.bf16 %v434_v9, %v434_v9  ;;  %v13888_v32 = vld [vmem:[%s14728_s28 + $0xad8] sm:$0xff]  }
 0x153   : > { %12560 = vmatprep.subr.bf16.mxu0 %v13842_v20  ;;  %12553 = vmatpush3.bf16.msra.mxu1 %v13840_v21  ;;  %v941_v18 = vpack.c.bf16 %v442_v13, %v442_v13  ;;  %v13878_v20 = vld [vmem:[%s14728_s28 + $0xa80] sm:$0xff]   ;;  %v13912_v13 = vld [vmem:[%s14728_s28 + $0xb48] sm:$0xff]  }
 0x154   : > { %12582 = vmatprep.subr.bf16.mxu1 %v13843_v24  ;;  %v13880_v24 = vld [vmem:[%s14728_s28 + $0xac8] sm:$0xff]  }
 0x155   : > { %9378 = vmatmul.mubr.bf16.vlgmr.msra.gmra.mrb[32].mxu0 %v936_v25  ;;  %v13881_v25 = vld [vmem:[%s14728_s28 + $0xa08] sm:$0xff]  }
 0x156   : > { %12561 = vmatpush3.bf16.msra.mxu0 %v13844_v26  ;;  %9418 = vmatmul.mubr.bf16.vlgmr.msra.gmra.mrb[32].mxu1 %v938_v30  ;;  %v13882_v26 = vld [vmem:[%s14728_s28 + $0xa88] sm:$0xff]   ;;  %v13886_v30 = vld [vmem:[%s14728_s28 + $0xa90] sm:$0xff]  }
 0x157   : > { %12562 = vmatprep.subr.bf16.mxu0 %v13846_v31  ;;  %12583 = vmatpush3.bf16.msra.mxu1 %v13845_v29  ;;  %v13885_v29 = vld [vmem:[%s14728_s28 + $0xa10] sm:$0xff]   ;;  %v13887_v31 = vld [vmem:[%s14728_s28 + $0xa58] sm:$0xff]  }
 0x158   : > { %12584 = vmatprep.subr.bf16.mxu1 %v13847_v33  ;;  %9457 = vmatprep.mubr.bf16.mxu0 %v941_v18  ;;  %v13889_v33 = vld [vmem:[%s14728_s28 + $0xa18] sm:$0xff]   ;;  %v13916_v18 = vld [vmem:[%s14728_s28 + $0xb50] sm:$0xff]  }
 0x15a   : > { %12563 = vmatpush3.bf16.msra.mxu0 %v13848_v34  ;;  %v13890_v34 = vld [vmem:[%s14728_s28 + $0xa98] sm:$0xff]  }
 0x15b   : > { %12564 = vmatprep.subr.bf16.mxu0 %v13850_v37  ;;  %12585 = vmatpush3.bf16.msra.mxu1 %v13849_v36  ;;  %v13891_v36 = vld [vmem:[%s14728_s28 + $0xa60] sm:$0xff]  }
 0x15c   : > { %12586 = vmatprep.subr.bf16.mxu1 %v13851_v38  ;;  %v13892_v37 = vld [vmem:[%s14728_s28 + $0xae0] sm:$0xff]  }
 0x15d   : > { %v13893_v38 = vld [vmem:[%s14728_s28 + $0xa20] sm:$0xff]  }
 0x15e   : > { %12565 = vmatpush3.bf16.msra.mxu0 %v13852_v39  ;;  %v13894_v39 = vld [vmem:[%s14728_s28 + $0xaa0] sm:$0xff]  }
 0x15f   : > { %12566 = vmatprep.subr.bf16.mxu0 %v13854_v41  ;;  %12587 = vmatpush3.bf16.msra.mxu1 %v13853_v40  ;;  %v13895_v40 = vld [vmem:[%s14728_s28 + $0xa68] sm:$0xff]  }
 0x160   : > { %12588 = vmatprep.subr.bf16.mxu1 %v13855_v42  ;;  %v13896_v41 = vld [vmem:[%s14728_s28 + $0xae8] sm:$0xff]  }
 0x162   : > { %12567 = vmatpush3.bf16.msra.mxu0 %v13856_v43  ;;  %v13897_v43 = vld [vmem:[%s14728_s28 + $0xa28] sm:$0xff]  }
 0x163   : > { %12568 = vmatprep.subr.bf16.mxu0 %v13858_v45  ;;  %12589 = vmatpush3.bf16.msra.mxu1 %v13857_v44  ;;  %v13898_v45 = vld [vmem:[%s14728_s28 + $0xaa8] sm:$0xff]  }
 0x164   : > { %12590 = vmatprep.subr.bf16.mxu1 %v13859_v46 }
 0x166   : > { %12569 = vmatpush3.bf16.msra.mxu0 %v13860_v47 }
 0x167   : > { %12570 = vmatprep.subr.bf16.mxu0 %v13862_v49  ;;  %12591 = vmatpush3.bf16.msra.mxu1 %v13861_v48  ;;  %v13899_v49 = vld [vmem:[%s14728_s28 + $0xa70] sm:$0xff]  }
 0x168   : > { %v12268_v51 = vpop.f32.mrb[8].mxu0  ;;  %12592 = vmatprep.subr.bf16.mxu1 %v13863_v50  ;;  %v13900_v50 = vld [vmem:[%s14728_s28 + $0xaf0] sm:$0xff]  }
 0x169   : > { %v12269_v53 = vpop.f32.mrb[9].mxu0  ;;  %v12290_v55 = vpop.f32.mrb[8].mxu1 }
 0x16a   : > { %v12270_v56 = vadd.f32 %v12269_v53, %v12268_v51  ;;  %v12271_v57 = vpop.f32.mrb[10].mxu0  ;;  %v12291_v60 = vpop.f32.mrb[9].mxu1  ;;  %12571 = vmatpush3.bf16.msra.mxu0 %v13864_v52 }
 0x16b   : > { %v12272_v61 = vpop.f32.mrb[11].mxu0  ;;  %v12292_v63 = vadd.f32 %v12291_v60, %v12290_v55  ;;  %v12293_v0 = vpop.f32.mrb[10].mxu1  ;;  %12572 = vmatprep.subr.bf16.mxu0 %v13866_v58  ;;  %12593 = vmatpush3.bf16.msra.mxu1 %v13865_v54  ;;  %v13902_v58 = vld [vmem:[%s14728_s28 + $0xab0] sm:$0xff]   ;;  %v13903_v60 = vld [vmem:[%s14728_s28 + $0xa78] sm:$0xff]  }
 0x16c   : > { %v8900_v62 = vadd.f32 %v12270_v56, %v15054_v14  ;;  %v12294_v2 = vpop.f32.mrb[11].mxu1  ;;  %12594 = vmatprep.subr.bf16.mxu1 %v13867_v59  ;;  %v441_v14 = vrot.slane %v427_v10, %v14770_v35  ;;  %v13901_v56 = vld [vmem:[%s14728_s28 + $0xa30] sm:$0xff]   ;;  %v13904_v61 = vld [vmem:[%s14728_s28 + $0xaf8] sm:$0xff]  }
 0x16d   : > { %v13906_v0 = vld [vmem:[%s14728_s28 + $0xab8] sm:$0xff]  }
 0x16e   : > { %v15091_v4 = vadd.f32 %v12292_v63, %v8900_v62  ;;  %12573 = vmatpush3.bf16.msra.mxu0 %v13868_v1  ;;  %v443_v19 = vcombine.high %v441_v14, %v441_v14  ;;  %v942_v21 = vpack.c.bf16 %v441_v14, %v441_v14  ;;  %v13905_v62 = vld [vmem:[%s14728_s28 + $0xa38] sm:$0xff]   ;;  %v224_v63 = vld [vmem:[%s14768_s30 + $0x50] sm:$0xff] }
 0x16f   : > { %12574 = vmatprep.subr.bf16.mxu0 %v13870_v5  ;;  %12595 = vmatpush3.bf16.msra.mxu1 %v13869_v3  ;;  %v451_v1 = vrot.slane %v224_v63, %v14770_v35  ;;  %v444_v2 = vcombine.high %v224_v63, %v224_v63  ;;  %v13908_v3 = vld [vmem:[%s14728_s28 + $0xb40] sm:$0xff]  }
 0x170   : > { %12596 = vmatprep.subr.bf16.mxu1 %v13871_v6  ;;  %v943_v23 = vpack.c.bf16 %v443_v19, %v443_v19  ;;  %v13909_v6 = vld [vmem:[%s14728_s28 + $0xbc0] sm:$0xff]   ;;  %v13917_v19 = vld [vmem:[%s14728_s28 + $0xbd0] sm:$0xff]  }
 0x171   : > { %v458_v5 = vrot.slane %v444_v2, %v14770_v35  ;;  %v13943_v63 = vld [vmem:[%s14728_s28 + $0xc00] sm:$0xff]  }
 0x172   : > { %12575 = vmatpush3.bf16.msra.mxu0 %v13872_v7  ;;  %9497 = vmatprep.mubr.bf16.mxu1 %v943_v23  ;;  %v944_v7 = vpack.c.bf16 %v451_v1, %v451_v1  ;;  %v13921_v23 = vld [vmem:[%s14728_s28 + $0xbd8] sm:$0xff]   ;;  %v13944_v2 = vld [vmem:[%s14728_s28 + $0xc80] sm:$0xff]  }
 0x173   : > { %12604 = vmatprep.subr.bf16.mxu0 %v13875_v11  ;;  %12597 = vmatpush3.bf16.msra.mxu1 %v13873_v12  ;;  %v460_v10 = vcombine.high %v458_v5, %v458_v5  ;;  %v13911_v11 = vld [vmem:[%s14728_s28 + $0xb80] sm:$0xff]   ;;  %v946_v12 = vpack.c.bf16 %v458_v5, %v458_v5 }
 0x174   : > { %12626 = vmatprep.subr.bf16.mxu1 %v13876_v15  ;;  %v13913_v15 = vld [vmem:[%s14728_s28 + $0xbc8] sm:$0xff]  }
 0x175   : > { %9458 = vmatmul.mubr.bf16.vlgmr.msra.gmra.mrb[36].mxu0 %v940_v16  ;;  %v947_v14 = vpack.c.bf16 %v460_v10, %v460_v10  ;;  %v13914_v16 = vld [vmem:[%s14728_s28 + $0xb08] sm:$0xff]   ;;  %v13950_v10 = vld [vmem:[%s14728_s28 + $0xcd0] sm:$0xff]  }
 0x176   : > { %12605 = vmatpush3.bf16.msra.mxu0 %v13877_v17  ;;  %9498 = vmatmul.mubr.bf16.vlgmr.msra.gmra.mrb[36].mxu1 %v942_v21  ;;  %v13915_v17 = vld [vmem:[%s14728_s28 + $0xb88] sm:$0xff]   ;;  %v13919_v21 = vld [vmem:[%s14728_s28 + $0xb90] sm:$0xff]  }
 0x177   : > { %12606 = vmatprep.subr.bf16.mxu0 %v13879_v22  ;;  %12627 = vmatpush3.bf16.msra.mxu1 %v13878_v20  ;;  %v13918_v20 = vld [vmem:[%s14728_s28 + $0xb10] sm:$0xff]   ;;  %v13920_v22 = vld [vmem:[%s14728_s28 + $0xb58] sm:$0xff]  }
 0x178   : > { %12628 = vmatprep.subr.bf16.mxu1 %v13880_v24  ;;  %9577 = vmatprep.mubr.bf16.mxu1 %v947_v14  ;;  %v13922_v24 = vld [vmem:[%s14728_s28 + $0xb18] sm:$0xff]  }
 0x179   : > { %v13954_v14 = vld [vmem:[%s14728_s28 + $0xcd8] sm:$0xff]  }
 0x17a   : > { %12607 = vmatpush3.bf16.msra.mxu0 %v13881_v25  ;;  %v13923_v25 = vld [vmem:[%s14728_s28 + $0xb98] sm:$0xff]  }
 0x17b   : > { %12608 = vmatprep.subr.bf16.mxu0 %v13883_v27  ;;  %12629 = vmatpush3.bf16.msra.mxu1 %v13882_v26  ;;  %v13924_v26 = vld [vmem:[%s14728_s28 + $0xb60] sm:$0xff]  }
 0x17c   : > { %12630 = vmatprep.subr.bf16.mxu1 %v13884_v28  ;;  %v13925_v27 = vld [vmem:[%s14728_s28 + $0xbe0] sm:$0xff]  }
 0x17d   : > { %v13926_v28 = vld [vmem:[%s14728_s28 + $0xb20] sm:$0xff]  }
 0x17e   : > { %12609 = vmatpush3.bf16.msra.mxu0 %v13885_v29  ;;  %v13927_v29 = vld [vmem:[%s14728_s28 + $0xba0] sm:$0xff]  }
 0x17f   : > { %12610 = vmatprep.subr.bf16.mxu0 %v13887_v31  ;;  %12631 = vmatpush3.bf16.msra.mxu1 %v13886_v30  ;;  %v13928_v30 = vld [vmem:[%s14728_s28 + $0xb68] sm:$0xff]  }
 0x180   : > { %12632 = vmatprep.subr.bf16.mxu1 %v13888_v32  ;;  %v13929_v31 = vld [vmem:[%s14728_s28 + $0xbe8] sm:$0xff]  }
 0x182   : > { %12611 = vmatpush3.bf16.msra.mxu0 %v13889_v33  ;;  %v13930_v33 = vld [vmem:[%s14728_s28 + $0xb28] sm:$0xff]  }
 0x183   : > { %12612 = vmatprep.subr.bf16.mxu0 %v13891_v36  ;;  %12633 = vmatpush3.bf16.msra.mxu1 %v13890_v34  ;;  %v13932_v36 = vld [vmem:[%s14728_s28 + $0xb70] sm:$0xff]  }
 0x184   : > { %12634 = vmatprep.subr.bf16.mxu1 %v13892_v37 }
 0x186   : > { %12613 = vmatpush3.bf16.msra.mxu0 %v13893_v38 }
 0x187   : > { %12614 = vmatprep.subr.bf16.mxu0 %v13895_v40  ;;  %12635 = vmatpush3.bf16.msra.mxu1 %v13894_v39 }
 0x188   : > { %v12312_v42 = vpop.f32.mrb[12].mxu0  ;;  %12636 = vmatprep.subr.bf16.mxu1 %v13896_v41  ;;  %v13931_v41 = vld [vmem:[%s14728_s28 + $0xba8] sm:$0xff]  }
 0x189   : > { %v12313_v44 = vpop.f32.mrb[13].mxu0  ;;  %v12334_v46 = vpop.f32.mrb[12].mxu1 }
 0x18a   : > { %v12314_v47 = vadd.f32 %v12313_v44, %v12312_v42  ;;  %v12315_v48 = vpop.f32.mrb[14].mxu0  ;;  %v12335_v51 = vpop.f32.mrb[13].mxu1  ;;  %12615 = vmatpush3.bf16.msra.mxu0 %v13897_v43  ;;  %v13933_v43 = vld [vmem:[%s14728_s28 + $0xbf0] sm:$0xff]  }
 0x18b   : > { %v12316_v52 = vpop.f32.mrb[15].mxu0  ;;  %v12336_v54 = vadd.f32 %v12335_v51, %v12334_v46  ;;  %v12337_v55 = vpop.f32.mrb[14].mxu1  ;;  %12616 = vmatprep.subr.bf16.mxu0 %v13899_v49  ;;  %12637 = vmatpush3.bf16.msra.mxu1 %v13898_v45  ;;  %v13936_v49 = vld [vmem:[%s14728_s28 + $0xb78] sm:$0xff]   ;;  %v13935_v51 = vld [vmem:[%s14728_s28 + $0xbb0] sm:$0xff]  }
 0x18c   : > { %v8980_v53 = vadd.f32 %v12314_v47, %v15091_v4  ;;  %v12338_v57 = vpop.f32.mrb[15].mxu1  ;;  %12638 = vmatprep.subr.bf16.mxu1 %v13900_v50  ;;  %v459_v4 = vcombine.high %v451_v1, %v451_v1  ;;  %v13934_v47 = vld [vmem:[%s14728_s28 + $0xb30] sm:$0xff]   ;;  %v13937_v52 = vld [vmem:[%s14728_s28 + $0xbf8] sm:$0xff]  }
 0x18d   : > { %v13941_v57 = vld [vmem:[%s14728_s28 + $0xc40] sm:$0xff]  }
 0x18e   : > { %v15129_v59 = vadd.f32 %v12336_v54, %v8980_v53  ;;  %12617 = vmatpush3.bf16.msra.mxu0 %v13901_v56  ;;  %v945_v9 = vpack.c.bf16 %v459_v4, %v459_v4  ;;  %v13938_v53 = vld [vmem:[%s14728_s28 + $0xb38] sm:$0xff]   ;;  %v13945_v4 = vld [vmem:[%s14728_s28 + $0xc48] sm:$0xff]  }
 0x18f   : > { %12618 = vmatprep.subr.bf16.mxu0 %v13903_v60  ;;  %12639 = vmatpush3.bf16.msra.mxu1 %v13902_v58  ;;  %v225_v54 = vld [vmem:[%s14768_s30 + $0x58] sm:$0xff] }
 0x190   : > { %12640 = vmatprep.subr.bf16.mxu1 %v13904_v61  ;;  %9537 = vmatprep.mubr.bf16.mxu0 %v945_v9  ;;  %v468_v55 = vrot.slane %v225_v54, %v14770_v35  ;;  %v461_v56 = vcombine.high %v225_v54, %v225_v54  ;;  %v13939_v58 = vld [vmem:[%s14728_s28 + $0xbb8] sm:$0xff]   ;;  %v13942_v61 = vld [vmem:[%s14728_s28 + $0xcc0] sm:$0xff]   ;;  %v13949_v9 = vld [vmem:[%s14728_s28 + $0xc50] sm:$0xff]  }
 0x191   : > { %v13976_v54 = vld [vmem:[%s14728_s28 + $0xd00] sm:$0xff]  }
 0x192   : > { %12619 = vmatpush3.bf16.msra.mxu0 %v13905_v62  ;;  %v475_v60 = vrot.slane %v461_v56, %v14770_v35  ;;  %v948_v62 = vpack.c.bf16 %v468_v55, %v468_v55 }
 0x193   : > { %12648 = vmatprep.subr.bf16.mxu0 %v13908_v3  ;;  %12641 = vmatpush3.bf16.msra.mxu1 %v13906_v0 }
 0x194   : > { %12670 = vmatprep.subr.bf16.mxu1 %v13909_v6  ;;  %v477_v1 = vcombine.high %v475_v60, %v475_v60  ;;  %v950_v3 = vpack.c.bf16 %v475_v60, %v475_v60  ;;  %v13946_v6 = vld [vmem:[%s14728_s28 + $0xcc8] sm:$0xff]  }
 0x195   : > { %9538 = vmatmul.mubr.bf16.vlgmr.msra.gmra.mrb[40].mxu0 %v944_v7  ;;  %v13947_v7 = vld [vmem:[%s14728_s28 + $0xc08] sm:$0xff]  }
 0x196   : > { %12649 = vmatpush3.bf16.msra.mxu0 %v13910_v8  ;;  %9578 = vmatmul.mubr.bf16.vlgmr.msra.gmra.mrb[40].mxu1 %v946_v12  ;;  %v951_v5 = vpack.c.bf16 %v477_v1, %v477_v1  ;;  %v13948_v8 = vld [vmem:[%s14728_s28 + $0xc88] sm:$0xff]   ;;  %v13952_v12 = vld [vmem:[%s14728_s28 + $0xc90] sm:$0xff]  }
 0x197   : > { %12650 = vmatprep.subr.bf16.mxu0 %v13912_v13  ;;  %12671 = vmatpush3.bf16.msra.mxu1 %v13911_v11  ;;  %v13951_v11 = vld [vmem:[%s14728_s28 + $0xc10] sm:$0xff]   ;;  %v13953_v13 = vld [vmem:[%s14728_s28 + $0xc58] sm:$0xff]  }
 0x198   : > { %12672 = vmatprep.subr.bf16.mxu1 %v13913_v15  ;;  %9657 = vmatprep.mubr.bf16.mxu1 %v951_v5  ;;  %v13955_v15 = vld [vmem:[%s14728_s28 + $0xc18] sm:$0xff]   ;;  %v13983_v1 = vld [vmem:[%s14728_s28 + $0xdd0] sm:$0xff]  }
 0x199   : > { %v13987_v5 = vld [vmem:[%s14728_s28 + $0xdd8] sm:$0xff]  }
 0x19a   : > { %12651 = vmatpush3.bf16.msra.mxu0 %v13914_v16  ;;  %v13956_v16 = vld [vmem:[%s14728_s28 + $0xc98] sm:$0xff]  }
 0x19b   : > { %12652 = vmatprep.subr.bf16.mxu0 %v13916_v18  ;;  %12673 = vmatpush3.bf16.msra.mxu1 %v13915_v17  ;;  %v13957_v17 = vld [vmem:[%s14728_s28 + $0xc60] sm:$0xff]  }
 0x19c   : > { %12674 = vmatprep.subr.bf16.mxu1 %v13917_v19  ;;  %v13958_v18 = vld [vmem:[%s14728_s28 + $0xce0] sm:$0xff]  }
 0x19d   : > { %v13959_v19 = vld [vmem:[%s14728_s28 + $0xc20] sm:$0xff]  }
 0x19e   : > { %12653 = vmatpush3.bf16.msra.mxu0 %v13918_v20  ;;  %v13960_v20 = vld [vmem:[%s14728_s28 + $0xca0] sm:$0xff]  }
 0x19f   : > { %12654 = vmatprep.subr.bf16.mxu0 %v13920_v22  ;;  %12675 = vmatpush3.bf16.msra.mxu1 %v13919_v21  ;;  %v13961_v21 = vld [vmem:[%s14728_s28 + $0xc68] sm:$0xff]  }
 0x1a0   : > { %12676 = vmatprep.subr.bf16.mxu1 %v13921_v23  ;;  %v13962_v23 = vld [vmem:[%s14728_s28 + $0xce8] sm:$0xff]  }
 0x1a2   : > { %12655 = vmatpush3.bf16.msra.mxu0 %v13922_v24 }
 0x1a3   : > { %12656 = vmatprep.subr.bf16.mxu0 %v13924_v26  ;;  %12677 = vmatpush3.bf16.msra.mxu1 %v13923_v25  ;;  %v13963_v25 = vld [vmem:[%s14728_s28 + $0xc28] sm:$0xff]  }
 0x1a4   : > { %12678 = vmatprep.subr.bf16.mxu1 %v13925_v27 }
 0x1a6   : > { %12657 = vmatpush3.bf16.msra.mxu0 %v13926_v28 }
 0x1a7   : > { %12658 = vmatprep.subr.bf16.mxu0 %v13928_v30  ;;  %12679 = vmatpush3.bf16.msra.mxu1 %v13927_v29  ;;  %v13964_v29 = vld [vmem:[%s14728_s28 + $0xca8] sm:$0xff]   ;;  %v13965_v30 = vld [vmem:[%s14728_s28 + $0xc70] sm:$0xff]  }
 0x1a8   : > { %v12356_v32 = vpop.f32.mrb[16].mxu0  ;;  %12680 = vmatprep.subr.bf16.mxu1 %v13929_v31 }
 0x1a9   : > { %v12357_v34 = vpop.f32.mrb[17].mxu0  ;;  %v12378_v37 = vpop.f32.mrb[16].mxu1 }
 0x1aa   : > { %v12358_v38 = vadd.f32 %v12357_v34, %v12356_v32  ;;  %v12359_v39 = vpop.f32.mrb[18].mxu0  ;;  %v12379_v40 = vpop.f32.mrb[17].mxu1  ;;  %12659 = vmatpush3.bf16.msra.mxu0 %v13930_v33 }
 0x1ab   : > { %v12360_v42 = vpop.f32.mrb[19].mxu0  ;;  %v12380_v45 = vadd.f32 %v12379_v40, %v12378_v37  ;;  %v12381_v46 = vpop.f32.mrb[18].mxu1  ;;  %12660 = vmatprep.subr.bf16.mxu0 %v13932_v36  ;;  %12681 = vmatpush3.bf16.msra.mxu1 %v13931_v41  ;;  %v13966_v37 = vld [vmem:[%s14728_s28 + $0xcf0] sm:$0xff]  }
 0x1ac   : > { %v9060_v44 = vadd.f32 %v12358_v38, %v15129_v59  ;;  %v12382_v48 = vpop.f32.mrb[19].mxu1  ;;  %12682 = vmatprep.subr.bf16.mxu1 %v13933_v43  ;;  %v476_v59 = vcombine.high %v468_v55, %v468_v55  ;;  %v13967_v39 = vld [vmem:[%s14728_s28 + $0xc30] sm:$0xff]   ;;  %v13969_v42 = vld [vmem:[%s14728_s28 + $0xc78] sm:$0xff]  }
 0x1ad   : > { %v13968_v41 = vld [vmem:[%s14728_s28 + $0xcb0] sm:$0xff]   ;;  %v13970_v43 = vld [vmem:[%s14728_s28 + $0xcf8] sm:$0xff]   ;;  %v13974_v48 = vld [vmem:[%s14728_s28 + $0xd40] sm:$0xff]  }
 0x1ae   : > { %v15167_v50 = vadd.f32 %v12380_v45, %v9060_v44  ;;  %12661 = vmatpush3.bf16.msra.mxu0 %v13934_v47  ;;  %v949_v0 = vpack.c.bf16 %v476_v59, %v476_v59  ;;  %v13971_v44 = vld [vmem:[%s14728_s28 + $0xc38] sm:$0xff]   ;;  %v226_v45 = vld [vmem:[%s14768_s30 + $0x60] sm:$0xff]  ;;  %v13978_v59 = vld [vmem:[%s14728_s28 + $0xd48] sm:$0xff]  }
 0x1af   : > { %12662 = vmatprep.subr.bf16.mxu0 %v13936_v49  ;;  %12683 = vmatpush3.bf16.msra.mxu1 %v13935_v51  ;;  %v485_v46 = vrot.slane %v226_v45, %v14770_v35  ;;  %v478_v47 = vcombine.high %v226_v45, %v226_v45  ;;  %v13972_v49 = vld [vmem:[%s14728_s28 + $0xcb8] sm:$0xff]   ;;  %v14009_v45 = vld [vmem:[%s14728_s28 + $0xe00] sm:$0xff]  }
 0x1b0   : > { %12684 = vmatprep.subr.bf16.mxu1 %v13937_v52  ;;  %9617 = vmatprep.mubr.bf16.mxu0 %v949_v0  ;;  %v13975_v52 = vld [vmem:[%s14728_s28 + $0xdc0] sm:$0xff]   ;;  %v13982_v0 = vld [vmem:[%s14728_s28 + $0xd50] sm:$0xff]  }
 0x1b1   : > { %v492_v51 = vrot.slane %v478_v47, %v14770_v35 }
 0x1b2   : > { %12663 = vmatpush3.bf16.msra.mxu0 %v13938_v53  ;;  %v952_v53 = vpack.c.bf16 %v485_v46, %v485_v46 }
 0x1b3   : > { %12692 = vmatprep.subr.bf16.mxu0 %v13941_v57  ;;  %12685 = vmatpush3.bf16.msra.mxu1 %v13939_v58  ;;  %v494_v56 = vcombine.high %v492_v51, %v492_v51  ;;  %v13977_v57 = vld [vmem:[%s14728_s28 + $0xd80] sm:$0xff]   ;;  %v954_v58 = vpack.c.bf16 %v492_v51, %v492_v51 }
 0x1b4   : > { %12714 = vmatprep.subr.bf16.mxu1 %v13942_v61  ;;  %v13979_v61 = vld [vmem:[%s14728_s28 + $0xdc8] sm:$0xff]  }
 0x1b5   : > { %9618 = vmatmul.mubr.bf16.vlgmr.msra.gmra.mrb[44].mxu0 %v948_v62  ;;  %v955_v60 = vpack.c.bf16 %v494_v56, %v494_v56  ;;  %v13980_v62 = vld [vmem:[%s14728_s28 + $0xd08] sm:$0xff]   ;;  %v14016_v56 = vld [vmem:[%s14728_s28 + $0xed0] sm:$0xff]  }
 0x1b6   : > { %12693 = vmatpush3.bf16.msra.mxu0 %v13943_v63  ;;  %9658 = vmatmul.mubr.bf16.vlgmr.msra.gmra.mrb[44].mxu1 %v950_v3  ;;  %v13981_v63 = vld [vmem:[%s14728_s28 + $0xd88] sm:$0xff]   ;;  %v13985_v3 = vld [vmem:[%s14728_s28 + $0xd90] sm:$0xff]  }
 0x1b7   : > { %12694 = vmatprep.subr.bf16.mxu0 %v13945_v4  ;;  %12715 = vmatpush3.bf16.msra.mxu1 %v13944_v2  ;;  %v13984_v2 = vld [vmem:[%s14728_s28 + $0xd10] sm:$0xff]   ;;  %v13986_v4 = vld [vmem:[%s14728_s28 + $0xd58] sm:$0xff]  }
 0x1b8   : > { %12716 = vmatprep.subr.bf16.mxu1 %v13946_v6  ;;  %9737 = vmatprep.mubr.bf16.mxu1 %v955_v60  ;;  %v13988_v6 = vld [vmem:[%s14728_s28 + $0xd18] sm:$0xff]  }
 0x1b9   : > { %v14020_v60 = vld [vmem:[%s14728_s28 + $0xed8] sm:$0xff]  }
 0x1ba   : > { %12695 = vmatpush3.bf16.msra.mxu0 %v13947_v7  ;;  %v13989_v7 = vld [vmem:[%s14728_s28 + $0xd98] sm:$0xff]  }
 0x1bb   : > { %12696 = vmatprep.subr.bf16.mxu0 %v13949_v9  ;;  %12717 = vmatpush3.bf16.msra.mxu1 %v13948_v8  ;;  %v13990_v8 = vld [vmem:[%s14728_s28 + $0xd60] sm:$0xff]  }
 0x1bc   : > { %12718 = vmatprep.subr.bf16.mxu1 %v13950_v10  ;;  %v13991_v9 = vld [vmem:[%s14728_s28 + $0xde0] sm:$0xff]  }
 0x1bd   : > { %v13992_v10 = vld [vmem:[%s14728_s28 + $0xd20] sm:$0xff]  }
 0x1be   : > { %12697 = vmatpush3.bf16.msra.mxu0 %v13951_v11  ;;  %v13993_v11 = vld [vmem:[%s14728_s28 + $0xda0] sm:$0xff]  }
 0x1bf   : > { %12698 = vmatprep.subr.bf16.mxu0 %v13953_v13  ;;  %12719 = vmatpush3.bf16.msra.mxu1 %v13952_v12  ;;  %v13994_v12 = vld [vmem:[%s14728_s28 + $0xd68] sm:$0xff]  }
 0x1c0   : > { %12720 = vmatprep.subr.bf16.mxu1 %v13954_v14  ;;  %v13995_v14 = vld [vmem:[%s14728_s28 + $0xde8] sm:$0xff]  }
 0x1c2   : > { %12699 = vmatpush3.bf16.msra.mxu0 %v13955_v15 }
 0x1c3   : > { %12700 = vmatprep.subr.bf16.mxu0 %v13957_v17  ;;  %12721 = vmatpush3.bf16.msra.mxu1 %v13956_v16  ;;  %v13996_v16 = vld [vmem:[%s14728_s28 + $0xd28] sm:$0xff]  }
 0x1c4   : > { %12722 = vmatprep.subr.bf16.mxu1 %v13958_v18 }
 0x1c6   : > { %12701 = vmatpush3.bf16.msra.mxu0 %v13959_v19 }
 0x1c7   : > { %12702 = vmatprep.subr.bf16.mxu0 %v13961_v21  ;;  %12723 = vmatpush3.bf16.msra.mxu1 %v13960_v20  ;;  %v13997_v20 = vld [vmem:[%s14728_s28 + $0xda8] sm:$0xff]   ;;  %v13998_v21 = vld [vmem:[%s14728_s28 + $0xd70] sm:$0xff]  }
 0x1c8   : > { %v12400_v22 = vpop.f32.mrb[20].mxu0  ;;  %12724 = vmatprep.subr.bf16.mxu1 %v13962_v23 }
 0x1c9   : > { %v12401_v24 = vpop.f32.mrb[21].mxu0  ;;  %v12422_v26 = vpop.f32.mrb[20].mxu1 }
 0x1ca   : > { %v12402_v27 = vadd.f32 %v12401_v24, %v12400_v22  ;;  %v12403_v28 = vpop.f32.mrb[22].mxu0  ;;  %v12423_v31 = vpop.f32.mrb[21].mxu1  ;;  %12703 = vmatpush3.bf16.msra.mxu0 %v13963_v25 }
 0x1cb   : > { %v12404_v32 = vpop.f32.mrb[23].mxu0  ;;  %v12424_v34 = vadd.f32 %v12423_v31, %v12422_v26  ;;  %v12425_v36 = vpop.f32.mrb[22].mxu1  ;;  %12704 = vmatprep.subr.bf16.mxu0 %v13965_v30  ;;  %12725 = vmatpush3.bf16.msra.mxu1 %v13964_v29  ;;  %v14000_v29 = vld [vmem:[%s14728_s28 + $0xd30] sm:$0xff]  }
 0x1cc   : > { %v9140_v33 = vadd.f32 %v12402_v27, %v15167_v50  ;;  %v12426_v38 = vpop.f32.mrb[23].mxu1  ;;  %12726 = vmatprep.subr.bf16.mxu1 %v13966_v37  ;;  %v493_v50 = vcombine.high %v485_v46, %v485_v46  ;;  %v13999_v27 = vld [vmem:[%s14728_s28 + $0xdf0] sm:$0xff]   ;;  %v14002_v32 = vld [vmem:[%s14728_s28 + $0xd78] sm:$0xff]   ;;  %v227_v36 = vld [vmem:[%s14768_s30 + $0x68] sm:$0xff] }
 0x1cd   : > { %v14001_v31 = vld [vmem:[%s14728_s28 + $0xdb0] sm:$0xff]   ;;  %v14005_v37 = vld [vmem:[%s14728_s28 + $0xdb8] sm:$0xff]   ;;  %v502_v38 = vrot.slane %v227_v36, %v14770_v35 }
 0x1ce   : > { %v15204_v40 = vadd.f32 %v12424_v34, %v9140_v33  ;;  %12705 = vmatpush3.bf16.msra.mxu0 %v13967_v39  ;;  %v953_v55 = vpack.c.bf16 %v493_v50, %v493_v50  ;;  %v14003_v33 = vld [vmem:[%s14728_s28 + $0xdf8] sm:$0xff]   ;;  %v495_v39 = vcombine.high %v227_v36, %v227_v36  ;;  %v14011_v50 = vld [vmem:[%s14728_s28 + $0xe48] sm:$0xff]   ;;  %v14042_v36 = vld [vmem:[%s14728_s28 + $0xf00] sm:$0xff]  }
 0x1cf   : > { %12706 = vmatprep.subr.bf16.mxu0 %v13969_v42  ;;  %12727 = vmatpush3.bf16.msra.mxu1 %v13968_v41  ;;  %v14004_v34 = vld [vmem:[%s14728_s28 + $0xd38] sm:$0xff]   ;;  %v510_v41 = vcombine.high %v502_v38, %v502_v38 }
 0x1d0   : > { %12728 = vmatprep.subr.bf16.mxu1 %v13970_v43  ;;  %9697 = vmatprep.mubr.bf16.mxu0 %v953_v55  ;;  %v509_v42 = vrot.slane %v495_v39, %v14770_v35  ;;  %v14008_v43 = vld [vmem:[%s14728_s28 + $0xec0] sm:$0xff]   ;;  %v14015_v55 = vld [vmem:[%s14728_s28 + $0xe50] sm:$0xff]  }
 0x1d1   : > { %v957_v46 = vpack.c.bf16 %v510_v41, %v510_v41  ;;  %v14043_v39 = vld [vmem:[%s14728_s28 + $0xf80] sm:$0xff]   ;;  %v14044_v41 = vld [vmem:[%s14728_s28 + $0xf48] sm:$0xff]  }
 0x1d2   : > { %12707 = vmatpush3.bf16.msra.mxu0 %v13971_v44  ;;  %v956_v44 = vpack.c.bf16 %v502_v38, %v502_v38  ;;  %v511_v47 = vcombine.high %v509_v42, %v509_v42 }
 0x1d3   : > { %12736 = vmatprep.subr.bf16.mxu0 %v13974_v48  ;;  %12729 = vmatpush3.bf16.msra.mxu1 %v13972_v49  ;;  %v14010_v48 = vld [vmem:[%s14728_s28 + $0xe80] sm:$0xff]   ;;  %v958_v49 = vpack.c.bf16 %v509_v42, %v509_v42 }
 0x1d4   : > { %12758 = vmatprep.subr.bf16.mxu1 %v13975_v52  ;;  %v959_v51 = vpack.c.bf16 %v511_v47, %v511_v47  ;;  %v14012_v52 = vld [vmem:[%s14728_s28 + $0xec8] sm:$0xff]   ;;  %v14049_v47 = vld [vmem:[%s14728_s28 + $0xfd0] sm:$0xff]  }
 0x1d5   : > { %9698 = vmatmul.mubr.bf16.vlgmr.msra.gmra.mrb[48].mxu0 %v952_v53  ;;  %v14013_v53 = vld [vmem:[%s14728_s28 + $0xe08] sm:$0xff]  }
 0x1d6   : > { %12737 = vmatpush3.bf16.msra.mxu0 %v13976_v54  ;;  %9738 = vmatmul.mubr.bf16.vlgmr.msra.gmra.mrb[48].mxu1 %v954_v58  ;;  %v14014_v54 = vld [vmem:[%s14728_s28 + $0xe88] sm:$0xff]   ;;  %v14018_v58 = vld [vmem:[%s14728_s28 + $0xe90] sm:$0xff]  }
 0x1d7   : > { %12738 = vmatprep.subr.bf16.mxu0 %v13978_v59  ;;  %12759 = vmatpush3.bf16.msra.mxu1 %v13977_v57  ;;  %v14017_v57 = vld [vmem:[%s14728_s28 + $0xe10] sm:$0xff]   ;;  %v14019_v59 = vld [vmem:[%s14728_s28 + $0xe58] sm:$0xff]  }
 0x1d8   : > { %12760 = vmatprep.subr.bf16.mxu1 %v13979_v61  ;;  %9777 = vmatprep.mubr.bf16.mxu0 %v957_v46  ;;  %v14021_v61 = vld [vmem:[%s14728_s28 + $0xe18] sm:$0xff]   ;;  %v14048_v46 = vld [vmem:[%s14728_s28 + $0xf50] sm:$0xff]  }
 0x1d9   : > { %9817 = vmatprep.mubr.bf16.mxu1 %v959_v51  ;;  %v14053_v51 = vld [vmem:[%s14728_s28 + $0xfd8] sm:$0xff]  }
 0x1da   : > { %12739 = vmatpush3.bf16.msra.mxu0 %v13980_v62  ;;  %v14022_v62 = vld [vmem:[%s14728_s28 + $0xe98] sm:$0xff]  }
 0x1db   : > { %12740 = vmatprep.subr.bf16.mxu0 %v13982_v0  ;;  %12761 = vmatpush3.bf16.msra.mxu1 %v13981_v63  ;;  %v14023_v63 = vld [vmem:[%s14728_s28 + $0xe60] sm:$0xff]  }
 0x1dc   : > { %12762 = vmatprep.subr.bf16.mxu1 %v13983_v1  ;;  %v14024_v0 = vld [vmem:[%s14728_s28 + $0xee0] sm:$0xff]  }
 0x1dd   : > { %v14025_v1 = vld [vmem:[%s14728_s28 + $0xe20] sm:$0xff]  }
 0x1de   : > { %12741 = vmatpush3.bf16.msra.mxu0 %v13984_v2  ;;  %v14026_v2 = vld [vmem:[%s14728_s28 + $0xea0] sm:$0xff]  }
 0x1df   : > { %12742 = vmatprep.subr.bf16.mxu0 %v13986_v4  ;;  %12763 = vmatpush3.bf16.msra.mxu1 %v13985_v3  ;;  %v14027_v3 = vld [vmem:[%s14728_s28 + $0xe68] sm:$0xff]  }
 0x1e0   : > { %12764 = vmatprep.subr.bf16.mxu1 %v13987_v5  ;;  %v14028_v5 = vld [vmem:[%s14728_s28 + $0xee8] sm:$0xff]  }
 0x1e2   : > { %12743 = vmatpush3.bf16.msra.mxu0 %v13988_v6 }
 0x1e3   : > { %12744 = vmatprep.subr.bf16.mxu0 %v13990_v8  ;;  %12765 = vmatpush3.bf16.msra.mxu1 %v13989_v7  ;;  %v14029_v7 = vld [vmem:[%s14728_s28 + $0xe28] sm:$0xff]  }
 0x1e4   : > { %12766 = vmatprep.subr.bf16.mxu1 %v13991_v9 }
 0x1e6   : > { %12745 = vmatpush3.bf16.msra.mxu0 %v13992_v10 }
 0x1e7   : > { %12746 = vmatprep.subr.bf16.mxu0 %v13994_v12  ;;  %12767 = vmatpush3.bf16.msra.mxu1 %v13993_v11  ;;  %v14030_v12 = vld [vmem:[%s14728_s28 + $0xea8] sm:$0xff]  }
 0x1e8   : > { %v12444_v13 = vpop.f32.mrb[24].mxu0  ;;  %12768 = vmatprep.subr.bf16.mxu1 %v13995_v14  ;;  %v14031_v14 = vld [vmem:[%s14728_s28 + $0xe70] sm:$0xff]  }
 0x1e9   : > { %v12445_v15 = vpop.f32.mrb[25].mxu0  ;;  %v12466_v17 = vpop.f32.mrb[24].mxu1 }
 0x1ea   : > { %v12446_v18 = vadd.f32 %v12445_v15, %v12444_v13  ;;  %v12447_v19 = vpop.f32.mrb[26].mxu0  ;;  %v12467_v22 = vpop.f32.mrb[25].mxu1  ;;  %12747 = vmatpush3.bf16.msra.mxu0 %v13996_v16 }
 0x1eb   : > { %v12448_v23 = vpop.f32.mrb[27].mxu0  ;;  %v12468_v25 = vadd.f32 %v12467_v22, %v12466_v17  ;;  %v12469_v26 = vpop.f32.mrb[26].mxu1  ;;  %12748 = vmatprep.subr.bf16.mxu0 %v13998_v21  ;;  %12769 = vmatpush3.bf16.msra.mxu1 %v13997_v20  ;;  %v14033_v20 = vld [vmem:[%s14728_s28 + $0xe30] sm:$0xff]   ;;  %v14035_v22 = vld [vmem:[%s14728_s28 + $0xe78] sm:$0xff]  }
 0x1ec   : > { %v9220_v24 = vadd.f32 %v12446_v18, %v15204_v40  ;;  %v12470_v28 = vpop.f32.mrb[27].mxu1  ;;  %12770 = vmatprep.subr.bf16.mxu1 %v13999_v27  ;;  %v14007_v40 = vld [vmem:[%s14728_s28 + $0xe40] sm:$0xff]   ;;  %v14032_v18 = vld [vmem:[%s14728_s28 + $0xef0] sm:$0xff]  }
 0x1ed   : > { %v14034_v23 = vld [vmem:[%s14728_s28 + $0xeb0] sm:$0xff]  }
 0x1ee   : > { %v15242_v30 = vadd.f32 %v12468_v25, %v9220_v24  ;;  %12749 = vmatpush3.bf16.msra.mxu0 %v14000_v29  ;;  %v14036_v24 = vld [vmem:[%s14728_s28 + $0xef8] sm:$0xff]   ;;  %v228_v26 = vld [vmem:[%s14768_s30 + $0x70] sm:$0xff]  ;;  %v14040_v29 = vld [vmem:[%s14728_s28 + $0xf40] sm:$0xff]  }
 0x1ef   : > { %12750 = vmatprep.subr.bf16.mxu0 %v14002_v32  ;;  %12771 = vmatpush3.bf16.msra.mxu1 %v14001_v31  ;;  %v14037_v25 = vld [vmem:[%s14728_s28 + $0xe38] sm:$0xff]   ;;  %v519_v27 = vrot.slane %v228_v26, %v14770_v35  ;;  %v512_v28 = vcombine.high %v228_v26, %v228_v26  ;;  %v14075_v26 = vld [vmem:[%s14728_s28 + $0x1000] sm:$0xff]  }
 0x1f0   : > { %12772 = vmatprep.subr.bf16.mxu1 %v14003_v33  ;;  %v14041_v33 = vld [vmem:[%s14728_s28 + $0xfc0] sm:$0xff]  }
 0x1f1   : > { %v527_v31 = vcombine.high %v519_v27, %v519_v27  ;;  %v526_v32 = vrot.slane %v512_v28, %v14770_v35 }
 0x1f2   : > { %12751 = vmatpush3.bf16.msra.mxu0 %v14004_v34  ;;  %v960_v34 = vpack.c.bf16 %v519_v27, %v519_v27 }
 0x1f3   : > { %12780 = vmatprep.subr.bf16.mxu0 %v14007_v40  ;;  %12773 = vmatpush3.bf16.msra.mxu1 %v14005_v37  ;;  %v961_v37 = vpack.c.bf16 %v527_v31, %v527_v31  ;;  %v528_v38 = vcombine.high %v526_v32, %v526_v32  ;;  %v962_v40 = vpack.c.bf16 %v526_v32, %v526_v32  ;;  %v14077_v31 = vld [vmem:[%s14728_s28 + $0x1048] sm:$0xff]  }
 0x1f4   : > { %12802 = vmatprep.subr.bf16.mxu1 %v14008_v43  ;;  %v14045_v43 = vld [vmem:[%s14728_s28 + $0xfc8] sm:$0xff]  }
 0x1f5   : > { %9778 = vmatmul.mubr.bf16.vlgmr.msra.gmra.mrb[52].mxu0 %v956_v44  ;;  %v963_v42 = vpack.c.bf16 %v528_v38, %v528_v38  ;;  %v14046_v44 = vld [vmem:[%s14728_s28 + $0xf08] sm:$0xff]   ;;  %v14082_v38 = vld [vmem:[%s14728_s28 + $0x10d0] sm:$0xff]  }
 0x1f6   : > { %12781 = vmatpush3.bf16.msra.mxu0 %v14009_v45  ;;  %9818 = vmatmul.mubr.bf16.vlgmr.msra.gmra.mrb[52].mxu1 %v958_v49  ;;  %v14047_v45 = vld [vmem:[%s14728_s28 + $0xf88] sm:$0xff]   ;;  %v14051_v49 = vld [vmem:[%s14728_s28 + $0xf90] sm:$0xff]  }
 0x1f7   : > { %12782 = vmatprep.subr.bf16.mxu0 %v14011_v50  ;;  %12803 = vmatpush3.bf16.msra.mxu1 %v14010_v48  ;;  %v14050_v48 = vld [vmem:[%s14728_s28 + $0xf10] sm:$0xff]   ;;  %v14052_v50 = vld [vmem:[%s14728_s28 + $0xf58] sm:$0xff]  }
 0x1f8   : > { %12804 = vmatprep.subr.bf16.mxu1 %v14012_v52  ;;  %9857 = vmatprep.mubr.bf16.mxu0 %v961_v37  ;;  %v14054_v52 = vld [vmem:[%s14728_s28 + $0xf18] sm:$0xff]   ;;  %v14081_v37 = vld [vmem:[%s14728_s28 + $0x1050] sm:$0xff]  }
 0x1f9   : > { %9897 = vmatprep.mubr.bf16.mxu1 %v963_v42  ;;  %v14086_v42 = vld [vmem:[%s14728_s28 + $0x10d8] sm:$0xff]  }
 0x1fa   : > { %12783 = vmatpush3.bf16.msra.mxu0 %v14013_v53  ;;  %v14055_v53 = vld [vmem:[%s14728_s28 + $0xf98] sm:$0xff]  }
 0x1fb   : > { %12784 = vmatprep.subr.bf16.mxu0 %v14015_v55  ;;  %12805 = vmatpush3.bf16.msra.mxu1 %v14014_v54  ;;  %v14056_v54 = vld [vmem:[%s14728_s28 + $0xf60] sm:$0xff]  }
 0x1fc   : > { %12806 = vmatprep.subr.bf16.mxu1 %v14016_v56  ;;  %v14057_v55 = vld [vmem:[%s14728_s28 + $0xfe0] sm:$0xff]  }
 0x1fd   : > { %v14058_v56 = vld [vmem:[%s14728_s28 + $0xf20] sm:$0xff]  }
 0x1fe   : > { %12785 = vmatpush3.bf16.msra.mxu0 %v14017_v57  ;;  %v14059_v57 = vld [vmem:[%s14728_s28 + $0xfa0] sm:$0xff]  }
 0x1ff   : > { %12786 = vmatprep.subr.bf16.mxu0 %v14019_v59  ;;  %12807 = vmatpush3.bf16.msra.mxu1 %v14018_v58  ;;  %v14060_v58 = vld [vmem:[%s14728_s28 + $0xf68] sm:$0xff]  }
 0x200   : > { %12808 = vmatprep.subr.bf16.mxu1 %v14020_v60  ;;  %v14061_v60 = vld [vmem:[%s14728_s28 + $0xfe8] sm:$0xff]  }
 0x202   : > { %12787 = vmatpush3.bf16.msra.mxu0 %v14021_v61 }
 0x203   : > { %12788 = vmatprep.subr.bf16.mxu0 %v14023_v63  ;;  %12809 = vmatpush3.bf16.msra.mxu1 %v14022_v62  ;;  %v14062_v62 = vld [vmem:[%s14728_s28 + $0xf28] sm:$0xff]  }
 0x204   : > { %12810 = vmatprep.subr.bf16.mxu1 %v14024_v0 }
 0x206   : > { %12789 = vmatpush3.bf16.msra.mxu0 %v14025_v1 }
 0x207   : > { %12790 = vmatprep.subr.bf16.mxu0 %v14027_v3  ;;  %12811 = vmatpush3.bf16.msra.mxu1 %v14026_v2  ;;  %v14063_v2 = vld [vmem:[%s14728_s28 + $0xfa8] sm:$0xff]   ;;  %v14064_v3 = vld [vmem:[%s14728_s28 + $0xf70] sm:$0xff]  }
 0x208   : > { %v12488_v4 = vpop.f32.mrb[28].mxu0  ;;  %12812 = vmatprep.subr.bf16.mxu1 %v14028_v5 }
 0x209   : > { %v12489_v6 = vpop.f32.mrb[29].mxu0  ;;  %v12510_v8 = vpop.f32.mrb[28].mxu1 }
 0x20a   : > { %v12490_v9 = vadd.f32 %v12489_v6, %v12488_v4  ;;  %v12491_v10 = vpop.f32.mrb[30].mxu0  ;;  %v12511_v11 = vpop.f32.mrb[29].mxu1  ;;  %12791 = vmatpush3.bf16.msra.mxu0 %v14029_v7 }
 0x20b   : > { %v12492_v13 = vpop.f32.mrb[31].mxu0  ;;  %v12512_v16 = vadd.f32 %v12511_v11, %v12510_v8  ;;  %v12513_v17 = vpop.f32.mrb[30].mxu1  ;;  %12792 = vmatprep.subr.bf16.mxu0 %v14031_v14  ;;  %12813 = vmatpush3.bf16.msra.mxu1 %v14030_v12  ;;  %v14066_v11 = vld [vmem:[%s14728_s28 + $0xf30] sm:$0xff]   ;;  %v14068_v14 = vld [vmem:[%s14728_s28 + $0xf78] sm:$0xff]  }
 0x20c   : > { %v9300_v15 = vadd.f32 %v12490_v9, %v15242_v30  ;;  %v12514_v19 = vpop.f32.mrb[31].mxu1  ;;  %12814 = vmatprep.subr.bf16.mxu1 %v14032_v18  ;;  %v14038_v30 = vld [vmem:[%s14728_s28 + $0xeb8] sm:$0xff]   ;;  %v14065_v9 = vld [vmem:[%s14728_s28 + $0xff0] sm:$0xff]  }
 0x20d   : > { %v14067_v13 = vld [vmem:[%s14728_s28 + $0xfb0] sm:$0xff]   ;;  %v229_v17 = vld [vmem:[%s14768_s30 + $0x78] sm:$0xff] }
 0x20e   : > { %v15280_v21 = vadd.f32 %v12512_v16, %v9300_v15  ;;  %12793 = vmatpush3.bf16.msra.mxu0 %v14033_v20  ;;  %v14069_v15 = vld [vmem:[%s14728_s28 + $0xff8] sm:$0xff]   ;;  %v536_v18 = vrot.slane %v229_v17, %v14770_v35  ;;  %v529_v19 = vcombine.high %v229_v17, %v229_v17  ;;  %v14073_v20 = vld [vmem:[%s14728_s28 + $0x1040] sm:$0xff]  }
 0x20f   : > { %12794 = vmatprep.subr.bf16.mxu0 %v14035_v22  ;;  %12815 = vmatpush3.bf16.msra.mxu1 %v14034_v23  ;;  %v14070_v16 = vld [vmem:[%s14728_s28 + $0xf38] sm:$0xff]   ;;  %v14108_v17 = vld [vmem:[%s14728_s28 + $0x1100] sm:$0xff]  }
 0x210   : > { %12816 = vmatprep.subr.bf16.mxu1 %v14036_v24  ;;  %v544_v22 = vcombine.high %v536_v18, %v536_v18  ;;  %v543_v23 = vrot.slane %v529_v19, %v14770_v35  ;;  %v14074_v24 = vld [vmem:[%s14728_s28 + $0x10c0] sm:$0xff]  }
 0x212   : > { %12795 = vmatpush3.bf16.msra.mxu0 %v14037_v25  ;;  %v964_v25 = vpack.c.bf16 %v536_v18, %v536_v18  ;;  %v965_v27 = vpack.c.bf16 %v544_v22, %v544_v22  ;;  %v545_v28 = vcombine.high %v543_v23, %v543_v23  ;;  %v14110_v22 = vld [vmem:[%s14728_s28 + $0x1148] sm:$0xff]  }
 0x213   : > { %12824 = vmatprep.subr.bf16.mxu0 %v14040_v29  ;;  %12817 = vmatpush3.bf16.msra.mxu1 %v14038_v30  ;;  %v14076_v29 = vld [vmem:[%s14728_s28 + $0x1080] sm:$0xff]   ;;  %v966_v30 = vpack.c.bf16 %v543_v23, %v543_v23 }
 0x214   : > { %12846 = vmatprep.subr.bf16.mxu1 %v14041_v33  ;;  %v967_v32 = vpack.c.bf16 %v545_v28, %v545_v28  ;;  %v14078_v33 = vld [vmem:[%s14728_s28 + $0x10c8] sm:$0xff]   ;;  %v14115_v28 = vld [vmem:[%s14728_s28 + $0x11d0] sm:$0xff]  }
 0x215   : > { %9858 = vmatmul.mubr.bf16.vlgmr.msra.gmra.mrb[56].mxu0 %v960_v34  ;;  %v14079_v34 = vld [vmem:[%s14728_s28 + $0x1008] sm:$0xff]  }
 0x216   : > { %12825 = vmatpush3.bf16.msra.mxu0 %v14042_v36  ;;  %9898 = vmatmul.mubr.bf16.vlgmr.msra.gmra.mrb[56].mxu1 %v962_v40  ;;  %v14080_v36 = vld [vmem:[%s14728_s28 + $0x1088] sm:$0xff]   ;;  %v14084_v40 = vld [vmem:[%s14728_s28 + $0x1090] sm:$0xff]  }
 0x217   : > { %12826 = vmatprep.subr.bf16.mxu0 %v14044_v41  ;;  %12847 = vmatpush3.bf16.msra.mxu1 %v14043_v39  ;;  %v14083_v39 = vld [vmem:[%s14728_s28 + $0x1010] sm:$0xff]   ;;  %v14085_v41 = vld [vmem:[%s14728_s28 + $0x1058] sm:$0xff]  }
 0x218   : > { %12848 = vmatprep.subr.bf16.mxu1 %v14045_v43  ;;  %9937 = vmatprep.mubr.bf16.mxu0 %v965_v27  ;;  %v14087_v43 = vld [vmem:[%s14728_s28 + $0x1018] sm:$0xff]   ;;  %v14114_v27 = vld [vmem:[%s14728_s28 + $0x1150] sm:$0xff]  }
 0x219   : > { %9977 = vmatprep.mubr.bf16.mxu1 %v967_v32  ;;  %v14119_v32 = vld [vmem:[%s14728_s28 + $0x11d8] sm:$0xff]  }
 0x21a   : > { %12827 = vmatpush3.bf16.msra.mxu0 %v14046_v44  ;;  %v14088_v44 = vld [vmem:[%s14728_s28 + $0x1098] sm:$0xff]  }
 0x21b   : > { %12828 = vmatprep.subr.bf16.mxu0 %v14048_v46  ;;  %12849 = vmatpush3.bf16.msra.mxu1 %v14047_v45  ;;  %v14089_v45 = vld [vmem:[%s14728_s28 + $0x1060] sm:$0xff]  }
 0x21c   : > { %12850 = vmatprep.subr.bf16.mxu1 %v14049_v47  ;;  %v14090_v46 = vld [vmem:[%s14728_s28 + $0x10e0] sm:$0xff]  }
 0x21d   : > { %v14091_v47 = vld [vmem:[%s14728_s28 + $0x1020] sm:$0xff]  }
 0x21e   : > { %12829 = vmatpush3.bf16.msra.mxu0 %v14050_v48  ;;  %v14092_v48 = vld [vmem:[%s14728_s28 + $0x10a0] sm:$0xff]  }
 0x21f   : > { %12830 = vmatprep.subr.bf16.mxu0 %v14052_v50  ;;  %12851 = vmatpush3.bf16.msra.mxu1 %v14051_v49  ;;  %v14093_v49 = vld [vmem:[%s14728_s28 + $0x1068] sm:$0xff]  }
 0x220   : > { %12852 = vmatprep.subr.bf16.mxu1 %v14053_v51  ;;  %v14094_v51 = vld [vmem:[%s14728_s28 + $0x10e8] sm:$0xff]  }
 0x222   : > { %12831 = vmatpush3.bf16.msra.mxu0 %v14054_v52 }
 0x223   : > { %12832 = vmatprep.subr.bf16.mxu0 %v14056_v54  ;;  %12853 = vmatpush3.bf16.msra.mxu1 %v14055_v53  ;;  %v14095_v53 = vld [vmem:[%s14728_s28 + $0x1028] sm:$0xff]  }
 0x224   : > { %12854 = vmatprep.subr.bf16.mxu1 %v14057_v55 }
 0x226   : > { %12833 = vmatpush3.bf16.msra.mxu0 %v14058_v56 }
 0x227   : > { %12834 = vmatprep.subr.bf16.mxu0 %v14060_v58  ;;  %12855 = vmatpush3.bf16.msra.mxu1 %v14059_v57  ;;  %v14096_v57 = vld [vmem:[%s14728_s28 + $0x10a8] sm:$0xff]   ;;  %v14097_v58 = vld [vmem:[%s14728_s28 + $0x1070] sm:$0xff]  }
 0x228   : > { %v12532_v59 = vpop.f32.mrb[32].mxu0  ;;  %12856 = vmatprep.subr.bf16.mxu1 %v14061_v60 }
 0x229   : > { %v12533_v61 = vpop.f32.mrb[33].mxu0  ;;  %v12554_v63 = vpop.f32.mrb[32].mxu1 }
 0x22a   : > { %v12534_v0 = vadd.f32 %v12533_v61, %v12532_v59  ;;  %v12535_v1 = vpop.f32.mrb[34].mxu0  ;;  %v12555_v4 = vpop.f32.mrb[33].mxu1  ;;  %12835 = vmatpush3.bf16.msra.mxu0 %v14062_v62 }
 0x22b   : > { %v12536_v5 = vpop.f32.mrb[35].mxu0  ;;  %v12556_v7 = vadd.f32 %v12555_v4, %v12554_v63  ;;  %v12557_v8 = vpop.f32.mrb[34].mxu1  ;;  %12836 = vmatprep.subr.bf16.mxu0 %v14064_v3  ;;  %12857 = vmatpush3.bf16.msra.mxu1 %v14063_v2  ;;  %v14099_v2 = vld [vmem:[%s14728_s28 + $0x1030] sm:$0xff]  }
 0x22c   : > { %v9380_v6 = vadd.f32 %v12534_v0, %v15280_v21  ;;  %v12558_v10 = vpop.f32.mrb[35].mxu1  ;;  %12858 = vmatprep.subr.bf16.mxu1 %v14065_v9  ;;  %v14071_v21 = vld [vmem:[%s14728_s28 + $0xfb8] sm:$0xff]   ;;  %v14098_v0 = vld [vmem:[%s14728_s28 + $0x10f0] sm:$0xff]   ;;  %v230_v8 = vld [vmem:[%s14768_s30 + $0x80] sm:$0xff] }
 0x22d   : > { %v14100_v4 = vld [vmem:[%s14728_s28 + $0x10b0] sm:$0xff]   ;;  %v14101_v5 = vld [vmem:[%s14728_s28 + $0x1078] sm:$0xff]   ;;  %v553_v10 = vrot.slane %v230_v8, %v14770_v35 }
 0x22e   : > { %v15318_v12 = vadd.f32 %v12556_v7, %v9380_v6  ;;  %12837 = vmatpush3.bf16.msra.mxu0 %v14066_v11  ;;  %v14102_v6 = vld [vmem:[%s14728_s28 + $0x10f8] sm:$0xff]   ;;  %v546_v11 = vcombine.high %v230_v8, %v230_v8  ;;  %v14141_v8 = vld [vmem:[%s14728_s28 + $0x1200] sm:$0xff]  }
 0x22f   : > { %12838 = vmatprep.subr.bf16.mxu0 %v14068_v14  ;;  %12859 = vmatpush3.bf16.msra.mxu1 %v14067_v13  ;;  %v14103_v7 = vld [vmem:[%s14728_s28 + $0x1038] sm:$0xff]   ;;  %v561_v13 = vcombine.high %v553_v10, %v553_v10 }
 0x230   : > { %12860 = vmatprep.subr.bf16.mxu1 %v14069_v15  ;;  %v14104_v9 = vld [vmem:[%s14728_s28 + $0x10b8] sm:$0xff]   ;;  %v560_v14 = vrot.slane %v546_v11, %v14770_v35  ;;  %v14107_v15 = vld [vmem:[%s14728_s28 + $0x11c0] sm:$0xff]  }
 0x231   : > { %v969_v18 = vpack.c.bf16 %v561_v13, %v561_v13  ;;  %v14142_v11 = vld [vmem:[%s14728_s28 + $0x1280] sm:$0xff]   ;;  %v14143_v13 = vld [vmem:[%s14728_s28 + $0x1248] sm:$0xff]  }
 0x232   : > { %12839 = vmatpush3.bf16.msra.mxu0 %v14070_v16  ;;  %v968_v16 = vpack.c.bf16 %v553_v10, %v553_v10  ;;  %v562_v19 = vcombine.high %v560_v14, %v560_v14 }
 0x233   : > { %12868 = vmatprep.subr.bf16.mxu0 %v14073_v20  ;;  %12861 = vmatpush3.bf16.msra.mxu1 %v14071_v21  ;;  %v14109_v20 = vld [vmem:[%s14728_s28 + $0x1180] sm:$0xff]   ;;  %v970_v21 = vpack.c.bf16 %v560_v14, %v560_v14 }
 0x234   : > { %12890 = vmatprep.subr.bf16.mxu1 %v14074_v24  ;;  %v971_v23 = vpack.c.bf16 %v562_v19, %v562_v19  ;;  %v14111_v24 = vld [vmem:[%s14728_s28 + $0x11c8] sm:$0xff]   ;;  %v14148_v19 = vld [vmem:[%s14728_s28 + $0x12d0] sm:$0xff]  }
 0x235   : > { %9938 = vmatmul.mubr.bf16.vlgmr.msra.gmra.mrb[60].mxu0 %v964_v25  ;;  %v14112_v25 = vld [vmem:[%s14728_s28 + $0x1108] sm:$0xff]  }
 0x236   : > { %12869 = vmatpush3.bf16.msra.mxu0 %v14075_v26  ;;  %9978 = vmatmul.mubr.bf16.vlgmr.msra.gmra.mrb[60].mxu1 %v966_v30  ;;  %v14113_v26 = vld [vmem:[%s14728_s28 + $0x1188] sm:$0xff]   ;;  %v14117_v30 = vld [vmem:[%s14728_s28 + $0x1190] sm:$0xff]  }
 0x237   : > { %12870 = vmatprep.subr.bf16.mxu0 %v14077_v31  ;;  %12891 = vmatpush3.bf16.msra.mxu1 %v14076_v29  ;;  %v14116_v29 = vld [vmem:[%s14728_s28 + $0x1110] sm:$0xff]   ;;  %v14118_v31 = vld [vmem:[%s14728_s28 + $0x1158] sm:$0xff]  }
 0x238   : > { %12892 = vmatprep.subr.bf16.mxu1 %v14078_v33  ;;  %10017 = vmatprep.mubr.bf16.mxu0 %v969_v18  ;;  %v14120_v33 = vld [vmem:[%s14728_s28 + $0x1118] sm:$0xff]   ;;  %v14147_v18 = vld [vmem:[%s14728_s28 + $0x1250] sm:$0xff]  }
 0x239   : > { %10057 = vmatprep.mubr.bf16.mxu1 %v971_v23  ;;  %v14152_v23 = vld [vmem:[%s14728_s28 + $0x12d8] sm:$0xff]  }
 0x23a   : > { %12871 = vmatpush3.bf16.msra.mxu0 %v14079_v34  ;;  %v14121_v34 = vld [vmem:[%s14728_s28 + $0x1198] sm:$0xff]  }
 0x23b   : > { %12872 = vmatprep.subr.bf16.mxu0 %v14081_v37  ;;  %12893 = vmatpush3.bf16.msra.mxu1 %v14080_v36  ;;  %v14122_v36 = vld [vmem:[%s14728_s28 + $0x1160] sm:$0xff]  }
 0x23c   : > { %12894 = vmatprep.subr.bf16.mxu1 %v14082_v38  ;;  %v14123_v37 = vld [vmem:[%s14728_s28 + $0x11e0] sm:$0xff]  }
 0x23d   : > { %v14124_v38 = vld [vmem:[%s14728_s28 + $0x1120] sm:$0xff]  }
 0x23e   : > { %12873 = vmatpush3.bf16.msra.mxu0 %v14083_v39  ;;  %v14125_v39 = vld [vmem:[%s14728_s28 + $0x11a0] sm:$0xff]  }
 0x23f   : > { %12874 = vmatprep.subr.bf16.mxu0 %v14085_v41  ;;  %12895 = vmatpush3.bf16.msra.mxu1 %v14084_v40  ;;  %v14126_v40 = vld [vmem:[%s14728_s28 + $0x1168] sm:$0xff]  }
 0x240   : > { %12896 = vmatprep.subr.bf16.mxu1 %v14086_v42  ;;  %v14127_v42 = vld [vmem:[%s14728_s28 + $0x11e8] sm:$0xff]  }
 0x242   : > { %12875 = vmatpush3.bf16.msra.mxu0 %v14087_v43 }
 0x243   : > { %12876 = vmatprep.subr.bf16.mxu0 %v14089_v45  ;;  %12897 = vmatpush3.bf16.msra.mxu1 %v14088_v44  ;;  %v14128_v44 = vld [vmem:[%s14728_s28 + $0x1128] sm:$0xff]  }
 0x244   : > { %12898 = vmatprep.subr.bf16.mxu1 %v14090_v46 }
 0x246   : > { %12877 = vmatpush3.bf16.msra.mxu0 %v14091_v47 }
 0x247   : > { %12878 = vmatprep.subr.bf16.mxu0 %v14093_v49  ;;  %12899 = vmatpush3.bf16.msra.mxu1 %v14092_v48  ;;  %v14129_v49 = vld [vmem:[%s14728_s28 + $0x11a8] sm:$0xff]  }
 0x248   : > { %v12576_v50 = vpop.f32.mrb[36].mxu0  ;;  %12900 = vmatprep.subr.bf16.mxu1 %v14094_v51  ;;  %v14130_v51 = vld [vmem:[%s14728_s28 + $0x1170] sm:$0xff]  }
 0x249   : > { %v12577_v52 = vpop.f32.mrb[37].mxu0  ;;  %v12598_v54 = vpop.f32.mrb[36].mxu1 }
 0x24a   : > { %v12578_v55 = vadd.f32 %v12577_v52, %v12576_v50  ;;  %v12579_v56 = vpop.f32.mrb[38].mxu0  ;;  %v12599_v59 = vpop.f32.mrb[37].mxu1  ;;  %12879 = vmatpush3.bf16.msra.mxu0 %v14095_v53 }
 0x24b   : > { %v12580_v60 = vpop.f32.mrb[39].mxu0  ;;  %v12600_v62 = vadd.f32 %v12599_v59, %v12598_v54  ;;  %v12601_v63 = vpop.f32.mrb[38].mxu1  ;;  %12880 = vmatprep.subr.bf16.mxu0 %v14097_v58  ;;  %12901 = vmatpush3.bf16.msra.mxu1 %v14096_v57  ;;  %v14132_v57 = vld [vmem:[%s14728_s28 + $0x1130] sm:$0xff]   ;;  %v14134_v59 = vld [vmem:[%s14728_s28 + $0x1178] sm:$0xff]  }
 0x24c   : > { %v9460_v61 = vadd.f32 %v12578_v55, %v15318_v12  ;;  %v12602_v1 = vpop.f32.mrb[39].mxu1  ;;  %12902 = vmatprep.subr.bf16.mxu1 %v14098_v0  ;;  %v14106_v12 = vld [vmem:[%s14728_s28 + $0x1140] sm:$0xff]   ;;  %v14131_v55 = vld [vmem:[%s14728_s28 + $0x11f0] sm:$0xff]   ;;  %v231_v63 = vld [vmem:[%s14768_s30 + $0x88] sm:$0xff] }
 0x24d   : > { %v14133_v60 = vld [vmem:[%s14728_s28 + $0x11b0] sm:$0xff]   ;;  %v570_v0 = vrot.slane %v231_v63, %v14770_v35  ;;  %v563_v1 = vcombine.high %v231_v63, %v231_v63  ;;  %v14174_v63 = vld [vmem:[%s14728_s28 + $0x1300] sm:$0xff]  }
 0x24e   : > { %v15356_v3 = vadd.f32 %v12600_v62, %v9460_v61  ;;  %12881 = vmatpush3.bf16.msra.mxu0 %v14099_v2  ;;  %v14135_v61 = vld [vmem:[%s14728_s28 + $0x11f8] sm:$0xff]   ;;  %v14139_v2 = vld [vmem:[%s14728_s28 + $0x1240] sm:$0xff]  }
 0x24f   : > { %12882 = vmatprep.subr.bf16.mxu0 %v14101_v5  ;;  %12903 = vmatpush3.bf16.msra.mxu1 %v14100_v4  ;;  %v14136_v62 = vld [vmem:[%s14728_s28 + $0x1138] sm:$0xff]   ;;  %v578_v4 = vcombine.high %v570_v0, %v570_v0  ;;  %v577_v5 = vrot.slane %v563_v1, %v14770_v35 }
 0x250   : > { %12904 = vmatprep.subr.bf16.mxu1 %v14102_v6  ;;  %v14140_v6 = vld [vmem:[%s14728_s28 + $0x12c0] sm:$0xff]  }
 0x251   : > { %v579_v10 = vcombine.high %v577_v5, %v577_v5 }
 0x252   : > { %12883 = vmatpush3.bf16.msra.mxu0 %v14103_v7  ;;  %v972_v7 = vpack.c.bf16 %v570_v0, %v570_v0 }
 0x253   : > { %12912 = vmatprep.subr.bf16.mxu0 %v14106_v12  ;;  %12905 = vmatpush3.bf16.msra.mxu1 %v14104_v9  ;;  %v973_v9 = vpack.c.bf16 %v578_v4, %v578_v4  ;;  %v974_v12 = vpack.c.bf16 %v577_v5, %v577_v5  ;;  %v975_v14 = vpack.c.bf16 %v579_v10, %v579_v10  ;;  %v14176_v4 = vld [vmem:[%s14728_s28 + $0x1348] sm:$0xff]   ;;  %v14181_v10 = vld [vmem:[%s14728_s28 + $0x13d0] sm:$0xff]  }
 0x254   : > { %12934 = vmatprep.subr.bf16.mxu1 %v14107_v15  ;;  %v14144_v15 = vld [vmem:[%s14728_s28 + $0x12c8] sm:$0xff]  }
 0x255   : > { %10018 = vmatmul.mubr.bf16.vlgmr.msra.gmra.mrb[64].mxu0 %v968_v16  ;;  %v14145_v16 = vld [vmem:[%s14728_s28 + $0x1208] sm:$0xff]  }
 0x256   : > { %12913 = vmatpush3.bf16.msra.mxu0 %v14108_v17  ;;  %10058 = vmatmul.mubr.bf16.vlgmr.msra.gmra.mrb[64].mxu1 %v970_v21  ;;  %v14146_v17 = vld [vmem:[%s14728_s28 + $0x1288] sm:$0xff]   ;;  %v14150_v21 = vld [vmem:[%s14728_s28 + $0x1290] sm:$0xff]  }
 0x257   : > { %12914 = vmatprep.subr.bf16.mxu0 %v14110_v22  ;;  %12935 = vmatpush3.bf16.msra.mxu1 %v14109_v20  ;;  %v14149_v20 = vld [vmem:[%s14728_s28 + $0x1210] sm:$0xff]   ;;  %v14151_v22 = vld [vmem:[%s14728_s28 + $0x1258] sm:$0xff]  }
 0x258   : > { %12936 = vmatprep.subr.bf16.mxu1 %v14111_v24  ;;  %10097 = vmatprep.mubr.bf16.mxu0 %v973_v9  ;;  %v14153_v24 = vld [vmem:[%s14728_s28 + $0x1218] sm:$0xff]   ;;  %v14180_v9 = vld [vmem:[%s14728_s28 + $0x1350] sm:$0xff]  }
 0x259   : > { %10137 = vmatprep.mubr.bf16.mxu1 %v975_v14  ;;  %v14185_v14 = vld [vmem:[%s14728_s28 + $0x13d8] sm:$0xff]  }
 0x25a   : > { %12915 = vmatpush3.bf16.msra.mxu0 %v14112_v25  ;;  %v14154_v25 = vld [vmem:[%s14728_s28 + $0x1298] sm:$0xff]  }
 0x25b   : > { %12916 = vmatprep.subr.bf16.mxu0 %v14114_v27  ;;  %12937 = vmatpush3.bf16.msra.mxu1 %v14113_v26  ;;  %v14155_v26 = vld [vmem:[%s14728_s28 + $0x1260] sm:$0xff]  }
 0x25c   : > { %12938 = vmatprep.subr.bf16.mxu1 %v14115_v28  ;;  %v14156_v27 = vld [vmem:[%s14728_s28 + $0x12e0] sm:$0xff]  }
 0x25d   : > { %v14157_v28 = vld [vmem:[%s14728_s28 + $0x1220] sm:$0xff]  }
 0x25e   : > { %12917 = vmatpush3.bf16.msra.mxu0 %v14116_v29  ;;  %v14158_v29 = vld [vmem:[%s14728_s28 + $0x12a0] sm:$0xff]  }
 0x25f   : > { %12918 = vmatprep.subr.bf16.mxu0 %v14118_v31  ;;  %12939 = vmatpush3.bf16.msra.mxu1 %v14117_v30  ;;  %v14159_v30 = vld [vmem:[%s14728_s28 + $0x1268] sm:$0xff]  }
 0x260   : > { %12940 = vmatprep.subr.bf16.mxu1 %v14119_v32  ;;  %v14160_v32 = vld [vmem:[%s14728_s28 + $0x12e8] sm:$0xff]  }
 0x262   : > { %12919 = vmatpush3.bf16.msra.mxu0 %v14120_v33 }
 0x263   : > { %12920 = vmatprep.subr.bf16.mxu0 %v14122_v36  ;;  %12941 = vmatpush3.bf16.msra.mxu1 %v14121_v34  ;;  %v14161_v34 = vld [vmem:[%s14728_s28 + $0x1228] sm:$0xff]  }
 0x264   : > { %12942 = vmatprep.subr.bf16.mxu1 %v14123_v37 }
 0x266   : > { %12921 = vmatpush3.bf16.msra.mxu0 %v14124_v38 }
 0x267   : > { %12922 = vmatprep.subr.bf16.mxu0 %v14126_v40  ;;  %12943 = vmatpush3.bf16.msra.mxu1 %v14125_v39  ;;  %v14162_v39 = vld [vmem:[%s14728_s28 + $0x12a8] sm:$0xff]   ;;  %v14163_v40 = vld [vmem:[%s14728_s28 + $0x1270] sm:$0xff]  }
 0x268   : > { %v12620_v41 = vpop.f32.mrb[40].mxu0  ;;  %12944 = vmatprep.subr.bf16.mxu1 %v14127_v42 }
 0x269   : > { %v12621_v43 = vpop.f32.mrb[41].mxu0  ;;  %v12642_v45 = vpop.f32.mrb[40].mxu1 }
 0x26a   : > { %v12622_v46 = vadd.f32 %v12621_v43, %v12620_v41  ;;  %v12623_v47 = vpop.f32.mrb[42].mxu0  ;;  %v12643_v48 = vpop.f32.mrb[41].mxu1  ;;  %12923 = vmatpush3.bf16.msra.mxu0 %v14128_v44 }
 0x26b   : > { %v12624_v50 = vpop.f32.mrb[43].mxu0  ;;  %v12644_v53 = vadd.f32 %v12643_v48, %v12642_v45  ;;  %v12645_v54 = vpop.f32.mrb[42].mxu1  ;;  %12924 = vmatprep.subr.bf16.mxu0 %v14130_v51  ;;  %12945 = vmatpush3.bf16.msra.mxu1 %v14129_v49  ;;  %v14165_v48 = vld [vmem:[%s14728_s28 + $0x1230] sm:$0xff]   ;;  %v14167_v51 = vld [vmem:[%s14728_s28 + $0x1278] sm:$0xff]  }
 0x26c   : > { %v9540_v52 = vadd.f32 %v12622_v46, %v15356_v3  ;;  %v12646_v56 = vpop.f32.mrb[43].mxu1  ;;  %12946 = vmatprep.subr.bf16.mxu1 %v14131_v55  ;;  %v14137_v3 = vld [vmem:[%s14728_s28 + $0x11b8] sm:$0xff]   ;;  %v14164_v46 = vld [vmem:[%s14728_s28 + $0x12f0] sm:$0xff]  }
 0x26d   : > { %v14166_v50 = vld [vmem:[%s14728_s28 + $0x12b0] sm:$0xff]  }
 0x26e   : > { %v15394_v58 = vadd.f32 %v12644_v53, %v9540_v52  ;;  %12925 = vmatpush3.bf16.msra.mxu0 %v14132_v57  ;;  %v14168_v52 = vld [vmem:[%s14728_s28 + $0x12f8] sm:$0xff]   ;;  %v232_v54 = vld [vmem:[%s14768_s30 + $0x90] sm:$0xff]  ;;  %v14172_v57 = vld [vmem:[%s14728_s28 + $0x1340] sm:$0xff]  }
 0x26f   : > { %12926 = vmatprep.subr.bf16.mxu0 %v14134_v59  ;;  %12947 = vmatpush3.bf16.msra.mxu1 %v14133_v60  ;;  %v14169_v53 = vld [vmem:[%s14728_s28 + $0x1238] sm:$0xff]   ;;  %v587_v55 = vrot.slane %v232_v54, %v14770_v35  ;;  %v580_v56 = vcombine.high %v232_v54, %v232_v54  ;;  %v14207_v54 = vld [vmem:[%s14728_s28 + $0x1400] sm:$0xff]  }
 0x270   : > { %12948 = vmatprep.subr.bf16.mxu1 %v14135_v61  ;;  %v14173_v61 = vld [vmem:[%s14728_s28 + $0x13c0] sm:$0xff]  }
 0x271   : > { %v595_v59 = vcombine.high %v587_v55, %v587_v55  ;;  %v594_v60 = vrot.slane %v580_v56, %v14770_v35 }
 0x272   : > { %12927 = vmatpush3.bf16.msra.mxu0 %v14136_v62  ;;  %v976_v62 = vpack.c.bf16 %v587_v55, %v587_v55 }
 0x273   : > { %12956 = vmatprep.subr.bf16.mxu0 %v14139_v2  ;;  %12949 = vmatpush3.bf16.msra.mxu1 %v14137_v3  ;;  %v977_v0 = vpack.c.bf16 %v595_v59, %v595_v59  ;;  %v596_v1 = vcombine.high %v594_v60, %v594_v60  ;;  %v14175_v2 = vld [vmem:[%s14728_s28 + $0x1380] sm:$0xff]   ;;  %v978_v3 = vpack.c.bf16 %v594_v60, %v594_v60  ;;  %v14209_v59 = vld [vmem:[%s14728_s28 + $0x1448] sm:$0xff]  }
 0x274   : > { %12978 = vmatprep.subr.bf16.mxu1 %v14140_v6  ;;  %v14177_v6 = vld [vmem:[%s14728_s28 + $0x13c8] sm:$0xff]  }
 0x275   : > { %10098 = vmatmul.mubr.bf16.vlgmr.msra.gmra.mrb[68].mxu0 %v972_v7  ;;  %v979_v5 = vpack.c.bf16 %v596_v1, %v596_v1  ;;  %v14178_v7 = vld [vmem:[%s14728_s28 + $0x1308] sm:$0xff]   ;;  %v14214_v1 = vld [vmem:[%s14728_s28 + $0x14d0] sm:$0xff]  }
 0x276   : > { %12957 = vmatpush3.bf16.msra.mxu0 %v14141_v8  ;;  %10138 = vmatmul.mubr.bf16.vlgmr.msra.gmra.mrb[68].mxu1 %v974_v12  ;;  %v14179_v8 = vld [vmem:[%s14728_s28 + $0x1388] sm:$0xff]   ;;  %v14183_v12 = vld [vmem:[%s14728_s28 + $0x1390] sm:$0xff]  }
 0x277   : > { %12958 = vmatprep.subr.bf16.mxu0 %v14143_v13  ;;  %12979 = vmatpush3.bf16.msra.mxu1 %v14142_v11  ;;  %v14182_v11 = vld [vmem:[%s14728_s28 + $0x1310] sm:$0xff]   ;;  %v14184_v13 = vld [vmem:[%s14728_s28 + $0x1358] sm:$0xff]  }
 0x278   : > { %12980 = vmatprep.subr.bf16.mxu1 %v14144_v15  ;;  %10177 = vmatprep.mubr.bf16.mxu0 %v977_v0  ;;  %v14186_v15 = vld [vmem:[%s14728_s28 + $0x1318] sm:$0xff]   ;;  %v14213_v0 = vld [vmem:[%s14728_s28 + $0x1450] sm:$0xff]  }
 0x279   : > { %10217 = vmatprep.mubr.bf16.mxu1 %v979_v5  ;;  %v14218_v5 = vld [vmem:[%s14728_s28 + $0x14d8] sm:$0xff]  }
 0x27a   : > { %12959 = vmatpush3.bf16.msra.mxu0 %v14145_v16  ;;  %v14187_v16 = vld [vmem:[%s14728_s28 + $0x1398] sm:$0xff]  }
 0x27b   : > { %12960 = vmatprep.subr.bf16.mxu0 %v14147_v18  ;;  %12981 = vmatpush3.bf16.msra.mxu1 %v14146_v17  ;;  %v14188_v17 = vld [vmem:[%s14728_s28 + $0x1360] sm:$0xff]  }
 0x27c   : > { %12982 = vmatprep.subr.bf16.mxu1 %v14148_v19  ;;  %v14189_v18 = vld [vmem:[%s14728_s28 + $0x13e0] sm:$0xff]  }
 0x27d   : > { %v14190_v19 = vld [vmem:[%s14728_s28 + $0x1320] sm:$0xff]  }
 0x27e   : > { %12961 = vmatpush3.bf16.msra.mxu0 %v14149_v20  ;;  %v14191_v20 = vld [vmem:[%s14728_s28 + $0x13a0] sm:$0xff]  }
 0x27f   : > { %12962 = vmatprep.subr.bf16.mxu0 %v14151_v22  ;;  %12983 = vmatpush3.bf16.msra.mxu1 %v14150_v21  ;;  %v14192_v21 = vld [vmem:[%s14728_s28 + $0x1368] sm:$0xff]  }
 0x280   : > { %12984 = vmatprep.subr.bf16.mxu1 %v14152_v23  ;;  %v14193_v23 = vld [vmem:[%s14728_s28 + $0x13e8] sm:$0xff]  }
 0x282   : > { %12963 = vmatpush3.bf16.msra.mxu0 %v14153_v24 }
 0x283   : > { %12964 = vmatprep.subr.bf16.mxu0 %v14155_v26  ;;  %12985 = vmatpush3.bf16.msra.mxu1 %v14154_v25  ;;  %v14194_v25 = vld [vmem:[%s14728_s28 + $0x1328] sm:$0xff]  }
 0x284   : > { %12986 = vmatprep.subr.bf16.mxu1 %v14156_v27 }
 0x286   : > { %12965 = vmatpush3.bf16.msra.mxu0 %v14157_v28 }
 0x287   : > { %12966 = vmatprep.subr.bf16.mxu0 %v14159_v30  ;;  %12987 = vmatpush3.bf16.msra.mxu1 %v14158_v29  ;;  %v14195_v29 = vld [vmem:[%s14728_s28 + $0x13a8] sm:$0xff]   ;;  %v14196_v30 = vld [vmem:[%s14728_s28 + $0x1370] sm:$0xff]  }
 0x288   : > { %v12664_v31 = vpop.f32.mrb[44].mxu0  ;;  %12988 = vmatprep.subr.bf16.mxu1 %v14160_v32 }
 0x289   : > { %v12665_v33 = vpop.f32.mrb[45].mxu0  ;;  %v12686_v36 = vpop.f32.mrb[44].mxu1 }
 0x28a   : > { %v12666_v37 = vadd.f32 %v12665_v33, %v12664_v31  ;;  %v12667_v38 = vpop.f32.mrb[46].mxu0  ;;  %v12687_v41 = vpop.f32.mrb[45].mxu1  ;;  %12967 = vmatpush3.bf16.msra.mxu0 %v14161_v34 }
 0x28b   : > { %v12668_v42 = vpop.f32.mrb[47].mxu0  ;;  %v12688_v44 = vadd.f32 %v12687_v41, %v12686_v36  ;;  %v12689_v45 = vpop.f32.mrb[46].mxu1  ;;  %12968 = vmatprep.subr.bf16.mxu0 %v14163_v40  ;;  %12989 = vmatpush3.bf16.msra.mxu1 %v14162_v39  ;;  %v14198_v39 = vld [vmem:[%s14728_s28 + $0x1330] sm:$0xff]  }
 0x28c   : > { %v9620_v43 = vadd.f32 %v12666_v37, %v15394_v58  ;;  %v12690_v47 = vpop.f32.mrb[47].mxu1  ;;  %12990 = vmatprep.subr.bf16.mxu1 %v14164_v46  ;;  %v14170_v58 = vld [vmem:[%s14728_s28 + $0x12b8] sm:$0xff]   ;;  %v14197_v37 = vld [vmem:[%s14728_s28 + $0x13f0] sm:$0xff]  }
 0x28d   : > { %v14199_v41 = vld [vmem:[%s14728_s28 + $0x13b0] sm:$0xff]   ;;  %v14200_v42 = vld [vmem:[%s14728_s28 + $0x1378] sm:$0xff]  }
 0x28e   : > { %v15432_v49 = vadd.f32 %v12688_v44, %v9620_v43  ;;  %12969 = vmatpush3.bf16.msra.mxu0 %v14165_v48  ;;  %v14201_v43 = vld [vmem:[%s14728_s28 + $0x13f8] sm:$0xff]  }
 0x28f   : > { %12970 = vmatprep.subr.bf16.mxu0 %v14167_v51  ;;  %12991 = vmatpush3.bf16.msra.mxu1 %v14166_v50  ;;  %v14202_v44 = vld [vmem:[%s14728_s28 + $0x1338] sm:$0xff]  }
 0x290   : > { %12992 = vmatprep.subr.bf16.mxu1 %v14168_v52  ;;  %v233_v45 = vld [vmem:[%s14768_s30 + $0x98] sm:$0xff]  ;;  %v14206_v52 = vld [vmem:[%s14728_s28 + $0x14c0] sm:$0xff]  }
 0x291   : > { %v14203_v46 = vld [vmem:[%s14728_s28 + $0x13b8] sm:$0xff]   ;;  %v604_v47 = vrot.slane %v233_v45, %v14770_v35  ;;  %v597_v48 = vcombine.high %v233_v45, %v233_v45  ;;  %v14240_v45 = vld [vmem:[%s14728_s28 + $0x1500] sm:$0xff]  }
 0x292   : > { %12971 = vmatpush3.bf16.msra.mxu0 %v14169_v53 }
 0x293   : > { %13000 = vmatprep.subr.bf16.mxu0 %v14172_v57  ;;  %12993 = vmatpush3.bf16.msra.mxu1 %v14170_v58  ;;  %v612_v50 = vcombine.high %v604_v47, %v604_v47  ;;  %v611_v51 = vrot.slane %v597_v48, %v14770_v35  ;;  %v980_v53 = vpack.c.bf16 %v604_v47, %v604_v47  ;;  %v14208_v57 = vld [vmem:[%s14728_s28 + $0x1480] sm:$0xff]  }
 0x294   : > { %13022 = vmatprep.subr.bf16.mxu1 %v14173_v61  ;;  %v14210_v61 = vld [vmem:[%s14728_s28 + $0x14c8] sm:$0xff]   ;;  %v14241_v48 = vld [vmem:[%s14728_s28 + $0x1580] sm:$0xff]  }
 0x295   : > { %10178 = vmatmul.mubr.bf16.vlgmr.msra.gmra.mrb[72].mxu0 %v976_v62  ;;  %v981_v55 = vpack.c.bf16 %v612_v50, %v612_v50  ;;  %v613_v56 = vcombine.high %v611_v51, %v611_v51  ;;  %v982_v58 = vpack.c.bf16 %v611_v51, %v611_v51  ;;  %v14211_v62 = vld [vmem:[%s14728_s28 + $0x1408] sm:$0xff]  }
 0x296   : > { %13001 = vmatpush3.bf16.msra.mxu0 %v14174_v63  ;;  %10218 = vmatmul.mubr.bf16.vlgmr.msra.gmra.mrb[72].mxu1 %v978_v3  ;;  %v14212_v63 = vld [vmem:[%s14728_s28 + $0x1488] sm:$0xff]   ;;  %v14216_v3 = vld [vmem:[%s14728_s28 + $0x1490] sm:$0xff]  }
 0x297   : > { %13002 = vmatprep.subr.bf16.mxu0 %v14176_v4  ;;  %13023 = vmatpush3.bf16.msra.mxu1 %v14175_v2  ;;  %v983_v60 = vpack.c.bf16 %v613_v56, %v613_v56  ;;  %v14215_v2 = vld [vmem:[%s14728_s28 + $0x1410] sm:$0xff]   ;;  %v14217_v4 = vld [vmem:[%s14728_s28 + $0x1458] sm:$0xff]   ;;  %v14242_v50 = vld [vmem:[%s14728_s28 + $0x1548] sm:$0xff]  }
 0x298   : > { %13024 = vmatprep.subr.bf16.mxu1 %v14177_v6  ;;  %10257 = vmatprep.mubr.bf16.mxu0 %v981_v55  ;;  %v14219_v6 = vld [vmem:[%s14728_s28 + $0x1418] sm:$0xff]   ;;  %v14246_v55 = vld [vmem:[%s14728_s28 + $0x1550] sm:$0xff]  }
 0x299   : > { %10297 = vmatprep.mubr.bf16.mxu1 %v983_v60  ;;  %v14247_v56 = vld [vmem:[%s14728_s28 + $0x15d0] sm:$0xff]   ;;  %v14251_v60 = vld [vmem:[%s14728_s28 + $0x15d8] sm:$0xff]  }
 0x29a   : > { %13003 = vmatpush3.bf16.msra.mxu0 %v14178_v7  ;;  %v14220_v7 = vld [vmem:[%s14728_s28 + $0x1498] sm:$0xff]  }
 0x29b   : > { %13004 = vmatprep.subr.bf16.mxu0 %v14180_v9  ;;  %13025 = vmatpush3.bf16.msra.mxu1 %v14179_v8  ;;  %v14221_v8 = vld [vmem:[%s14728_s28 + $0x1460] sm:$0xff]  }
 0x29c   : > { %13026 = vmatprep.subr.bf16.mxu1 %v14181_v10  ;;  %v14222_v9 = vld [vmem:[%s14728_s28 + $0x14e0] sm:$0xff]  }
 0x29d   : > { %v14223_v10 = vld [vmem:[%s14728_s28 + $0x1420] sm:$0xff]  }
 0x29e   : > { %13005 = vmatpush3.bf16.msra.mxu0 %v14182_v11  ;;  %v14224_v11 = vld [vmem:[%s14728_s28 + $0x14a0] sm:$0xff]  }
 0x29f   : > { %13006 = vmatprep.subr.bf16.mxu0 %v14184_v13  ;;  %13027 = vmatpush3.bf16.msra.mxu1 %v14183_v12  ;;  %v14225_v12 = vld [vmem:[%s14728_s28 + $0x1468] sm:$0xff]  }
 0x2a0   : > { %13028 = vmatprep.subr.bf16.mxu1 %v14185_v14  ;;  %v14226_v14 = vld [vmem:[%s14728_s28 + $0x14e8] sm:$0xff]  }
 0x2a2   : > { %13007 = vmatpush3.bf16.msra.mxu0 %v14186_v15 }
 0x2a3   : > { %13008 = vmatprep.subr.bf16.mxu0 %v14188_v17  ;;  %13029 = vmatpush3.bf16.msra.mxu1 %v14187_v16  ;;  %v14227_v16 = vld [vmem:[%s14728_s28 + $0x1428] sm:$0xff]  }
 0x2a4   : > { %13030 = vmatprep.subr.bf16.mxu1 %v14189_v18 }
 0x2a6   : > { %13009 = vmatpush3.bf16.msra.mxu0 %v14190_v19 }
 0x2a7   : > { %13010 = vmatprep.subr.bf16.mxu0 %v14192_v21  ;;  %13031 = vmatpush3.bf16.msra.mxu1 %v14191_v20  ;;  %v14228_v21 = vld [vmem:[%s14728_s28 + $0x14a8] sm:$0xff]  }
 0x2a8   : > { %v12708_v22 = vpop.f32.mrb[48].mxu0  ;;  %13032 = vmatprep.subr.bf16.mxu1 %v14193_v23  ;;  %v14229_v23 = vld [vmem:[%s14728_s28 + $0x1470] sm:$0xff]  }
 0x2a9   : > { %v12709_v24 = vpop.f32.mrb[49].mxu0  ;;  %v12730_v26 = vpop.f32.mrb[48].mxu1 }
 0x2aa   : > { %v12710_v27 = vadd.f32 %v12709_v24, %v12708_v22  ;;  %v12711_v28 = vpop.f32.mrb[50].mxu0  ;;  %v12731_v31 = vpop.f32.mrb[49].mxu1  ;;  %13011 = vmatpush3.bf16.msra.mxu0 %v14194_v25 }
 0x2ab   : > { %v12712_v32 = vpop.f32.mrb[51].mxu0  ;;  %v12732_v34 = vadd.f32 %v12731_v31, %v12730_v26  ;;  %v12733_v36 = vpop.f32.mrb[50].mxu1  ;;  %13012 = vmatprep.subr.bf16.mxu0 %v14196_v30  ;;  %13033 = vmatpush3.bf16.msra.mxu1 %v14195_v29  ;;  %v14231_v29 = vld [vmem:[%s14728_s28 + $0x1430] sm:$0xff]   ;;  %v14233_v31 = vld [vmem:[%s14728_s28 + $0x1478] sm:$0xff]  }
 0x2ac   : > { %v9700_v33 = vadd.f32 %v12710_v27, %v15432_v49  ;;  %v12734_v38 = vpop.f32.mrb[51].mxu1  ;;  %13034 = vmatprep.subr.bf16.mxu1 %v14197_v37  ;;  %v14205_v49 = vld [vmem:[%s14728_s28 + $0x1440] sm:$0xff]   ;;  %v14230_v27 = vld [vmem:[%s14728_s28 + $0x14f0] sm:$0xff]  }
 0x2ad   : > { %v14232_v32 = vld [vmem:[%s14728_s28 + $0x14b0] sm:$0xff]   ;;  %v234_v36 = vld [vmem:[%s14768_s30 + $0xa0] sm:$0xff] }
 0x2ae   : > { %v15470_v40 = vadd.f32 %v12732_v34, %v9700_v33  ;;  %13013 = vmatpush3.bf16.msra.mxu0 %v14198_v39  ;;  %v14234_v33 = vld [vmem:[%s14728_s28 + $0x14f8] sm:$0xff]   ;;  %v621_v37 = vrot.slane %v234_v36, %v14770_v35  ;;  %v614_v38 = vcombine.high %v234_v36, %v234_v36  ;;  %v14238_v39 = vld [vmem:[%s14728_s28 + $0x1540] sm:$0xff]  }
 0x2af   : > { %13014 = vmatprep.subr.bf16.mxu0 %v14200_v42  ;;  %13035 = vmatpush3.bf16.msra.mxu1 %v14199_v41  ;;  %v14235_v34 = vld [vmem:[%s14728_s28 + $0x1438] sm:$0xff]   ;;  %v14273_v36 = vld [vmem:[%s14728_s28 + $0x1600] sm:$0xff]  }
 0x2b0   : > { %13036 = vmatprep.subr.bf16.mxu1 %v14201_v43  ;;  %v629_v41 = vcombine.high %v621_v37, %v621_v37  ;;  %v628_v42 = vrot.slane %v614_v38, %v14770_v35  ;;  %v14239_v43 = vld [vmem:[%s14728_s28 + $0x15c0] sm:$0xff]  }
 0x2b2   : > { %13015 = vmatpush3.bf16.msra.mxu0 %v14202_v44  ;;  %v984_v44 = vpack.c.bf16 %v621_v37, %v621_v37  ;;  %v630_v47 = vcombine.high %v628_v42, %v628_v42 }
 0x2b3   : > { %13044 = vmatprep.subr.bf16.mxu0 %v14205_v49  ;;  %13037 = vmatpush3.bf16.msra.mxu1 %v14203_v46  ;;  %v985_v46 = vpack.c.bf16 %v629_v41, %v629_v41  ;;  %v986_v49 = vpack.c.bf16 %v628_v42, %v628_v42  ;;  %v14275_v41 = vld [vmem:[%s14728_s28 + $0x1648] sm:$0xff]  }
 0x2b4   : > { %13066 = vmatprep.subr.bf16.mxu1 %v14206_v52  ;;  %v987_v51 = vpack.c.bf16 %v630_v47, %v630_v47  ;;  %v14243_v52 = vld [vmem:[%s14728_s28 + $0x15c8] sm:$0xff]   ;;  %v14280_v47 = vld [vmem:[%s14728_s28 + $0x16d0] sm:$0xff]  }
 0x2b5   : > { %10258 = vmatmul.mubr.bf16.vlgmr.msra.gmra.mrb[76].mxu0 %v980_v53  ;;  %v14244_v53 = vld [vmem:[%s14728_s28 + $0x1508] sm:$0xff]  }
 0x2b6   : > { %13045 = vmatpush3.bf16.msra.mxu0 %v14207_v54  ;;  %10298 = vmatmul.mubr.bf16.vlgmr.msra.gmra.mrb[76].mxu1 %v982_v58  ;;  %v14245_v54 = vld [vmem:[%s14728_s28 + $0x1588] sm:$0xff]   ;;  %v14249_v58 = vld [vmem:[%s14728_s28 + $0x1590] sm:$0xff]  }
 0x2b7   : > { %13046 = vmatprep.subr.bf16.mxu0 %v14209_v59  ;;  %13067 = vmatpush3.bf16.msra.mxu1 %v14208_v57  ;;  %v14248_v57 = vld [vmem:[%s14728_s28 + $0x1510] sm:$0xff]   ;;  %v14250_v59 = vld [vmem:[%s14728_s28 + $0x1558] sm:$0xff]  }
 0x2b8   : > { %13068 = vmatprep.subr.bf16.mxu1 %v14210_v61  ;;  %10337 = vmatprep.mubr.bf16.mxu0 %v985_v46  ;;  %v14252_v61 = vld [vmem:[%s14728_s28 + $0x1518] sm:$0xff]   ;;  %v14279_v46 = vld [vmem:[%s14728_s28 + $0x1650] sm:$0xff]  }
 0x2b9   : > { %10377 = vmatprep.mubr.bf16.mxu1 %v987_v51  ;;  %v14284_v51 = vld [vmem:[%s14728_s28 + $0x16d8] sm:$0xff]  }
 0x2ba   : > { %13047 = vmatpush3.bf16.msra.mxu0 %v14211_v62  ;;  %v14253_v62 = vld [vmem:[%s14728_s28 + $0x1598] sm:$0xff]  }
 0x2bb   : > { %13048 = vmatprep.subr.bf16.mxu0 %v14213_v0  ;;  %13069 = vmatpush3.bf16.msra.mxu1 %v14212_v63  ;;  %v14254_v63 = vld [vmem:[%s14728_s28 + $0x1560] sm:$0xff]  }
 0x2bc   : > { %13070 = vmatprep.subr.bf16.mxu1 %v14214_v1  ;;  %v14255_v0 = vld [vmem:[%s14728_s28 + $0x15e0] sm:$0xff]  }
 0x2bd   : > { %v14256_v1 = vld [vmem:[%s14728_s28 + $0x1520] sm:$0xff]  }
 0x2be   : > { %13049 = vmatpush3.bf16.msra.mxu0 %v14215_v2  ;;  %v14257_v2 = vld [vmem:[%s14728_s28 + $0x15a0] sm:$0xff]  }
 0x2bf   : > { %13050 = vmatprep.subr.bf16.mxu0 %v14217_v4  ;;  %13071 = vmatpush3.bf16.msra.mxu1 %v14216_v3  ;;  %v14258_v3 = vld [vmem:[%s14728_s28 + $0x1568] sm:$0xff]  }
 0x2c0   : > { %13072 = vmatprep.subr.bf16.mxu1 %v14218_v5  ;;  %v14259_v5 = vld [vmem:[%s14728_s28 + $0x15e8] sm:$0xff]  }
 0x2c2   : > { %13051 = vmatpush3.bf16.msra.mxu0 %v14219_v6 }
 0x2c3   : > { %13052 = vmatprep.subr.bf16.mxu0 %v14221_v8  ;;  %13073 = vmatpush3.bf16.msra.mxu1 %v14220_v7  ;;  %v14260_v7 = vld [vmem:[%s14728_s28 + $0x1528] sm:$0xff]  }
 0x2c4   : > { %13074 = vmatprep.subr.bf16.mxu1 %v14222_v9 }
 0x2c6   : > { %13053 = vmatpush3.bf16.msra.mxu0 %v14223_v10 }
 0x2c7   : > { %13054 = vmatprep.subr.bf16.mxu0 %v14225_v12  ;;  %13075 = vmatpush3.bf16.msra.mxu1 %v14224_v11  ;;  %v14261_v11 = vld [vmem:[%s14728_s28 + $0x15a8] sm:$0xff]   ;;  %v14262_v12 = vld [vmem:[%s14728_s28 + $0x1570] sm:$0xff]  }
 0x2c8   : > { %v12752_v13 = vpop.f32.mrb[52].mxu0  ;;  %13076 = vmatprep.subr.bf16.mxu1 %v14226_v14 }
 0x2c9   : > { %v12753_v15 = vpop.f32.mrb[53].mxu0  ;;  %v12774_v17 = vpop.f32.mrb[52].mxu1 }
 0x2ca   : > { %v12754_v18 = vadd.f32 %v12753_v15, %v12752_v13  ;;  %v12755_v19 = vpop.f32.mrb[54].mxu0  ;;  %v12775_v20 = vpop.f32.mrb[53].mxu1  ;;  %13055 = vmatpush3.bf16.msra.mxu0 %v14227_v16 }
 0x2cb   : > { %v12756_v22 = vpop.f32.mrb[55].mxu0  ;;  %v12776_v25 = vadd.f32 %v12775_v20, %v12774_v17  ;;  %v12777_v26 = vpop.f32.mrb[54].mxu1  ;;  %13056 = vmatprep.subr.bf16.mxu0 %v14229_v23  ;;  %13077 = vmatpush3.bf16.msra.mxu1 %v14228_v21  ;;  %v14264_v20 = vld [vmem:[%s14728_s28 + $0x1530] sm:$0xff]   ;;  %v14266_v23 = vld [vmem:[%s14728_s28 + $0x1578] sm:$0xff]  }
 0x2cc   : > { %v9780_v24 = vadd.f32 %v12754_v18, %v15470_v40  ;;  %v12778_v28 = vpop.f32.mrb[55].mxu1  ;;  %13078 = vmatprep.subr.bf16.mxu1 %v14230_v27  ;;  %v14236_v40 = vld [vmem:[%s14728_s28 + $0x14b8] sm:$0xff]   ;;  %v14263_v18 = vld [vmem:[%s14728_s28 + $0x15f0] sm:$0xff]   ;;  %v235_v26 = vld [vmem:[%s14768_s30 + $0xa8] sm:$0xff] }
 0x2cd   : > { %v14265_v22 = vld [vmem:[%s14728_s28 + $0x15b0] sm:$0xff]   ;;  %v638_v27 = vrot.slane %v235_v26, %v14770_v35  ;;  %v631_v28 = vcombine.high %v235_v26, %v235_v26  ;;  %v14306_v26 = vld [vmem:[%s14728_s28 + $0x1700] sm:$0xff]  }
 0x2ce   : > { %v15508_v30 = vadd.f32 %v12776_v25, %v9780_v24  ;;  %13057 = vmatpush3.bf16.msra.mxu0 %v14231_v29  ;;  %v14267_v24 = vld [vmem:[%s14728_s28 + $0x15f8] sm:$0xff]   ;;  %v14271_v29 = vld [vmem:[%s14728_s28 + $0x1640] sm:$0xff]  }
 0x2cf   : > { %13058 = vmatprep.subr.bf16.mxu0 %v14233_v31  ;;  %13079 = vmatpush3.bf16.msra.mxu1 %v14232_v32  ;;  %v14268_v25 = vld [vmem:[%s14728_s28 + $0x1538] sm:$0xff]   ;;  %v646_v31 = vcombine.high %v638_v27, %v638_v27  ;;  %v645_v32 = vrot.slane %v631_v28, %v14770_v35 }
 0x2d0   : > { %13080 = vmatprep.subr.bf16.mxu1 %v14234_v33  ;;  %v14272_v33 = vld [vmem:[%s14728_s28 + $0x16c0] sm:$0xff]  }
 0x2d1   : > { %v989_v37 = vpack.c.bf16 %v646_v31, %v646_v31  ;;  %v647_v38 = vcombine.high %v645_v32, %v645_v32  ;;  %v14308_v31 = vld [vmem:[%s14728_s28 + $0x1748] sm:$0xff]  }
 0x2d2   : > { %13059 = vmatpush3.bf16.msra.mxu0 %v14235_v34  ;;  %v988_v34 = vpack.c.bf16 %v638_v27, %v638_v27 }
 0x2d3   : > { %13088 = vmatprep.subr.bf16.mxu0 %v14238_v39  ;;  %13081 = vmatpush3.bf16.msra.mxu1 %v14236_v40  ;;  %v14274_v39 = vld [vmem:[%s14728_s28 + $0x1680] sm:$0xff]   ;;  %v990_v40 = vpack.c.bf16 %v645_v32, %v645_v32  ;;  %v991_v42 = vpack.c.bf16 %v647_v38, %v647_v38  ;;  %v14313_v38 = vld [vmem:[%s14728_s28 + $0x17d0] sm:$0xff]  }
 0x2d4   : > { %13110 = vmatprep.subr.bf16.mxu1 %v14239_v43  ;;  %v14276_v43 = vld [vmem:[%s14728_s28 + $0x16c8] sm:$0xff]  }
 0x2d5   : > { %10338 = vmatmul.mubr.bf16.vlgmr.msra.gmra.mrb[80].mxu0 %v984_v44  ;;  %v14277_v44 = vld [vmem:[%s14728_s28 + $0x1608] sm:$0xff]  }
 0x2d6   : > { %13089 = vmatpush3.bf16.msra.mxu0 %v14240_v45  ;;  %10378 = vmatmul.mubr.bf16.vlgmr.msra.gmra.mrb[80].mxu1 %v986_v49  ;;  %v14278_v45 = vld [vmem:[%s14728_s28 + $0x1688] sm:$0xff]   ;;  %v14282_v49 = vld [vmem:[%s14728_s28 + $0x1690] sm:$0xff]  }
 0x2d7   : > { %13090 = vmatprep.subr.bf16.mxu0 %v14242_v50  ;;  %13111 = vmatpush3.bf16.msra.mxu1 %v14241_v48  ;;  %v14281_v48 = vld [vmem:[%s14728_s28 + $0x1610] sm:$0xff]   ;;  %v14283_v50 = vld [vmem:[%s14728_s28 + $0x1658] sm:$0xff]  }
 0x2d8   : > { %13112 = vmatprep.subr.bf16.mxu1 %v14243_v52  ;;  %10417 = vmatprep.mubr.bf16.mxu0 %v989_v37  ;;  %v14285_v52 = vld [vmem:[%s14728_s28 + $0x1618] sm:$0xff]   ;;  %v14312_v37 = vld [vmem:[%s14728_s28 + $0x1750] sm:$0xff]  }
 0x2d9   : > { %10457 = vmatprep.mubr.bf16.mxu1 %v991_v42  ;;  %v14317_v42 = vld [vmem:[%s14728_s28 + $0x17d8] sm:$0xff]  }
 0x2da   : > { %13091 = vmatpush3.bf16.msra.mxu0 %v14244_v53  ;;  %v14286_v53 = vld [vmem:[%s14728_s28 + $0x1698] sm:$0xff]  }
 0x2db   : > { %13092 = vmatprep.subr.bf16.mxu0 %v14246_v55  ;;  %13113 = vmatpush3.bf16.msra.mxu1 %v14245_v54  ;;  %v14287_v54 = vld [vmem:[%s14728_s28 + $0x1660] sm:$0xff]  }
 0x2dc   : > { %13114 = vmatprep.subr.bf16.mxu1 %v14247_v56  ;;  %v14288_v55 = vld [vmem:[%s14728_s28 + $0x16e0] sm:$0xff]  }
 0x2dd   : > { %v14289_v56 = vld [vmem:[%s14728_s28 + $0x1620] sm:$0xff]  }
 0x2de   : > { %13093 = vmatpush3.bf16.msra.mxu0 %v14248_v57  ;;  %v14290_v57 = vld [vmem:[%s14728_s28 + $0x16a0] sm:$0xff]  }
 0x2df   : > { %13094 = vmatprep.subr.bf16.mxu0 %v14250_v59  ;;  %13115 = vmatpush3.bf16.msra.mxu1 %v14249_v58  ;;  %v14291_v58 = vld [vmem:[%s14728_s28 + $0x1668] sm:$0xff]  }
 0x2e0   : > { %13116 = vmatprep.subr.bf16.mxu1 %v14251_v60  ;;  %v14292_v60 = vld [vmem:[%s14728_s28 + $0x16e8] sm:$0xff]  }
 0x2e2   : > { %13095 = vmatpush3.bf16.msra.mxu0 %v14252_v61 }
 0x2e3   : > { %13096 = vmatprep.subr.bf16.mxu0 %v14254_v63  ;;  %13117 = vmatpush3.bf16.msra.mxu1 %v14253_v62  ;;  %v14293_v62 = vld [vmem:[%s14728_s28 + $0x1628] sm:$0xff]  }
 0x2e4   : > { %13118 = vmatprep.subr.bf16.mxu1 %v14255_v0 }
 0x2e6   : > { %13097 = vmatpush3.bf16.msra.mxu0 %v14256_v1 }
 0x2e7   : > { %13098 = vmatprep.subr.bf16.mxu0 %v14258_v3  ;;  %13119 = vmatpush3.bf16.msra.mxu1 %v14257_v2  ;;  %v14294_v2 = vld [vmem:[%s14728_s28 + $0x16a8] sm:$0xff]   ;;  %v14295_v3 = vld [vmem:[%s14728_s28 + $0x1670] sm:$0xff]  }
 0x2e8   : > { %v12796_v4 = vpop.f32.mrb[56].mxu0  ;;  %13120 = vmatprep.subr.bf16.mxu1 %v14259_v5 }
 0x2e9   : > { %v12797_v6 = vpop.f32.mrb[57].mxu0  ;;  %v12818_v8 = vpop.f32.mrb[56].mxu1 }
 0x2ea   : > { %v12798_v9 = vadd.f32 %v12797_v6, %v12796_v4  ;;  %v12799_v10 = vpop.f32.mrb[58].mxu0  ;;  %v12819_v13 = vpop.f32.mrb[57].mxu1  ;;  %13099 = vmatpush3.bf16.msra.mxu0 %v14260_v7 }
 0x2eb   : > { %v12800_v14 = vpop.f32.mrb[59].mxu0  ;;  %v12820_v16 = vadd.f32 %v12819_v13, %v12818_v8  ;;  %v12821_v17 = vpop.f32.mrb[58].mxu1  ;;  %13100 = vmatprep.subr.bf16.mxu0 %v14262_v12  ;;  %13121 = vmatpush3.bf16.msra.mxu1 %v14261_v11  ;;  %v14297_v11 = vld [vmem:[%s14728_s28 + $0x1630] sm:$0xff]  }
 0x2ec   : > { %v9860_v15 = vadd.f32 %v12798_v9, %v15508_v30  ;;  %v12822_v19 = vpop.f32.mrb[59].mxu1  ;;  %13122 = vmatprep.subr.bf16.mxu1 %v14263_v18  ;;  %v14269_v30 = vld [vmem:[%s14728_s28 + $0x15b8] sm:$0xff]   ;;  %v14296_v9 = vld [vmem:[%s14728_s28 + $0x16f0] sm:$0xff]  }
 0x2ed   : > { %v14298_v13 = vld [vmem:[%s14728_s28 + $0x16b0] sm:$0xff]   ;;  %v14299_v14 = vld [vmem:[%s14728_s28 + $0x1678] sm:$0xff]  }
 0x2ee   : > { %v15546_v21 = vadd.f32 %v12820_v16, %v9860_v15  ;;  %13101 = vmatpush3.bf16.msra.mxu0 %v14264_v20  ;;  %v14300_v15 = vld [vmem:[%s14728_s28 + $0x16f8] sm:$0xff]   ;;  %v236_v17 = vld [vmem:[%s14768_s30 + $0xb0] sm:$0xff] }
 0x2ef   : > { %13102 = vmatprep.subr.bf16.mxu0 %v14266_v23  ;;  %13123 = vmatpush3.bf16.msra.mxu1 %v14265_v22  ;;  %v14301_v16 = vld [vmem:[%s14728_s28 + $0x1638] sm:$0xff]   ;;  %v655_v19 = vrot.slane %v236_v17, %v14770_v35  ;;  %v648_v20 = vcombine.high %v236_v17, %v236_v17  ;;  %v14339_v17 = vld [vmem:[%s14728_s28 + $0x1800] sm:$0xff]  }
 0x2f0   : > { %13124 = vmatprep.subr.bf16.mxu1 %v14267_v24  ;;  %v14302_v18 = vld [vmem:[%s14728_s28 + $0x16b8] sm:$0xff]   ;;  %v14305_v24 = vld [vmem:[%s14728_s28 + $0x17c0] sm:$0xff]  }
 0x2f1   : > { %v663_v22 = vcombine.high %v655_v19, %v655_v19  ;;  %v662_v23 = vrot.slane %v648_v20, %v14770_v35  ;;  %v14340_v20 = vld [vmem:[%s14728_s28 + $0x1880] sm:$0xff]  }
 0x2f2   : > { %13103 = vmatpush3.bf16.msra.mxu0 %v14268_v25  ;;  %v992_v25 = vpack.c.bf16 %v655_v19, %v655_v19 }
 0x2f3   : > { %13132 = vmatprep.subr.bf16.mxu0 %v14271_v29  ;;  %13125 = vmatpush3.bf16.msra.mxu1 %v14269_v30  ;;  %v993_v27 = vpack.c.bf16 %v663_v22, %v663_v22  ;;  %v664_v28 = vcombine.high %v662_v23, %v662_v23  ;;  %v14307_v29 = vld [vmem:[%s14728_s28 + $0x1780] sm:$0xff]   ;;  %v994_v30 = vpack.c.bf16 %v662_v23, %v662_v23  ;;  %v14341_v22 = vld [vmem:[%s14728_s28 + $0x1848] sm:$0xff]  }
 0x2f4   : > { %13154 = vmatprep.subr.bf16.mxu1 %v14272_v33  ;;  %v14309_v33 = vld [vmem:[%s14728_s28 + $0x17c8] sm:$0xff]  }
 0x2f5   : > { %10418 = vmatmul.mubr.bf16.vlgmr.msra.gmra.mrb[84].mxu0 %v988_v34  ;;  %v995_v32 = vpack.c.bf16 %v664_v28, %v664_v28  ;;  %v14310_v34 = vld [vmem:[%s14728_s28 + $0x1708] sm:$0xff]   ;;  %v14346_v28 = vld [vmem:[%s14728_s28 + $0x18d0] sm:$0xff]  }
 0x2f6   : > { %13133 = vmatpush3.bf16.msra.mxu0 %v14273_v36  ;;  %10458 = vmatmul.mubr.bf16.vlgmr.msra.gmra.mrb[84].mxu1 %v990_v40  ;;  %v14311_v36 = vld [vmem:[%s14728_s28 + $0x1788] sm:$0xff]   ;;  %v14315_v40 = vld [vmem:[%s14728_s28 + $0x1790] sm:$0xff]  }
 0x2f7   : > { %13134 = vmatprep.subr.bf16.mxu0 %v14275_v41  ;;  %13155 = vmatpush3.bf16.msra.mxu1 %v14274_v39  ;;  %v14314_v39 = vld [vmem:[%s14728_s28 + $0x1710] sm:$0xff]   ;;  %v14316_v41 = vld [vmem:[%s14728_s28 + $0x1758] sm:$0xff]  }
 0x2f8   : > { %13156 = vmatprep.subr.bf16.mxu1 %v14276_v43  ;;  %10497 = vmatprep.mubr.bf16.mxu0 %v993_v27  ;;  %v14318_v43 = vld [vmem:[%s14728_s28 + $0x1718] sm:$0xff]   ;;  %v14345_v27 = vld [vmem:[%s14728_s28 + $0x1850] sm:$0xff]  }
 0x2f9   : > { %10537 = vmatprep.mubr.bf16.mxu1 %v995_v32  ;;  %v14350_v32 = vld [vmem:[%s14728_s28 + $0x18d8] sm:$0xff]  }
 0x2fa   : > { %13135 = vmatpush3.bf16.msra.mxu0 %v14277_v44  ;;  %v14319_v44 = vld [vmem:[%s14728_s28 + $0x1798] sm:$0xff]  }
 0x2fb   : > { %13136 = vmatprep.subr.bf16.mxu0 %v14279_v46  ;;  %13157 = vmatpush3.bf16.msra.mxu1 %v14278_v45  ;;  %v14320_v45 = vld [vmem:[%s14728_s28 + $0x1760] sm:$0xff]  }
 0x2fc   : > { %13158 = vmatprep.subr.bf16.mxu1 %v14280_v47  ;;  %v14321_v46 = vld [vmem:[%s14728_s28 + $0x17e0] sm:$0xff]  }
 0x2fd   : > { %v14322_v47 = vld [vmem:[%s14728_s28 + $0x1720] sm:$0xff]  }
 0x2fe   : > { %13137 = vmatpush3.bf16.msra.mxu0 %v14281_v48  ;;  %v14323_v48 = vld [vmem:[%s14728_s28 + $0x17a0] sm:$0xff]  }
 0x2ff   : > { %13138 = vmatprep.subr.bf16.mxu0 %v14283_v50  ;;  %13159 = vmatpush3.bf16.msra.mxu1 %v14282_v49  ;;  %v14324_v49 = vld [vmem:[%s14728_s28 + $0x1768] sm:$0xff]  }
 0x300   : > { %13160 = vmatprep.subr.bf16.mxu1 %v14284_v51  ;;  %v14325_v51 = vld [vmem:[%s14728_s28 + $0x17e8] sm:$0xff]  }
 0x302   : > { %13139 = vmatpush3.bf16.msra.mxu0 %v14285_v52 }
 0x303   : > { %13140 = vmatprep.subr.bf16.mxu0 %v14287_v54  ;;  %13161 = vmatpush3.bf16.msra.mxu1 %v14286_v53  ;;  %v14326_v53 = vld [vmem:[%s14728_s28 + $0x1728] sm:$0xff]  }
 0x304   : > { %13162 = vmatprep.subr.bf16.mxu1 %v14288_v55 }
 0x306   : > { %13141 = vmatpush3.bf16.msra.mxu0 %v14289_v56 }
 0x307   : > { %13142 = vmatprep.subr.bf16.mxu0 %v14291_v58  ;;  %13163 = vmatpush3.bf16.msra.mxu1 %v14290_v57  ;;  %v14327_v58 = vld [vmem:[%s14728_s28 + $0x17a8] sm:$0xff]  }
 0x308   : > { %v12840_v59 = vpop.f32.mrb[60].mxu0  ;;  %13164 = vmatprep.subr.bf16.mxu1 %v14292_v60  ;;  %v14328_v60 = vld [vmem:[%s14728_s28 + $0x1770] sm:$0xff]  }
 0x309   : > { %v12841_v61 = vpop.f32.mrb[61].mxu0  ;;  %v12862_v63 = vpop.f32.mrb[60].mxu1 }
 0x30a   : > { %v12842_v0 = vadd.f32 %v12841_v61, %v12840_v59  ;;  %v12843_v1 = vpop.f32.mrb[62].mxu0  ;;  %v12863_v4 = vpop.f32.mrb[61].mxu1  ;;  %13143 = vmatpush3.bf16.msra.mxu0 %v14293_v62 }
 0x30b   : > { %v12844_v5 = vpop.f32.mrb[63].mxu0  ;;  %v12864_v7 = vadd.f32 %v12863_v4, %v12862_v63  ;;  %v12865_v8 = vpop.f32.mrb[62].mxu1  ;;  %13144 = vmatprep.subr.bf16.mxu0 %v14295_v3  ;;  %13165 = vmatpush3.bf16.msra.mxu1 %v14294_v2  ;;  %v14330_v2 = vld [vmem:[%s14728_s28 + $0x1730] sm:$0xff]   ;;  %v14332_v4 = vld [vmem:[%s14728_s28 + $0x1778] sm:$0xff]  }
 0x30c   : > { %v9940_v6 = vadd.f32 %v12842_v0, %v15546_v21  ;;  %v12866_v10 = vpop.f32.mrb[63].mxu1  ;;  %13166 = vmatprep.subr.bf16.mxu1 %v14296_v9  ;;  %v14304_v21 = vld [vmem:[%s14728_s28 + $0x1740] sm:$0xff]   ;;  %v14329_v0 = vld [vmem:[%s14728_s28 + $0x17f0] sm:$0xff]   ;;  %v237_v8 = vld [vmem:[%s14768_s30 + $0xb8] sm:$0xff] }
 0x30d   : > { %v14331_v5 = vld [vmem:[%s14728_s28 + $0x17b0] sm:$0xff]   ;;  %v672_v9 = vrot.slane %v237_v8, %v14770_v35  ;;  %v665_v10 = vcombine.high %v237_v8, %v237_v8  ;;  %v14372_v8 = vld [vmem:[%s14728_s28 + $0x1900] sm:$0xff]  }
 0x30e   : > { %v15584_v12 = vadd.f32 %v12864_v7, %v9940_v6  ;;  %13145 = vmatpush3.bf16.msra.mxu0 %v14297_v11  ;;  %v14333_v6 = vld [vmem:[%s14728_s28 + $0x17f8] sm:$0xff]   ;;  %v14337_v11 = vld [vmem:[%s14728_s28 + $0x1840] sm:$0xff]  }
 0x30f   : > { %13146 = vmatprep.subr.bf16.mxu0 %v14299_v14  ;;  %13167 = vmatpush3.bf16.msra.mxu1 %v14298_v13  ;;  %v14334_v7 = vld [vmem:[%s14728_s28 + $0x1738] sm:$0xff]   ;;  %v680_v13 = vcombine.high %v672_v9, %v672_v9  ;;  %v679_v14 = vrot.slane %v665_v10, %v14770_v35 }
 0x310   : > { %13168 = vmatprep.subr.bf16.mxu1 %v14300_v15  ;;  %v14338_v15 = vld [vmem:[%s14728_s28 + $0x18c0] sm:$0xff]  }
 0x311   : > { %v681_v19 = vcombine.high %v679_v14, %v679_v14 }
 0x312   : > { %13147 = vmatpush3.bf16.msra.mxu0 %v14301_v16  ;;  %v996_v16 = vpack.c.bf16 %v672_v9, %v672_v9 }
 0x313   : > { %13176 = vmatprep.subr.bf16.mxu0 %v14304_v21  ;;  %13169 = vmatpush3.bf16.msra.mxu1 %v14302_v18  ;;  %v997_v18 = vpack.c.bf16 %v680_v13, %v680_v13  ;;  %v998_v21 = vpack.c.bf16 %v679_v14, %v679_v14  ;;  %v999_v23 = vpack.c.bf16 %v681_v19, %v681_v19  ;;  %v14374_v13 = vld [vmem:[%s14728_s28 + $0x1948] sm:$0xff]   ;;  %v14379_v19 = vld [vmem:[%s14728_s28 + $0x19d0] sm:$0xff]  }
 0x314   : > { %13198 = vmatprep.subr.bf16.mxu1 %v14305_v24  ;;  %v14342_v24 = vld [vmem:[%s14728_s28 + $0x18c8] sm:$0xff]  }
 0x315   : > { %10498 = vmatmul.mubr.bf16.vlgmr.msra.gmra.mrb[88].mxu0 %v992_v25  ;;  %v14343_v25 = vld [vmem:[%s14728_s28 + $0x1808] sm:$0xff]  }
 0x316   : > { %13177 = vmatpush3.bf16.msra.mxu0 %v14306_v26  ;;  %10538 = vmatmul.mubr.bf16.vlgmr.msra.gmra.mrb[88].mxu1 %v994_v30  ;;  %v14344_v26 = vld [vmem:[%s14728_s28 + $0x1888] sm:$0xff]   ;;  %v14348_v30 = vld [vmem:[%s14728_s28 + $0x1890] sm:$0xff]  }
 0x317   : > { %13178 = vmatprep.subr.bf16.mxu0 %v14308_v31  ;;  %13199 = vmatpush3.bf16.msra.mxu1 %v14307_v29  ;;  %v14347_v29 = vld [vmem:[%s14728_s28 + $0x1810] sm:$0xff]   ;;  %v14349_v31 = vld [vmem:[%s14728_s28 + $0x1858] sm:$0xff]  }
 0x318   : > { %13200 = vmatprep.subr.bf16.mxu1 %v14309_v33  ;;  %10577 = vmatprep.mubr.bf16.mxu0 %v997_v18  ;;  %v14351_v33 = vld [vmem:[%s14728_s28 + $0x1818] sm:$0xff]   ;;  %v14378_v18 = vld [vmem:[%s14728_s28 + $0x1950] sm:$0xff]  }
 0x319   : > { %10617 = vmatprep.mubr.bf16.mxu1 %v999_v23  ;;  %v14383_v23 = vld [vmem:[%s14728_s28 + $0x19d8] sm:$0xff]  }
 0x31a   : > { %13179 = vmatpush3.bf16.msra.mxu0 %v14310_v34  ;;  %v14352_v34 = vld [vmem:[%s14728_s28 + $0x1898] sm:$0xff]  }
 0x31b   : > { %13180 = vmatprep.subr.bf16.mxu0 %v14312_v37  ;;  %13201 = vmatpush3.bf16.msra.mxu1 %v14311_v36  ;;  %v14353_v36 = vld [vmem:[%s14728_s28 + $0x1860] sm:$0xff]  }
 0x31c   : > { %13202 = vmatprep.subr.bf16.mxu1 %v14313_v38  ;;  %v14354_v37 = vld [vmem:[%s14728_s28 + $0x18e0] sm:$0xff]  }
 0x31d   : > { %v14355_v38 = vld [vmem:[%s14728_s28 + $0x1820] sm:$0xff]  }
 0x31e   : > { %13181 = vmatpush3.bf16.msra.mxu0 %v14314_v39  ;;  %v14356_v39 = vld [vmem:[%s14728_s28 + $0x18a0] sm:$0xff]  }
 0x31f   : > { %13182 = vmatprep.subr.bf16.mxu0 %v14316_v41  ;;  %13203 = vmatpush3.bf16.msra.mxu1 %v14315_v40  ;;  %v14357_v40 = vld [vmem:[%s14728_s28 + $0x1868] sm:$0xff]  }
 0x320   : > { %13204 = vmatprep.subr.bf16.mxu1 %v14317_v42  ;;  %v14358_v42 = vld [vmem:[%s14728_s28 + $0x18e8] sm:$0xff]  }
 0x322   : > { %13183 = vmatpush3.bf16.msra.mxu0 %v14318_v43 }
 0x323   : > { %13184 = vmatprep.subr.bf16.mxu0 %v14320_v45  ;;  %13205 = vmatpush3.bf16.msra.mxu1 %v14319_v44  ;;  %v14359_v44 = vld [vmem:[%s14728_s28 + $0x1828] sm:$0xff]  }
 0x324   : > { %13206 = vmatprep.subr.bf16.mxu1 %v14321_v46 }
 0x326   : > { %13185 = vmatpush3.bf16.msra.mxu0 %v14322_v47 }
 0x327   : > { %13186 = vmatprep.subr.bf16.mxu0 %v14324_v49  ;;  %13207 = vmatpush3.bf16.msra.mxu1 %v14323_v48  ;;  %v14360_v48 = vld [vmem:[%s14728_s28 + $0x18a8] sm:$0xff]   ;;  %v14361_v49 = vld [vmem:[%s14728_s28 + $0x1870] sm:$0xff]  }
 0x328   : > { %v12884_v50 = vpop.f32.mrb[64].mxu0  ;;  %13208 = vmatprep.subr.bf16.mxu1 %v14325_v51 }
 0x329   : > { %v12885_v52 = vpop.f32.mrb[65].mxu0  ;;  %v12906_v54 = vpop.f32.mrb[64].mxu1 }
 0x32a   : > { %v12886_v55 = vadd.f32 %v12885_v52, %v12884_v50  ;;  %v12887_v56 = vpop.f32.mrb[66].mxu0  ;;  %v12907_v57 = vpop.f32.mrb[65].mxu1  ;;  %13187 = vmatpush3.bf16.msra.mxu0 %v14326_v53 }
 0x32b   : > { %v12888_v59 = vpop.f32.mrb[67].mxu0  ;;  %v12908_v62 = vadd.f32 %v12907_v57, %v12906_v54  ;;  %v12909_v63 = vpop.f32.mrb[66].mxu1  ;;  %13188 = vmatprep.subr.bf16.mxu0 %v14328_v60  ;;  %13209 = vmatpush3.bf16.msra.mxu1 %v14327_v58  ;;  %v14363_v57 = vld [vmem:[%s14728_s28 + $0x1830] sm:$0xff]   ;;  %v14365_v60 = vld [vmem:[%s14728_s28 + $0x1878] sm:$0xff]  }
 0x32c   : > { %v10020_v61 = vadd.f32 %v12886_v55, %v15584_v12  ;;  %v12910_v1 = vpop.f32.mrb[67].mxu1  ;;  %13210 = vmatprep.subr.bf16.mxu1 %v14329_v0  ;;  %v14335_v12 = vld [vmem:[%s14728_s28 + $0x17b8] sm:$0xff]   ;;  %v14362_v55 = vld [vmem:[%s14728_s28 + $0x18f0] sm:$0xff]   ;;  %v238_v63 = vld [vmem:[%s14768_s30 + $0xc0] sm:$0xff] }
 0x32d   : > { %v14364_v59 = vld [vmem:[%s14728_s28 + $0x18b0] sm:$0xff]   ;;  %v689_v0 = vrot.slane %v238_v63, %v14770_v35  ;;  %v682_v1 = vcombine.high %v238_v63, %v238_v63  ;;  %v14405_v63 = vld [vmem:[%s14728_s28 + $0x1a00] sm:$0xff]  }
 0x32e   : > { %v15622_v3 = vadd.f32 %v12908_v62, %v10020_v61  ;;  %13189 = vmatpush3.bf16.msra.mxu0 %v14330_v2  ;;  %v14366_v61 = vld [vmem:[%s14728_s28 + $0x18f8] sm:$0xff]   ;;  %v14370_v2 = vld [vmem:[%s14728_s28 + $0x1940] sm:$0xff]  }
 0x32f   : > { %13190 = vmatprep.subr.bf16.mxu0 %v14332_v4  ;;  %13211 = vmatpush3.bf16.msra.mxu1 %v14331_v5  ;;  %v14367_v62 = vld [vmem:[%s14728_s28 + $0x1838] sm:$0xff]   ;;  %v697_v4 = vcombine.high %v689_v0, %v689_v0  ;;  %v696_v5 = vrot.slane %v682_v1, %v14770_v35 }
 0x330   : > { %13212 = vmatprep.subr.bf16.mxu1 %v14333_v6  ;;  %v14371_v6 = vld [vmem:[%s14728_s28 + $0x19c0] sm:$0xff]  }
 0x331   : > { %v1001_v9 = vpack.c.bf16 %v697_v4, %v697_v4  ;;  %v698_v10 = vcombine.high %v696_v5, %v696_v5  ;;  %v14407_v4 = vld [vmem:[%s14728_s28 + $0x1a48] sm:$0xff]  }
 0x332   : > { %13191 = vmatpush3.bf16.msra.mxu0 %v14334_v7  ;;  %v1000_v7 = vpack.c.bf16 %v689_v0, %v689_v0 }
 0x333   : > { %13220 = vmatprep.subr.bf16.mxu0 %v14337_v11  ;;  %13213 = vmatpush3.bf16.msra.mxu1 %v14335_v12  ;;  %v14373_v11 = vld [vmem:[%s14728_s28 + $0x1980] sm:$0xff]   ;;  %v1002_v12 = vpack.c.bf16 %v696_v5, %v696_v5  ;;  %v1003_v14 = vpack.c.bf16 %v698_v10, %v698_v10  ;;  %v14412_v10 = vld [vmem:[%s14728_s28 + $0x1ad0] sm:$0xff]  }
 0x334   : > { %13242 = vmatprep.subr.bf16.mxu1 %v14338_v15  ;;  %v14375_v15 = vld [vmem:[%s14728_s28 + $0x19c8] sm:$0xff]  }
 0x335   : > { %10578 = vmatmul.mubr.bf16.vlgmr.msra.gmra.mrb[92].mxu0 %v996_v16  ;;  %v14376_v16 = vld [vmem:[%s14728_s28 + $0x1908] sm:$0xff]  }
 0x336   : > { %13221 = vmatpush3.bf16.msra.mxu0 %v14339_v17  ;;  %10618 = vmatmul.mubr.bf16.vlgmr.msra.gmra.mrb[92].mxu1 %v998_v21  ;;  %v14377_v17 = vld [vmem:[%s14728_s28 + $0x1988] sm:$0xff]   ;;  %v14381_v21 = vld [vmem:[%s14728_s28 + $0x1990] sm:$0xff]  }
 0x337   : > { %13222 = vmatprep.subr.bf16.mxu0 %v14341_v22  ;;  %13243 = vmatpush3.bf16.msra.mxu1 %v14340_v20  ;;  %v14380_v20 = vld [vmem:[%s14728_s28 + $0x1910] sm:$0xff]   ;;  %v14382_v22 = vld [vmem:[%s14728_s28 + $0x1958] sm:$0xff]  }
 0x338   : > { %13244 = vmatprep.subr.bf16.mxu1 %v14342_v24  ;;  %10657 = vmatprep.mubr.bf16.mxu0 %v1001_v9  ;;  %v14384_v24 = vld [vmem:[%s14728_s28 + $0x1918] sm:$0xff]   ;;  %v14411_v9 = vld [vmem:[%s14728_s28 + $0x1a50] sm:$0xff]  }
 0x339   : > { %10697 = vmatprep.mubr.bf16.mxu1 %v1003_v14  ;;  %v14416_v14 = vld [vmem:[%s14728_s28 + $0x1ad8] sm:$0xff]  }
 0x33a   : > { %13223 = vmatpush3.bf16.msra.mxu0 %v14343_v25  ;;  %v14385_v25 = vld [vmem:[%s14728_s28 + $0x1998] sm:$0xff]  }
 0x33b   : > { %13224 = vmatprep.subr.bf16.mxu0 %v14345_v27  ;;  %13245 = vmatpush3.bf16.msra.mxu1 %v14344_v26  ;;  %v14386_v26 = vld [vmem:[%s14728_s28 + $0x1960] sm:$0xff]  }
 0x33c   : > { %13246 = vmatprep.subr.bf16.mxu1 %v14346_v28  ;;  %v14387_v27 = vld [vmem:[%s14728_s28 + $0x19e0] sm:$0xff]  }
 0x33d   : > { %v14388_v28 = vld [vmem:[%s14728_s28 + $0x1920] sm:$0xff]  }
 0x33e   : > { %13225 = vmatpush3.bf16.msra.mxu0 %v14347_v29  ;;  %v14389_v29 = vld [vmem:[%s14728_s28 + $0x19a0] sm:$0xff]  }
 0x33f   : > { %13226 = vmatprep.subr.bf16.mxu0 %v14349_v31  ;;  %13247 = vmatpush3.bf16.msra.mxu1 %v14348_v30  ;;  %v14390_v30 = vld [vmem:[%s14728_s28 + $0x1968] sm:$0xff]  }
 0x340   : > { %13248 = vmatprep.subr.bf16.mxu1 %v14350_v32  ;;  %v14391_v32 = vld [vmem:[%s14728_s28 + $0x19e8] sm:$0xff]  }
 0x342   : > { %13227 = vmatpush3.bf16.msra.mxu0 %v14351_v33 }
 0x343   : > { %13228 = vmatprep.subr.bf16.mxu0 %v14353_v36  ;;  %13249 = vmatpush3.bf16.msra.mxu1 %v14352_v34  ;;  %v14392_v34 = vld [vmem:[%s14728_s28 + $0x1928] sm:$0xff]  }
 0x344   : > { %13250 = vmatprep.subr.bf16.mxu1 %v14354_v37 }
 0x346   : > { %13229 = vmatpush3.bf16.msra.mxu0 %v14355_v38 }
 0x347   : > { %13230 = vmatprep.subr.bf16.mxu0 %v14357_v40  ;;  %13251 = vmatpush3.bf16.msra.mxu1 %v14356_v39  ;;  %v14393_v39 = vld [vmem:[%s14728_s28 + $0x19a8] sm:$0xff]   ;;  %v14394_v40 = vld [vmem:[%s14728_s28 + $0x1970] sm:$0xff]  }
 0x348   : > { %v12928_v41 = vpop.f32.mrb[68].mxu0  ;;  %13252 = vmatprep.subr.bf16.mxu1 %v14358_v42 }
 0x349   : > { %v12929_v43 = vpop.f32.mrb[69].mxu0  ;;  %v12950_v45 = vpop.f32.mrb[68].mxu1 }
 0x34a   : > { %v12930_v46 = vadd.f32 %v12929_v43, %v12928_v41  ;;  %v12931_v47 = vpop.f32.mrb[70].mxu0  ;;  %v12951_v50 = vpop.f32.mrb[69].mxu1  ;;  %13231 = vmatpush3.bf16.msra.mxu0 %v14359_v44 }
 0x34b   : > { %v12932_v51 = vpop.f32.mrb[71].mxu0  ;;  %v12952_v53 = vadd.f32 %v12951_v50, %v12950_v45  ;;  %v12953_v54 = vpop.f32.mrb[70].mxu1  ;;  %13232 = vmatprep.subr.bf16.mxu0 %v14361_v49  ;;  %13253 = vmatpush3.bf16.msra.mxu1 %v14360_v48  ;;  %v14396_v48 = vld [vmem:[%s14728_s28 + $0x1930] sm:$0xff]  }
 0x34c   : > { %v10100_v52 = vadd.f32 %v12930_v46, %v15622_v3  ;;  %v12954_v56 = vpop.f32.mrb[71].mxu1  ;;  %13254 = vmatprep.subr.bf16.mxu1 %v14362_v55  ;;  %v14368_v3 = vld [vmem:[%s14728_s28 + $0x18b8] sm:$0xff]   ;;  %v14395_v46 = vld [vmem:[%s14728_s28 + $0x19f0] sm:$0xff]   ;;  %v239_v54 = vld [vmem:[%s14768_s30 + $0xc8] sm:$0xff] }
 0x34d   : > { %v14397_v50 = vld [vmem:[%s14728_s28 + $0x19b0] sm:$0xff]   ;;  %v14398_v51 = vld [vmem:[%s14728_s28 + $0x1978] sm:$0xff]   ;;  %v706_v56 = vrot.slane %v239_v54, %v14770_v35 }
 0x34e   : > { %v15660_v58 = vadd.f32 %v12952_v53, %v10100_v52  ;;  %13233 = vmatpush3.bf16.msra.mxu0 %v14363_v57  ;;  %v14399_v52 = vld [vmem:[%s14728_s28 + $0x19f8] sm:$0xff]   ;;  %v699_v57 = vcombine.high %v239_v54, %v239_v54  ;;  %v14438_v54 = vld [vmem:[%s14728_s28 + $0x1b00] sm:$0xff]  }
 0x34f   : > { %13234 = vmatprep.subr.bf16.mxu0 %v14365_v60  ;;  %13255 = vmatpush3.bf16.msra.mxu1 %v14364_v59  ;;  %v14400_v53 = vld [vmem:[%s14728_s28 + $0x1938] sm:$0xff]   ;;  %v714_v59 = vcombine.high %v706_v56, %v706_v56 }
 0x350   : > { %13256 = vmatprep.subr.bf16.mxu1 %v14366_v61  ;;  %v14401_v55 = vld [vmem:[%s14728_s28 + $0x19b8] sm:$0xff]   ;;  %v713_v60 = vrot.slane %v699_v57, %v14770_v35  ;;  %v14404_v61 = vld [vmem:[%s14728_s28 + $0x1ac0] sm:$0xff]  }
 0x351   : > { %v1005_v0 = vpack.c.bf16 %v714_v59, %v714_v59  ;;  %v14439_v57 = vld [vmem:[%s14728_s28 + $0x1b80] sm:$0xff]   ;;  %v14440_v59 = vld [vmem:[%s14728_s28 + $0x1b48] sm:$0xff]  }
 0x352   : > { %13235 = vmatpush3.bf16.msra.mxu0 %v14367_v62  ;;  %v1004_v62 = vpack.c.bf16 %v706_v56, %v706_v56  ;;  %v715_v1 = vcombine.high %v713_v60, %v713_v60 }
 0x353   : > { %13264 = vmatprep.subr.bf16.mxu0 %v14370_v2  ;;  %13257 = vmatpush3.bf16.msra.mxu1 %v14368_v3  ;;  %v14406_v2 = vld [vmem:[%s14728_s28 + $0x1a80] sm:$0xff]   ;;  %v1006_v3 = vpack.c.bf16 %v713_v60, %v713_v60 }
 0x354   : > { %13286 = vmatprep.subr.bf16.mxu1 %v14371_v6  ;;  %v1007_v5 = vpack.c.bf16 %v715_v1, %v715_v1  ;;  %v14408_v6 = vld [vmem:[%s14728_s28 + $0x1ac8] sm:$0xff]   ;;  %v14445_v1 = vld [vmem:[%s14728_s28 + $0x1bd0] sm:$0xff]  }
 0x355   : > { %10658 = vmatmul.mubr.bf16.vlgmr.msra.gmra.mrb[96].mxu0 %v1000_v7  ;;  %v14409_v7 = vld [vmem:[%s14728_s28 + $0x1a08] sm:$0xff]  }
 0x356   : > { %13265 = vmatpush3.bf16.msra.mxu0 %v14372_v8  ;;  %10698 = vmatmul.mubr.bf16.vlgmr.msra.gmra.mrb[96].mxu1 %v1002_v12  ;;  %v14410_v8 = vld [vmem:[%s14728_s28 + $0x1a88] sm:$0xff]   ;;  %v14414_v12 = vld [vmem:[%s14728_s28 + $0x1a90] sm:$0xff]  }
 0x357   : > { %13266 = vmatprep.subr.bf16.mxu0 %v14374_v13  ;;  %13287 = vmatpush3.bf16.msra.mxu1 %v14373_v11  ;;  %v14413_v11 = vld [vmem:[%s14728_s28 + $0x1a10] sm:$0xff]   ;;  %v14415_v13 = vld [vmem:[%s14728_s28 + $0x1a58] sm:$0xff]  }
 0x358   : > { %13288 = vmatprep.subr.bf16.mxu1 %v14375_v15  ;;  %10737 = vmatprep.mubr.bf16.mxu0 %v1005_v0  ;;  %v14417_v15 = vld [vmem:[%s14728_s28 + $0x1a18] sm:$0xff]   ;;  %v14444_v0 = vld [vmem:[%s14728_s28 + $0x1b50] sm:$0xff]  }
 0x359   : > { %10777 = vmatprep.mubr.bf16.mxu1 %v1007_v5  ;;  %v14449_v5 = vld [vmem:[%s14728_s28 + $0x1bd8] sm:$0xff]  }
 0x35a   : > { %13267 = vmatpush3.bf16.msra.mxu0 %v14376_v16  ;;  %v14418_v16 = vld [vmem:[%s14728_s28 + $0x1a98] sm:$0xff]  }
 0x35b   : > { %13268 = vmatprep.subr.bf16.mxu0 %v14378_v18  ;;  %13289 = vmatpush3.bf16.msra.mxu1 %v14377_v17  ;;  %v14419_v17 = vld [vmem:[%s14728_s28 + $0x1a60] sm:$0xff]  }
 0x35c   : > { %13290 = vmatprep.subr.bf16.mxu1 %v14379_v19  ;;  %v14420_v18 = vld [vmem:[%s14728_s28 + $0x1ae0] sm:$0xff]  }
 0x35d   : > { %v14421_v19 = vld [vmem:[%s14728_s28 + $0x1a20] sm:$0xff]  }
 0x35e   : > { %13269 = vmatpush3.bf16.msra.mxu0 %v14380_v20  ;;  %v14422_v20 = vld [vmem:[%s14728_s28 + $0x1aa0] sm:$0xff]  }
 0x35f   : > { %13270 = vmatprep.subr.bf16.mxu0 %v14382_v22  ;;  %13291 = vmatpush3.bf16.msra.mxu1 %v14381_v21  ;;  %v14423_v21 = vld [vmem:[%s14728_s28 + $0x1a68] sm:$0xff]  }
 0x360   : > { %13292 = vmatprep.subr.bf16.mxu1 %v14383_v23  ;;  %v14424_v23 = vld [vmem:[%s14728_s28 + $0x1ae8] sm:$0xff]  }
 0x362   : > { %13271 = vmatpush3.bf16.msra.mxu0 %v14384_v24 }
 0x363   : > { %13272 = vmatprep.subr.bf16.mxu0 %v14386_v26  ;;  %13293 = vmatpush3.bf16.msra.mxu1 %v14385_v25  ;;  %v14425_v25 = vld [vmem:[%s14728_s28 + $0x1a28] sm:$0xff]  }
 0x364   : > { %13294 = vmatprep.subr.bf16.mxu1 %v14387_v27 }
 0x366   : > { %13273 = vmatpush3.bf16.msra.mxu0 %v14388_v28 }
 0x367   : > { %13274 = vmatprep.subr.bf16.mxu0 %v14390_v30  ;;  %13295 = vmatpush3.bf16.msra.mxu1 %v14389_v29  ;;  %v14426_v30 = vld [vmem:[%s14728_s28 + $0x1aa8] sm:$0xff]  }
 0x368   : > { %v12972_v31 = vpop.f32.mrb[72].mxu0  ;;  %13296 = vmatprep.subr.bf16.mxu1 %v14391_v32  ;;  %v14427_v32 = vld [vmem:[%s14728_s28 + $0x1a70] sm:$0xff]  }
 0x369   : > { %v12973_v33 = vpop.f32.mrb[73].mxu0  ;;  %v12994_v36 = vpop.f32.mrb[72].mxu1 }
 0x36a   : > { %v12974_v37 = vadd.f32 %v12973_v33, %v12972_v31  ;;  %v12975_v38 = vpop.f32.mrb[74].mxu0  ;;  %v12995_v41 = vpop.f32.mrb[73].mxu1  ;;  %13275 = vmatpush3.bf16.msra.mxu0 %v14392_v34 }
 0x36b   : > { %v12976_v42 = vpop.f32.mrb[75].mxu0  ;;  %v12996_v44 = vadd.f32 %v12995_v41, %v12994_v36  ;;  %v12997_v45 = vpop.f32.mrb[74].mxu1  ;;  %13276 = vmatprep.subr.bf16.mxu0 %v14394_v40  ;;  %13297 = vmatpush3.bf16.msra.mxu1 %v14393_v39  ;;  %v14429_v39 = vld [vmem:[%s14728_s28 + $0x1a30] sm:$0xff]   ;;  %v14431_v41 = vld [vmem:[%s14728_s28 + $0x1a78] sm:$0xff]  }
 0x36c   : > { %v10180_v43 = vadd.f32 %v12974_v37, %v15660_v58  ;;  %v12998_v47 = vpop.f32.mrb[75].mxu1  ;;  %13298 = vmatprep.subr.bf16.mxu1 %v14395_v46  ;;  %v14403_v58 = vld [vmem:[%s14728_s28 + $0x1a40] sm:$0xff]   ;;  %v14428_v37 = vld [vmem:[%s14728_s28 + $0x1af0] sm:$0xff]  }
 0x36d   : > { %v14430_v42 = vld [vmem:[%s14728_s28 + $0x1ab0] sm:$0xff]  }
 0x36e   : > { %v15698_v49 = vadd.f32 %v12996_v44, %v10180_v43  ;;  %13277 = vmatpush3.bf16.msra.mxu0 %v14396_v48  ;;  %v14432_v43 = vld [vmem:[%s14728_s28 + $0x1af8] sm:$0xff]   ;;  %v240_v45 = vld [vmem:[%s14768_s30 + $0xd0] sm:$0xff]  ;;  %v14436_v48 = vld [vmem:[%s14728_s28 + $0x1b40] sm:$0xff]  }
 0x36f   : > { %13278 = vmatprep.subr.bf16.mxu0 %v14398_v51  ;;  %13299 = vmatpush3.bf16.msra.mxu1 %v14397_v50  ;;  %v14433_v44 = vld [vmem:[%s14728_s28 + $0x1a38] sm:$0xff]   ;;  %v723_v46 = vrot.slane %v240_v45, %v14770_v35  ;;  %v716_v47 = vcombine.high %v240_v45, %v240_v45  ;;  %v14471_v45 = vld [vmem:[%s14728_s28 + $0x1c00] sm:$0xff]  }
 0x370   : > { %13300 = vmatprep.subr.bf16.mxu1 %v14399_v52  ;;  %v14437_v52 = vld [vmem:[%s14728_s28 + $0x1bc0] sm:$0xff]  }
 0x371   : > { %v731_v50 = vcombine.high %v723_v46, %v723_v46  ;;  %v730_v51 = vrot.slane %v716_v47, %v14770_v35 }
 0x372   : > { %13279 = vmatpush3.bf16.msra.mxu0 %v14400_v53  ;;  %v1008_v53 = vpack.c.bf16 %v723_v46, %v723_v46 }
 0x373   : > { %13308 = vmatprep.subr.bf16.mxu0 %v14403_v58  ;;  %13301 = vmatpush3.bf16.msra.mxu1 %v14401_v55  ;;  %v1009_v55 = vpack.c.bf16 %v731_v50, %v731_v50  ;;  %v732_v56 = vcombine.high %v730_v51, %v730_v51  ;;  %v1010_v58 = vpack.c.bf16 %v730_v51, %v730_v51  ;;  %v14473_v50 = vld [vmem:[%s14728_s28 + $0x1c48] sm:$0xff]  }
 0x374   : > { %13330 = vmatprep.subr.bf16.mxu1 %v14404_v61  ;;  %v14441_v61 = vld [vmem:[%s14728_s28 + $0x1bc8] sm:$0xff]  }
 0x375   : > { %10738 = vmatmul.mubr.bf16.vlgmr.msra.gmra.mrb[100].mxu0 %v1004_v62  ;;  %v1011_v60 = vpack.c.bf16 %v732_v56, %v732_v56  ;;  %v14442_v62 = vld [vmem:[%s14728_s28 + $0x1b08] sm:$0xff]   ;;  %v14478_v56 = vld [vmem:[%s14728_s28 + $0x1cd0] sm:$0xff]  }
 0x376   : > { %13309 = vmatpush3.bf16.msra.mxu0 %v14405_v63  ;;  %10778 = vmatmul.mubr.bf16.vlgmr.msra.gmra.mrb[100].mxu1 %v1006_v3  ;;  %v14443_v63 = vld [vmem:[%s14728_s28 + $0x1b88] sm:$0xff]   ;;  %v14447_v3 = vld [vmem:[%s14728_s28 + $0x1b90] sm:$0xff]  }
 0x377   : > { %13310 = vmatprep.subr.bf16.mxu0 %v14407_v4  ;;  %13331 = vmatpush3.bf16.msra.mxu1 %v14406_v2  ;;  %v14446_v2 = vld [vmem:[%s14728_s28 + $0x1b10] sm:$0xff]   ;;  %v14448_v4 = vld [vmem:[%s14728_s28 + $0x1b58] sm:$0xff]  }
 0x378   : > { %13332 = vmatprep.subr.bf16.mxu1 %v14408_v6  ;;  %10817 = vmatprep.mubr.bf16.mxu0 %v1009_v55  ;;  %v14450_v6 = vld [vmem:[%s14728_s28 + $0x1b18] sm:$0xff]   ;;  %v14477_v55 = vld [vmem:[%s14728_s28 + $0x1c50] sm:$0xff]  }
 0x379   : > { %10857 = vmatprep.mubr.bf16.mxu1 %v1011_v60  ;;  %v14482_v60 = vld [vmem:[%s14728_s28 + $0x1cd8] sm:$0xff]  }
 0x37a   : > { %13311 = vmatpush3.bf16.msra.mxu0 %v14409_v7  ;;  %v14451_v7 = vld [vmem:[%s14728_s28 + $0x1b98] sm:$0xff]  }
 0x37b   : > { %13312 = vmatprep.subr.bf16.mxu0 %v14411_v9  ;;  %13333 = vmatpush3.bf16.msra.mxu1 %v14410_v8  ;;  %v14452_v8 = vld [vmem:[%s14728_s28 + $0x1b60] sm:$0xff]  }
 0x37c   : > { %13334 = vmatprep.subr.bf16.mxu1 %v14412_v10  ;;  %v14453_v9 = vld [vmem:[%s14728_s28 + $0x1be0] sm:$0xff]  }
 0x37d   : > { %v14454_v10 = vld [vmem:[%s14728_s28 + $0x1b20] sm:$0xff]  }
 0x37e   : > { %13313 = vmatpush3.bf16.msra.mxu0 %v14413_v11  ;;  %v14455_v11 = vld [vmem:[%s14728_s28 + $0x1ba0] sm:$0xff]  }
 0x37f   : > { %13314 = vmatprep.subr.bf16.mxu0 %v14415_v13  ;;  %13335 = vmatpush3.bf16.msra.mxu1 %v14414_v12  ;;  %v14456_v12 = vld [vmem:[%s14728_s28 + $0x1b68] sm:$0xff]  }
 0x380   : > { %13336 = vmatprep.subr.bf16.mxu1 %v14416_v14  ;;  %v14457_v14 = vld [vmem:[%s14728_s28 + $0x1be8] sm:$0xff]  }
 0x382   : > { %13315 = vmatpush3.bf16.msra.mxu0 %v14417_v15 }
 0x383   : > { %13316 = vmatprep.subr.bf16.mxu0 %v14419_v17  ;;  %13337 = vmatpush3.bf16.msra.mxu1 %v14418_v16  ;;  %v14458_v16 = vld [vmem:[%s14728_s28 + $0x1b28] sm:$0xff]  }
 0x384   : > { %13338 = vmatprep.subr.bf16.mxu1 %v14420_v18 }
 0x386   : > { %13317 = vmatpush3.bf16.msra.mxu0 %v14421_v19 }
 0x387   : > { %13318 = vmatprep.subr.bf16.mxu0 %v14423_v21  ;;  %13339 = vmatpush3.bf16.msra.mxu1 %v14422_v20  ;;  %v14459_v20 = vld [vmem:[%s14728_s28 + $0x1ba8] sm:$0xff]   ;;  %v14460_v21 = vld [vmem:[%s14728_s28 + $0x1b70] sm:$0xff]  }
 0x388   : > { %v13016_v22 = vpop.f32.mrb[76].mxu0  ;;  %13340 = vmatprep.subr.bf16.mxu1 %v14424_v23 }
 0x389   : > { %v13017_v24 = vpop.f32.mrb[77].mxu0  ;;  %v13038_v26 = vpop.f32.mrb[76].mxu1 }
 0x38a   : > { %v13018_v27 = vadd.f32 %v13017_v24, %v13016_v22  ;;  %v13019_v28 = vpop.f32.mrb[78].mxu0  ;;  %v13039_v29 = vpop.f32.mrb[77].mxu1  ;;  %13319 = vmatpush3.bf16.msra.mxu0 %v14425_v25 }
 0x38b   : > { %v13020_v31 = vpop.f32.mrb[79].mxu0  ;;  %v13040_v34 = vadd.f32 %v13039_v29, %v13038_v26  ;;  %v13041_v36 = vpop.f32.mrb[78].mxu1  ;;  %13320 = vmatprep.subr.bf16.mxu0 %v14427_v32  ;;  %13341 = vmatpush3.bf16.msra.mxu1 %v14426_v30  ;;  %v14462_v29 = vld [vmem:[%s14728_s28 + $0x1b30] sm:$0xff]   ;;  %v14464_v32 = vld [vmem:[%s14728_s28 + $0x1b78] sm:$0xff]  }
 0x38c   : > { %v10260_v33 = vadd.f32 %v13018_v27, %v15698_v49  ;;  %v13042_v38 = vpop.f32.mrb[79].mxu1  ;;  %13342 = vmatprep.subr.bf16.mxu1 %v14428_v37  ;;  %v14434_v49 = vld [vmem:[%s14728_s28 + $0x1ab8] sm:$0xff]   ;;  %v14461_v27 = vld [vmem:[%s14728_s28 + $0x1bf0] sm:$0xff]  }
 0x38d   : > { %v14463_v31 = vld [vmem:[%s14728_s28 + $0x1bb0] sm:$0xff]   ;;  %v241_v36 = vld [vmem:[%s14768_s30 + $0xd8] sm:$0xff] }
 0x38e   : > { %v15736_v40 = vadd.f32 %v13040_v34, %v10260_v33  ;;  %13321 = vmatpush3.bf16.msra.mxu0 %v14429_v39  ;;  %v14465_v33 = vld [vmem:[%s14728_s28 + $0x1bf8] sm:$0xff]   ;;  %v740_v37 = vrot.slane %v241_v36, %v14770_v35  ;;  %v733_v38 = vcombine.high %v241_v36, %v241_v36  ;;  %v14469_v39 = vld [vmem:[%s14728_s28 + $0x1c40] sm:$0xff]  }
 0x38f   : > { %13322 = vmatprep.subr.bf16.mxu0 %v14431_v41  ;;  %13343 = vmatpush3.bf16.msra.mxu1 %v14430_v42  ;;  %v14466_v34 = vld [vmem:[%s14728_s28 + $0x1b38] sm:$0xff]   ;;  %v14504_v36 = vld [vmem:[%s14728_s28 + $0x1d00] sm:$0xff]  }
 0x390   : > { %13344 = vmatprep.subr.bf16.mxu1 %v14432_v43  ;;  %v748_v41 = vcombine.high %v740_v37, %v740_v37  ;;  %v747_v42 = vrot.slane %v733_v38, %v14770_v35  ;;  %v14470_v43 = vld [vmem:[%s14728_s28 + $0x1cc0] sm:$0xff]  }
 0x392   : > { %13323 = vmatpush3.bf16.msra.mxu0 %v14433_v44  ;;  %v1012_v44 = vpack.c.bf16 %v740_v37, %v740_v37  ;;  %v1013_v46 = vpack.c.bf16 %v748_v41, %v748_v41  ;;  %v749_v47 = vcombine.high %v747_v42, %v747_v42  ;;  %v14506_v41 = vld [vmem:[%s14728_s28 + $0x1d48] sm:$0xff]  }
 0x393   : > { %13352 = vmatprep.subr.bf16.mxu0 %v14436_v48  ;;  %13345 = vmatpush3.bf16.msra.mxu1 %v14434_v49  ;;  %v14472_v48 = vld [vmem:[%s14728_s28 + $0x1c80] sm:$0xff]   ;;  %v1014_v49 = vpack.c.bf16 %v747_v42, %v747_v42 }
 0x394   : > { %13374 = vmatprep.subr.bf16.mxu1 %v14437_v52  ;;  %v1015_v51 = vpack.c.bf16 %v749_v47, %v749_v47  ;;  %v14474_v52 = vld [vmem:[%s14728_s28 + $0x1cc8] sm:$0xff]   ;;  %v14511_v47 = vld [vmem:[%s14728_s28 + $0x1dd0] sm:$0xff]  }
 0x395   : > { %10818 = vmatmul.mubr.bf16.vlgmr.msra.gmra.mrb[104].mxu0 %v1008_v53  ;;  %v14475_v53 = vld [vmem:[%s14728_s28 + $0x1c08] sm:$0xff]  }
 0x396   : > { %13353 = vmatpush3.bf16.msra.mxu0 %v14438_v54  ;;  %10858 = vmatmul.mubr.bf16.vlgmr.msra.gmra.mrb[104].mxu1 %v1010_v58  ;;  %v14476_v54 = vld [vmem:[%s14728_s28 + $0x1c88] sm:$0xff]   ;;  %v14480_v58 = vld [vmem:[%s14728_s28 + $0x1c90] sm:$0xff]  }
 0x397   : > { %13354 = vmatprep.subr.bf16.mxu0 %v14440_v59  ;;  %13375 = vmatpush3.bf16.msra.mxu1 %v14439_v57  ;;  %v14479_v57 = vld [vmem:[%s14728_s28 + $0x1c10] sm:$0xff]   ;;  %v14481_v59 = vld [vmem:[%s14728_s28 + $0x1c58] sm:$0xff]  }
 0x398   : > { %13376 = vmatprep.subr.bf16.mxu1 %v14441_v61  ;;  %10897 = vmatprep.mubr.bf16.mxu0 %v1013_v46  ;;  %v14483_v61 = vld [vmem:[%s14728_s28 + $0x1c18] sm:$0xff]   ;;  %v14510_v46 = vld [vmem:[%s14728_s28 + $0x1d50] sm:$0xff]  }
 0x399   : > { %10937 = vmatprep.mubr.bf16.mxu1 %v1015_v51  ;;  %v14515_v51 = vld [vmem:[%s14728_s28 + $0x1dd8] sm:$0xff]  }
 0x39a   : > { %13355 = vmatpush3.bf16.msra.mxu0 %v14442_v62  ;;  %v14484_v62 = vld [vmem:[%s14728_s28 + $0x1c98] sm:$0xff]  }
 0x39b   : > { %13356 = vmatprep.subr.bf16.mxu0 %v14444_v0  ;;  %13377 = vmatpush3.bf16.msra.mxu1 %v14443_v63  ;;  %v14485_v63 = vld [vmem:[%s14728_s28 + $0x1c60] sm:$0xff]  }
 0x39c   : > { %13378 = vmatprep.subr.bf16.mxu1 %v14445_v1  ;;  %v14486_v0 = vld [vmem:[%s14728_s28 + $0x1ce0] sm:$0xff]  }
 0x39d   : > { %v14487_v1 = vld [vmem:[%s14728_s28 + $0x1c20] sm:$0xff]  }
 0x39e   : > { %13357 = vmatpush3.bf16.msra.mxu0 %v14446_v2  ;;  %v14488_v2 = vld [vmem:[%s14728_s28 + $0x1ca0] sm:$0xff]  }
 0x39f   : > { %13358 = vmatprep.subr.bf16.mxu0 %v14448_v4  ;;  %13379 = vmatpush3.bf16.msra.mxu1 %v14447_v3  ;;  %v14489_v3 = vld [vmem:[%s14728_s28 + $0x1c68] sm:$0xff]  }
 0x3a0   : > { %13380 = vmatprep.subr.bf16.mxu1 %v14449_v5  ;;  %v14490_v5 = vld [vmem:[%s14728_s28 + $0x1ce8] sm:$0xff]  }
 0x3a2   : > { %13359 = vmatpush3.bf16.msra.mxu0 %v14450_v6 }
 0x3a3   : > { %13360 = vmatprep.subr.bf16.mxu0 %v14452_v8  ;;  %13381 = vmatpush3.bf16.msra.mxu1 %v14451_v7  ;;  %v14491_v7 = vld [vmem:[%s14728_s28 + $0x1c28] sm:$0xff]  }
 0x3a4   : > { %13382 = vmatprep.subr.bf16.mxu1 %v14453_v9 }
 0x3a6   : > { %13361 = vmatpush3.bf16.msra.mxu0 %v14454_v10 }
 0x3a7   : > { %13362 = vmatprep.subr.bf16.mxu0 %v14456_v12  ;;  %13383 = vmatpush3.bf16.msra.mxu1 %v14455_v11  ;;  %v14492_v11 = vld [vmem:[%s14728_s28 + $0x1ca8] sm:$0xff]   ;;  %v14493_v12 = vld [vmem:[%s14728_s28 + $0x1c70] sm:$0xff]  }
 0x3a8   : > { %v13060_v13 = vpop.f32.mrb[80].mxu0  ;;  %13384 = vmatprep.subr.bf16.mxu1 %v14457_v14 }
 0x3a9   : > { %v13061_v15 = vpop.f32.mrb[81].mxu0  ;;  %v13082_v17 = vpop.f32.mrb[80].mxu1 }
 0x3aa   : > { %v13062_v18 = vadd.f32 %v13061_v15, %v13060_v13  ;;  %v13063_v19 = vpop.f32.mrb[82].mxu0  ;;  %v13083_v22 = vpop.f32.mrb[81].mxu1  ;;  %13363 = vmatpush3.bf16.msra.mxu0 %v14458_v16 }
 0x3ab   : > { %v13064_v23 = vpop.f32.mrb[83].mxu0  ;;  %v13084_v25 = vadd.f32 %v13083_v22, %v13082_v17  ;;  %v13085_v26 = vpop.f32.mrb[82].mxu1  ;;  %13364 = vmatprep.subr.bf16.mxu0 %v14460_v21  ;;  %13385 = vmatpush3.bf16.msra.mxu1 %v14459_v20  ;;  %v14495_v20 = vld [vmem:[%s14728_s28 + $0x1c30] sm:$0xff]  }
 0x3ac   : > { %v10340_v24 = vadd.f32 %v13062_v18, %v15736_v40  ;;  %v13086_v28 = vpop.f32.mrb[83].mxu1  ;;  %13386 = vmatprep.subr.bf16.mxu1 %v14461_v27  ;;  %v14467_v40 = vld [vmem:[%s14728_s28 + $0x1bb8] sm:$0xff]   ;;  %v14494_v18 = vld [vmem:[%s14728_s28 + $0x1cf0] sm:$0xff]   ;;  %v242_v26 = vld [vmem:[%s14768_s30 + $0xe0] sm:$0xff] }
 0x3ad   : > { %v14496_v22 = vld [vmem:[%s14728_s28 + $0x1cb0] sm:$0xff]   ;;  %v14497_v23 = vld [vmem:[%s14728_s28 + $0x1c78] sm:$0xff]   ;;  %v757_v28 = vrot.slane %v242_v26, %v14770_v35 }
 0x3ae   : > { %v15774_v30 = vadd.f32 %v13084_v25, %v10340_v24  ;;  %13365 = vmatpush3.bf16.msra.mxu0 %v14462_v29  ;;  %v14498_v24 = vld [vmem:[%s14728_s28 + $0x1cf8] sm:$0xff]   ;;  %v750_v29 = vcombine.high %v242_v26, %v242_v26 }
 0x3af   : > { %13366 = vmatprep.subr.bf16.mxu0 %v14464_v32  ;;  %13387 = vmatpush3.bf16.msra.mxu1 %v14463_v31  ;;  %v14499_v25 = vld [vmem:[%s14728_s28 + $0x1c38] sm:$0xff]   ;;  %v765_v31 = vcombine.high %v757_v28, %v757_v28 }
 0x3b0   : > { %13388 = vmatprep.subr.bf16.mxu1 %v14465_v33  ;;  %v14500_v27 = vld [vmem:[%s14728_s28 + $0x1cb8] sm:$0xff]   ;;  %v764_v32 = vrot.slane %v750_v29, %v14770_v35  ;;  %v14503_v33 = vld [vmem:[%s14728_s28 + $0x1dc0] sm:$0xff]  }
 0x3b1   : > { %v1017_v37 = vpack.c.bf16 %v765_v31, %v765_v31 }
 0x3b2   : > { %13367 = vmatpush3.bf16.msra.mxu0 %v14466_v34  ;;  %v1016_v34 = vpack.c.bf16 %v757_v28, %v757_v28  ;;  %v766_v38 = vcombine.high %v764_v32, %v764_v32 }
 0x3b3   : > { %13396 = vmatprep.subr.bf16.mxu0 %v14469_v39  ;;  %13389 = vmatpush3.bf16.msra.mxu1 %v14467_v40  ;;  %v14505_v39 = vld [vmem:[%s14728_s28 + $0x1d80] sm:$0xff]   ;;  %v1018_v40 = vpack.c.bf16 %v764_v32, %v764_v32 }
 0x3b4   : > { %13418 = vmatprep.subr.bf16.mxu1 %v14470_v43  ;;  %v1019_v42 = vpack.c.bf16 %v766_v38, %v766_v38  ;;  %v14507_v43 = vld [vmem:[%s14728_s28 + $0x1dc8] sm:$0xff]  }
 0x3b5   : > { %10898 = vmatmul.mubr.bf16.vlgmr.msra.gmra.mrb[108].mxu0 %v1012_v44  ;;  %v14508_v44 = vld [vmem:[%s14728_s28 + $0x1d08] sm:$0xff]  }
 0x3b6   : > { %13397 = vmatpush3.bf16.msra.mxu0 %v14471_v45  ;;  %10938 = vmatmul.mubr.bf16.vlgmr.msra.gmra.mrb[108].mxu1 %v1014_v49  ;;  %v14509_v45 = vld [vmem:[%s14728_s28 + $0x1d88] sm:$0xff]   ;;  %v14513_v49 = vld [vmem:[%s14728_s28 + $0x1d90] sm:$0xff]  }
 0x3b7   : > { %13398 = vmatprep.subr.bf16.mxu0 %v14473_v50  ;;  %13419 = vmatpush3.bf16.msra.mxu1 %v14472_v48  ;;  %v14512_v48 = vld [vmem:[%s14728_s28 + $0x1d10] sm:$0xff]   ;;  %v14514_v50 = vld [vmem:[%s14728_s28 + $0x1d58] sm:$0xff]  }
 0x3b8   : > { %13420 = vmatprep.subr.bf16.mxu1 %v14474_v52  ;;  %10977 = vmatprep.mubr.bf16.mxu0 %v1017_v37  ;;  %v14516_v52 = vld [vmem:[%s14728_s28 + $0x1d18] sm:$0xff]  }
 0x3b9   : > { %11017 = vmatprep.mubr.bf16.mxu1 %v1019_v42 }
 0x3ba   : > { %13399 = vmatpush3.bf16.msra.mxu0 %v14475_v53  ;;  %v14517_v53 = vld [vmem:[%s14728_s28 + $0x1d98] sm:$0xff]  }
 0x3bb   : > { %13400 = vmatprep.subr.bf16.mxu0 %v14477_v55  ;;  %13421 = vmatpush3.bf16.msra.mxu1 %v14476_v54  ;;  %v14518_v54 = vld [vmem:[%s14728_s28 + $0x1d60] sm:$0xff]  }
 0x3bc   : > { %13422 = vmatprep.subr.bf16.mxu1 %v14478_v56  ;;  %v14519_v55 = vld [vmem:[%s14728_s28 + $0x1de0] sm:$0xff]  }
 0x3bd   : > { %v14520_v56 = vld [vmem:[%s14728_s28 + $0x1d20] sm:$0xff]  }
 0x3be   : > { %13401 = vmatpush3.bf16.msra.mxu0 %v14479_v57  ;;  %v14521_v57 = vld [vmem:[%s14728_s28 + $0x1da0] sm:$0xff]  }
 0x3bf   : > { %13402 = vmatprep.subr.bf16.mxu0 %v14481_v59  ;;  %13423 = vmatpush3.bf16.msra.mxu1 %v14480_v58  ;;  %v14522_v58 = vld [vmem:[%s14728_s28 + $0x1d68] sm:$0xff]  }
 0x3c0   : > { %13424 = vmatprep.subr.bf16.mxu1 %v14482_v60  ;;  %v14523_v60 = vld [vmem:[%s14728_s28 + $0x1de8] sm:$0xff]  }
 0x3c2   : > { %13403 = vmatpush3.bf16.msra.mxu0 %v14483_v61 }
 0x3c3   : > { %13404 = vmatprep.subr.bf16.mxu0 %v14485_v63  ;;  %13425 = vmatpush3.bf16.msra.mxu1 %v14484_v62  ;;  %v14524_v62 = vld [vmem:[%s14728_s28 + $0x1d28] sm:$0xff]  }
 0x3c4   : > { %13426 = vmatprep.subr.bf16.mxu1 %v14486_v0 }
 0x3c6   : > { %13405 = vmatpush3.bf16.msra.mxu0 %v14487_v1 }
 0x3c7   : > { %13406 = vmatprep.subr.bf16.mxu0 %v14489_v3  ;;  %13427 = vmatpush3.bf16.msra.mxu1 %v14488_v2  ;;  %v14525_v3 = vld [vmem:[%s14728_s28 + $0x1da8] sm:$0xff]  }
 0x3c8   : > { %v13104_v4 = vpop.f32.mrb[84].mxu0  ;;  %13428 = vmatprep.subr.bf16.mxu1 %v14490_v5  ;;  %v14526_v5 = vld [vmem:[%s14728_s28 + $0x1d70] sm:$0xff]  }
 0x3c9   : > { %v13105_v6 = vpop.f32.mrb[85].mxu0  ;;  %v13126_v8 = vpop.f32.mrb[84].mxu1 }
 0x3ca   : > { %v13106_v9 = vadd.f32 %v13105_v6, %v13104_v4  ;;  %v13107_v10 = vpop.f32.mrb[86].mxu0  ;;  %v13127_v13 = vpop.f32.mrb[85].mxu1  ;;  %13407 = vmatpush3.bf16.msra.mxu0 %v14491_v7 }
 0x3cb   : > { %v13108_v14 = vpop.f32.mrb[87].mxu0  ;;  %v13128_v16 = vadd.f32 %v13127_v13, %v13126_v8  ;;  %v13129_v17 = vpop.f32.mrb[86].mxu1  ;;  %13408 = vmatprep.subr.bf16.mxu0 %v14493_v12  ;;  %13429 = vmatpush3.bf16.msra.mxu1 %v14492_v11  ;;  %v14528_v11 = vld [vmem:[%s14728_s28 + $0x1d30] sm:$0xff]   ;;  %v14530_v13 = vld [vmem:[%s14728_s28 + $0x1d78] sm:$0xff]  }
 0x3cc   : > { %v10420_v15 = vadd.f32 %v13106_v9, %v15774_v30  ;;  %v13130_v19 = vpop.f32.mrb[87].mxu1  ;;  %13430 = vmatprep.subr.bf16.mxu1 %v14494_v18  ;;  %v14502_v30 = vld [vmem:[%s14728_s28 + $0x1d40] sm:$0xff]   ;;  %v14527_v9 = vld [vmem:[%s14728_s28 + $0x1df0] sm:$0xff]   ;;  %v243_v17 = vld [vmem:[%s14768_s30 + $0xe8] sm:$0xff] }
 0x3cd   : > { %v14529_v14 = vld [vmem:[%s14728_s28 + $0x1db0] sm:$0xff]   ;;  %v774_v18 = vrot.slane %v243_v17, %v14770_v35  ;;  %v767_v19 = vcombine.high %v243_v17, %v243_v17 }
 0x3ce   : > { %v15812_v21 = vadd.f32 %v13128_v16, %v10420_v15  ;;  %13409 = vmatpush3.bf16.msra.mxu0 %v14495_v20  ;;  %v14531_v15 = vld [vmem:[%s14728_s28 + $0x1df8] sm:$0xff]  }
 0x3cf   : > { %13410 = vmatprep.subr.bf16.mxu0 %v14497_v23  ;;  %13431 = vmatpush3.bf16.msra.mxu1 %v14496_v22  ;;  %v14532_v16 = vld [vmem:[%s14728_s28 + $0x1d38] sm:$0xff]   ;;  %v781_v22 = vrot.slane %v767_v19, %v14770_v35  ;;  %v1020_v23 = vpack.c.bf16 %v774_v18, %v774_v18 }
 0x3d0   : > { %13432 = vmatprep.subr.bf16.mxu1 %v14498_v24  ;;  %v14533_v20 = vld [vmem:[%s14728_s28 + $0x1db8] sm:$0xff]  }
 0x3d1   : > { %v1022_v26 = vpack.c.bf16 %v781_v22, %v781_v22 }
 0x3d2   : > { %13411 = vmatpush3.bf16.msra.mxu0 %v14499_v25  ;;  %v783_v25 = vcombine.high %v781_v22, %v781_v22 }
 0x3d3   : > { %13440 = vmatprep.subr.bf16.mxu0 %v14502_v30  ;;  %13433 = vmatpush3.bf16.msra.mxu1 %v14500_v27 }
 0x3d4   : > { %13462 = vmatprep.subr.bf16.mxu1 %v14503_v33  ;;  %v1023_v27 = vpack.c.bf16 %v783_v25, %v783_v25 }
 0x3d5   : > { %10978 = vmatmul.mubr.bf16.vlgmr.msra.gmra.mrb[112].mxu0 %v1016_v34 }
 0x3d6   : > { %13441 = vmatpush3.bf16.msra.mxu0 %v14504_v36  ;;  %11018 = vmatmul.mubr.bf16.vlgmr.msra.gmra.mrb[112].mxu1 %v1018_v40 }
 0x3d7   : > { %13442 = vmatprep.subr.bf16.mxu0 %v14506_v41  ;;  %13463 = vmatpush3.bf16.msra.mxu1 %v14505_v39 }
 0x3d8   : > { %13464 = vmatprep.subr.bf16.mxu1 %v14507_v43  ;;  %11097 = vmatprep.mubr.bf16.mxu1 %v1023_v27 }
 0x3da   : > { %13443 = vmatpush3.bf16.msra.mxu0 %v14508_v44 }
 0x3db   : > { %13444 = vmatprep.subr.bf16.mxu0 %v14510_v46  ;;  %13465 = vmatpush3.bf16.msra.mxu1 %v14509_v45 }
 0x3dc   : > { %13466 = vmatprep.subr.bf16.mxu1 %v14511_v47 }
 0x3de   : > { %13445 = vmatpush3.bf16.msra.mxu0 %v14512_v48 }
 0x3df   : > { %13446 = vmatprep.subr.bf16.mxu0 %v14514_v50  ;;  %13467 = vmatpush3.bf16.msra.mxu1 %v14513_v49 }
 0x3e0   : > { %13468 = vmatprep.subr.bf16.mxu1 %v14515_v51 }
 0x3e2   : > { %13447 = vmatpush3.bf16.msra.mxu0 %v14516_v52 }
 0x3e3   : > { %13448 = vmatprep.subr.bf16.mxu0 %v14518_v54  ;;  %13469 = vmatpush3.bf16.msra.mxu1 %v14517_v53 }
 0x3e4   : > { %13470 = vmatprep.subr.bf16.mxu1 %v14519_v55 }
 0x3e6   : > { %13449 = vmatpush3.bf16.msra.mxu0 %v14520_v56 }
 0x3e7   : > { %13450 = vmatprep.subr.bf16.mxu0 %v14522_v58  ;;  %13471 = vmatpush3.bf16.msra.mxu1 %v14521_v57 }
 0x3e8   : > { %v13148_v59 = vpop.f32.mrb[88].mxu0  ;;  %13472 = vmatprep.subr.bf16.mxu1 %v14523_v60 }
 0x3e9   : > { %v13149_v61 = vpop.f32.mrb[89].mxu0  ;;  %v13170_v63 = vpop.f32.mrb[88].mxu1 }
 0x3ea   : > { %v13150_v0 = vadd.f32 %v13149_v61, %v13148_v59  ;;  %v13151_v1 = vpop.f32.mrb[90].mxu0  ;;  %v13171_v2 = vpop.f32.mrb[89].mxu1  ;;  %13451 = vmatpush3.bf16.msra.mxu0 %v14524_v62 }
 0x3eb   : > { %v13152_v4 = vpop.f32.mrb[91].mxu0  ;;  %v13172_v7 = vadd.f32 %v13171_v2, %v13170_v63  ;;  %v13173_v8 = vpop.f32.mrb[90].mxu1  ;;  %13452 = vmatprep.subr.bf16.mxu0 %v14526_v5  ;;  %13473 = vmatpush3.bf16.msra.mxu1 %v14525_v3  ;;  %v14621_v63 = vmov 0.0  }
 0x3ec   : > { %v10500_v6 = vadd.f32 %v13150_v0, %v15812_v21  ;;  %v13174_v10 = vpop.f32.mrb[91].mxu1  ;;  %13474 = vmatprep.subr.bf16.mxu1 %v14527_v9  ;;  %v782_v21 = vcombine.high %v774_v18, %v774_v18  ;;  %213 = vst [vmem:[%s15863_s6] sm:$0x3] %v14621_v63 }
 0x3ee   : > { %v10540_v12 = vadd.f32 %v13172_v7, %v10500_v6  ;;  %13453 = vmatpush3.bf16.msra.mxu0 %v14528_v11  ;;  %v1021_v24 = vpack.c.bf16 %v782_v21, %v782_v21 }
 0x3ef   : > { %13454 = vmatprep.subr.bf16.mxu0 %v14530_v13  ;;  %13475 = vmatpush3.bf16.msra.mxu1 %v14529_v14 }
 0x3f0   : > { %13476 = vmatprep.subr.bf16.mxu1 %v14531_v15  ;;  %11057 = vmatprep.mubr.bf16.mxu0 %v1021_v24 }
 0x3f2   : > { %13455 = vmatpush3.bf16.msra.mxu0 %v14532_v16 }
 0x3f3   : > { %13477 = vmatpush3.bf16.msra.mxu1 %v14533_v20 }
 0x3f5   : > { %11058 = vmatmul.mubr.bf16.vlgmr.msra.gmra.mrb[116].mxu0 %v1020_v23 }
 0x3f6   : > { %11098 = vmatmul.mubr.bf16.vlgmr.msra.gmra.mrb[116].mxu1 %v1022_v26 }
 0x408   : > { %v13192_v28 = vpop.f32.mrb[92].mxu0 }
 0x409   : > { %v13193_v29 = vpop.f32.mrb[93].mxu0  ;;  %v13214_v30 = vpop.f32.mrb[92].mxu1 }
 0x40a   : > { %v13194_v31 = vadd.f32 %v13193_v29, %v13192_v28  ;;  %v13195_v32 = vpop.f32.mrb[94].mxu0  ;;  %v13215_v33 = vpop.f32.mrb[93].mxu1 }
 0x40b   : > { %v13196_v34 = vpop.f32.mrb[95].mxu0  ;;  %v13216_v35 = vadd.f32 %v13215_v33, %v13214_v30  ;;  %v13217_v37 = vpop.f32.mrb[94].mxu1 }
 0x40c   : > { %v10580_v36 = vadd.f32 %v13194_v31, %v10540_v12  ;;  %v13218_v38 = vpop.f32.mrb[95].mxu1 }
 0x40e   : > { %v10620_v39 = vadd.f32 %v13216_v35, %v10580_v36 }
 0x428   : > { %v13236_v40 = vpop.f32.mrb[96].mxu0 }
 0x429   : > { %v13237_v41 = vpop.f32.mrb[97].mxu0  ;;  %v13258_v42 = vpop.f32.mrb[96].mxu1 }
 0x42a   : > { %v13238_v43 = vadd.f32 %v13237_v41, %v13236_v40  ;;  %v13239_v44 = vpop.f32.mrb[98].mxu0  ;;  %v13259_v45 = vpop.f32.mrb[97].mxu1 }
 0x42b   : > { %v13240_v46 = vpop.f32.mrb[99].mxu0  ;;  %v13260_v48 = vadd.f32 %v13259_v45, %v13258_v42  ;;  %v13261_v49 = vpop.f32.mrb[98].mxu1 }
 0x42c   : > { %v10660_v47 = vadd.f32 %v13238_v43, %v10620_v39  ;;  %v13262_v50 = vpop.f32.mrb[99].mxu1 }
 0x42e   : > { %v10700_v51 = vadd.f32 %v13260_v48, %v10660_v47  ;;  %v1024_v47 = vld [vmem:[%s15863_s6] sm:$0x3] }
 0x448   : > { %v13280_v52 = vpop.f32.mrb[100].mxu0 }
 0x449   : > { %v13281_v53 = vpop.f32.mrb[101].mxu0  ;;  %v13302_v54 = vpop.f32.mrb[100].mxu1 }
 0x44a   : > { %v13282_v55 = vadd.f32 %v13281_v53, %v13280_v52  ;;  %v13283_v56 = vpop.f32.mrb[102].mxu0  ;;  %v13303_v57 = vpop.f32.mrb[101].mxu1 }
 0x44b   : > { %v13284_v58 = vpop.f32.mrb[103].mxu0  ;;  %v13304_v60 = vadd.f32 %v13303_v57, %v13302_v54  ;;  %v13305_v61 = vpop.f32.mrb[102].mxu1 }
 0x44c   : > { %v10740_v59 = vadd.f32 %v13282_v55, %v10700_v51  ;;  %v13306_v62 = vpop.f32.mrb[103].mxu1 }
 0x44e   : > { %v10780_v0 = vadd.f32 %v13304_v60, %v10740_v59 }
 0x468   : > { %v13324_v1 = vpop.f32.mrb[104].mxu0 }
 0x469   : > { %v13325_v2 = vpop.f32.mrb[105].mxu0  ;;  %v13346_v3 = vpop.f32.mrb[104].mxu1 }
 0x46a   : > { %v13326_v4 = vadd.f32 %v13325_v2, %v13324_v1  ;;  %v13327_v5 = vpop.f32.mrb[106].mxu0  ;;  %v13347_v6 = vpop.f32.mrb[105].mxu1 }
 0x46b   : > { %v13328_v7 = vpop.f32.mrb[107].mxu0  ;;  %v13348_v9 = vadd.f32 %v13347_v6, %v13346_v3  ;;  %v13349_v10 = vpop.f32.mrb[106].mxu1 }
 0x46c   : > { %v10820_v8 = vadd.f32 %v13326_v4, %v10780_v0  ;;  %v13350_v11 = vpop.f32.mrb[107].mxu1 }
 0x46e   : > { %v10860_v12 = vadd.f32 %v13348_v9, %v10820_v8 }
 0x488   : > { %v13368_v13 = vpop.f32.mrb[108].mxu0 }
 0x489   : > { %v13369_v14 = vpop.f32.mrb[109].mxu0  ;;  %v13390_v15 = vpop.f32.mrb[108].mxu1 }
 0x48a   : > { %v13370_v16 = vadd.f32 %v13369_v14, %v13368_v13  ;;  %v13371_v17 = vpop.f32.mrb[110].mxu0  ;;  %v13391_v18 = vpop.f32.mrb[109].mxu1 }
 0x48b   : > { %v13372_v19 = vpop.f32.mrb[111].mxu0  ;;  %v13392_v21 = vadd.f32 %v13391_v18, %v13390_v15  ;;  %v13393_v22 = vpop.f32.mrb[110].mxu1 }
 0x48c   : > { %v10900_v20 = vadd.f32 %v13370_v16, %v10860_v12  ;;  %v13394_v23 = vpop.f32.mrb[111].mxu1 }
 0x48e   : > { %v10940_v24 = vadd.f32 %v13392_v21, %v10900_v20 }
 0x4a8   : > { %v13412_v25 = vpop.f32.mrb[112].mxu0 }
 0x4a9   : > { %v13413_v26 = vpop.f32.mrb[113].mxu0  ;;  %v13434_v27 = vpop.f32.mrb[112].mxu1 }
 0x4aa   : > { %v13414_v28 = vadd.f32 %v13413_v26, %v13412_v25  ;;  %v13415_v29 = vpop.f32.mrb[114].mxu0  ;;  %v13435_v30 = vpop.f32.mrb[113].mxu1 }
 0x4ab   : > { %v13416_v31 = vpop.f32.mrb[115].mxu0  ;;  %v13436_v33 = vadd.f32 %v13435_v30, %v13434_v27  ;;  %v13437_v34 = vpop.f32.mrb[114].mxu1 }
 0x4ac   : > { %v10980_v32 = vadd.f32 %v13414_v28, %v10940_v24  ;;  %v13438_v36 = vpop.f32.mrb[115].mxu1 }
 0x4ae   : > { %v11020_v35 = vadd.f32 %v13436_v33, %v10980_v32 }
 0x4c8   : > { %v13456_v37 = vpop.f32.mrb[116].mxu0 }
 0x4c9   : > { %v13457_v38 = vpop.f32.mrb[117].mxu0  ;;  %v13478_v39 = vpop.f32.mrb[116].mxu1 }
 0x4ca   : > { %v13458_v40 = vadd.f32 %v13457_v38, %v13456_v37  ;;  %v13459_v41 = vpop.f32.mrb[118].mxu0  ;;  %v13479_v42 = vpop.f32.mrb[117].mxu1 }
 0x4cb   : > { %v13460_v43 = vpop.f32.mrb[119].mxu0  ;;  %v13480_v45 = vadd.f32 %v13479_v42, %v13478_v39  ;;  %v13481_v46 = vpop.f32.mrb[118].mxu1 }
 0x4cc   : > { %v11060_v44 = vadd.f32 %v13458_v40, %v11020_v35  ;;  %v13482_v48 = vpop.f32.mrb[119].mxu1 }
 0x4ce   : > { %v11100_v49 = vadd.f32 %v13480_v45, %v11060_v44 }
 0x4d0   : > { %v11105_v50 = vadd.f32 %v11100_v49, %v1024_v47 }
 0x4d2   : > { %11106 = vst [vmem:[%s15863_s6] sm:$0x3] %v11105_v50 }
 0x4d3 PF: > { %s15_s14 = sadd.s32 1, %s14615_s14   ;;  %s15891_s9 = smov %s14599_s10 }
 0x4d4   : > { %p12_p4 = scmp.ge.s32.totalorder %s15_s14, 4   ;;  %s15892_s10 = smov %s14603_s11 }
 0x4d5   : > { %s15893_s11 = smov %s14682_s20  ;;  %s15894_s12 = smov %s14611_s13 }
 0x4d6   : > { %s15895_s13 = smov %s15897_s16  ;;  %14 = sbr.rel (!%p12_p4) target bundleno = 4 (0x4), region = 75 }
 0x4dd   :  { %11126 = vsyncpa [#allocation3], 1 }
 0x4de   :  { %11128 = vsyncpa [#allocation3 + $0x1], 1 }

</bundles_post_ra>
